<compile_context>
chip_gen: v5e
topology: v5e:2x2
jax: 0.10.0
libtpu: 0.0.40
codegen_flags: <defaults>
</compile_context>

<pallas_src>
import functools

import jax
import jax.numpy as jnp
from jax import lax
from jax.experimental import pallas as pl
from jax.experimental.pallas import tpu as pltpu

LEAKY_SLOPE = 0.01  # F.leaky_relu default


def _round_up(x, m):
    return (x + m - 1) // m * m


# ----------------------------------------------------------------------------
# Fused kernel: multi-layer LSTM over time + (fc1 -> leaky_relu -> fc2) head.
# ----------------------------------------------------------------------------
def _make_kernel(num_layers, hidden_dim, n_past, slope=LEAKY_SLOPE):
    H, L, T = hidden_dim, num_layers, n_past

    def kernel(*refs):
        x_ref = refs[0]                                   # [T, Bp, D]
        idx = 1
        w0_ih_ref, w0_hh_ref, b0_ref = refs[idx:idx + 3]  # layer 0: [D,4H],[H,4H],[1,4H]
        idx += 3
        fused_refs = []                                   # layers 1..L-1: ([2H,4H],[1,4H])
        for _ in range(1, L):
            fused_refs.append((refs[idx], refs[idx + 1]))
            idx += 2
        fc1_w_ref, fc1_b_ref, fc2_w_ref, fc2_b_ref = refs[idx:idx + 4]
        idx += 4
        out_ref = refs[idx]                               # [Bp, Fp]
        h_sc, c_sc = refs[idx + 1], refs[idx + 2]         # VMEM [Bp, L*H]

        h_sc[...] = jnp.zeros_like(h_sc)
        c_sc[...] = jnp.zeros_like(c_sc)

        def cell_update(gates, l):
            # PyTorch gate order: i, f, g, o (lane-aligned slices, H = 128).
            i_g = jax.nn.sigmoid(gates[:, 0 * H:1 * H])
            f_g = jax.nn.sigmoid(gates[:, 1 * H:2 * H])
            g_g = jnp.tanh(gates[:, 2 * H:3 * H])
            o_g = jax.nn.sigmoid(gates[:, 3 * H:4 * H])
            c_new = f_g * c_sc[:, l * H:(l + 1) * H] + i_g * g_g
            h_new = o_g * jnp.tanh(c_new)
            c_sc[:, l * H:(l + 1) * H] = c_new
            h_sc[:, l * H:(l + 1) * H] = h_new

        def step(t, carry):
            x_t = x_ref[t]                                # [Bp, D]
            # Layer 0: D is tiny -> keep two dots.
            gates0 = (
                jnp.dot(x_t, w0_ih_ref[...], preferred_element_type=jnp.float32)
                + jnp.dot(h_sc[:, 0:H], w0_hh_ref[...],
                          preferred_element_type=jnp.float32)
                + b0_ref[...]
            )
            cell_update(gates0, 0)
            # Layers >= 1: one fused K=2H matmul per layer-step.  The LHS
            # [h_{l-1}^t, h_l^{t-1}] is a contiguous slice of h_sc because
            # layer l-1 was just updated in place and layer l has not been.
            for l in range(1, L):
                wf_ref, bl_ref = fused_refs[l - 1]
                lhs = h_sc[:, (l - 1) * H:(l + 1) * H]    # [Bp, 2H]
                gates = (jnp.dot(lhs, wf_ref[...],
                                 preferred_element_type=jnp.float32)
                         + bl_ref[...])
                cell_update(gates, l)
            return carry

        lax.fori_loop(0, T, step, 0, unroll=True)

        # FC head.  h_sc layout [Bp, L*H] == hidden.permute(1,0,2).view(B,-1),
        # so FC1 is a single dot with K = L*H.
        y = (jnp.dot(h_sc[...], fc1_w_ref[...],
                     preferred_element_type=jnp.float32) + fc1_b_ref[...])
        y = jnp.where(y >= 0, y, slope * y)               # leaky_relu; drop1 = identity (eval)
        out = (jnp.dot(y, fc2_w_ref[...],
                       preferred_element_type=jnp.float32) + fc2_b_ref[...])
        out_ref[...] = out.astype(out_ref.dtype)

    return kernel


# ----------------------------------------------------------------------------
# Forward pass (matches PredictorRecurrent.forward, inference mode)
# ----------------------------------------------------------------------------
def predictor_recurrent_forward(x, y_prev, params, *, lstm_layers, lstm_hidden_dim,
                                feat_size):
    """x: [B, n_past, x_dim], y_prev: [B, n_past, y_dim] -> [B, feat_size]."""
    B, T, _ = x.shape
    H, L = lstm_hidden_dim, lstm_layers

    lstm_in = jnp.concatenate([x, y_prev], axis=-1)       # [B, T, D]
    lstm_in = jnp.transpose(lstm_in, (1, 0, 2))           # [T, B, D] (batch_first=False)
    D = lstm_in.shape[-1]

    # Pad batch only to the sublane minimum (8); padded rows are independent
    # (zero x, zero-init h/c) and sliced off.
    Bp = _round_up(max(B, 8), 8)
    if Bp != B:
        lstm_in = jnp.pad(lstm_in, ((0, 0), (0, Bp - B), (0, 0)))

    # Lane-dense output: pad feat dim to a multiple of 128.
    Fp = _round_up(max(feat_size, 128), 128)
    fc2_w, fc2_b = params["fc2_w"], params["fc2_b"]
    if Fp != feat_size:
        fc2_w = jnp.pad(fc2_w, ((0, 0), (0, Fp - feat_size)))
        fc2_b = jnp.pad(fc2_b, ((0, 0), (0, Fp - feat_size)))

    # Layer 0 kept unfused; layers >= 1 use a fused [2H, 4H] weight.
    inputs = [lstm_in,
              params["lstm_w_ih_0"], params["lstm_w_hh_0"], params["lstm_b_0"]]
    for l in range(1, L):
        w_fused = jnp.concatenate(
            [params[f"lstm_w_ih_{l}"], params[f"lstm_w_hh_{l}"]], axis=0)
        inputs += [w_fused, params[f"lstm_b_{l}"]]
    inputs += [params["fc1_w"], params["fc1_b"], fc2_w, fc2_b]

    vmem_spec = pl.BlockSpec(memory_space=pltpu.MemorySpace.VMEM)
    out = pl.pallas_call(
        _make_kernel(L, H, T),
        out_shape=jax.ShapeDtypeStruct((Bp, Fp), jnp.float32),
        in_specs=[vmem_spec] * len(inputs),
        out_specs=vmem_spec,
        scratch_shapes=[pltpu.VMEM((Bp, L * H), jnp.float32),
                        pltpu.VMEM((Bp, L * H), jnp.float32)],
    )(*inputs)
    return out[:B, :feat_size]


# ----------------------------------------------------------------------------
# Parameter init (PyTorch-like: U(-1/sqrt(fan), 1/sqrt(fan)); LSTM forget-gate
# bias slices of BOTH b_ih and b_hh set to 1.0, as in the module's __init__).
# ----------------------------------------------------------------------------
def init_params(key, *, x_dim, y_dim, lstm_hidden_dim, lstm_layers, feat_size):
    H = lstm_hidden_dim
    D = x_dim + y_dim
    keys = jax.random.split(key, 4 * lstm_layers + 4)
    k = 0
    p = {}
    bound = 1.0 / float(jnp.sqrt(jnp.float32(H)))
    for l in range(lstm_layers):
        in_dim = D if l == 0 else H
        w_ih = jax.random.uniform(keys[k], (in_dim, 4 * H), jnp.float32, -bound, bound); k += 1
        w_hh = jax.random.uniform(keys[k], (H, 4 * H), jnp.float32, -bound, bound); k += 1
        b_ih = jax.random.uniform(keys[k], (4 * H,), jnp.float32, -bound, bound); k += 1
        b_hh = jax.random.uniform(keys[k], (4 * H,), jnp.float32, -bound, bound); k += 1
        b_ih = b_ih.at[H:2 * H].set(1.0)   # forget-gate bias = 1.0 (both biases)
        b_hh = b_hh.at[H:2 * H].set(1.0)
        p[f"lstm_w_ih_{l}"] = w_ih
        p[f"lstm_w_hh_{l}"] = w_hh
        p[f"lstm_b_{l}"] = (b_ih + b_hh).reshape(1, 4 * H)
    fc1_in = H * lstm_layers
    b1 = 1.0 / float(jnp.sqrt(jnp.float32(fc1_in)))
    p["fc1_w"] = jax.random.uniform(keys[k], (fc1_in, 1024), jnp.float32, -b1, b1); k += 1
    p["fc1_b"] = jax.random.uniform(keys[k], (1, 1024), jnp.float32, -b1, b1); k += 1
    b2 = 1.0 / float(jnp.sqrt(jnp.float32(1024)))
    p["fc2_w"] = jax.random.uniform(keys[k], (1024, feat_size), jnp.float32, -b2, b2); k += 1
    p["fc2_b"] = jax.random.uniform(keys[k], (1, feat_size), jnp.float32, -b2, b2)
    return p


# ----------------------------------------------------------------------------
# Pure-JAX reference (same math, lax.scan LSTM) for a correctness check.
# ----------------------------------------------------------------------------
def reference_forward(x, y_prev, params, *, lstm_layers, lstm_hidden_dim, feat_size):
    H, L = lstm_hidden_dim, lstm_layers
    B = x.shape[0]
    hi = jax.lax.Precision.HIGHEST
    seq = jnp.transpose(jnp.concatenate([x, y_prev], -1), (1, 0, 2))  # [T, B, D]
    h0 = jnp.zeros((L, B, H), jnp.float32)
    c0 = jnp.zeros((L, B, H), jnp.float32)

    def step(carry, x_t):
        h, c = carry
        inp = x_t
        hs, cs = [], []
        for l in range(L):
            gates = (jnp.dot(inp, params[f"lstm_w_ih_{l}"], precision=hi)
                     + jnp.dot(h[l], params[f"lstm_w_hh_{l}"], precision=hi)
                     + params[f"lstm_b_{l}"])
            i = jax.nn.sigmoid(gates[:, :H])
            f = jax.nn.sigmoid(gates[:, H:2 * H])
            g = jnp.tanh(gates[:, 2 * H:3 * H])
            o = jax.nn.sigmoid(gates[:, 3 * H:])
            c_new = f * c[l] + i * g
            h_new = o * jnp.tanh(c_new)
            hs.append(h_new)
            cs.append(c_new)
            inp = h_new
        return (jnp.stack(hs), jnp.stack(cs)), None

    (h, _), _ = jax.lax.scan(step, (h0, c0), seq)
    hp = jnp.transpose(h, (1, 0, 2)).reshape(B, L * H)
    fc = jnp.dot(hp, params["fc1_w"], precision=hi) + params["fc1_b"]
    fc = jnp.where(fc >= 0, fc, LEAKY_SLOPE * fc)
    return jnp.dot(fc, params["fc2_w"], precision=hi) + params["fc2_b"]


if __name__ == "__main__":
    # Small shapes implied by the module; lstm_hidden_dim=128 keeps the LSTM
    # gate slices lane-aligned (4H = 512) and the fused recurrent matmul K=256.
    batch, n_past = 2, 8
    x_dim, y_dim = 8, 8
    lstm_hidden_dim, lstm_layers = 128, 2
    feat_size = 16

    key = jax.random.PRNGKey(0)
    kp, kx, ky = jax.random.split(key, 3)
    params = init_params(kp, x_dim=x_dim, y_dim=y_dim,
                         lstm_hidden_dim=lstm_hidden_dim,
                         lstm_layers=lstm_layers, feat_size=feat_size)
    x = jax.random.normal(kx, (batch, n_past, x_dim), dtype=jnp.float32)
    y_prev = jax.random.normal(ky, (batch, n_past, y_dim), dtype=jnp.float32)

    fwd = jax.jit(functools.partial(predictor_recurrent_forward,
                                    lstm_layers=lstm_layers,
                                    lstm_hidden_dim=lstm_hidden_dim,
                                    feat_size=feat_size))
    out = jax.block_until_ready(fwd(x, y_prev, params))
    assert out.shape == (batch, feat_size), out.shape

    ref = jax.block_until_ready(
        reference_forward(x, y_prev, params, lstm_layers=lstm_layers,
                          lstm_hidden_dim=lstm_hidden_dim, feat_size=feat_size))
    assert jnp.allclose(out, ref, atol=1e-2, rtol=1e-2), \
        float(jnp.max(jnp.abs(out - ref)))

    # TODO(synk): dropout (drop1 / lstm_dropout) is identity (inference mode);
    # training-mode dropout masks are not generated in-kernel.
    print("KERNEL_OK")
</pallas_src>

<mosaic_0001>
module attributes {stable_mosaic.version = 11 : i64} {
  func.func @kernel(%arg0: memref<8x8x16xf32, #tpu.memory_space<vmem>>, %arg1: memref<16x512xf32, #tpu.memory_space<vmem>>, %arg2: memref<128x512xf32, #tpu.memory_space<vmem>>, %arg3: memref<1x512xf32, #tpu.memory_space<vmem>>, %arg4: memref<256x512xf32, #tpu.memory_space<vmem>>, %arg5: memref<1x512xf32, #tpu.memory_space<vmem>>, %arg6: memref<256x1024xf32, #tpu.memory_space<vmem>>, %arg7: memref<1x1024xf32, #tpu.memory_space<vmem>>, %arg8: memref<1024x128xf32, #tpu.memory_space<vmem>>, %arg9: memref<1x128xf32, #tpu.memory_space<vmem>>, %arg10: memref<8x128xf32, #tpu.memory_space<vmem>>, %arg11: memref<8x256xf32, #tpu.memory_space<vmem>>, %arg12: memref<8x256xf32, #tpu.memory_space<vmem>>) attributes {dimension_semantics = [], scalar_prefetch = 0 : i64, scratch_operands = 2 : i64, tpu.core_type = #tpu.core_type<tc>} {
    %cst = arith.constant 0.000000e+00 : f32
    %0 = vector.broadcast %cst : f32 to vector<8x256xf32>
    %c0 = arith.constant 0 : index
    %c0_0 = arith.constant 0 : index
    %1 = vector.load %arg11[%c0, %c0_0] : memref<8x256xf32, #tpu.memory_space<vmem>>, vector<8x256xf32>
    tpu.vector_store %arg11[%c0, %c0_0], %0 {strides = array<i32>} : memref<8x256xf32, #tpu.memory_space<vmem>>, vector<8x256xf32>,
    %cst_1 = arith.constant 0.000000e+00 : f32
    %2 = vector.broadcast %cst_1 : f32 to vector<8x256xf32>
    %c0_2 = arith.constant 0 : index
    %c0_3 = arith.constant 0 : index
    %3 = vector.load %arg12[%c0_2, %c0_3] : memref<8x256xf32, #tpu.memory_space<vmem>>, vector<8x256xf32>
    tpu.vector_store %arg12[%c0_2, %c0_3], %2 {strides = array<i32>} : memref<8x256xf32, #tpu.memory_space<vmem>>, vector<8x256xf32>,
    %c0_i32 = arith.constant 0 : i32
    %4 = arith.index_cast %c0_i32 : i32 to index
    %c0_4 = arith.constant 0 : index
    %c0_5 = arith.constant 0 : index
    %5 = vector.load %arg0[%4, %c0_4, %c0_5] : memref<8x8x16xf32, #tpu.memory_space<vmem>>, vector<1x8x16xf32>
    %6 = vector.shape_cast %5 : vector<1x8x16xf32> to vector<8x16xf32>
    %c0_6 = arith.constant 0 : index
    %c0_7 = arith.constant 0 : index
    %7 = vector.load %arg1[%c0_6, %c0_7] : memref<16x512xf32, #tpu.memory_space<vmem>>, vector<16x512xf32>
    %cst_8 = arith.constant dense<0.000000e+00> : vector<8x512xf32>
    %8 = tpu.matmul %6, %7, %cst_8 {dimension_numbers = #tpu.dot_dimension_numbers<[1], [0], [0], [1], [0, 0, 1, 1], [], []>} : vector<8x16xf32>, vector<16x512xf32>, vector<8x512xf32> -> vector<8x512xf32>
    %c0_9 = arith.constant 0 : index
    %c0_10 = arith.constant 0 : index
    %9 = vector.load %arg11[%c0_9, %c0_10] : memref<8x256xf32, #tpu.memory_space<vmem>>, vector<8x128xf32>
    %c0_11 = arith.constant 0 : index
    %c0_12 = arith.constant 0 : index
    %10 = vector.load %arg2[%c0_11, %c0_12] : memref<128x512xf32, #tpu.memory_space<vmem>>, vector<128x512xf32>
    %cst_13 = arith.constant dense<0.000000e+00> : vector<8x512xf32>
    %11 = tpu.matmul %9, %10, %cst_13 {dimension_numbers = #tpu.dot_dimension_numbers<[1], [0], [0], [1], [0, 0, 1, 1], [], []>} : vector<8x128xf32>, vector<128x512xf32>, vector<8x512xf32> -> vector<8x512xf32>
    %12 = arith.addf %8, %11 : vector<8x512xf32>
    %c0_14 = arith.constant 0 : index
    %c0_15 = arith.constant 0 : index
    %13 = vector.load %arg3[%c0_14, %c0_15] : memref<1x512xf32, #tpu.memory_space<vmem>>, vector<1x512xf32>
    %14 = vector.broadcast %13 : vector<1x512xf32> to vector<8x512xf32>
    %15 = arith.addf %12, %14 : vector<8x512xf32>
    %16 = vector.extract_strided_slice %15 {offsets = [0, 0], sizes = [8, 128], strides = [1, 1]} : vector<8x512xf32> to vector<8x128xf32>
    %17 = arith.negf %16 : vector<8x128xf32>
    %18 = math.exp %17 : vector<8x128xf32>
    %cst_16 = arith.constant 1.000000e+00 : f32
    %19 = vector.broadcast %cst_16 : f32 to vector<8x128xf32>
    %20 = arith.addf %19, %18 : vector<8x128xf32>
    %21 = arith.divf %19, %20 : vector<8x128xf32>
    %22 = vector.extract_strided_slice %15 {offsets = [0, 128], sizes = [8, 128], strides = [1, 1]} : vector<8x512xf32> to vector<8x128xf32>
    %23 = arith.negf %22 : vector<8x128xf32>
    %24 = math.exp %23 : vector<8x128xf32>
    %cst_17 = arith.constant 1.000000e+00 : f32
    %25 = vector.broadcast %cst_17 : f32 to vector<8x128xf32>
    %26 = arith.addf %25, %24 : vector<8x128xf32>
    %27 = arith.divf %25, %26 : vector<8x128xf32>
    %28 = vector.extract_strided_slice %15 {offsets = [0, 256], sizes = [8, 128], strides = [1, 1]} : vector<8x512xf32> to vector<8x128xf32>
    %29 = math.tanh %28 : vector<8x128xf32>
    %30 = vector.extract_strided_slice %15 {offsets = [0, 384], sizes = [8, 128], strides = [1, 1]} : vector<8x512xf32> to vector<8x128xf32>
    %31 = arith.negf %30 : vector<8x128xf32>
    %32 = math.exp %31 : vector<8x128xf32>
    %cst_18 = arith.constant 1.000000e+00 : f32
    %33 = vector.broadcast %cst_18 : f32 to vector<8x128xf32>
    %34 = arith.addf %33, %32 : vector<8x128xf32>
    %35 = arith.divf %33, %34 : vector<8x128xf32>
    %c0_19 = arith.constant 0 : index
    %c0_20 = arith.constant 0 : index
    %36 = vector.load %arg12[%c0_19, %c0_20] : memref<8x256xf32, #tpu.memory_space<vmem>>, vector<8x128xf32>
    %37 = arith.mulf %27, %36 : vector<8x128xf32>
    %38 = arith.mulf %21, %29 : vector<8x128xf32>
    %39 = arith.addf %37, %38 : vector<8x128xf32>
    %40 = math.tanh %39 : vector<8x128xf32>
    %41 = arith.mulf %35, %40 : vector<8x128xf32>
    %c0_21 = arith.constant 0 : index
    %c0_22 = arith.constant 0 : index
    %42 = vector.load %arg12[%c0_21, %c0_22] : memref<8x256xf32, #tpu.memory_space<vmem>>, vector<8x128xf32>
    tpu.vector_store %arg12[%c0_21, %c0_22], %39 {strides = array<i32>} : memref<8x256xf32, #tpu.memory_space<vmem>>, vector<8x128xf32>,
    %c0_23 = arith.constant 0 : index
    %c0_24 = arith.constant 0 : index
    %43 = vector.load %arg11[%c0_23, %c0_24] : memref<8x256xf32, #tpu.memory_space<vmem>>, vector<8x128xf32>
    tpu.vector_store %arg11[%c0_23, %c0_24], %41 {strides = array<i32>} : memref<8x256xf32, #tpu.memory_space<vmem>>, vector<8x128xf32>,
    %c0_25 = arith.constant 0 : index
    %c0_26 = arith.constant 0 : index
    %44 = vector.load %arg11[%c0_25, %c0_26] : memref<8x256xf32, #tpu.memory_space<vmem>>, vector<8x256xf32>
    %c0_27 = arith.constant 0 : index
    %c0_28 = arith.constant 0 : index
    %45 = vector.load %arg4[%c0_27, %c0_28] : memref<256x512xf32, #tpu.memory_space<vmem>>, vector<256x512xf32>
    %cst_29 = arith.constant dense<0.000000e+00> : vector<8x512xf32>
    %46 = tpu.matmul %44, %45, %cst_29 {dimension_numbers = #tpu.dot_dimension_numbers<[1], [0], [0], [1], [0, 0, 1, 1], [], []>} : vector<8x256xf32>, vector<256x512xf32>, vector<8x512xf32> -> vector<8x512xf32>
    %c0_30 = arith.constant 0 : index
    %c0_31 = arith.constant 0 : index
    %47 = vector.load %arg5[%c0_30, %c0_31] : memref<1x512xf32, #tpu.memory_space<vmem>>, vector<1x512xf32>
    %48 = vector.broadcast %47 : vector<1x512xf32> to vector<8x512xf32>
    %49 = arith.addf %46, %48 : vector<8x512xf32>
    %50 = vector.extract_strided_slice %49 {offsets = [0, 0], sizes = [8, 128], strides = [1, 1]} : vector<8x512xf32> to vector<8x128xf32>
    %51 = arith.negf %50 : vector<8x128xf32>
    %52 = math.exp %51 : vector<8x128xf32>
    %cst_32 = arith.constant 1.000000e+00 : f32
    %53 = vector.broadcast %cst_32 : f32 to vector<8x128xf32>
    %54 = arith.addf %53, %52 : vector<8x128xf32>
    %55 = arith.divf %53, %54 : vector<8x128xf32>
    %56 = vector.extract_strided_slice %49 {offsets = [0, 128], sizes = [8, 128], strides = [1, 1]} : vector<8x512xf32> to vector<8x128xf32>
    %57 = arith.negf %56 : vector<8x128xf32>
    %58 = math.exp %57 : vector<8x128xf32>
    %cst_33 = arith.constant 1.000000e+00 : f32
    %59 = vector.broadcast %cst_33 : f32 to vector<8x128xf32>
    %60 = arith.addf %59, %58 : vector<8x128xf32>
    %61 = arith.divf %59, %60 : vector<8x128xf32>
    %62 = vector.extract_strided_slice %49 {offsets = [0, 256], sizes = [8, 128], strides = [1, 1]} : vector<8x512xf32> to vector<8x128xf32>
    %63 = math.tanh %62 : vector<8x128xf32>
    %64 = vector.extract_strided_slice %49 {offsets = [0, 384], sizes = [8, 128], strides = [1, 1]} : vector<8x512xf32> to vector<8x128xf32>
    %65 = arith.negf %64 : vector<8x128xf32>
    %66 = math.exp %65 : vector<8x128xf32>
    %cst_34 = arith.constant 1.000000e+00 : f32
    %67 = vector.broadcast %cst_34 : f32 to vector<8x128xf32>
    %68 = arith.addf %67, %66 : vector<8x128xf32>
    %69 = arith.divf %67, %68 : vector<8x128xf32>
    %c0_35 = arith.constant 0 : index
    %c128 = arith.constant 128 : index
    %70 = vector.load %arg12[%c0_35, %c128] : memref<8x256xf32, #tpu.memory_space<vmem>>, vector<8x128xf32>
    %71 = arith.mulf %61, %70 : vector<8x128xf32>
    %72 = arith.mulf %55, %63 : vector<8x128xf32>
    %73 = arith.addf %71, %72 : vector<8x128xf32>
    %74 = math.tanh %73 : vector<8x128xf32>
    %75 = arith.mulf %69, %74 : vector<8x128xf32>
    %c0_36 = arith.constant 0 : index
    %c128_37 = arith.constant 128 : index
    %76 = vector.load %arg12[%c0_36, %c128_37] : memref<8x256xf32, #tpu.memory_space<vmem>>, vector<8x128xf32>
    tpu.vector_store %arg12[%c0_36, %c128_37], %73 {strides = array<i32>} : memref<8x256xf32, #tpu.memory_space<vmem>>, vector<8x128xf32>,
    %c0_38 = arith.constant 0 : index
    %c128_39 = arith.constant 128 : index
    %77 = vector.load %arg11[%c0_38, %c128_39] : memref<8x256xf32, #tpu.memory_space<vmem>>, vector<8x128xf32>
    tpu.vector_store %arg11[%c0_38, %c128_39], %75 {strides = array<i32>} : memref<8x256xf32, #tpu.memory_space<vmem>>, vector<8x128xf32>,
    %c1_i32 = arith.constant 1 : i32
    %78 = arith.index_cast %c1_i32 : i32 to index
    %c0_40 = arith.constant 0 : index
    %c0_41 = arith.constant 0 : index
    %79 = vector.load %arg0[%78, %c0_40, %c0_41] : memref<8x8x16xf32, #tpu.memory_space<vmem>>, vector<1x8x16xf32>
    %80 = vector.shape_cast %79 : vector<1x8x16xf32> to vector<8x16xf32>
    %c0_42 = arith.constant 0 : index
    %c0_43 = arith.constant 0 : index
    %81 = vector.load %arg1[%c0_42, %c0_43] : memref<16x512xf32, #tpu.memory_space<vmem>>, vector<16x512xf32>
    %cst_44 = arith.constant dense<0.000000e+00> : vector<8x512xf32>
    %82 = tpu.matmul %80, %81, %cst_44 {dimension_numbers = #tpu.dot_dimension_numbers<[1], [0], [0], [1], [0, 0, 1, 1], [], []>} : vector<8x16xf32>, vector<16x512xf32>, vector<8x512xf32> -> vector<8x512xf32>
    %c0_45 = arith.constant 0 : index
    %c0_46 = arith.constant 0 : index
    %83 = vector.load %arg11[%c0_45, %c0_46] : memref<8x256xf32, #tpu.memory_space<vmem>>, vector<8x128xf32>
    %c0_47 = arith.constant 0 : index
    %c0_48 = arith.constant 0 : index
    %84 = vector.load %arg2[%c0_47, %c0_48] : memref<128x512xf32, #tpu.memory_space<vmem>>, vector<128x512xf32>
    %cst_49 = arith.constant dense<0.000000e+00> : vector<8x512xf32>
    %85 = tpu.matmul %83, %84, %cst_49 {dimension_numbers = #tpu.dot_dimension_numbers<[1], [0], [0], [1], [0, 0, 1, 1], [], []>} : vector<8x128xf32>, vector<128x512xf32>, vector<8x512xf32> -> vector<8x512xf32>
    %86 = arith.addf %82, %85 : vector<8x512xf32>
    %c0_50 = arith.constant 0 : index
    %c0_51 = arith.constant 0 : index
    %87 = vector.load %arg3[%c0_50, %c0_51] : memref<1x512xf32, #tpu.memory_space<vmem>>, vector<1x512xf32>
    %88 = vector.broadcast %87 : vector<1x512xf32> to vector<8x512xf32>
    %89 = arith.addf %86, %88 : vector<8x512xf32>
    %90 = vector.extract_strided_slice %89 {offsets = [0, 0], sizes = [8, 128], strides = [1, 1]} : vector<8x512xf32> to vector<8x128xf32>
    %91 = arith.negf %90 : vector<8x128xf32>
    %92 = math.exp %91 : vector<8x128xf32>
    %cst_52 = arith.constant 1.000000e+00 : f32
    %93 = vector.broadcast %cst_52 : f32 to vector<8x128xf32>
    %94 = arith.addf %93, %92 : vector<8x128xf32>
    %95 = arith.divf %93, %94 : vector<8x128xf32>
    %96 = vector.extract_strided_slice %89 {offsets = [0, 128], sizes = [8, 128], strides = [1, 1]} : vector<8x512xf32> to vector<8x128xf32>
    %97 = arith.negf %96 : vector<8x128xf32>
    %98 = math.exp %97 : vector<8x128xf32>
    %cst_53 = arith.constant 1.000000e+00 : f32
    %99 = vector.broadcast %cst_53 : f32 to vector<8x128xf32>
    %100 = arith.addf %99, %98 : vector<8x128xf32>
    %101 = arith.divf %99, %100 : vector<8x128xf32>
    %102 = vector.extract_strided_slice %89 {offsets = [0, 256], sizes = [8, 128], strides = [1, 1]} : vector<8x512xf32> to vector<8x128xf32>
    %103 = math.tanh %102 : vector<8x128xf32>
    %104 = vector.extract_strided_slice %89 {offsets = [0, 384], sizes = [8, 128], strides = [1, 1]} : vector<8x512xf32> to vector<8x128xf32>
    %105 = arith.negf %104 : vector<8x128xf32>
    %106 = math.exp %105 : vector<8x128xf32>
    %cst_54 = arith.constant 1.000000e+00 : f32
    %107 = vector.broadcast %cst_54 : f32 to vector<8x128xf32>
    %108 = arith.addf %107, %106 : vector<8x128xf32>
    %109 = arith.divf %107, %108 : vector<8x128xf32>
    %c0_55 = arith.constant 0 : index
    %c0_56 = arith.constant 0 : index
    %110 = vector.load %arg12[%c0_55, %c0_56] : memref<8x256xf32, #tpu.memory_space<vmem>>, vector<8x128xf32>
    %111 = arith.mulf %101, %110 : vector<8x128xf32>
    %112 = arith.mulf %95, %103 : vector<8x128xf32>
    %113 = arith.addf %111, %112 : vector<8x128xf32>
    %114 = math.tanh %113 : vector<8x128xf32>
    %115 = arith.mulf %109, %114 : vector<8x128xf32>
    %c0_57 = arith.constant 0 : index
    %c0_58 = arith.constant 0 : index
    %116 = vector.load %arg12[%c0_57, %c0_58] : memref<8x256xf32, #tpu.memory_space<vmem>>, vector<8x128xf32>
    tpu.vector_store %arg12[%c0_57, %c0_58], %113 {strides = array<i32>} : memref<8x256xf32, #tpu.memory_space<vmem>>, vector<8x128xf32>,
    %c0_59 = arith.constant 0 : index
    %c0_60 = arith.constant 0 : index
    %117 = vector.load %arg11[%c0_59, %c0_60] : memref<8x256xf32, #tpu.memory_space<vmem>>, vector<8x128xf32>
    tpu.vector_store %arg11[%c0_59, %c0_60], %115 {strides = array<i32>} : memref<8x256xf32, #tpu.memory_space<vmem>>, vector<8x128xf32>,
    %c0_61 = arith.constant 0 : index
    %c0_62 = arith.constant 0 : index
    %118 = vector.load %arg11[%c0_61, %c0_62] : memref<8x256xf32, #tpu.memory_space<vmem>>, vector<8x256xf32>
    %c0_63 = arith.constant 0 : index
    %c0_64 = arith.constant 0 : index
    %119 = vector.load %arg4[%c0_63, %c0_64] : memref<256x512xf32, #tpu.memory_space<vmem>>, vector<256x512xf32>
    %cst_65 = arith.constant dense<0.000000e+00> : vector<8x512xf32>
    %120 = tpu.matmul %118, %119, %cst_65 {dimension_numbers = #tpu.dot_dimension_numbers<[1], [0], [0], [1], [0, 0, 1, 1], [], []>} : vector<8x256xf32>, vector<256x512xf32>, vector<8x512xf32> -> vector<8x512xf32>
    %c0_66 = arith.constant 0 : index
    %c0_67 = arith.constant 0 : index
    %121 = vector.load %arg5[%c0_66, %c0_67] : memref<1x512xf32, #tpu.memory_space<vmem>>, vector<1x512xf32>
    %122 = vector.broadcast %121 : vector<1x512xf32> to vector<8x512xf32>
    %123 = arith.addf %120, %122 : vector<8x512xf32>
    %124 = vector.extract_strided_slice %123 {offsets = [0, 0], sizes = [8, 128], strides = [1, 1]} : vector<8x512xf32> to vector<8x128xf32>
    %125 = arith.negf %124 : vector<8x128xf32>
    %126 = math.exp %125 : vector<8x128xf32>
    %cst_68 = arith.constant 1.000000e+00 : f32
    %127 = vector.broadcast %cst_68 : f32 to vector<8x128xf32>
    %128 = arith.addf %127, %126 : vector<8x128xf32>
    %129 = arith.divf %127, %128 : vector<8x128xf32>
    %130 = vector.extract_strided_slice %123 {offsets = [0, 128], sizes = [8, 128], strides = [1, 1]} : vector<8x512xf32> to vector<8x128xf32>
    %131 = arith.negf %130 : vector<8x128xf32>
    %132 = math.exp %131 : vector<8x128xf32>
    %cst_69 = arith.constant 1.000000e+00 : f32
    %133 = vector.broadcast %cst_69 : f32 to vector<8x128xf32>
    %134 = arith.addf %133, %132 : vector<8x128xf32>
    %135 = arith.divf %133, %134 : vector<8x128xf32>
    %136 = vector.extract_strided_slice %123 {offsets = [0, 256], sizes = [8, 128], strides = [1, 1]} : vector<8x512xf32> to vector<8x128xf32>
    %137 = math.tanh %136 : vector<8x128xf32>
    %138 = vector.extract_strided_slice %123 {offsets = [0, 384], sizes = [8, 128], strides = [1, 1]} : vector<8x512xf32> to vector<8x128xf32>
    %139 = arith.negf %138 : vector<8x128xf32>
    %140 = math.exp %139 : vector<8x128xf32>
    %cst_70 = arith.constant 1.000000e+00 : f32
    %141 = vector.broadcast %cst_70 : f32 to vector<8x128xf32>
    %142 = arith.addf %141, %140 : vector<8x128xf32>
    %143 = arith.divf %141, %142 : vector<8x128xf32>
    %c0_71 = arith.constant 0 : index
    %c128_72 = arith.constant 128 : index
    %144 = vector.load %arg12[%c0_71, %c128_72] : memref<8x256xf32, #tpu.memory_space<vmem>>, vector<8x128xf32>
    %145 = arith.mulf %135, %144 : vector<8x128xf32>
    %146 = arith.mulf %129, %137 : vector<8x128xf32>
    %147 = arith.addf %145, %146 : vector<8x128xf32>
    %148 = math.tanh %147 : vector<8x128xf32>
    %149 = arith.mulf %143, %148 : vector<8x128xf32>
    %c0_73 = arith.constant 0 : index
    %c128_74 = arith.constant 128 : index
    %150 = vector.load %arg12[%c0_73, %c128_74] : memref<8x256xf32, #tpu.memory_space<vmem>>, vector<8x128xf32>
    tpu.vector_store %arg12[%c0_73, %c128_74], %147 {strides = array<i32>} : memref<8x256xf32, #tpu.memory_space<vmem>>, vector<8x128xf32>,
    %c0_75 = arith.constant 0 : index
    %c128_76 = arith.constant 128 : index
    %151 = vector.load %arg11[%c0_75, %c128_76] : memref<8x256xf32, #tpu.memory_space<vmem>>, vector<8x128xf32>
    tpu.vector_store %arg11[%c0_75, %c128_76], %149 {strides = array<i32>} : memref<8x256xf32, #tpu.memory_space<vmem>>, vector<8x128xf32>,
    %c2_i32 = arith.constant 2 : i32
    %152 = arith.index_cast %c2_i32 : i32 to index
    %c0_77 = arith.constant 0 : index
    %c0_78 = arith.constant 0 : index
    %153 = vector.load %arg0[%152, %c0_77, %c0_78] : memref<8x8x16xf32, #tpu.memory_space<vmem>>, vector<1x8x16xf32>
    %154 = vector.shape_cast %153 : vector<1x8x16xf32> to vector<8x16xf32>
    %c0_79 = arith.constant 0 : index
    %c0_80 = arith.constant 0 : index
    %155 = vector.load %arg1[%c0_79, %c0_80] : memref<16x512xf32, #tpu.memory_space<vmem>>, vector<16x512xf32>
    %cst_81 = arith.constant dense<0.000000e+00> : vector<8x512xf32>
    %156 = tpu.matmul %154, %155, %cst_81 {dimension_numbers = #tpu.dot_dimension_numbers<[1], [0], [0], [1], [0, 0, 1, 1], [], []>} : vector<8x16xf32>, vector<16x512xf32>, vector<8x512xf32> -> vector<8x512xf32>
    %c0_82 = arith.constant 0 : index
    %c0_83 = arith.constant 0 : index
    %157 = vector.load %arg11[%c0_82, %c0_83] : memref<8x256xf32, #tpu.memory_space<vmem>>, vector<8x128xf32>
    %c0_84 = arith.constant 0 : index
    %c0_85 = arith.constant 0 : index
    %158 = vector.load %arg2[%c0_84, %c0_85] : memref<128x512xf32, #tpu.memory_space<vmem>>, vector<128x512xf32>
    %cst_86 = arith.constant dense<0.000000e+00> : vector<8x512xf32>
    %159 = tpu.matmul %157, %158, %cst_86 {dimension_numbers = #tpu.dot_dimension_numbers<[1], [0], [0], [1], [0, 0, 1, 1], [], []>} : vector<8x128xf32>, vector<128x512xf32>, vector<8x512xf32> -> vector<8x512xf32>
    %160 = arith.addf %156, %159 : vector<8x512xf32>
    %c0_87 = arith.constant 0 : index
    %c0_88 = arith.constant 0 : index
    %161 = vector.load %arg3[%c0_87, %c0_88] : memref<1x512xf32, #tpu.memory_space<vmem>>, vector<1x512xf32>
    %162 = vector.broadcast %161 : vector<1x512xf32> to vector<8x512xf32>
    %163 = arith.addf %160, %162 : vector<8x512xf32>
    %164 = vector.extract_strided_slice %163 {offsets = [0, 0], sizes = [8, 128], strides = [1, 1]} : vector<8x512xf32> to vector<8x128xf32>
    %165 = arith.negf %164 : vector<8x128xf32>
    %166 = math.exp %165 : vector<8x128xf32>
    %cst_89 = arith.constant 1.000000e+00 : f32
    %167 = vector.broadcast %cst_89 : f32 to vector<8x128xf32>
    %168 = arith.addf %167, %166 : vector<8x128xf32>
    %169 = arith.divf %167, %168 : vector<8x128xf32>
    %170 = vector.extract_strided_slice %163 {offsets = [0, 128], sizes = [8, 128], strides = [1, 1]} : vector<8x512xf32> to vector<8x128xf32>
    %171 = arith.negf %170 : vector<8x128xf32>
    %172 = math.exp %171 : vector<8x128xf32>
    %cst_90 = arith.constant 1.000000e+00 : f32
    %173 = vector.broadcast %cst_90 : f32 to vector<8x128xf32>
    %174 = arith.addf %173, %172 : vector<8x128xf32>
    %175 = arith.divf %173, %174 : vector<8x128xf32>
    %176 = vector.extract_strided_slice %163 {offsets = [0, 256], sizes = [8, 128], strides = [1, 1]} : vector<8x512xf32> to vector<8x128xf32>
    %177 = math.tanh %176 : vector<8x128xf32>
    %178 = vector.extract_strided_slice %163 {offsets = [0, 384], sizes = [8, 128], strides = [1, 1]} : vector<8x512xf32> to vector<8x128xf32>
    %179 = arith.negf %178 : vector<8x128xf32>
    %180 = math.exp %179 : vector<8x128xf32>
    %cst_91 = arith.constant 1.000000e+00 : f32
    %181 = vector.broadcast %cst_91 : f32 to vector<8x128xf32>
    %182 = arith.addf %181, %180 : vector<8x128xf32>
    %183 = arith.divf %181, %182 : vector<8x128xf32>
    %c0_92 = arith.constant 0 : index
    %c0_93 = arith.constant 0 : index
    %184 = vector.load %arg12[%c0_92, %c0_93] : memref<8x256xf32, #tpu.memory_space<vmem>>, vector<8x128xf32>
    %185 = arith.mulf %175, %184 : vector<8x128xf32>
    %186 = arith.mulf %169, %177 : vector<8x128xf32>
    %187 = arith.addf %185, %186 : vector<8x128xf32>
    %188 = math.tanh %187 : vector<8x128xf32>
    %189 = arith.mulf %183, %188 : vector<8x128xf32>
    %c0_94 = arith.constant 0 : index
    %c0_95 = arith.constant 0 : index
    %190 = vector.load %arg12[%c0_94, %c0_95] : memref<8x256xf32, #tpu.memory_space<vmem>>, vector<8x128xf32>
    tpu.vector_store %arg12[%c0_94, %c0_95], %187 {strides = array<i32>} : memref<8x256xf32, #tpu.memory_space<vmem>>, vector<8x128xf32>,
    %c0_96 = arith.constant 0 : index
    %c0_97 = arith.constant 0 : index
    %191 = vector.load %arg11[%c0_96, %c0_97] : memref<8x256xf32, #tpu.memory_space<vmem>>, vector<8x128xf32>
    tpu.vector_store %arg11[%c0_96, %c0_97], %189 {strides = array<i32>} : memref<8x256xf32, #tpu.memory_space<vmem>>, vector<8x128xf32>,
    %c0_98 = arith.constant 0 : index
    %c0_99 = arith.constant 0 : index
    %192 = vector.load %arg11[%c0_98, %c0_99] : memref<8x256xf32, #tpu.memory_space<vmem>>, vector<8x256xf32>
    %c0_100 = arith.constant 0 : index
    %c0_101 = arith.constant 0 : index
    %193 = vector.load %arg4[%c0_100, %c0_101] : memref<256x512xf32, #tpu.memory_space<vmem>>, vector<256x512xf32>
    %cst_102 = arith.constant dense<0.000000e+00> : vector<8x512xf32>
    %194 = tpu.matmul %192, %193, %cst_102 {dimension_numbers = #tpu.dot_dimension_numbers<[1], [0], [0], [1], [0, 0, 1, 1], [], []>} : vector<8x256xf32>, vector<256x512xf32>, vector<8x512xf32> -> vector<8x512xf32>
    %c0_103 = arith.constant 0 : index
    %c0_104 = arith.constant 0 : index
    %195 = vector.load %arg5[%c0_103, %c0_104] : memref<1x512xf32, #tpu.memory_space<vmem>>, vector<1x512xf32>
    %196 = vector.broadcast %195 : vector<1x512xf32> to vector<8x512xf32>
    %197 = arith.addf %194, %196 : vector<8x512xf32>
    %198 = vector.extract_strided_slice %197 {offsets = [0, 0], sizes = [8, 128], strides = [1, 1]} : vector<8x512xf32> to vector<8x128xf32>
    %199 = arith.negf %198 : vector<8x128xf32>
    %200 = math.exp %199 : vector<8x128xf32>
    %cst_105 = arith.constant 1.000000e+00 : f32
    %201 = vector.broadcast %cst_105 : f32 to vector<8x128xf32>
    %202 = arith.addf %201, %200 : vector<8x128xf32>
    %203 = arith.divf %201, %202 : vector<8x128xf32>
    %204 = vector.extract_strided_slice %197 {offsets = [0, 128], sizes = [8, 128], strides = [1, 1]} : vector<8x512xf32> to vector<8x128xf32>
    %205 = arith.negf %204 : vector<8x128xf32>
    %206 = math.exp %205 : vector<8x128xf32>
    %cst_106 = arith.constant 1.000000e+00 : f32
    %207 = vector.broadcast %cst_106 : f32 to vector<8x128xf32>
    %208 = arith.addf %207, %206 : vector<8x128xf32>
    %209 = arith.divf %207, %208 : vector<8x128xf32>
    %210 = vector.extract_strided_slice %197 {offsets = [0, 256], sizes = [8, 128], strides = [1, 1]} : vector<8x512xf32> to vector<8x128xf32>
    %211 = math.tanh %210 : vector<8x128xf32>
    %212 = vector.extract_strided_slice %197 {offsets = [0, 384], sizes = [8, 128], strides = [1, 1]} : vector<8x512xf32> to vector<8x128xf32>
    %213 = arith.negf %212 : vector<8x128xf32>
    %214 = math.exp %213 : vector<8x128xf32>
    %cst_107 = arith.constant 1.000000e+00 : f32
    %215 = vector.broadcast %cst_107 : f32 to vector<8x128xf32>
    %216 = arith.addf %215, %214 : vector<8x128xf32>
    %217 = arith.divf %215, %216 : vector<8x128xf32>
    %c0_108 = arith.constant 0 : index
    %c128_109 = arith.constant 128 : index
    %218 = vector.load %arg12[%c0_108, %c128_109] : memref<8x256xf32, #tpu.memory_space<vmem>>, vector<8x128xf32>
    %219 = arith.mulf %209, %218 : vector<8x128xf32>
    %220 = arith.mulf %203, %211 : vector<8x128xf32>
    %221 = arith.addf %219, %220 : vector<8x128xf32>
    %222 = math.tanh %221 : vector<8x128xf32>
    %223 = arith.mulf %217, %222 : vector<8x128xf32>
    %c0_110 = arith.constant 0 : index
    %c128_111 = arith.constant 128 : index
    %224 = vector.load %arg12[%c0_110, %c128_111] : memref<8x256xf32, #tpu.memory_space<vmem>>, vector<8x128xf32>
    tpu.vector_store %arg12[%c0_110, %c128_111], %221 {strides = array<i32>} : memref<8x256xf32, #tpu.memory_space<vmem>>, vector<8x128xf32>,
    %c0_112 = arith.constant 0 : index
    %c128_113 = arith.constant 128 : index
    %225 = vector.load %arg11[%c0_112, %c128_113] : memref<8x256xf32, #tpu.memory_space<vmem>>, vector<8x128xf32>
    tpu.vector_store %arg11[%c0_112, %c128_113], %223 {strides = array<i32>} : memref<8x256xf32, #tpu.memory_space<vmem>>, vector<8x128xf32>,
    %c3_i32 = arith.constant 3 : i32
    %226 = arith.index_cast %c3_i32 : i32 to index
    %c0_114 = arith.constant 0 : index
    %c0_115 = arith.constant 0 : index
    %227 = vector.load %arg0[%226, %c0_114, %c0_115] : memref<8x8x16xf32, #tpu.memory_space<vmem>>, vector<1x8x16xf32>
    %228 = vector.shape_cast %227 : vector<1x8x16xf32> to vector<8x16xf32>
    %c0_116 = arith.constant 0 : index
    %c0_117 = arith.constant 0 : index
    %229 = vector.load %arg1[%c0_116, %c0_117] : memref<16x512xf32, #tpu.memory_space<vmem>>, vector<16x512xf32>
    %cst_118 = arith.constant dense<0.000000e+00> : vector<8x512xf32>
    %230 = tpu.matmul %228, %229, %cst_118 {dimension_numbers = #tpu.dot_dimension_numbers<[1], [0], [0], [1], [0, 0, 1, 1], [], []>} : vector<8x16xf32>, vector<16x512xf32>, vector<8x512xf32> -> vector<8x512xf32>
    %c0_119 = arith.constant 0 : index
    %c0_120 = arith.constant 0 : index
    %231 = vector.load %arg11[%c0_119, %c0_120] : memref<8x256xf32, #tpu.memory_space<vmem>>, vector<8x128xf32>
    %c0_121 = arith.constant 0 : index
    %c0_122 = arith.constant 0 : index
    %232 = vector.load %arg2[%c0_121, %c0_122] : memref<128x512xf32, #tpu.memory_space<vmem>>, vector<128x512xf32>
    %cst_123 = arith.constant dense<0.000000e+00> : vector<8x512xf32>
    %233 = tpu.matmul %231, %232, %cst_123 {dimension_numbers = #tpu.dot_dimension_numbers<[1], [0], [0], [1], [0, 0, 1, 1], [], []>} : vector<8x128xf32>, vector<128x512xf32>, vector<8x512xf32> -> vector<8x512xf32>
    %234 = arith.addf %230, %233 : vector<8x512xf32>
    %c0_124 = arith.constant 0 : index
    %c0_125 = arith.constant 0 : index
    %235 = vector.load %arg3[%c0_124, %c0_125] : memref<1x512xf32, #tpu.memory_space<vmem>>, vector<1x512xf32>
    %236 = vector.broadcast %235 : vector<1x512xf32> to vector<8x512xf32>
    %237 = arith.addf %234, %236 : vector<8x512xf32>
    %238 = vector.extract_strided_slice %237 {offsets = [0, 0], sizes = [8, 128], strides = [1, 1]} : vector<8x512xf32> to vector<8x128xf32>
    %239 = arith.negf %238 : vector<8x128xf32>
    %240 = math.exp %239 : vector<8x128xf32>
    %cst_126 = arith.constant 1.000000e+00 : f32
    %241 = vector.broadcast %cst_126 : f32 to vector<8x128xf32>
    %242 = arith.addf %241, %240 : vector<8x128xf32>
    %243 = arith.divf %241, %242 : vector<8x128xf32>
    %244 = vector.extract_strided_slice %237 {offsets = [0, 128], sizes = [8, 128], strides = [1, 1]} : vector<8x512xf32> to vector<8x128xf32>
    %245 = arith.negf %244 : vector<8x128xf32>
    %246 = math.exp %245 : vector<8x128xf32>
    %cst_127 = arith.constant 1.000000e+00 : f32
    %247 = vector.broadcast %cst_127 : f32 to vector<8x128xf32>
    %248 = arith.addf %247, %246 : vector<8x128xf32>
    %249 = arith.divf %247, %248 : vector<8x128xf32>
    %250 = vector.extract_strided_slice %237 {offsets = [0, 256], sizes = [8, 128], strides = [1, 1]} : vector<8x512xf32> to vector<8x128xf32>
    %251 = math.tanh %250 : vector<8x128xf32>
    %252 = vector.extract_strided_slice %237 {offsets = [0, 384], sizes = [8, 128], strides = [1, 1]} : vector<8x512xf32> to vector<8x128xf32>
    %253 = arith.negf %252 : vector<8x128xf32>
    %254 = math.exp %253 : vector<8x128xf32>
    %cst_128 = arith.constant 1.000000e+00 : f32
    %255 = vector.broadcast %cst_128 : f32 to vector<8x128xf32>
    %256 = arith.addf %255, %254 : vector<8x128xf32>
    %257 = arith.divf %255, %256 : vector<8x128xf32>
    %c0_129 = arith.constant 0 : index
    %c0_130 = arith.constant 0 : index
    %258 = vector.load %arg12[%c0_129, %c0_130] : memref<8x256xf32, #tpu.memory_space<vmem>>, vector<8x128xf32>
    %259 = arith.mulf %249, %258 : vector<8x128xf32>
    %260 = arith.mulf %243, %251 : vector<8x128xf32>
    %261 = arith.addf %259, %260 : vector<8x128xf32>
    %262 = math.tanh %261 : vector<8x128xf32>
    %263 = arith.mulf %257, %262 : vector<8x128xf32>
    %c0_131 = arith.constant 0 : index
    %c0_132 = arith.constant 0 : index
    %264 = vector.load %arg12[%c0_131, %c0_132] : memref<8x256xf32, #tpu.memory_space<vmem>>, vector<8x128xf32>
    tpu.vector_store %arg12[%c0_131, %c0_132], %261 {strides = array<i32>} : memref<8x256xf32, #tpu.memory_space<vmem>>, vector<8x128xf32>,
    %c0_133 = arith.constant 0 : index
    %c0_134 = arith.constant 0 : index
    %265 = vector.load %arg11[%c0_133, %c0_134] : memref<8x256xf32, #tpu.memory_space<vmem>>, vector<8x128xf32>
    tpu.vector_store %arg11[%c0_133, %c0_134], %263 {strides = array<i32>} : memref<8x256xf32, #tpu.memory_space<vmem>>, vector<8x128xf32>,
    %c0_135 = arith.constant 0 : index
    %c0_136 = arith.constant 0 : index
    %266 = vector.load %arg11[%c0_135, %c0_136] : memref<8x256xf32, #tpu.memory_space<vmem>>, vector<8x256xf32>
    %c0_137 = arith.constant 0 : index
    %c0_138 = arith.constant 0 : index
    %267 = vector.load %arg4[%c0_137, %c0_138] : memref<256x512xf32, #tpu.memory_space<vmem>>, vector<256x512xf32>
    %cst_139 = arith.constant dense<0.000000e+00> : vector<8x512xf32>
    %268 = tpu.matmul %266, %267, %cst_139 {dimension_numbers = #tpu.dot_dimension_numbers<[1], [0], [0], [1], [0, 0, 1, 1], [], []>} : vector<8x256xf32>, vector<256x512xf32>, vector<8x512xf32> -> vector<8x512xf32>
    %c0_140 = arith.constant 0 : index
    %c0_141 = arith.constant 0 : index
    %269 = vector.load %arg5[%c0_140, %c0_141] : memref<1x512xf32, #tpu.memory_space<vmem>>, vector<1x512xf32>
    %270 = vector.broadcast %269 : vector<1x512xf32> to vector<8x512xf32>
    %271 = arith.addf %268, %270 : vector<8x512xf32>
    %272 = vector.extract_strided_slice %271 {offsets = [0, 0], sizes = [8, 128], strides = [1, 1]} : vector<8x512xf32> to vector<8x128xf32>
    %273 = arith.negf %272 : vector<8x128xf32>
    %274 = math.exp %273 : vector<8x128xf32>
    %cst_142 = arith.constant 1.000000e+00 : f32
    %275 = vector.broadcast %cst_142 : f32 to vector<8x128xf32>
    %276 = arith.addf %275, %274 : vector<8x128xf32>
    %277 = arith.divf %275, %276 : vector<8x128xf32>
    %278 = vector.extract_strided_slice %271 {offsets = [0, 128], sizes = [8, 128], strides = [1, 1]} : vector<8x512xf32> to vector<8x128xf32>
    %279 = arith.negf %278 : vector<8x128xf32>
    %280 = math.exp %279 : vector<8x128xf32>
    %cst_143 = arith.constant 1.000000e+00 : f32
    %281 = vector.broadcast %cst_143 : f32 to vector<8x128xf32>
    %282 = arith.addf %281, %280 : vector<8x128xf32>
    %283 = arith.divf %281, %282 : vector<8x128xf32>
    %284 = vector.extract_strided_slice %271 {offsets = [0, 256], sizes = [8, 128], strides = [1, 1]} : vector<8x512xf32> to vector<8x128xf32>
    %285 = math.tanh %284 : vector<8x128xf32>
    %286 = vector.extract_strided_slice %271 {offsets = [0, 384], sizes = [8, 128], strides = [1, 1]} : vector<8x512xf32> to vector<8x128xf32>
    %287 = arith.negf %286 : vector<8x128xf32>
    %288 = math.exp %287 : vector<8x128xf32>
    %cst_144 = arith.constant 1.000000e+00 : f32
    %289 = vector.broadcast %cst_144 : f32 to vector<8x128xf32>
    %290 = arith.addf %289, %288 : vector<8x128xf32>
    %291 = arith.divf %289, %290 : vector<8x128xf32>
    %c0_145 = arith.constant 0 : index
    %c128_146 = arith.constant 128 : index
    %292 = vector.load %arg12[%c0_145, %c128_146] : memref<8x256xf32, #tpu.memory_space<vmem>>, vector<8x128xf32>
    %293 = arith.mulf %283, %292 : vector<8x128xf32>
    %294 = arith.mulf %277, %285 : vector<8x128xf32>
    %295 = arith.addf %293, %294 : vector<8x128xf32>
    %296 = math.tanh %295 : vector<8x128xf32>
    %297 = arith.mulf %291, %296 : vector<8x128xf32>
    %c0_147 = arith.constant 0 : index
    %c128_148 = arith.constant 128 : index
    %298 = vector.load %arg12[%c0_147, %c128_148] : memref<8x256xf32, #tpu.memory_space<vmem>>, vector<8x128xf32>
    tpu.vector_store %arg12[%c0_147, %c128_148], %295 {strides = array<i32>} : memref<8x256xf32, #tpu.memory_space<vmem>>, vector<8x128xf32>,
    %c0_149 = arith.constant 0 : index
    %c128_150 = arith.constant 128 : index
    %299 = vector.load %arg11[%c0_149, %c128_150] : memref<8x256xf32, #tpu.memory_space<vmem>>, vector<8x128xf32>
    tpu.vector_store %arg11[%c0_149, %c128_150], %297 {strides = array<i32>} : memref<8x256xf32, #tpu.memory_space<vmem>>, vector<8x128xf32>,
    %c4_i32 = arith.constant 4 : i32
    %300 = arith.index_cast %c4_i32 : i32 to index
    %c0_151 = arith.constant 0 : index
    %c0_152 = arith.constant 0 : index
    %301 = vector.load %arg0[%300, %c0_151, %c0_152] : memref<8x8x16xf32, #tpu.memory_space<vmem>>, vector<1x8x16xf32>
    %302 = vector.shape_cast %301 : vector<1x8x16xf32> to vector<8x16xf32>
    %c0_153 = arith.constant 0 : index
    %c0_154 = arith.constant 0 : index
    %303 = vector.load %arg1[%c0_153, %c0_154] : memref<16x512xf32, #tpu.memory_space<vmem>>, vector<16x512xf32>
    %cst_155 = arith.constant dense<0.000000e+00> : vector<8x512xf32>
    %304 = tpu.matmul %302, %303, %cst_155 {dimension_numbers = #tpu.dot_dimension_numbers<[1], [0], [0], [1], [0, 0, 1, 1], [], []>} : vector<8x16xf32>, vector<16x512xf32>, vector<8x512xf32> -> vector<8x512xf32>
    %c0_156 = arith.constant 0 : index
    %c0_157 = arith.constant 0 : index
    %305 = vector.load %arg11[%c0_156, %c0_157] : memref<8x256xf32, #tpu.memory_space<vmem>>, vector<8x128xf32>
    %c0_158 = arith.constant 0 : index
    %c0_159 = arith.constant 0 : index
    %306 = vector.load %arg2[%c0_158, %c0_159] : memref<128x512xf32, #tpu.memory_space<vmem>>, vector<128x512xf32>
    %cst_160 = arith.constant dense<0.000000e+00> : vector<8x512xf32>
    %307 = tpu.matmul %305, %306, %cst_160 {dimension_numbers = #tpu.dot_dimension_numbers<[1], [0], [0], [1], [0, 0, 1, 1], [], []>} : vector<8x128xf32>, vector<128x512xf32>, vector<8x512xf32> -> vector<8x512xf32>
    %308 = arith.addf %304, %307 : vector<8x512xf32>
    %c0_161 = arith.constant 0 : index
    %c0_162 = arith.constant 0 : index
    %309 = vector.load %arg3[%c0_161, %c0_162] : memref<1x512xf32, #tpu.memory_space<vmem>>, vector<1x512xf32>
    %310 = vector.broadcast %309 : vector<1x512xf32> to vector<8x512xf32>
    %311 = arith.addf %308, %310 : vector<8x512xf32>
    %312 = vector.extract_strided_slice %311 {offsets = [0, 0], sizes = [8, 128], strides = [1, 1]} : vector<8x512xf32> to vector<8x128xf32>
    %313 = arith.negf %312 : vector<8x128xf32>
    %314 = math.exp %313 : vector<8x128xf32>
    %cst_163 = arith.constant 1.000000e+00 : f32
    %315 = vector.broadcast %cst_163 : f32 to vector<8x128xf32>
    %316 = arith.addf %315, %314 : vector<8x128xf32>
    %317 = arith.divf %315, %316 : vector<8x128xf32>
    %318 = vector.extract_strided_slice %311 {offsets = [0, 128], sizes = [8, 128], strides = [1, 1]} : vector<8x512xf32> to vector<8x128xf32>
    %319 = arith.negf %318 : vector<8x128xf32>
    %320 = math.exp %319 : vector<8x128xf32>
    %cst_164 = arith.constant 1.000000e+00 : f32
    %321 = vector.broadcast %cst_164 : f32 to vector<8x128xf32>
    %322 = arith.addf %321, %320 : vector<8x128xf32>
    %323 = arith.divf %321, %322 : vector<8x128xf32>
    %324 = vector.extract_strided_slice %311 {offsets = [0, 256], sizes = [8, 128], strides = [1, 1]} : vector<8x512xf32> to vector<8x128xf32>
    %325 = math.tanh %324 : vector<8x128xf32>
    %326 = vector.extract_strided_slice %311 {offsets = [0, 384], sizes = [8, 128], strides = [1, 1]} : vector<8x512xf32> to vector<8x128xf32>
    %327 = arith.negf %326 : vector<8x128xf32>
    %328 = math.exp %327 : vector<8x128xf32>
    %cst_165 = arith.constant 1.000000e+00 : f32
    %329 = vector.broadcast %cst_165 : f32 to vector<8x128xf32>
    %330 = arith.addf %329, %328 : vector<8x128xf32>
    %331 = arith.divf %329, %330 : vector<8x128xf32>
    %c0_166 = arith.constant 0 : index
    %c0_167 = arith.constant 0 : index
    %332 = vector.load %arg12[%c0_166, %c0_167] : memref<8x256xf32, #tpu.memory_space<vmem>>, vector<8x128xf32>
    %333 = arith.mulf %323, %332 : vector<8x128xf32>
    %334 = arith.mulf %317, %325 : vector<8x128xf32>
    %335 = arith.addf %333, %334 : vector<8x128xf32>
    %336 = math.tanh %335 : vector<8x128xf32>
    %337 = arith.mulf %331, %336 : vector<8x128xf32>
    %c0_168 = arith.constant 0 : index
    %c0_169 = arith.constant 0 : index
    %338 = vector.load %arg12[%c0_168, %c0_169] : memref<8x256xf32, #tpu.memory_space<vmem>>, vector<8x128xf32>
    tpu.vector_store %arg12[%c0_168, %c0_169], %335 {strides = array<i32>} : memref<8x256xf32, #tpu.memory_space<vmem>>, vector<8x128xf32>,
    %c0_170 = arith.constant 0 : index
    %c0_171 = arith.constant 0 : index
    %339 = vector.load %arg11[%c0_170, %c0_171] : memref<8x256xf32, #tpu.memory_space<vmem>>, vector<8x128xf32>
    tpu.vector_store %arg11[%c0_170, %c0_171], %337 {strides = array<i32>} : memref<8x256xf32, #tpu.memory_space<vmem>>, vector<8x128xf32>,
    %c0_172 = arith.constant 0 : index
    %c0_173 = arith.constant 0 : index
    %340 = vector.load %arg11[%c0_172, %c0_173] : memref<8x256xf32, #tpu.memory_space<vmem>>, vector<8x256xf32>
    %c0_174 = arith.constant 0 : index
    %c0_175 = arith.constant 0 : index
    %341 = vector.load %arg4[%c0_174, %c0_175] : memref<256x512xf32, #tpu.memory_space<vmem>>, vector<256x512xf32>
    %cst_176 = arith.constant dense<0.000000e+00> : vector<8x512xf32>
    %342 = tpu.matmul %340, %341, %cst_176 {dimension_numbers = #tpu.dot_dimension_numbers<[1], [0], [0], [1], [0, 0, 1, 1], [], []>} : vector<8x256xf32>, vector<256x512xf32>, vector<8x512xf32> -> vector<8x512xf32>
    %c0_177 = arith.constant 0 : index
    %c0_178 = arith.constant 0 : index
    %343 = vector.load %arg5[%c0_177, %c0_178] : memref<1x512xf32, #tpu.memory_space<vmem>>, vector<1x512xf32>
    %344 = vector.broadcast %343 : vector<1x512xf32> to vector<8x512xf32>
    %345 = arith.addf %342, %344 : vector<8x512xf32>
    %346 = vector.extract_strided_slice %345 {offsets = [0, 0], sizes = [8, 128], strides = [1, 1]} : vector<8x512xf32> to vector<8x128xf32>
    %347 = arith.negf %346 : vector<8x128xf32>
    %348 = math.exp %347 : vector<8x128xf32>
    %cst_179 = arith.constant 1.000000e+00 : f32
    %349 = vector.broadcast %cst_179 : f32 to vector<8x128xf32>
    %350 = arith.addf %349, %348 : vector<8x128xf32>
    %351 = arith.divf %349, %350 : vector<8x128xf32>
    %352 = vector.extract_strided_slice %345 {offsets = [0, 128], sizes = [8, 128], strides = [1, 1]} : vector<8x512xf32> to vector<8x128xf32>
    %353 = arith.negf %352 : vector<8x128xf32>
    %354 = math.exp %353 : vector<8x128xf32>
    %cst_180 = arith.constant 1.000000e+00 : f32
    %355 = vector.broadcast %cst_180 : f32 to vector<8x128xf32>
    %356 = arith.addf %355, %354 : vector<8x128xf32>
    %357 = arith.divf %355, %356 : vector<8x128xf32>
    %358 = vector.extract_strided_slice %345 {offsets = [0, 256], sizes = [8, 128], strides = [1, 1]} : vector<8x512xf32> to vector<8x128xf32>
    %359 = math.tanh %358 : vector<8x128xf32>
    %360 = vector.extract_strided_slice %345 {offsets = [0, 384], sizes = [8, 128], strides = [1, 1]} : vector<8x512xf32> to vector<8x128xf32>
    %361 = arith.negf %360 : vector<8x128xf32>
    %362 = math.exp %361 : vector<8x128xf32>
    %cst_181 = arith.constant 1.000000e+00 : f32
    %363 = vector.broadcast %cst_181 : f32 to vector<8x128xf32>
    %364 = arith.addf %363, %362 : vector<8x128xf32>
    %365 = arith.divf %363, %364 : vector<8x128xf32>
    %c0_182 = arith.constant 0 : index
    %c128_183 = arith.constant 128 : index
    %366 = vector.load %arg12[%c0_182, %c128_183] : memref<8x256xf32, #tpu.memory_space<vmem>>, vector<8x128xf32>
    %367 = arith.mulf %357, %366 : vector<8x128xf32>
    %368 = arith.mulf %351, %359 : vector<8x128xf32>
    %369 = arith.addf %367, %368 : vector<8x128xf32>
    %370 = math.tanh %369 : vector<8x128xf32>
    %371 = arith.mulf %365, %370 : vector<8x128xf32>
    %c0_184 = arith.constant 0 : index
    %c128_185 = arith.constant 128 : index
    %372 = vector.load %arg12[%c0_184, %c128_185] : memref<8x256xf32, #tpu.memory_space<vmem>>, vector<8x128xf32>
    tpu.vector_store %arg12[%c0_184, %c128_185], %369 {strides = array<i32>} : memref<8x256xf32, #tpu.memory_space<vmem>>, vector<8x128xf32>,
    %c0_186 = arith.constant 0 : index
    %c128_187 = arith.constant 128 : index
    %373 = vector.load %arg11[%c0_186, %c128_187] : memref<8x256xf32, #tpu.memory_space<vmem>>, vector<8x128xf32>
    tpu.vector_store %arg11[%c0_186, %c128_187], %371 {strides = array<i32>} : memref<8x256xf32, #tpu.memory_space<vmem>>, vector<8x128xf32>,
    %c5_i32 = arith.constant 5 : i32
    %374 = arith.index_cast %c5_i32 : i32 to index
    %c0_188 = arith.constant 0 : index
    %c0_189 = arith.constant 0 : index
    %375 = vector.load %arg0[%374, %c0_188, %c0_189] : memref<8x8x16xf32, #tpu.memory_space<vmem>>, vector<1x8x16xf32>
    %376 = vector.shape_cast %375 : vector<1x8x16xf32> to vector<8x16xf32>
    %c0_190 = arith.constant 0 : index
    %c0_191 = arith.constant 0 : index
    %377 = vector.load %arg1[%c0_190, %c0_191] : memref<16x512xf32, #tpu.memory_space<vmem>>, vector<16x512xf32>
    %cst_192 = arith.constant dense<0.000000e+00> : vector<8x512xf32>
    %378 = tpu.matmul %376, %377, %cst_192 {dimension_numbers = #tpu.dot_dimension_numbers<[1], [0], [0], [1], [0, 0, 1, 1], [], []>} : vector<8x16xf32>, vector<16x512xf32>, vector<8x512xf32> -> vector<8x512xf32>
    %c0_193 = arith.constant 0 : index
    %c0_194 = arith.constant 0 : index
    %379 = vector.load %arg11[%c0_193, %c0_194] : memref<8x256xf32, #tpu.memory_space<vmem>>, vector<8x128xf32>
    %c0_195 = arith.constant 0 : index
    %c0_196 = arith.constant 0 : index
    %380 = vector.load %arg2[%c0_195, %c0_196] : memref<128x512xf32, #tpu.memory_space<vmem>>, vector<128x512xf32>
    %cst_197 = arith.constant dense<0.000000e+00> : vector<8x512xf32>
    %381 = tpu.matmul %379, %380, %cst_197 {dimension_numbers = #tpu.dot_dimension_numbers<[1], [0], [0], [1], [0, 0, 1, 1], [], []>} : vector<8x128xf32>, vector<128x512xf32>, vector<8x512xf32> -> vector<8x512xf32>
    %382 = arith.addf %378, %381 : vector<8x512xf32>
    %c0_198 = arith.constant 0 : index
    %c0_199 = arith.constant 0 : index
    %383 = vector.load %arg3[%c0_198, %c0_199] : memref<1x512xf32, #tpu.memory_space<vmem>>, vector<1x512xf32>
    %384 = vector.broadcast %383 : vector<1x512xf32> to vector<8x512xf32>
    %385 = arith.addf %382, %384 : vector<8x512xf32>
    %386 = vector.extract_strided_slice %385 {offsets = [0, 0], sizes = [8, 128], strides = [1, 1]} : vector<8x512xf32> to vector<8x128xf32>
    %387 = arith.negf %386 : vector<8x128xf32>
    %388 = math.exp %387 : vector<8x128xf32>
    %cst_200 = arith.constant 1.000000e+00 : f32
    %389 = vector.broadcast %cst_200 : f32 to vector<8x128xf32>
    %390 = arith.addf %389, %388 : vector<8x128xf32>
    %391 = arith.divf %389, %390 : vector<8x128xf32>
    %392 = vector.extract_strided_slice %385 {offsets = [0, 128], sizes = [8, 128], strides = [1, 1]} : vector<8x512xf32> to vector<8x128xf32>
    %393 = arith.negf %392 : vector<8x128xf32>
    %394 = math.exp %393 : vector<8x128xf32>
    %cst_201 = arith.constant 1.000000e+00 : f32
    %395 = vector.broadcast %cst_201 : f32 to vector<8x128xf32>
    %396 = arith.addf %395, %394 : vector<8x128xf32>
    %397 = arith.divf %395, %396 : vector<8x128xf32>
    %398 = vector.extract_strided_slice %385 {offsets = [0, 256], sizes = [8, 128], strides = [1, 1]} : vector<8x512xf32> to vector<8x128xf32>
    %399 = math.tanh %398 : vector<8x128xf32>
    %400 = vector.extract_strided_slice %385 {offsets = [0, 384], sizes = [8, 128], strides = [1, 1]} : vector<8x512xf32> to vector<8x128xf32>
    %401 = arith.negf %400 : vector<8x128xf32>
    %402 = math.exp %401 : vector<8x128xf32>
    %cst_202 = arith.constant 1.000000e+00 : f32
    %403 = vector.broadcast %cst_202 : f32 to vector<8x128xf32>
    %404 = arith.addf %403, %402 : vector<8x128xf32>
    %405 = arith.divf %403, %404 : vector<8x128xf32>
    %c0_203 = arith.constant 0 : index
    %c0_204 = arith.constant 0 : index
    %406 = vector.load %arg12[%c0_203, %c0_204] : memref<8x256xf32, #tpu.memory_space<vmem>>, vector<8x128xf32>
    %407 = arith.mulf %397, %406 : vector<8x128xf32>
    %408 = arith.mulf %391, %399 : vector<8x128xf32>
    %409 = arith.addf %407, %408 : vector<8x128xf32>
    %410 = math.tanh %409 : vector<8x128xf32>
    %411 = arith.mulf %405, %410 : vector<8x128xf32>
    %c0_205 = arith.constant 0 : index
    %c0_206 = arith.constant 0 : index
    %412 = vector.load %arg12[%c0_205, %c0_206] : memref<8x256xf32, #tpu.memory_space<vmem>>, vector<8x128xf32>
    tpu.vector_store %arg12[%c0_205, %c0_206], %409 {strides = array<i32>} : memref<8x256xf32, #tpu.memory_space<vmem>>, vector<8x128xf32>,
    %c0_207 = arith.constant 0 : index
    %c0_208 = arith.constant 0 : index
    %413 = vector.load %arg11[%c0_207, %c0_208] : memref<8x256xf32, #tpu.memory_space<vmem>>, vector<8x128xf32>
    tpu.vector_store %arg11[%c0_207, %c0_208], %411 {strides = array<i32>} : memref<8x256xf32, #tpu.memory_space<vmem>>, vector<8x128xf32>,
    %c0_209 = arith.constant 0 : index
    %c0_210 = arith.constant 0 : index
    %414 = vector.load %arg11[%c0_209, %c0_210] : memref<8x256xf32, #tpu.memory_space<vmem>>, vector<8x256xf32>
    %c0_211 = arith.constant 0 : index
    %c0_212 = arith.constant 0 : index
    %415 = vector.load %arg4[%c0_211, %c0_212] : memref<256x512xf32, #tpu.memory_space<vmem>>, vector<256x512xf32>
    %cst_213 = arith.constant dense<0.000000e+00> : vector<8x512xf32>
    %416 = tpu.matmul %414, %415, %cst_213 {dimension_numbers = #tpu.dot_dimension_numbers<[1], [0], [0], [1], [0, 0, 1, 1], [], []>} : vector<8x256xf32>, vector<256x512xf32>, vector<8x512xf32> -> vector<8x512xf32>
    %c0_214 = arith.constant 0 : index
    %c0_215 = arith.constant 0 : index
    %417 = vector.load %arg5[%c0_214, %c0_215] : memref<1x512xf32, #tpu.memory_space<vmem>>, vector<1x512xf32>
    %418 = vector.broadcast %417 : vector<1x512xf32> to vector<8x512xf32>
    %419 = arith.addf %416, %418 : vector<8x512xf32>
    %420 = vector.extract_strided_slice %419 {offsets = [0, 0], sizes = [8, 128], strides = [1, 1]} : vector<8x512xf32> to vector<8x128xf32>
    %421 = arith.negf %420 : vector<8x128xf32>
    %422 = math.exp %421 : vector<8x128xf32>
    %cst_216 = arith.constant 1.000000e+00 : f32
    %423 = vector.broadcast %cst_216 : f32 to vector<8x128xf32>
    %424 = arith.addf %423, %422 : vector<8x128xf32>
    %425 = arith.divf %423, %424 : vector<8x128xf32>
    %426 = vector.extract_strided_slice %419 {offsets = [0, 128], sizes = [8, 128], strides = [1, 1]} : vector<8x512xf32> to vector<8x128xf32>
    %427 = arith.negf %426 : vector<8x128xf32>
    %428 = math.exp %427 : vector<8x128xf32>
    %cst_217 = arith.constant 1.000000e+00 : f32
    %429 = vector.broadcast %cst_217 : f32 to vector<8x128xf32>
    %430 = arith.addf %429, %428 : vector<8x128xf32>
    %431 = arith.divf %429, %430 : vector<8x128xf32>
    %432 = vector.extract_strided_slice %419 {offsets = [0, 256], sizes = [8, 128], strides = [1, 1]} : vector<8x512xf32> to vector<8x128xf32>
    %433 = math.tanh %432 : vector<8x128xf32>
    %434 = vector.extract_strided_slice %419 {offsets = [0, 384], sizes = [8, 128], strides = [1, 1]} : vector<8x512xf32> to vector<8x128xf32>
    %435 = arith.negf %434 : vector<8x128xf32>
    %436 = math.exp %435 : vector<8x128xf32>
    %cst_218 = arith.constant 1.000000e+00 : f32
    %437 = vector.broadcast %cst_218 : f32 to vector<8x128xf32>
    %438 = arith.addf %437, %436 : vector<8x128xf32>
    %439 = arith.divf %437, %438 : vector<8x128xf32>
    %c0_219 = arith.constant 0 : index
    %c128_220 = arith.constant 128 : index
    %440 = vector.load %arg12[%c0_219, %c128_220] : memref<8x256xf32, #tpu.memory_space<vmem>>, vector<8x128xf32>
    %441 = arith.mulf %431, %440 : vector<8x128xf32>
    %442 = arith.mulf %425, %433 : vector<8x128xf32>
    %443 = arith.addf %441, %442 : vector<8x128xf32>
    %444 = math.tanh %443 : vector<8x128xf32>
    %445 = arith.mulf %439, %444 : vector<8x128xf32>
    %c0_221 = arith.constant 0 : index
    %c128_222 = arith.constant 128 : index
    %446 = vector.load %arg12[%c0_221, %c128_222] : memref<8x256xf32, #tpu.memory_space<vmem>>, vector<8x128xf32>
    tpu.vector_store %arg12[%c0_221, %c128_222], %443 {strides = array<i32>} : memref<8x256xf32, #tpu.memory_space<vmem>>, vector<8x128xf32>,
    %c0_223 = arith.constant 0 : index
    %c128_224 = arith.constant 128 : index
    %447 = vector.load %arg11[%c0_223, %c128_224] : memref<8x256xf32, #tpu.memory_space<vmem>>, vector<8x128xf32>
    tpu.vector_store %arg11[%c0_223, %c128_224], %445 {strides = array<i32>} : memref<8x256xf32, #tpu.memory_space<vmem>>, vector<8x128xf32>,
    %c6_i32 = arith.constant 6 : i32
    %448 = arith.index_cast %c6_i32 : i32 to index
    %c0_225 = arith.constant 0 : index
    %c0_226 = arith.constant 0 : index
    %449 = vector.load %arg0[%448, %c0_225, %c0_226] : memref<8x8x16xf32, #tpu.memory_space<vmem>>, vector<1x8x16xf32>
    %450 = vector.shape_cast %449 : vector<1x8x16xf32> to vector<8x16xf32>
    %c0_227 = arith.constant 0 : index
    %c0_228 = arith.constant 0 : index
    %451 = vector.load %arg1[%c0_227, %c0_228] : memref<16x512xf32, #tpu.memory_space<vmem>>, vector<16x512xf32>
    %cst_229 = arith.constant dense<0.000000e+00> : vector<8x512xf32>
    %452 = tpu.matmul %450, %451, %cst_229 {dimension_numbers = #tpu.dot_dimension_numbers<[1], [0], [0], [1], [0, 0, 1, 1], [], []>} : vector<8x16xf32>, vector<16x512xf32>, vector<8x512xf32> -> vector<8x512xf32>
    %c0_230 = arith.constant 0 : index
    %c0_231 = arith.constant 0 : index
    %453 = vector.load %arg11[%c0_230, %c0_231] : memref<8x256xf32, #tpu.memory_space<vmem>>, vector<8x128xf32>
    %c0_232 = arith.constant 0 : index
    %c0_233 = arith.constant 0 : index
    %454 = vector.load %arg2[%c0_232, %c0_233] : memref<128x512xf32, #tpu.memory_space<vmem>>, vector<128x512xf32>
    %cst_234 = arith.constant dense<0.000000e+00> : vector<8x512xf32>
    %455 = tpu.matmul %453, %454, %cst_234 {dimension_numbers = #tpu.dot_dimension_numbers<[1], [0], [0], [1], [0, 0, 1, 1], [], []>} : vector<8x128xf32>, vector<128x512xf32>, vector<8x512xf32> -> vector<8x512xf32>
    %456 = arith.addf %452, %455 : vector<8x512xf32>
    %c0_235 = arith.constant 0 : index
    %c0_236 = arith.constant 0 : index
    %457 = vector.load %arg3[%c0_235, %c0_236] : memref<1x512xf32, #tpu.memory_space<vmem>>, vector<1x512xf32>
    %458 = vector.broadcast %457 : vector<1x512xf32> to vector<8x512xf32>
    %459 = arith.addf %456, %458 : vector<8x512xf32>
    %460 = vector.extract_strided_slice %459 {offsets = [0, 0], sizes = [8, 128], strides = [1, 1]} : vector<8x512xf32> to vector<8x128xf32>
    %461 = arith.negf %460 : vector<8x128xf32>
    %462 = math.exp %461 : vector<8x128xf32>
    %cst_237 = arith.constant 1.000000e+00 : f32
    %463 = vector.broadcast %cst_237 : f32 to vector<8x128xf32>
    %464 = arith.addf %463, %462 : vector<8x128xf32>
    %465 = arith.divf %463, %464 : vector<8x128xf32>
    %466 = vector.extract_strided_slice %459 {offsets = [0, 128], sizes = [8, 128], strides = [1, 1]} : vector<8x512xf32> to vector<8x128xf32>
    %467 = arith.negf %466 : vector<8x128xf32>
    %468 = math.exp %467 : vector<8x128xf32>
    %cst_238 = arith.constant 1.000000e+00 : f32
    %469 = vector.broadcast %cst_238 : f32 to vector<8x128xf32>
    %470 = arith.addf %469, %468 : vector<8x128xf32>
    %471 = arith.divf %469, %470 : vector<8x128xf32>
    %472 = vector.extract_strided_slice %459 {offsets = [0, 256], sizes = [8, 128], strides = [1, 1]} : vector<8x512xf32> to vector<8x128xf32>
    %473 = math.tanh %472 : vector<8x128xf32>
    %474 = vector.extract_strided_slice %459 {offsets = [0, 384], sizes = [8, 128], strides = [1, 1]} : vector<8x512xf32> to vector<8x128xf32>
    %475 = arith.negf %474 : vector<8x128xf32>
    %476 = math.exp %475 : vector<8x128xf32>
    %cst_239 = arith.constant 1.000000e+00 : f32
    %477 = vector.broadcast %cst_239 : f32 to vector<8x128xf32>
    %478 = arith.addf %477, %476 : vector<8x128xf32>
    %479 = arith.divf %477, %478 : vector<8x128xf32>
    %c0_240 = arith.constant 0 : index
    %c0_241 = arith.constant 0 : index
    %480 = vector.load %arg12[%c0_240, %c0_241] : memref<8x256xf32, #tpu.memory_space<vmem>>, vector<8x128xf32>
    %481 = arith.mulf %471, %480 : vector<8x128xf32>
    %482 = arith.mulf %465, %473 : vector<8x128xf32>
    %483 = arith.addf %481, %482 : vector<8x128xf32>
    %484 = math.tanh %483 : vector<8x128xf32>
    %485 = arith.mulf %479, %484 : vector<8x128xf32>
    %c0_242 = arith.constant 0 : index
    %c0_243 = arith.constant 0 : index
    %486 = vector.load %arg12[%c0_242, %c0_243] : memref<8x256xf32, #tpu.memory_space<vmem>>, vector<8x128xf32>
    tpu.vector_store %arg12[%c0_242, %c0_243], %483 {strides = array<i32>} : memref<8x256xf32, #tpu.memory_space<vmem>>, vector<8x128xf32>,
    %c0_244 = arith.constant 0 : index
    %c0_245 = arith.constant 0 : index
    %487 = vector.load %arg11[%c0_244, %c0_245] : memref<8x256xf32, #tpu.memory_space<vmem>>, vector<8x128xf32>
    tpu.vector_store %arg11[%c0_244, %c0_245], %485 {strides = array<i32>} : memref<8x256xf32, #tpu.memory_space<vmem>>, vector<8x128xf32>,
    %c0_246 = arith.constant 0 : index
    %c0_247 = arith.constant 0 : index
    %488 = vector.load %arg11[%c0_246, %c0_247] : memref<8x256xf32, #tpu.memory_space<vmem>>, vector<8x256xf32>
    %c0_248 = arith.constant 0 : index
    %c0_249 = arith.constant 0 : index
    %489 = vector.load %arg4[%c0_248, %c0_249] : memref<256x512xf32, #tpu.memory_space<vmem>>, vector<256x512xf32>
    %cst_250 = arith.constant dense<0.000000e+00> : vector<8x512xf32>
    %490 = tpu.matmul %488, %489, %cst_250 {dimension_numbers = #tpu.dot_dimension_numbers<[1], [0], [0], [1], [0, 0, 1, 1], [], []>} : vector<8x256xf32>, vector<256x512xf32>, vector<8x512xf32> -> vector<8x512xf32>
    %c0_251 = arith.constant 0 : index
    %c0_252 = arith.constant 0 : index
    %491 = vector.load %arg5[%c0_251, %c0_252] : memref<1x512xf32, #tpu.memory_space<vmem>>, vector<1x512xf32>
    %492 = vector.broadcast %491 : vector<1x512xf32> to vector<8x512xf32>
    %493 = arith.addf %490, %492 : vector<8x512xf32>
    %494 = vector.extract_strided_slice %493 {offsets = [0, 0], sizes = [8, 128], strides = [1, 1]} : vector<8x512xf32> to vector<8x128xf32>
    %495 = arith.negf %494 : vector<8x128xf32>
    %496 = math.exp %495 : vector<8x128xf32>
    %cst_253 = arith.constant 1.000000e+00 : f32
    %497 = vector.broadcast %cst_253 : f32 to vector<8x128xf32>
    %498 = arith.addf %497, %496 : vector<8x128xf32>
    %499 = arith.divf %497, %498 : vector<8x128xf32>
    %500 = vector.extract_strided_slice %493 {offsets = [0, 128], sizes = [8, 128], strides = [1, 1]} : vector<8x512xf32> to vector<8x128xf32>
    %501 = arith.negf %500 : vector<8x128xf32>
    %502 = math.exp %501 : vector<8x128xf32>
    %cst_254 = arith.constant 1.000000e+00 : f32
    %503 = vector.broadcast %cst_254 : f32 to vector<8x128xf32>
    %504 = arith.addf %503, %502 : vector<8x128xf32>
    %505 = arith.divf %503, %504 : vector<8x128xf32>
    %506 = vector.extract_strided_slice %493 {offsets = [0, 256], sizes = [8, 128], strides = [1, 1]} : vector<8x512xf32> to vector<8x128xf32>
    %507 = math.tanh %506 : vector<8x128xf32>
    %508 = vector.extract_strided_slice %493 {offsets = [0, 384], sizes = [8, 128], strides = [1, 1]} : vector<8x512xf32> to vector<8x128xf32>
    %509 = arith.negf %508 : vector<8x128xf32>
    %510 = math.exp %509 : vector<8x128xf32>
    %cst_255 = arith.constant 1.000000e+00 : f32
    %511 = vector.broadcast %cst_255 : f32 to vector<8x128xf32>
    %512 = arith.addf %511, %510 : vector<8x128xf32>
    %513 = arith.divf %511, %512 : vector<8x128xf32>
    %c0_256 = arith.constant 0 : index
    %c128_257 = arith.constant 128 : index
    %514 = vector.load %arg12[%c0_256, %c128_257] : memref<8x256xf32, #tpu.memory_space<vmem>>, vector<8x128xf32>
    %515 = arith.mulf %505, %514 : vector<8x128xf32>
    %516 = arith.mulf %499, %507 : vector<8x128xf32>
    %517 = arith.addf %515, %516 : vector<8x128xf32>
    %518 = math.tanh %517 : vector<8x128xf32>
    %519 = arith.mulf %513, %518 : vector<8x128xf32>
    %c0_258 = arith.constant 0 : index
    %c128_259 = arith.constant 128 : index
    %520 = vector.load %arg12[%c0_258, %c128_259] : memref<8x256xf32, #tpu.memory_space<vmem>>, vector<8x128xf32>
    tpu.vector_store %arg12[%c0_258, %c128_259], %517 {strides = array<i32>} : memref<8x256xf32, #tpu.memory_space<vmem>>, vector<8x128xf32>,
    %c0_260 = arith.constant 0 : index
    %c128_261 = arith.constant 128 : index
    %521 = vector.load %arg11[%c0_260, %c128_261] : memref<8x256xf32, #tpu.memory_space<vmem>>, vector<8x128xf32>
    tpu.vector_store %arg11[%c0_260, %c128_261], %519 {strides = array<i32>} : memref<8x256xf32, #tpu.memory_space<vmem>>, vector<8x128xf32>,
    %c7_i32 = arith.constant 7 : i32
    %522 = arith.index_cast %c7_i32 : i32 to index
    %c0_262 = arith.constant 0 : index
    %c0_263 = arith.constant 0 : index
    %523 = vector.load %arg0[%522, %c0_262, %c0_263] : memref<8x8x16xf32, #tpu.memory_space<vmem>>, vector<1x8x16xf32>
    %524 = vector.shape_cast %523 : vector<1x8x16xf32> to vector<8x16xf32>
    %c0_264 = arith.constant 0 : index
    %c0_265 = arith.constant 0 : index
    %525 = vector.load %arg1[%c0_264, %c0_265] : memref<16x512xf32, #tpu.memory_space<vmem>>, vector<16x512xf32>
    %cst_266 = arith.constant dense<0.000000e+00> : vector<8x512xf32>
    %526 = tpu.matmul %524, %525, %cst_266 {dimension_numbers = #tpu.dot_dimension_numbers<[1], [0], [0], [1], [0, 0, 1, 1], [], []>} : vector<8x16xf32>, vector<16x512xf32>, vector<8x512xf32> -> vector<8x512xf32>
    %c0_267 = arith.constant 0 : index
    %c0_268 = arith.constant 0 : index
    %527 = vector.load %arg11[%c0_267, %c0_268] : memref<8x256xf32, #tpu.memory_space<vmem>>, vector<8x128xf32>
    %c0_269 = arith.constant 0 : index
    %c0_270 = arith.constant 0 : index
    %528 = vector.load %arg2[%c0_269, %c0_270] : memref<128x512xf32, #tpu.memory_space<vmem>>, vector<128x512xf32>
    %cst_271 = arith.constant dense<0.000000e+00> : vector<8x512xf32>
    %529 = tpu.matmul %527, %528, %cst_271 {dimension_numbers = #tpu.dot_dimension_numbers<[1], [0], [0], [1], [0, 0, 1, 1], [], []>} : vector<8x128xf32>, vector<128x512xf32>, vector<8x512xf32> -> vector<8x512xf32>
    %530 = arith.addf %526, %529 : vector<8x512xf32>
    %c0_272 = arith.constant 0 : index
    %c0_273 = arith.constant 0 : index
    %531 = vector.load %arg3[%c0_272, %c0_273] : memref<1x512xf32, #tpu.memory_space<vmem>>, vector<1x512xf32>
    %532 = vector.broadcast %531 : vector<1x512xf32> to vector<8x512xf32>
    %533 = arith.addf %530, %532 : vector<8x512xf32>
    %534 = vector.extract_strided_slice %533 {offsets = [0, 0], sizes = [8, 128], strides = [1, 1]} : vector<8x512xf32> to vector<8x128xf32>
    %535 = arith.negf %534 : vector<8x128xf32>
    %536 = math.exp %535 : vector<8x128xf32>
    %cst_274 = arith.constant 1.000000e+00 : f32
    %537 = vector.broadcast %cst_274 : f32 to vector<8x128xf32>
    %538 = arith.addf %537, %536 : vector<8x128xf32>
    %539 = arith.divf %537, %538 : vector<8x128xf32>
    %540 = vector.extract_strided_slice %533 {offsets = [0, 128], sizes = [8, 128], strides = [1, 1]} : vector<8x512xf32> to vector<8x128xf32>
    %541 = arith.negf %540 : vector<8x128xf32>
    %542 = math.exp %541 : vector<8x128xf32>
    %cst_275 = arith.constant 1.000000e+00 : f32
    %543 = vector.broadcast %cst_275 : f32 to vector<8x128xf32>
    %544 = arith.addf %543, %542 : vector<8x128xf32>
    %545 = arith.divf %543, %544 : vector<8x128xf32>
    %546 = vector.extract_strided_slice %533 {offsets = [0, 256], sizes = [8, 128], strides = [1, 1]} : vector<8x512xf32> to vector<8x128xf32>
    %547 = math.tanh %546 : vector<8x128xf32>
    %548 = vector.extract_strided_slice %533 {offsets = [0, 384], sizes = [8, 128], strides = [1, 1]} : vector<8x512xf32> to vector<8x128xf32>
    %549 = arith.negf %548 : vector<8x128xf32>
    %550 = math.exp %549 : vector<8x128xf32>
    %cst_276 = arith.constant 1.000000e+00 : f32
    %551 = vector.broadcast %cst_276 : f32 to vector<8x128xf32>
    %552 = arith.addf %551, %550 : vector<8x128xf32>
    %553 = arith.divf %551, %552 : vector<8x128xf32>
    %c0_277 = arith.constant 0 : index
    %c0_278 = arith.constant 0 : index
    %554 = vector.load %arg12[%c0_277, %c0_278] : memref<8x256xf32, #tpu.memory_space<vmem>>, vector<8x128xf32>
    %555 = arith.mulf %545, %554 : vector<8x128xf32>
    %556 = arith.mulf %539, %547 : vector<8x128xf32>
    %557 = arith.addf %555, %556 : vector<8x128xf32>
    %558 = math.tanh %557 : vector<8x128xf32>
    %559 = arith.mulf %553, %558 : vector<8x128xf32>
    %c0_279 = arith.constant 0 : index
    %c0_280 = arith.constant 0 : index
    %560 = vector.load %arg12[%c0_279, %c0_280] : memref<8x256xf32, #tpu.memory_space<vmem>>, vector<8x128xf32>
    tpu.vector_store %arg12[%c0_279, %c0_280], %557 {strides = array<i32>} : memref<8x256xf32, #tpu.memory_space<vmem>>, vector<8x128xf32>,
    %c0_281 = arith.constant 0 : index
    %c0_282 = arith.constant 0 : index
    %561 = vector.load %arg11[%c0_281, %c0_282] : memref<8x256xf32, #tpu.memory_space<vmem>>, vector<8x128xf32>
    tpu.vector_store %arg11[%c0_281, %c0_282], %559 {strides = array<i32>} : memref<8x256xf32, #tpu.memory_space<vmem>>, vector<8x128xf32>,
    %c0_283 = arith.constant 0 : index
    %c0_284 = arith.constant 0 : index
    %562 = vector.load %arg11[%c0_283, %c0_284] : memref<8x256xf32, #tpu.memory_space<vmem>>, vector<8x256xf32>
    %c0_285 = arith.constant 0 : index
    %c0_286 = arith.constant 0 : index
    %563 = vector.load %arg4[%c0_285, %c0_286] : memref<256x512xf32, #tpu.memory_space<vmem>>, vector<256x512xf32>
    %cst_287 = arith.constant dense<0.000000e+00> : vector<8x512xf32>
    %564 = tpu.matmul %562, %563, %cst_287 {dimension_numbers = #tpu.dot_dimension_numbers<[1], [0], [0], [1], [0, 0, 1, 1], [], []>} : vector<8x256xf32>, vector<256x512xf32>, vector<8x512xf32> -> vector<8x512xf32>
    %c0_288 = arith.constant 0 : index
    %c0_289 = arith.constant 0 : index
    %565 = vector.load %arg5[%c0_288, %c0_289] : memref<1x512xf32, #tpu.memory_space<vmem>>, vector<1x512xf32>
    %566 = vector.broadcast %565 : vector<1x512xf32> to vector<8x512xf32>
    %567 = arith.addf %564, %566 : vector<8x512xf32>
    %568 = vector.extract_strided_slice %567 {offsets = [0, 0], sizes = [8, 128], strides = [1, 1]} : vector<8x512xf32> to vector<8x128xf32>
    %569 = arith.negf %568 : vector<8x128xf32>
    %570 = math.exp %569 : vector<8x128xf32>
    %cst_290 = arith.constant 1.000000e+00 : f32
    %571 = vector.broadcast %cst_290 : f32 to vector<8x128xf32>
    %572 = arith.addf %571, %570 : vector<8x128xf32>
    %573 = arith.divf %571, %572 : vector<8x128xf32>
    %574 = vector.extract_strided_slice %567 {offsets = [0, 128], sizes = [8, 128], strides = [1, 1]} : vector<8x512xf32> to vector<8x128xf32>
    %575 = arith.negf %574 : vector<8x128xf32>
    %576 = math.exp %575 : vector<8x128xf32>
    %cst_291 = arith.constant 1.000000e+00 : f32
    %577 = vector.broadcast %cst_291 : f32 to vector<8x128xf32>
    %578 = arith.addf %577, %576 : vector<8x128xf32>
    %579 = arith.divf %577, %578 : vector<8x128xf32>
    %580 = vector.extract_strided_slice %567 {offsets = [0, 256], sizes = [8, 128], strides = [1, 1]} : vector<8x512xf32> to vector<8x128xf32>
    %581 = math.tanh %580 : vector<8x128xf32>
    %582 = vector.extract_strided_slice %567 {offsets = [0, 384], sizes = [8, 128], strides = [1, 1]} : vector<8x512xf32> to vector<8x128xf32>
    %583 = arith.negf %582 : vector<8x128xf32>
    %584 = math.exp %583 : vector<8x128xf32>
    %cst_292 = arith.constant 1.000000e+00 : f32
    %585 = vector.broadcast %cst_292 : f32 to vector<8x128xf32>
    %586 = arith.addf %585, %584 : vector<8x128xf32>
    %587 = arith.divf %585, %586 : vector<8x128xf32>
    %c0_293 = arith.constant 0 : index
    %c128_294 = arith.constant 128 : index
    %588 = vector.load %arg12[%c0_293, %c128_294] : memref<8x256xf32, #tpu.memory_space<vmem>>, vector<8x128xf32>
    %589 = arith.mulf %579, %588 : vector<8x128xf32>
    %590 = arith.mulf %573, %581 : vector<8x128xf32>
    %591 = arith.addf %589, %590 : vector<8x128xf32>
    %592 = math.tanh %591 : vector<8x128xf32>
    %593 = arith.mulf %587, %592 : vector<8x128xf32>
    %c0_295 = arith.constant 0 : index
    %c128_296 = arith.constant 128 : index
    %594 = vector.load %arg12[%c0_295, %c128_296] : memref<8x256xf32, #tpu.memory_space<vmem>>, vector<8x128xf32>
    tpu.vector_store %arg12[%c0_295, %c128_296], %591 {strides = array<i32>} : memref<8x256xf32, #tpu.memory_space<vmem>>, vector<8x128xf32>,
    %c0_297 = arith.constant 0 : index
    %c128_298 = arith.constant 128 : index
    %595 = vector.load %arg11[%c0_297, %c128_298] : memref<8x256xf32, #tpu.memory_space<vmem>>, vector<8x128xf32>
    tpu.vector_store %arg11[%c0_297, %c128_298], %593 {strides = array<i32>} : memref<8x256xf32, #tpu.memory_space<vmem>>, vector<8x128xf32>,
    %c8_i32 = arith.constant 8 : i32
    %c0_299 = arith.constant 0 : index
    %c0_300 = arith.constant 0 : index
    %596 = vector.load %arg11[%c0_299, %c0_300] : memref<8x256xf32, #tpu.memory_space<vmem>>, vector<8x256xf32>
    %c0_301 = arith.constant 0 : index
    %c0_302 = arith.constant 0 : index
    %597 = vector.load %arg6[%c0_301, %c0_302] : memref<256x1024xf32, #tpu.memory_space<vmem>>, vector<256x1024xf32>
    %cst_303 = arith.constant dense<0.000000e+00> : vector<8x1024xf32>
    %598 = tpu.matmul %596, %597, %cst_303 {dimension_numbers = #tpu.dot_dimension_numbers<[1], [0], [0], [1], [0, 0, 1, 1], [], []>} : vector<8x256xf32>, vector<256x1024xf32>, vector<8x1024xf32> -> vector<8x1024xf32>
    %c0_304 = arith.constant 0 : index
    %c0_305 = arith.constant 0 : index
    %599 = vector.load %arg7[%c0_304, %c0_305] : memref<1x1024xf32, #tpu.memory_space<vmem>>, vector<1x1024xf32>
    %600 = vector.broadcast %599 : vector<1x1024xf32> to vector<8x1024xf32>
    %601 = arith.addf %598, %600 : vector<8x1024xf32>
    %cst_306 = arith.constant 0.000000e+00 : f32
    %602 = vector.broadcast %cst_306 : f32 to vector<8x1024xf32>
    %603 = arith.cmpf oge, %601, %602 : vector<8x1024xf32>
    %cst_307 = arith.constant 0.00999999977 : f32
    %604 = vector.broadcast %cst_307 : f32 to vector<8x1024xf32>
    %605 = arith.mulf %604, %601 : vector<8x1024xf32>
    %606 = arith.select %603, %601, %605 : vector<8x1024xi1>, vector<8x1024xf32>
    %c0_308 = arith.constant 0 : index
    %c0_309 = arith.constant 0 : index
    %607 = vector.load %arg8[%c0_308, %c0_309] : memref<1024x128xf32, #tpu.memory_space<vmem>>, vector<1024x128xf32>
    %cst_310 = arith.constant dense<0.000000e+00> : vector<8x128xf32>
    %608 = tpu.matmul %606, %607, %cst_310 {dimension_numbers = #tpu.dot_dimension_numbers<[1], [0], [0], [1], [0, 0, 1, 1], [], []>} : vector<8x1024xf32>, vector<1024x128xf32>, vector<8x128xf32> -> vector<8x128xf32>
    %c0_311 = arith.constant 0 : index
    %c0_312 = arith.constant 0 : index
    %609 = vector.load %arg9[%c0_311, %c0_312] : memref<1x128xf32, #tpu.memory_space<vmem>>, vector<1x128xf32>
    %610 = vector.broadcast %609 : vector<1x128xf32> to vector<8x128xf32>
    %611 = arith.addf %608, %610 : vector<8x128xf32>
    %c0_313 = arith.constant 0 : index
    %c0_314 = arith.constant 0 : index
    %612 = vector.load %arg10[%c0_313, %c0_314] : memref<8x128xf32, #tpu.memory_space<vmem>>, vector<8x128xf32>
    tpu.vector_store %arg10[%c0_313, %c0_314], %611 {strides = array<i32>} : memref<8x128xf32, #tpu.memory_space<vmem>>, vector<8x128xf32>,
    return
  }
}

</mosaic_0001>

<bundles_post_ra>
// kernel: predictor_recurrent_forward.1
= control target key start
LH: loop header
LB: loop body
LE: loop exit
PB: predicated region body
PF: predicated region fallthrough
CT: control target
= control target key end

     0   :  { %v6773_v63 = vmov 0.0   ;;  %vm193_vm0 = vcmask 130048   ;;  %s13897_s2 = inlined_call_operand.vmem [shape: f32[128,512], index: 2, kind: input, shape index: {}]   ;;  %s13898_s1 = inlined_call_operand.vmem [shape: f32[16,512], index: 1, kind: input, shape index: {}]   ;;  %s13899_s4 = inlined_call_operand.vmem [shape: f32[256,512], index: 4, kind: input, shape index: {}]   ;;  %s13900_s0 = inlined_call_operand.vmem [shape: f32[8,8,16], index: 0, kind: input, shape index: {}]   ;;  %s13901_s3 = inlined_call_operand.vmem [shape: f32[1,512], index: 3, kind: input, shape index: {}]   ;;  %s13902_s5 = inlined_call_operand.vmem [shape: f32[1,512], index: 5, kind: input, shape index: {}]   ;;  %s13903_s6 = inlined_call_operand.vmem [shape: f32[256,1024], index: 6, kind: input, shape index: {}]   ;;  %s13904_s8 = inlined_call_operand.vmem [shape: f32[1024,128], index: 8, kind: input, shape index: {}]   ;;  %s13905_s9 = inlined_call_operand.vmem [shape: f32[1,128], index: 9, kind: input, shape index: {}]   ;;  %s13906_s7 = inlined_call_operand.vmem [shape: f32[1,1024], index: 7, kind: input, shape index: {}]   ;;  %s13907_s10 = inlined_call_operand.vmem [shape: f32[8,128], index: 10, kind: output, shape index: {}]  }
   0x1   :  { %v109_v0 = vld [vmem:[%s13897_s2 + $0x1e0] sm:$0xff]  ;;  %v6835_v1 = vld [vmem:[%s13897_s2 + $0x1e8] sm:$0xff]  ;;  %v6840_v2 = vld [vmem:[%s13897_s2 + $0x1f8] sm:$0xff] }
   0x2   :  { %113 = vmatpush.msra.mxu0 %v109_v0  ;;  %133 = vmatpush.msra.mxu1 %v6835_v1  ;;  %v105_v3 = vld [vmem:[%s13897_s2 + $0x1c0] sm:$0xff]  ;;  %v6849_v4 = vld [vmem:[%s13897_s2 + $0x1c8] sm:$0xff]  ;;  %v6854_v5 = vld [vmem:[%s13897_s2 + $0x1d8] sm:$0xff] }
   0x3   :  { %173 = vmatpush.msra.mxu3 %v6840_v2  ;;  %v101_v6 = vld [vmem:[%s13897_s2 + $0x1a0] sm:$0xff]  ;;  %v6863_v7 = vld [vmem:[%s13897_s2 + $0x1a8] sm:$0xff]  ;;  %v6869_v8 = vld [vmem:[%s13897_s2 + $0x1b8] sm:$0xff] }
   0x4   :  { %114 = vmatpush.msra.mxu0 %v105_v3  ;;  %134 = vmatpush.msra.mxu1 %v6849_v4  ;;  %v97_v9 = vld [vmem:[%s13897_s2 + $0x180] sm:$0xff]  ;;  %v6878_v10 = vld [vmem:[%s13897_s2 + $0x188] sm:$0xff]  ;;  %v111_v11 = vld [vmem:[%s13897_s2 + $0x1f0] sm:$0xff] }
   0x5   :  { %174 = vmatpush.msra.mxu3 %v6854_v5  ;;  %v6887_v12 = vld [vmem:[%s13897_s2 + $0x198] sm:$0xff]  ;;  %v107_v13 = vld [vmem:[%s13897_s2 + $0x1d0] sm:$0xff]  ;;  %153 = vmatpush.msra.mxu2 %v111_v11  ;;  %v93_v14 = vld [vmem:[%s13897_s2 + $0x160] sm:$0xff] }
   0x6   :  { %115 = vmatpush.msra.mxu0 %v101_v6  ;;  %135 = vmatpush.msra.mxu1 %v6863_v7  ;;  %v6899_v15 = vld [vmem:[%s13897_s2 + $0x168] sm:$0xff]  ;;  %v6905_v16 = vld [vmem:[%s13897_s2 + $0x178] sm:$0xff]  ;;  %v103_v17 = vld [vmem:[%s13897_s2 + $0x1b0] sm:$0xff] }
   0x7   :  { %175 = vmatpush.msra.mxu3 %v6869_v8  ;;  %154 = vmatpush.msra.mxu2 %v107_v13  ;;  %v89_v18 = vld [vmem:[%s13897_s2 + $0x140] sm:$0xff]  ;;  %v6917_v19 = vld [vmem:[%s13897_s2 + $0x148] sm:$0xff]  ;;  %v6923_v20 = vld [vmem:[%s13897_s2 + $0x158] sm:$0xff] }
   0x8   :  { %116 = vmatpush.msra.mxu0 %v97_v9  ;;  %136 = vmatpush.msra.mxu1 %v6878_v10  ;;  %v99_v21 = vld [vmem:[%s13897_s2 + $0x190] sm:$0xff]  ;;  %v85_v22 = vld [vmem:[%s13897_s2 + $0x120] sm:$0xff]  ;;  %v6935_v23 = vld [vmem:[%s13897_s2 + $0x128] sm:$0xff] }
   0x9   :  { %176 = vmatpush.msra.mxu3 %v6887_v12  ;;  %155 = vmatpush.msra.mxu2 %v103_v17  ;;  %v6941_v24 = vld [vmem:[%s13897_s2 + $0x138] sm:$0xff]  ;;  %v95_v25 = vld [vmem:[%s13897_s2 + $0x170] sm:$0xff]  ;;  %v81_v26 = vld [vmem:[%s13897_s2 + $0x100] sm:$0xff] }
   0xa   :  { %117 = vmatpush.msra.mxu0 %v93_v14  ;;  %137 = vmatpush.msra.mxu1 %v6899_v15  ;;  %v6953_v27 = vld [vmem:[%s13897_s2 + $0x108] sm:$0xff]  ;;  %v6959_v28 = vld [vmem:[%s13897_s2 + $0x118] sm:$0xff]  ;;  %v91_v29 = vld [vmem:[%s13897_s2 + $0x150] sm:$0xff] }
   0xb   :  { %177 = vmatpush.msra.mxu3 %v6905_v16  ;;  %156 = vmatpush.msra.mxu2 %v99_v21  ;;  %v77_v30 = vld [vmem:[%s13897_s2 + $0xe0] sm:$0xff]  ;;  %v6971_v31 = vld [vmem:[%s13897_s2 + $0xe8] sm:$0xff]  ;;  %v6977_v32 = vld [vmem:[%s13897_s2 + $0xf8] sm:$0xff] }
   0xc   :  { %118 = vmatpush.msra.mxu0 %v89_v18  ;;  %138 = vmatpush.msra.mxu1 %v6917_v19  ;;  %v87_v33 = vld [vmem:[%s13897_s2 + $0x130] sm:$0xff]  ;;  %v73_v34 = vld [vmem:[%s13897_s2 + $0xc0] sm:$0xff]  ;;  %v6989_v35 = vld [vmem:[%s13897_s2 + $0xc8] sm:$0xff] }
   0xd   :  { %178 = vmatpush.msra.mxu3 %v6923_v20  ;;  %157 = vmatpush.msra.mxu2 %v95_v25  ;;  %v6995_v36 = vld [vmem:[%s13897_s2 + $0xd8] sm:$0xff]  ;;  %v83_v37 = vld [vmem:[%s13897_s2 + $0x110] sm:$0xff]  ;;  %v69_v38 = vld [vmem:[%s13897_s2 + $0xa0] sm:$0xff] }
   0xe   :  { %119 = vmatpush.msra.mxu0 %v85_v22  ;;  %139 = vmatpush.msra.mxu1 %v6935_v23  ;;  %v7007_v39 = vld [vmem:[%s13897_s2 + $0xa8] sm:$0xff]  ;;  %v7013_v40 = vld [vmem:[%s13897_s2 + $0xb8] sm:$0xff]  ;;  %v79_v41 = vld [vmem:[%s13897_s2 + $0xf0] sm:$0xff] }
   0xf   :  { %179 = vmatpush.msra.mxu3 %v6941_v24  ;;  %158 = vmatpush.msra.mxu2 %v91_v29  ;;  %v65_v42 = vld [vmem:[%s13897_s2 + $0x80] sm:$0xff]  ;;  %v7025_v43 = vld [vmem:[%s13897_s2 + $0x88] sm:$0xff]  ;;  %v7031_v44 = vld [vmem:[%s13897_s2 + $0x98] sm:$0xff] }
  0x10   :  { %120 = vmatpush.msra.mxu0 %v81_v26  ;;  %140 = vmatpush.msra.mxu1 %v6953_v27  ;;  %v75_v45 = vld [vmem:[%s13897_s2 + $0xd0] sm:$0xff]  ;;  %v61_v46 = vld [vmem:[%s13897_s2 + $0x60] sm:$0xff]  ;;  %v7043_v47 = vld [vmem:[%s13897_s2 + $0x68] sm:$0xff] }
  0x11   :  { %180 = vmatpush.msra.mxu3 %v6959_v28  ;;  %159 = vmatpush.msra.mxu2 %v87_v33  ;;  %v7049_v48 = vld [vmem:[%s13897_s2 + $0x78] sm:$0xff]  ;;  %v71_v49 = vld [vmem:[%s13897_s2 + $0xb0] sm:$0xff]  ;;  %v57_v50 = vld [vmem:[%s13897_s2 + $0x40] sm:$0xff] }
  0x12   :  { %121 = vmatpush.msra.mxu0 %v77_v30  ;;  %141 = vmatpush.msra.mxu1 %v6971_v31  ;;  %v7061_v51 = vld [vmem:[%s13897_s2 + $0x48] sm:$0xff]  ;;  %v7067_v52 = vld [vmem:[%s13897_s2 + $0x58] sm:$0xff]  ;;  %v7072_v53 = vld [vmem:[%s13897_s2 + $0x90] sm:$0xff] }
  0x13   :  { %181 = vmatpush.msra.mxu3 %v6977_v32  ;;  %160 = vmatpush.msra.mxu2 %v83_v37  ;;  %v53_v54 = vld [vmem:[%s13897_s2 + $0x20] sm:$0xff]  ;;  %v7081_v55 = vld [vmem:[%s13897_s2 + $0x28] sm:$0xff]  ;;  %v7087_v56 = vld [vmem:[%s13897_s2 + $0x38] sm:$0xff] }
  0x14   :  { %122 = vmatpush.msra.mxu0 %v73_v34  ;;  %142 = vmatpush.msra.mxu1 %v6989_v35  ;;  %v7092_v57 = vld [vmem:[%s13897_s2 + $0x70] sm:$0xff]  ;;  %v49_v58 = vld [vmem:[%s13897_s2] sm:$0xff]  ;;  %v7102_v59 = vld [vmem:[%s13897_s2 + $0x8] sm:$0xff] }
  0x15   :  { %182 = vmatpush.msra.mxu3 %v6995_v36  ;;  %161 = vmatpush.msra.mxu2 %v79_v41  ;;  %v7108_v60 = vld [vmem:[%s13897_s2 + $0x18] sm:$0xff]  ;;  %v7116_v61 = vld [vmem:[%s13897_s2 + $0x50] sm:$0xff]  ;;  %v44_v62 = vld [vmem:[%s13898_s1 + $0x20] sm:$0xff] }
  0x16   :  { %123 = vmatpush.msra.mxu0 %v69_v38  ;;  %143 = vmatpush.msra.mxu1 %v7007_v39  ;;  %v7126_v0 = vld [vmem:[%s13898_s1 + $0x28] sm:$0xff]  ;;  %v7131_v3 = vld [vmem:[%s13898_s1 + $0x38] sm:$0xff]  ;;  %v7138_v6 = vld [vmem:[%s13897_s2 + $0x30] sm:$0xff] }
  0x17   :  { %183 = vmatpush.msra.mxu3 %v7013_v40  ;;  %162 = vmatpush.msra.mxu2 %v75_v45  ;;  %v7143_v9 = vld [vmem:[%s13898_s1] sm:$0xff]  ;;  %v7149_v11 = vld [vmem:[%s13898_s1 + $0x8] sm:$0xff]  ;;  %v7154_v13 = vld [vmem:[%s13898_s1 + $0x18] sm:$0xff] }
  0x18   :  { %124 = vmatpush.msra.mxu0 %v65_v42  ;;  %144 = vmatpush.msra.mxu1 %v7025_v43  ;;  %v7161_v14 = vld [vmem:[%s13897_s2 + $0x10] sm:$0xff]  ;;  %v7166_v17 = vld [vmem:[%s13899_s4 + $0x3e0] sm:$0xff]  ;;  %v7173_v18 = vld [vmem:[%s13899_s4 + $0x3e8] sm:$0xff] }
  0x19   :  { %184 = vmatpush.msra.mxu3 %v7031_v44  ;;  %163 = vmatpush.msra.mxu2 %v71_v49  ;;  %v39_v21 = vld [vmem:[%s13900_s0] sm:$0xff]  ;;  %v7183_v22 = vld [vmem:[%s13898_s1 + $0x30] sm:$0xff]  ;;  %v7204_v29 = vld [vmem:[%s13899_s4 + $0x3c8] sm:$0xff] }
  0x1a   :  { %125 = vmatpush.msra.mxu0 %v61_v46  ;;  %145 = vmatpush.msra.mxu1 %v7043_v47  ;;  %v7191_v25 = vld [vmem:[%s13898_s1 + $0x10] sm:$0xff]  ;;  %v7197_v26 = vld [vmem:[%s13899_s4 + $0x3c0] sm:$0xff]  ;;  %v420_v34 = vld [vmem:[%s13899_s4 + $0x1e8] sm:$0xff] }
  0x1b   :  { %185 = vmatpush.msra.mxu3 %v7049_v48  ;;  %164 = vmatpush.msra.mxu2 %v7072_v53  ;;  %v419_v30 = vld [vmem:[%s13899_s4 + $0x1e0] sm:$0xff]  ;;  %v7224_v37 = vld [vmem:[%s13899_s4 + $0x3a8] sm:$0xff] }
  0x1c   :  { %126 = vmatpush.msra.mxu0 %v57_v50  ;;  %146 = vmatpush.msra.mxu1 %v7061_v51  ;;  %v7214_v33 = vld [vmem:[%s13899_s4 + $0x3a0] sm:$0xff]  ;;  %v416_v42 = vld [vmem:[%s13899_s4 + $0x1c8] sm:$0xff] }
  0x1d   :  { %186 = vmatpush.msra.mxu3 %v7067_v52  ;;  %165 = vmatpush.msra.mxu2 %v7092_v57  ;;  %v415_v38 = vld [vmem:[%s13899_s4 + $0x1c0] sm:$0xff]  ;;  %v7242_v45 = vld [vmem:[%s13899_s4 + $0x388] sm:$0xff] }
  0x1e   :  { %127 = vmatpush.msra.mxu0 %v53_v54  ;;  %147 = vmatpush.msra.mxu1 %v7081_v55  ;;  %v7233_v41 = vld [vmem:[%s13899_s4 + $0x380] sm:$0xff]  ;;  %v468_v50 = vld [vmem:[%s13899_s4 + $0x368] sm:$0xff] }
  0x1f   :  { %187 = vmatpush.msra.mxu3 %v7087_v56  ;;  %166 = vmatpush.msra.mxu2 %v7116_v61  ;;  %v467_v46 = vld [vmem:[%s13899_s4 + $0x360] sm:$0xff]  ;;  %v412_v54 = vld [vmem:[%s13899_s4 + $0x1a8] sm:$0xff] }
  0x20   :  { %128 = vmatpush.msra.mxu0 %v49_v58  ;;  %148 = vmatpush.msra.mxu1 %v7102_v59  ;;  %v411_v49 = vld [vmem:[%s13899_s4 + $0x1a0] sm:$0xff] }
  0x21   :  { %188 = vmatpush.msra.mxu3 %v7108_v60  ;;  %129 = vmatmul.f32.vlgmr.msra.gmra.mxu0 %v6773_v63  ;;  %v463_v58 = vld [vmem:[%s13899_s4 + $0x340] sm:$0xff] }
  0x22   :  { %149 = vmatmul.f32.vlgmr.msra.gmra.mxu1 %v6773_v63  ;;  %189 = vmatmul.f32.vlgmr.msra.gmra.mxu3 %v6773_v63 }
  0x23   :  { %211 = vmatpush.msrb.mxu0 %v44_v62  ;;  %231 = vmatpush.msrb.mxu1 %v7126_v0  ;;  %v407_v62 = vld [vmem:[%s13899_s4 + $0x180] sm:$0xff] }
  0x24   :  { %271 = vmatpush.msrb.mxu3 %v7131_v3  ;;  %167 = vmatpush.msra.mxu2 %v7138_v6 }
  0x25   :  { %212 = vmatpush.msrb.mxu0 %v7143_v9  ;;  %232 = vmatpush.msrb.mxu1 %v7149_v11 }
  0x26   :  { %272 = vmatpush.msrb.mxu3 %v7154_v13  ;;  %168 = vmatpush.msra.mxu2 %v7161_v14 }
  0x27   :  { %517 = vmatpush.msra.mxu1 %v7166_v17  ;;  %169 = vmatmul.f32.vlgmr.msra.gmra.mxu2 %v6773_v63 }
  0x28   :  { %557 = vmatpush.msra.mxu3 %v7173_v18  ;;  %251 = vmatpush.msrb.mxu2 %v7183_v22 }
  0x29   :  { %6428 = vmatmul.msk.f32.vlgmr.msrb.gmra.mxu0 %vm193_vm0, %v39_v21  ;;  %518 = vmatpush.msra.mxu1 %v7197_v26 }
  0x2a   :  { %6429 = vmatmul.msk.f32.vlgmr.msrb.gmra.mxu1 %vm193_vm0, %v39_v21  ;;  %6431 = vmatmul.msk.f32.vlgmr.msrb.gmra.mxu3 %vm193_vm0, %v39_v21 }
  0x2b   :  { %252 = vmatpush.msrb.mxu2 %v7191_v25  ;;  %558 = vmatpush.msra.mxu3 %v7204_v29 }
  0x2c   :  { %497 = vmatpush.msra.mxu0 %v419_v30  ;;  %519 = vmatpush.msra.mxu1 %v7214_v33  ;;  %v464_v30 = vld [vmem:[%s13899_s4 + $0x348] sm:$0xff] }
  0x2d   :  { %537 = vmatpush.msra.mxu2 %v420_v34  ;;  %559 = vmatpush.msra.mxu3 %v7224_v37  ;;  %v459_v34 = vld [vmem:[%s13899_s4 + $0x320] sm:$0xff] }
  0x2e   :  { %498 = vmatpush.msra.mxu0 %v415_v38  ;;  %520 = vmatpush.msra.mxu1 %v7233_v41  ;;  %v460_v38 = vld [vmem:[%s13899_s4 + $0x328] sm:$0xff] }
  0x2f   :  { %538 = vmatpush.msra.mxu2 %v416_v42  ;;  %560 = vmatpush.msra.mxu3 %v7242_v45  ;;  %v455_v42 = vld [vmem:[%s13899_s4 + $0x300] sm:$0xff] }
  0x30   :  { %6430 = vmatmul.msk.f32.vlgmr.msrb.gmra.mxu2 %vm193_vm0, %v39_v21  ;;  %521 = vmatpush.msra.mxu1 %v467_v46  ;;  %v408_v21 = vld [vmem:[%s13899_s4 + $0x188] sm:$0xff] }
  0x31   :  { %499 = vmatpush.msra.mxu0 %v411_v49  ;;  %561 = vmatpush.msra.mxu3 %v468_v50  ;;  %v456_v46 = vld [vmem:[%s13899_s4 + $0x308] sm:$0xff]  ;;  %v451_v49 = vld [vmem:[%s13899_s4 + $0x2e0] sm:$0xff] }
  0x32   :  { %539 = vmatpush.msra.mxu2 %v412_v54  ;;  %522 = vmatpush.msra.mxu1 %v463_v58  ;;  %v452_v50 = vld [vmem:[%s13899_s4 + $0x2e8] sm:$0xff]  ;;  %v447_v54 = vld [vmem:[%s13899_s4 + $0x2c0] sm:$0xff] }
  0x33   :  { %500 = vmatpush.msra.mxu0 %v407_v62  ;;  %562 = vmatpush.msra.mxu3 %v464_v30  ;;  %v448_v58 = vld [vmem:[%s13899_s4 + $0x2c8] sm:$0xff]  ;;  %v443_v62 = vld [vmem:[%s13899_s4 + $0x2a0] sm:$0xff] }
  0x34   :  { %540 = vmatpush.msra.mxu2 %v408_v21  ;;  %523 = vmatpush.msra.mxu1 %v459_v34  ;;  %v444_v30 = vld [vmem:[%s13899_s4 + $0x2a8] sm:$0xff]  ;;  %v439_v21 = vld [vmem:[%s13899_s4 + $0x280] sm:$0xff] }
  0x35   :  { %563 = vmatpush.msra.mxu3 %v460_v38  ;;  %v440_v34 = vld [vmem:[%s13899_s4 + $0x288] sm:$0xff]  ;;  %v435_v38 = vld [vmem:[%s13899_s4 + $0x260] sm:$0xff] }
  0x36   :  { %524 = vmatpush.msra.mxu1 %v455_v42  ;;  %v436_v42 = vld [vmem:[%s13899_s4 + $0x268] sm:$0xff] }
  0x37   :  { %564 = vmatpush.msra.mxu3 %v456_v46  ;;  %v431_v46 = vld [vmem:[%s13899_s4 + $0x240] sm:$0xff] }
  0x38   :  { %525 = vmatpush.msra.mxu1 %v451_v49  ;;  %v432_v49 = vld [vmem:[%s13899_s4 + $0x248] sm:$0xff] }
  0x39   :  { %565 = vmatpush.msra.mxu3 %v452_v50  ;;  %v427_v50 = vld [vmem:[%s13899_s4 + $0x220] sm:$0xff] }
  0x3a   :  { %526 = vmatpush.msra.mxu1 %v447_v54  ;;  %v428_v54 = vld [vmem:[%s13899_s4 + $0x228] sm:$0xff] }
  0x3b   :  { %566 = vmatpush.msra.mxu3 %v448_v58  ;;  %v423_v58 = vld [vmem:[%s13899_s4 + $0x200] sm:$0xff] }
  0x3c   :  { %527 = vmatpush.msra.mxu1 %v443_v62  ;;  %v424_v62 = vld [vmem:[%s13899_s4 + $0x208] sm:$0xff] }
  0x3d   :  { %567 = vmatpush.msra.mxu3 %v444_v30  ;;  %v485_v30 = vld [vmem:[%s13899_s4 + $0x3f0] sm:$0xff] }
  0x3e   :  { %528 = vmatpush.msra.mxu1 %v439_v21  ;;  %v486_v21 = vld [vmem:[%s13899_s4 + $0x3f8] sm:$0xff] }
  0x3f   :  { %568 = vmatpush.msra.mxu3 %v440_v34  ;;  %v481_v34 = vld [vmem:[%s13899_s4 + $0x3d0] sm:$0xff] }
  0x40   :  { %529 = vmatpush.msra.mxu1 %v435_v38  ;;  %v482_v38 = vld [vmem:[%s13899_s4 + $0x3d8] sm:$0xff] }
  0x41   :  { %569 = vmatpush.msra.mxu3 %v436_v42  ;;  %v477_v42 = vld [vmem:[%s13899_s4 + $0x3b0] sm:$0xff] }
  0x42   :  { %530 = vmatpush.msra.mxu1 %v431_v46  ;;  %v478_v46 = vld [vmem:[%s13899_s4 + $0x3b8] sm:$0xff] }
  0x43   :  { %570 = vmatpush.msra.mxu3 %v432_v49  ;;  %v473_v49 = vld [vmem:[%s13899_s4 + $0x390] sm:$0xff] }
  0x44   :  { %531 = vmatpush.msra.mxu1 %v427_v50  ;;  %v474_v50 = vld [vmem:[%s13899_s4 + $0x398] sm:$0xff] }
  0x45   :  { %571 = vmatpush.msra.mxu3 %v428_v54  ;;  %v403_v54 = vld [vmem:[%s13899_s4 + $0x160] sm:$0xff] }
  0x46   :  { %532 = vmatpush.msra.mxu1 %v423_v58  ;;  %v404_v58 = vld [vmem:[%s13899_s4 + $0x168] sm:$0xff]  ;;  %501 = vmatpush.msra.mxu0 %v403_v54  ;;  %v462_v54 = vld [vmem:[%s13899_s4 + $0x338] sm:$0xff] }
  0x47   :  { %572 = vmatpush.msra.mxu3 %v424_v62  ;;  %533 = vmatmul.f32.vlgmr.msra.gmra.mxu1 %v6773_v63  ;;  %v469_v62 = vld [vmem:[%s13899_s4 + $0x370] sm:$0xff] }
  0x48   :  { %597 = vmatpush.msrb.mxu1 %v485_v30  ;;  %573 = vmatmul.f32.vlgmr.msra.gmra.mxu3 %v6773_v63  ;;  %v470_v30 = vld [vmem:[%s13899_s4 + $0x378] sm:$0xff] }
  0x49   :  { %637 = vmatpush.msrb.mxu3 %v486_v21  ;;  %541 = vmatpush.msra.mxu2 %v404_v58  ;;  %v399_v21 = vld [vmem:[%s13899_s4 + $0x140] sm:$0xff] }
  0x4a   :  { %598 = vmatpush.msrb.mxu1 %v481_v34  ;;  %v400_v34 = vld [vmem:[%s13899_s4 + $0x148] sm:$0xff]  ;;  %502 = vmatpush.msra.mxu0 %v399_v21  ;;  %v391_v58 = vld [vmem:[%s13899_s4 + $0x100] sm:$0xff]  ;;  %v458_v21 = vld [vmem:[%s13899_s4 + $0x318] sm:$0xff] }
  0x4b   :  { %638 = vmatpush.msrb.mxu3 %v482_v38  ;;  %v465_v38 = vld [vmem:[%s13899_s4 + $0x350] sm:$0xff]  ;;  %542 = vmatpush.msra.mxu2 %v400_v34  ;;  %v387_v34 = vld [vmem:[%s13899_s4 + $0xe0] sm:$0xff] }
  0x4c   :  { %599 = vmatpush.msrb.mxu1 %v477_v42  ;;  %v466_v42 = vld [vmem:[%s13899_s4 + $0x358] sm:$0xff] }
  0x4d   :  { %639 = vmatpush.msrb.mxu3 %v478_v46  ;;  %v395_v46 = vld [vmem:[%s13899_s4 + $0x120] sm:$0xff] }
  0x4e   :  { %600 = vmatpush.msrb.mxu1 %v473_v49  ;;  %v396_v49 = vld [vmem:[%s13899_s4 + $0x128] sm:$0xff]  ;;  %503 = vmatpush.msra.mxu0 %v395_v46  ;;  %v454_v46 = vld [vmem:[%s13899_s4 + $0x2f8] sm:$0xff] }
  0x4f   :  { %640 = vmatpush.msrb.mxu3 %v474_v50  ;;  %v461_v50 = vld [vmem:[%s13899_s4 + $0x330] sm:$0xff]  ;;  %543 = vmatpush.msra.mxu2 %v396_v49  ;;  %v383_v49 = vld [vmem:[%s13899_s4 + $0xc0] sm:$0xff] }
  0x50   :  { %601 = vmatpush.msrb.mxu1 %v469_v62  ;;  %v392_v62 = vld [vmem:[%s13899_s4 + $0x108] sm:$0xff]  ;;  %504 = vmatpush.msra.mxu0 %v391_v58  ;;  %v450_v58 = vld [vmem:[%s13899_s4 + $0x2d8] sm:$0xff] }
  0x51   :  { %641 = vmatpush.msrb.mxu3 %v470_v30  ;;  %v457_v30 = vld [vmem:[%s13899_s4 + $0x310] sm:$0xff]  ;;  %544 = vmatpush.msra.mxu2 %v392_v62  ;;  %v379_v62 = vld [vmem:[%s13899_s4 + $0xa0] sm:$0xff] }
  0x52   :  { %602 = vmatpush.msrb.mxu1 %v465_v38  ;;  %v388_v38 = vld [vmem:[%s13899_s4 + $0xe8] sm:$0xff]  ;;  %505 = vmatpush.msra.mxu0 %v387_v34  ;;  %v446_v34 = vld [vmem:[%s13899_s4 + $0x2b8] sm:$0xff] }
  0x53   :  { %642 = vmatpush.msrb.mxu3 %v466_v42  ;;  %v453_v42 = vld [vmem:[%s13899_s4 + $0x2f0] sm:$0xff]  ;;  %545 = vmatpush.msra.mxu2 %v388_v38  ;;  %v375_v38 = vld [vmem:[%s13899_s4 + $0x80] sm:$0xff] }
  0x54   :  { %603 = vmatpush.msrb.mxu1 %v461_v50  ;;  %v384_v50 = vld [vmem:[%s13899_s4 + $0xc8] sm:$0xff]  ;;  %506 = vmatpush.msra.mxu0 %v383_v49  ;;  %v442_v49 = vld [vmem:[%s13899_s4 + $0x298] sm:$0xff] }
  0x55   :  { %643 = vmatpush.msrb.mxu3 %v462_v54  ;;  %v449_v54 = vld [vmem:[%s13899_s4 + $0x2d0] sm:$0xff]  ;;  %546 = vmatpush.msra.mxu2 %v384_v50  ;;  %v371_v50 = vld [vmem:[%s13899_s4 + $0x60] sm:$0xff] }
  0x56   :  { %604 = vmatpush.msrb.mxu1 %v457_v30  ;;  %v380_v30 = vld [vmem:[%s13899_s4 + $0xa8] sm:$0xff]  ;;  %507 = vmatpush.msra.mxu0 %v379_v62  ;;  %v438_v62 = vld [vmem:[%s13899_s4 + $0x278] sm:$0xff] }
  0x57   :  { %644 = vmatpush.msrb.mxu3 %v458_v21  ;;  %v445_v21 = vld [vmem:[%s13899_s4 + $0x2b0] sm:$0xff]  ;;  %547 = vmatpush.msra.mxu2 %v380_v30  ;;  %v367_v30 = vld [vmem:[%s13899_s4 + $0x40] sm:$0xff] }
  0x58   :  { %605 = vmatpush.msrb.mxu1 %v453_v42  ;;  %v376_v42 = vld [vmem:[%s13899_s4 + $0x88] sm:$0xff]  ;;  %508 = vmatpush.msra.mxu0 %v375_v38  ;;  %v434_v38 = vld [vmem:[%s13899_s4 + $0x258] sm:$0xff] }
  0x59   :  { %645 = vmatpush.msrb.mxu3 %v454_v46  ;;  %v441_v46 = vld [vmem:[%s13899_s4 + $0x290] sm:$0xff]  ;;  %548 = vmatpush.msra.mxu2 %v376_v42  ;;  %v363_v42 = vld [vmem:[%s13899_s4 + $0x20] sm:$0xff] }
  0x5a   :  { %606 = vmatpush.msrb.mxu1 %v449_v54  ;;  %v372_v54 = vld [vmem:[%s13899_s4 + $0x68] sm:$0xff]  ;;  %509 = vmatpush.msra.mxu0 %v371_v50  ;;  %v430_v50 = vld [vmem:[%s13899_s4 + $0x238] sm:$0xff] }
  0x5b   :  { %646 = vmatpush.msrb.mxu3 %v450_v58  ;;  %v437_v58 = vld [vmem:[%s13899_s4 + $0x270] sm:$0xff]  ;;  %549 = vmatpush.msra.mxu2 %v372_v54  ;;  %v359_v54 = vld [vmem:[%s13899_s4] sm:$0xff] }
  0x5c   :  { %607 = vmatpush.msrb.mxu1 %v445_v21  ;;  %v368_v21 = vld [vmem:[%s13899_s4 + $0x48] sm:$0xff]  ;;  %510 = vmatpush.msra.mxu0 %v367_v30  ;;  %v426_v30 = vld [vmem:[%s13899_s4 + $0x218] sm:$0xff] }
  0x5d   :  { %647 = vmatpush.msrb.mxu3 %v446_v34  ;;  %v433_v34 = vld [vmem:[%s13899_s4 + $0x250] sm:$0xff]  ;;  %550 = vmatpush.msra.mxu2 %v368_v21 }
  0x5e   :  { %608 = vmatpush.msrb.mxu1 %v441_v46  ;;  %v364_v46 = vld [vmem:[%s13899_s4 + $0x28] sm:$0xff]  ;;  %511 = vmatpush.msra.mxu0 %v363_v42  ;;  %v421_v21 = vld [vmem:[%s13899_s4 + $0x1f0] sm:$0xff]  ;;  %v418_v42 = vld [vmem:[%s13899_s4 + $0x1d8] sm:$0xff] }
  0x5f   :  { %648 = vmatpush.msrb.mxu3 %v442_v49  ;;  %v429_v49 = vld [vmem:[%s13899_s4 + $0x230] sm:$0xff]  ;;  %551 = vmatpush.msra.mxu2 %v364_v46 }
  0x60   :  { %609 = vmatpush.msrb.mxu1 %v437_v58  ;;  %v360_v58 = vld [vmem:[%s13899_s4 + $0x8] sm:$0xff]  ;;  %512 = vmatpush.msra.mxu0 %v359_v54  ;;  %v413_v46 = vld [vmem:[%s13899_s4 + $0x1b0] sm:$0xff] }
  0x61   :  { %649 = vmatpush.msrb.mxu3 %v438_v62  ;;  %v425_v62 = vld [vmem:[%s13899_s4 + $0x210] sm:$0xff]  ;;  %552 = vmatpush.msra.mxu2 %v360_v58  ;;  %v398_v58 = vld [vmem:[%s13899_s4 + $0x138] sm:$0xff] }
  0x62   :  { %610 = vmatpush.msrb.mxu1 %v433_v34  ;;  %v422_v34 = vld [vmem:[%s13899_s4 + $0x1f8] sm:$0xff]  ;;  %577 = vmatpush.msrb.mxu0 %v421_v21  ;;  %v389_v21 = vld [vmem:[%s13899_s4 + $0xf0] sm:$0xff] }
  0x63   :  { %650 = vmatpush.msrb.mxu3 %v434_v38  ;;  %617 = vmatpush.msrb.mxu2 %v422_v34  ;;  %v417_v38 = vld [vmem:[%s13899_s4 + $0x1d0] sm:$0xff]  ;;  %v390_v34 = vld [vmem:[%s13899_s4 + $0xf8] sm:$0xff] }
  0x64   :  { %611 = vmatpush.msrb.mxu1 %v429_v49  ;;  %578 = vmatpush.msrb.mxu0 %v417_v38  ;;  %v414_v49 = vld [vmem:[%s13899_s4 + $0x1b8] sm:$0xff] }
  0x65   :  { %651 = vmatpush.msrb.mxu3 %v430_v50  ;;  %618 = vmatpush.msrb.mxu2 %v418_v42 }
  0x66   :  { %612 = vmatpush.msrb.mxu1 %v425_v62  ;;  %579 = vmatpush.msrb.mxu0 %v413_v46  ;;  %v386_v46 = vld [vmem:[%s13899_s4 + $0xd8] sm:$0xff] }
  0x67   :  { %652 = vmatpush.msrb.mxu3 %v426_v30  ;;  %619 = vmatpush.msrb.mxu2 %v414_v49 }
  0x68   :  { %818 = vmatpush.msra.mxu1 %v6835_v1  ;;  %v409_v1 = vld [vmem:[%s13899_s4 + $0x190] sm:$0xff]  ;;  %653 = vmatmul.f32.vlgmr.msrb.gmra.mxu3 %v6773_v63 }
  0x69   :  { %858 = vmatpush.msra.mxu3 %v6840_v2  ;;  %v410_v2 = vld [vmem:[%s13899_s4 + $0x198] sm:$0xff]  ;;  %580 = vmatpush.msrb.mxu0 %v409_v1 }
  0x6a   :  { %819 = vmatpush.msra.mxu1 %v6849_v4  ;;  %620 = vmatpush.msrb.mxu2 %v410_v2  ;;  %v405_v4 = vld [vmem:[%s13899_s4 + $0x170] sm:$0xff] }
  0x6b   :  { %859 = vmatpush.msra.mxu3 %v6854_v5  ;;  %v406_v5 = vld [vmem:[%s13899_s4 + $0x178] sm:$0xff]  ;;  %581 = vmatpush.msrb.mxu0 %v405_v4  ;;  %v377_v4 = vld [vmem:[%s13899_s4 + $0x90] sm:$0xff] }
  0x6c   :  { %820 = vmatpush.msra.mxu1 %v6863_v7  ;;  %621 = vmatpush.msrb.mxu2 %v406_v5  ;;  %v401_v7 = vld [vmem:[%s13899_s4 + $0x150] sm:$0xff]  ;;  %v378_v5 = vld [vmem:[%s13899_s4 + $0x98] sm:$0xff] }
  0x6d   :  { %860 = vmatpush.msra.mxu3 %v6869_v8  ;;  %v402_v8 = vld [vmem:[%s13899_s4 + $0x158] sm:$0xff]  ;;  %582 = vmatpush.msrb.mxu0 %v401_v7 }
  0x6e   :  { %821 = vmatpush.msra.mxu1 %v6878_v10  ;;  %v7551_v10 = vld [vmem:[%s13901_s3] sm:$0xf]  ;;  %622 = vmatpush.msrb.mxu2 %v402_v8  ;;  %v374_v7 = vld [vmem:[%s13899_s4 + $0x78] sm:$0xff] }
  0x6f   :  { %861 = vmatpush.msra.mxu3 %v6887_v12  ;;  %v397_v12 = vld [vmem:[%s13899_s4 + $0x130] sm:$0xff]  ;;  %v279_v30 = vperm.slane %v7551_v10, 0  ;;  %613 = vmatmul.f32.vlgmr.msrb.gmra.mxu1 %v6773_v63 }
  0x70   :  { %822 = vmatpush.msra.mxu1 %v6899_v15  ;;  %583 = vmatpush.msrb.mxu0 %v397_v12  ;;  %v393_v15 = vld [vmem:[%s13899_s4 + $0x110] sm:$0xff] }
  0x71   :  { %862 = vmatpush.msra.mxu3 %v6905_v16  ;;  %623 = vmatpush.msrb.mxu2 %v398_v58  ;;  %v394_v16 = vld [vmem:[%s13899_s4 + $0x118] sm:$0xff] }
  0x72   :  { %823 = vmatpush.msra.mxu1 %v6917_v19  ;;  %584 = vmatpush.msrb.mxu0 %v393_v15 }
  0x73   :  { %863 = vmatpush.msra.mxu3 %v6923_v20  ;;  %v280_v20 = vperm.slane %v7551_v10, 1  ;;  %624 = vmatpush.msrb.mxu2 %v394_v16 }
  0x74   :  { %824 = vmatpush.msra.mxu1 %v6935_v23  ;;  %585 = vmatpush.msrb.mxu0 %v389_v21 }
  0x75   :  { %864 = vmatpush.msra.mxu3 %v6941_v24  ;;  %625 = vmatpush.msrb.mxu2 %v390_v34  ;;  %v385_v24 = vld [vmem:[%s13899_s4 + $0xd0] sm:$0xff] }
  0x76   :  { %825 = vmatpush.msra.mxu1 %v6953_v27  ;;  %586 = vmatpush.msrb.mxu0 %v385_v24  ;;  %v381_v27 = vld [vmem:[%s13899_s4 + $0xb0] sm:$0xff] }
  0x77   :  { %865 = vmatpush.msra.mxu3 %v6959_v28  ;;  %626 = vmatpush.msrb.mxu2 %v386_v46  ;;  %v382_v28 = vld [vmem:[%s13899_s4 + $0xb8] sm:$0xff] }
  0x78   :  { %826 = vmatpush.msra.mxu1 %v6971_v31  ;;  %587 = vmatpush.msrb.mxu0 %v381_v27 }
  0x79   :  { %866 = vmatpush.msra.mxu3 %v6977_v32  ;;  %v282_v32 = vperm.slane %v7551_v10, 3  ;;  %627 = vmatpush.msrb.mxu2 %v382_v28 }
  0x7a   :  { %827 = vmatpush.msra.mxu1 %v6989_v35  ;;  %588 = vmatpush.msrb.mxu0 %v377_v4 }
  0x7b   :  { %867 = vmatpush.msra.mxu3 %v6995_v36  ;;  %628 = vmatpush.msrb.mxu2 %v378_v5  ;;  %v373_v36 = vld [vmem:[%s13899_s4 + $0x70] sm:$0xff] }
  0x7c   :  { %828 = vmatpush.msra.mxu1 %v7007_v39  ;;  %v369_v39 = vld [vmem:[%s13899_s4 + $0x50] sm:$0xff]  ;;  %589 = vmatpush.msrb.mxu0 %v373_v36 }
  0x7d   :  { %868 = vmatpush.msra.mxu3 %v7013_v40  ;;  %v370_v40 = vld [vmem:[%s13899_s4 + $0x58] sm:$0xff]  ;;  %629 = vmatpush.msrb.mxu2 %v374_v7 }
  0x7e   :  { %829 = vmatpush.msra.mxu1 %v7025_v43  ;;  %v365_v43 = vld [vmem:[%s13899_s4 + $0x30] sm:$0xff]  ;;  %590 = vmatpush.msrb.mxu0 %v369_v39 }
  0x7f   :  { %869 = vmatpush.msra.mxu3 %v7031_v44  ;;  %v366_v44 = vld [vmem:[%s13899_s4 + $0x38] sm:$0xff]  ;;  %630 = vmatpush.msrb.mxu2 %v370_v40 }
  0x80   :  { %830 = vmatpush.msra.mxu1 %v7043_v47  ;;  %v361_v47 = vld [vmem:[%s13899_s4 + $0x10] sm:$0xff]  ;;  %591 = vmatpush.msrb.mxu0 %v365_v43 }
  0x81   :  { %870 = vmatpush.msra.mxu3 %v7049_v48  ;;  %v362_v48 = vld [vmem:[%s13899_s4 + $0x18] sm:$0xff]  ;;  %631 = vmatpush.msrb.mxu2 %v366_v44 }
  0x82   :  { %831 = vmatpush.msra.mxu1 %v7061_v51  ;;  %592 = vmatpush.msrb.mxu0 %v361_v47  ;;  %v792_v47 = vld [vmem:[%s13897_s2 + $0x1d0] sm:$0xff] }
  0x83   :  { %871 = vmatpush.msra.mxu3 %v7067_v52  ;;  %632 = vmatpush.msrb.mxu2 %v362_v48  ;;  %v281_v52 = vperm.slane %v7551_v10, 2  ;;  %v786_v48 = vld [vmem:[%s13897_s2 + $0x1a0] sm:$0xff] }
  0x84   :  { %832 = vmatpush.msra.mxu1 %v7081_v55 }
  0x85   :  { %872 = vmatpush.msra.mxu3 %v7087_v56 }
  0x86   :  { %833 = vmatpush.msra.mxu1 %v7102_v59 }
  0x87   :  { %873 = vmatpush.msra.mxu3 %v7108_v60 }
  0x88   :  { %915 = vmatpush.msrb.mxu1 %v7126_v0 }
  0x89   :  { %955 = vmatpush.msrb.mxu3 %v7131_v3 }
  0x8a   :  { %916 = vmatpush.msrb.mxu1 %v7149_v11 }
  0x8b   :  { %956 = vmatpush.msrb.mxu3 %v7154_v13 }
  0x9e   :  { %v130_v50 = vpop.f32.mrf.mxu0 }
  0x9f   :  { %v150_v54 = vpop.f32.mrf.mxu1 }
  0xa5   :  { %v190_v62 = vpop.f32.mrf.mxu3 }
  0xa6   :  { %v214_v19 = vpop.f32.mrf.mxu0 }
  0xa7   :  { %v215_v38 = vadd.f32 %v214_v19, %v130_v50  ;;  %v234_v42 = vpop.f32.mrf.mxu1 }
  0xa8   :  { %v235_v23 = vadd.f32 %v234_v42, %v150_v54 }
  0xa9   :  { %v287_v49 = vadd.f32 %v279_v30, %v215_v38 }
  0xaa   :  { %v288_v1 = vadd.f32 %v280_v20, %v235_v23  ;;  %v170_v50 = vpop.f32.mrf.mxu2 }
  0xab   :  { %v6432_v2 = vmul.f32 -1.442695, %v287_v49 }
  0xac   :  { %v6433_v31 = vmul.f32 -1.442695, %v288_v1 }
  0xad   :  { %6517 = vpow2.f32 %v6432_v2  ;;  %v274_v54 = vpop.f32.mrf.mxu3 }
  0xae   :  { %6519 = vpow2.f32 %v6433_v31  ;;  %v275_v35 = vadd.f32 %v274_v54, %v190_v62 }
  0xb0   :  { %v290_v8 = vadd.f32 %v282_v32, %v275_v35 }
  0xb2   :  { %v6434_v12 = vmul.f32 -1.442695, %v290_v8 }
  0xb3   :  { %v6518_v63 = vpop.eup %6517  ;;  %v254_v62 = vpop.f32.mrf.mxu2 }
  0xb4   :  { %v6520_v58 = vpop.eup %6519  ;;  %v294_v15 = vadd.f32 1.0, %v6518_v63  ;;  %6521 = vpow2.f32 %v6434_v12  ;;  %v255_v51 = vadd.f32 %v254_v62, %v170_v50  ;;  %v794_v63 = vld [vmem:[%s13897_s2 + $0x1e0] sm:$0xff] }
  0xb5   :  { %v313_v16 = vadd.f32 1.0, %v6520_v58  ;;  %v796_v58 = vld [vmem:[%s13897_s2 + $0x1f0] sm:$0xff]  ;;  %v782_v62 = vld [vmem:[%s13897_s2 + $0x180] sm:$0xff] }
  0xb6   :  { %6523 = vrcp.f32 %v294_v15  ;;  %v289_v56 = vadd.f32 %v281_v52, %v255_v51  ;;  %v306_v38 = vand.u32 2147483648, %v294_v15  ;;  %v304_v3 = vand.u32 2147483647, %v294_v15  ;;  %v784_v51 = vld [vmem:[%s13897_s2 + $0x190] sm:$0xff]  ;;  %v778_v52 = vld [vmem:[%s13897_s2 + $0x160] sm:$0xff] }
  0xb7   :  { %6525 = vrcp.f32 %v313_v16  ;;  %v325_v60 = vand.u32 2147483648, %v313_v16  ;;  %v323_v23 = vand.u32 2147483647, %v313_v16  ;;  %vm300_vm3 = vweird.f32 %v294_v15 }
  0xb8   :  { %vm319_vm4 = vweird.f32 %v313_v16  ;;  %v307_v46 = vor.u32 1.1754944e-38, %v306_v38  ;;  %vm305_vm6 = vcmp.eq.f32.partialorder %v304_v3, 8.507059e+37  ;;  %v738_v38 = vld [vmem:[%s13897_s2 + $0x20] sm:$0xff] }
  0xb9   :  { %v326_v1 = vor.u32 1.1754944e-38, %v325_v60  ;;  %vm324_vm8 = vcmp.eq.f32.partialorder %v323_v23, 8.507059e+37  ;;  %v734_v60 = vld [vmem:[%s13897_s2] sm:$0xff] }
  0xba   :  { %v6522_v30 = vpop.eup %6521  ;;  %v1135_v3 = vld [vmem:[%s13899_s4 + $0x2e0] sm:$0xff] }
  0xbb   :  { %v333_v19 = vadd.f32 1.0, %v6522_v30  ;;  %v772_v30 = vld [vmem:[%s13897_s2 + $0x130] sm:$0xff]  ;;  %v1131_v23 = vld [vmem:[%s13899_s4 + $0x2c0] sm:$0xff] }
  0xbc   :  { %v6524_v55 = vpop.eup %6523 }
  0xbd   :  { %v6526_v20 = vpop.eup %6525  ;;  %v296_v21 = vmul.f32 %v6524_v55, %v294_v15  ;;  %6527 = vrcp.f32 %v333_v19  ;;  %vm301_vm1 = vweird.f32 %v6524_v55  ;;  %v345_v7 = vand.u32 2147483648, %v333_v19  ;;  %v790_v15 = vld [vmem:[%s13897_s2 + $0x1c0] sm:$0xff] }
  0xbe   :  { %v315_v10 = vmul.f32 %v6526_v20, %v313_v16  ;;  %6529 = vtanh.f32 %v289_v56  ;;  %vm320_vm2 = vweird.f32 %v6526_v20  ;;  %vm302_vm5 = vmor %vm300_vm3, %vm301_vm1  ;;  %vm339_vm10 = vweird.f32 %v333_v19  ;;  %v788_v16 = vld [vmem:[%s13897_s2 + $0x1b0] sm:$0xff]  ;;  %v762_v56 = vld [vmem:[%s13897_s2 + $0xe0] sm:$0xff] }
  0xbf   :  { %v297_v34 = vsub.f32 1.0, %v296_v21  ;;  %vm321_vm7 = vmor %vm319_vm4, %vm320_vm2  ;;  %v343_v8 = vand.u32 2147483647, %v333_v19  ;;  %v346_v40 = vor.u32 1.1754944e-38, %v345_v7  ;;  %v756_v21 = vld [vmem:[%s13897_s2 + $0xb0] sm:$0xff]  ;;  %v1103_v7 = vld [vmem:[%s13899_s4 + $0x1e0] sm:$0xff] }
  0xc0   :  { %v316_v59 = vsub.f32 1.0, %v315_v10  ;;  %v750_v10 = vld [vmem:[%s13897_s2 + $0x80] sm:$0xff] }
  0xc1   :  { %v298_v0 = vmul.f32 %v6524_v55, %v297_v34  ;;  %vm344_vm12 = vcmp.eq.f32.partialorder %v343_v8, 8.507059e+37  ;;  %v746_v34 = vld [vmem:[%s13897_s2 + $0x60] sm:$0xff]  ;;  %v1104_v8 = vld [vmem:[%s13899_s4 + $0x1e8] sm:$0xff] }
  0xc2   :  { %v317_v42 = vmul.f32 %v6526_v20, %v316_v59  ;;  %v742_v59 = vld [vmem:[%s13897_s2 + $0x40] sm:$0xff] }
  0xc3   :  { %v6528_v11 = vpop.eup %6527  ;;  %v299_v24 = vadd.f32 %v6524_v55, %v298_v0  ;;  %v1140_v0 = vld [vmem:[%s13899_s4 + $0x308] sm:$0xff] }
  0xc4   :  { %v335_v13 = vmul.f32 %v6528_v11, %v333_v19  ;;  %v318_v49 = vadd.f32 %v6526_v20, %v317_v42  ;;  %v6530_v28 = vpop.eup %6529  ;;  %vm340_vm9 = vweird.f32 %v6528_v11  ;;  %v766_v19 = vld [vmem:[%s13897_s2 + $0x100] sm:$0xff]  ;;  %v1136_v42 = vld [vmem:[%s13899_s4 + $0x2e8] sm:$0xff] }
  0xc5   :  { %v303_v27 = vsel %vm302_vm5, %v6524_v55, %v299_v24  ;;  %vm341_vm11 = vmor %vm339_vm10, %vm340_vm9  ;;  %v768_v55 = vld [vmem:[%s13897_s2 + $0x110] sm:$0xff]  ;;  %v1127_v24 = vld [vmem:[%s13899_s4 + $0x2a0] sm:$0xff] }
  0xc6   :  { %v336_v2 = vsub.f32 1.0, %v335_v13  ;;  %v308_v50 = vsel %vm305_vm6, %v307_v46, %v303_v27  ;;  %v322_v31 = vsel %vm321_vm7, %v6526_v20, %v318_v49  ;;  %v764_v20 = vld [vmem:[%s13897_s2 + $0xf0] sm:$0xff]  ;;  %v1128_v13 = vld [vmem:[%s13899_s4 + $0x2a8] sm:$0xff]  ;;  %v7807_v46 = vpop.f32.mrf.mxu1  ;;  %v1123_v49 = vld [vmem:[%s13899_s4 + $0x280] sm:$0xff] }
  0xc7   :  { %v327_v32 = vsel %vm324_vm8, %v326_v1, %v322_v31  ;;  %v351_v4 = vmul.f32 %v6530_v28, %v308_v50  ;;  %v1124_v1 = vld [vmem:[%s13899_s4 + $0x288] sm:$0xff]  ;;  %v1119_v27 = vld [vmem:[%s13899_s4 + $0x260] sm:$0xff] }
  0xc8   :  { %v337_v5 = vmul.f32 %v6528_v11, %v336_v2  ;;  %v350_v54 = vmul.f32 0.0, %v327_v32  ;;  %v1120_v28 = vld [vmem:[%s13899_s4 + $0x268] sm:$0xff]  ;;  %v1115_v2 = vld [vmem:[%s13899_s4 + $0x240] sm:$0xff] }
  0xc9   :  { %v1116_v50 = vld [vmem:[%s13899_s4 + $0x248] sm:$0xff]  ;;  %v1111_v31 = vld [vmem:[%s13899_s4 + $0x220] sm:$0xff] }
  0xca   :  { %v7645_v35 = vadd.f32 %v351_v4, %v350_v54  ;;  %v338_v36 = vadd.f32 %v6528_v11, %v337_v5  ;;  %v1112_v32 = vld [vmem:[%s13899_s4 + $0x228] sm:$0xff]  ;;  %v7836_v4 = vld [vmem:[%s13902_s5] sm:$0xf] }
  0xcb   :  { %v1107_v5 = vld [vmem:[%s13899_s4 + $0x200] sm:$0xff]  ;;  %v1108_v54 = vld [vmem:[%s13899_s4 + $0x208] sm:$0xff] }
  0xcc   :  { %6531 = vtanh.f32 %v7645_v35  ;;  %v342_v39 = vsel %vm341_vm11, %v6528_v11, %v338_v36  ;;  %v1132_v11 = vld [vmem:[%s13899_s4 + $0x2c8] sm:$0xff] }
  0xcd   :  { %v347_v43 = vsel %vm344_vm12, %v346_v40, %v342_v39  ;;  %v1169_v39 = vld [vmem:[%s13899_s4 + $0x3f0] sm:$0xff]  ;;  %v7855_v40 = vpop.f32.mrf.mxu3 }
  0xd2   :  { %v6532_v12 = vpop.eup %6531 }
  0xd3   :  { %v7648_v44 = vmul.f32 %v6532_v12, %v347_v43  ;;  %v1170_v12 = vld [vmem:[%s13899_s4 + $0x3f8] sm:$0xff]  ;;  %v1099_v43 = vld [vmem:[%s13899_s4 + $0x1c0] sm:$0xff] }
  0xd5   :  { %513 = vmatmul.f32.vlgmr.msra.gmra.mxu0 %v7648_v44  ;;  %553 = vmatmul.f32.vlgmr.msra.gmra.mxu2 %v7648_v44 }
  0xd6   :  { %798 = vmatpush.msra.mxu0 %v794_v63  ;;  %834 = vmatmul.f32.vlgmr.msra.gmra.mxu1 %v7648_v44  ;;  %v1165_v63 = vld [vmem:[%s13899_s4 + $0x3d0] sm:$0xff] }
  0xd7   :  { %838 = vmatpush.msra.mxu2 %v796_v58  ;;  %874 = vmatmul.f32.vlgmr.msra.gmra.mxu3 %v7648_v44  ;;  %v489_v58 = vperm.slane %v7836_v4, 0 }
  0xd8   :  { %799 = vmatpush.msra.mxu0 %v790_v15  ;;  %1201 = vmatpush.msra.mxu1 %v7166_v17  ;;  %v780_v17 = vld [vmem:[%s13897_s2 + $0x170] sm:$0xff]  ;;  %v1166_v15 = vld [vmem:[%s13899_s4 + $0x3d8] sm:$0xff] }
  0xd9   :  { %839 = vmatpush.msra.mxu2 %v792_v47  ;;  %1241 = vmatpush.msra.mxu3 %v7173_v18  ;;  %v6438_v18 = vld [vmem:[%s13900_s0 + $0x8] sm:$0xff]  ;;  %v1095_v47 = vld [vmem:[%s13899_s4 + $0x1a0] sm:$0xff] }
  0xda   :  { %800 = vmatpush.msra.mxu0 %v786_v48  ;;  %1202 = vmatpush.msra.mxu1 %v7197_v26  ;;  %v774_v26 = vld [vmem:[%s13897_s2 + $0x140] sm:$0xff]  ;;  %v1096_v48 = vld [vmem:[%s13899_s4 + $0x1a8] sm:$0xff] }
  0xdb   :  { %840 = vmatpush.msra.mxu2 %v788_v16  ;;  %1242 = vmatpush.msra.mxu3 %v7204_v29  ;;  %v776_v29 = vld [vmem:[%s13897_s2 + $0x150] sm:$0xff] }
  0xdc   :  { %801 = vmatpush.msra.mxu0 %v782_v62  ;;  %1203 = vmatpush.msra.mxu1 %v7214_v33  ;;  %v770_v33 = vld [vmem:[%s13897_s2 + $0x120] sm:$0xff]  ;;  %v1161_v16 = vld [vmem:[%s13899_s4 + $0x3b0] sm:$0xff]  ;;  %v1162_v62 = vld [vmem:[%s13899_s4 + $0x3b8] sm:$0xff] }
  0xdd   :  { %841 = vmatpush.msra.mxu2 %v784_v51  ;;  %593 = vmatmul.f32.vlgmr.msrb.gmra.mxu0 %v7648_v44 }
  0xde   :  { %633 = vmatmul.f32.vlgmr.msrb.gmra.mxu2 %v7648_v44  ;;  %802 = vmatpush.msra.mxu0 %v778_v52  ;;  %v1091_v52 = vld [vmem:[%s13899_s4 + $0x180] sm:$0xff] }
  0xdf   :  { %842 = vmatpush.msra.mxu2 %v780_v17  ;;  %6440 = vmatmul.msk.f32.vlgmr.msrb.gmra.mxu1 %vm193_vm0, %v6438_v18  ;;  %v1092_v17 = vld [vmem:[%s13899_s4 + $0x188] sm:$0xff] }
  0xe0   :  { %6442 = vmatmul.msk.f32.vlgmr.msrb.gmra.mxu3 %vm193_vm0, %v6438_v18  ;;  %803 = vmatpush.msra.mxu0 %v774_v26 }
  0xe1   :  { %843 = vmatpush.msra.mxu2 %v776_v29  ;;  %1243 = vmatpush.msra.mxu3 %v7224_v37  ;;  %v758_v37 = vld [vmem:[%s13897_s2 + $0xc0] sm:$0xff]  ;;  %v1158_v29 = vld [vmem:[%s13899_s4 + $0x398] sm:$0xff] }
  0xe2   :  { %804 = vmatpush.msra.mxu0 %v770_v33  ;;  %1204 = vmatpush.msra.mxu1 %v7233_v41  ;;  %v760_v41 = vld [vmem:[%s13897_s2 + $0xd0] sm:$0xff]  ;;  %v1087_v33 = vld [vmem:[%s13899_s4 + $0x160] sm:$0xff] }
  0xe3   :  { %844 = vmatpush.msra.mxu2 %v772_v30  ;;  %1244 = vmatpush.msra.mxu3 %v7242_v45  ;;  %v754_v45 = vld [vmem:[%s13897_s2 + $0xa0] sm:$0xff]  ;;  %v1088_v30 = vld [vmem:[%s13899_s4 + $0x168] sm:$0xff] }
  0xe4   :  { %805 = vmatpush.msra.mxu0 %v766_v19  ;;  %v1153_v19 = vld [vmem:[%s13899_s4 + $0x370] sm:$0xff] }
  0xe5   :  { %845 = vmatpush.msra.mxu2 %v768_v55 }
  0xe6   :  { %806 = vmatpush.msra.mxu0 %v762_v56  ;;  %v490_v56 = vperm.slane %v7836_v4, 1 }
  0xe7   :  { %846 = vmatpush.msra.mxu2 %v764_v20  ;;  %v1154_v20 = vld [vmem:[%s13899_s4 + $0x378] sm:$0xff] }
  0xe8   :  { %807 = vmatpush.msra.mxu0 %v758_v37 }
  0xe9   :  { %847 = vmatpush.msra.mxu2 %v760_v41  ;;  %v1083_v41 = vld [vmem:[%s13899_s4 + $0x140] sm:$0xff] }
  0xea   :  { %808 = vmatpush.msra.mxu0 %v754_v45  ;;  %v1084_v45 = vld [vmem:[%s13899_s4 + $0x148] sm:$0xff] }
  0xeb   :  { %848 = vmatpush.msra.mxu2 %v756_v21  ;;  %v1149_v21 = vld [vmem:[%s13899_s4 + $0x350] sm:$0xff] }
  0xec   :  { %809 = vmatpush.msra.mxu0 %v750_v10  ;;  %v7844_v36 = vpop.f32.mrf.mxu1  ;;  %v7922_v10 = vpop.f32.mrf.mxu3 }
  0xed   :  { %849 = vmatpush.msra.mxu2 %v7072_v53  ;;  %v729_v53 = vld [vmem:[%s13898_s1 + $0x20] sm:$0xff] }
  0xee   :  { %810 = vmatpush.msra.mxu0 %v746_v34 }
  0xef   :  { %850 = vmatpush.msra.mxu2 %v7092_v57  ;;  %v1151_v57 = vld [vmem:[%s13899_s4 + $0x360] sm:$0xff] }
  0xf0   :  { %811 = vmatpush.msra.mxu0 %v742_v59  ;;  %1205 = vmatpush.msra.mxu1 %v1151_v57  ;;  %v1150_v59 = vld [vmem:[%s13899_s4 + $0x358] sm:$0xff]  ;;  %v1145_v57 = vld [vmem:[%s13899_s4 + $0x330] sm:$0xff] }
  0xf1   :  { %851 = vmatpush.msra.mxu2 %v7116_v61  ;;  %v1152_v61 = vld [vmem:[%s13899_s4 + $0x368] sm:$0xff] }
  0xf2   :  { %812 = vmatpush.msra.mxu0 %v738_v38  ;;  %1245 = vmatpush.msra.mxu3 %v1152_v61 }
  0xf3   :  { %852 = vmatpush.msra.mxu2 %v7138_v6  ;;  %v1147_v6 = vld [vmem:[%s13899_s4 + $0x340] sm:$0xff] }
  0xf4   :  { %813 = vmatpush.msra.mxu0 %v734_v60  ;;  %1206 = vmatpush.msra.mxu1 %v1147_v6  ;;  %v1079_v60 = vld [vmem:[%s13899_s4 + $0x120] sm:$0xff]  ;;  %v1146_v6 = vld [vmem:[%s13899_s4 + $0x338] sm:$0xff] }
  0xf5   :  { %853 = vmatpush.msra.mxu2 %v7161_v14  ;;  %814 = vmatmul.f32.vlgmr.msra.gmra.mxu0 %v7648_v44  ;;  %v1143_v14 = vld [vmem:[%s13899_s4 + $0x320] sm:$0xff] }
  0xf6   :  { %854 = vmatmul.f32.vlgmr.msra.gmra.mxu2 %v7648_v44  ;;  %895 = vmatpush.msrb.mxu0 %v729_v53  ;;  %v1100_v44 = vld [vmem:[%s13899_s4 + $0x1c8] sm:$0xff] }
  0xf7   :  { %935 = vmatpush.msrb.mxu2 %v7183_v22  ;;  %v1144_v22 = vld [vmem:[%s13899_s4 + $0x328] sm:$0xff]  ;;  %1207 = vmatpush.msra.mxu1 %v1143_v14 }
  0xf8   :  { %896 = vmatpush.msrb.mxu0 %v7143_v9  ;;  %v1148_v9 = vld [vmem:[%s13899_s4 + $0x348] sm:$0xff] }
  0xf9   :  { %936 = vmatpush.msrb.mxu2 %v7191_v25  ;;  %1246 = vmatpush.msra.mxu3 %v1148_v9  ;;  %v1139_v25 = vld [vmem:[%s13899_s4 + $0x300] sm:$0xff]  ;;  %v1080_v53 = vld [vmem:[%s13899_s4 + $0x128] sm:$0xff] }
  0xfa   :  { %1208 = vmatpush.msra.mxu1 %v1139_v25  ;;  %1181 = vmatpush.msra.mxu0 %v1103_v7  ;;  %v1075_v9 = vld [vmem:[%s13899_s4 + $0x100] sm:$0xff]  ;;  %v1076_v14 = vld [vmem:[%s13899_s4 + $0x108] sm:$0xff] }
  0xfb   :  { %1247 = vmatpush.msra.mxu3 %v1144_v22  ;;  %1221 = vmatpush.msra.mxu2 %v1104_v8  ;;  %v1141_v22 = vld [vmem:[%s13899_s4 + $0x310] sm:$0xff] }
  0xfc   :  { %1209 = vmatpush.msra.mxu1 %v1135_v3  ;;  %1182 = vmatpush.msra.mxu0 %v1099_v43  ;;  %v1071_v3 = vld [vmem:[%s13899_s4 + $0xe0] sm:$0xff]  ;;  %v1125_v43 = vld [vmem:[%s13899_s4 + $0x290] sm:$0xff] }
  0xfd   :  { %6439 = vmatmul.msk.f32.vlgmr.msrb.gmra.mxu0 %vm193_vm0, %v6438_v18  ;;  %1248 = vmatpush.msra.mxu3 %v1140_v0  ;;  %v1142_v0 = vld [vmem:[%s13899_s4 + $0x318] sm:$0xff] }
  0xfe   :  { %6441 = vmatmul.msk.f32.vlgmr.msrb.gmra.mxu2 %vm193_vm0, %v6438_v18  ;;  %1210 = vmatpush.msra.mxu1 %v1131_v23  ;;  %v1157_v18 = vld [vmem:[%s13899_s4 + $0x390] sm:$0xff] }
  0xff   :  { %1249 = vmatpush.msra.mxu3 %v1136_v42  ;;  %1222 = vmatpush.msra.mxu2 %v1100_v44  ;;  %v1072_v42 = vld [vmem:[%s13899_s4 + $0xe8] sm:$0xff]  ;;  %v1137_v23 = vld [vmem:[%s13899_s4 + $0x2f0] sm:$0xff] }
 0x100   :  { %1211 = vmatpush.msra.mxu1 %v1127_v24  ;;  %1183 = vmatpush.msra.mxu0 %v1095_v47  ;;  %v1138_v24 = vld [vmem:[%s13899_s4 + $0x2f8] sm:$0xff]  ;;  %v1055_v47 = vld [vmem:[%s13899_s4 + $0x60] sm:$0xff] }
 0x101   :  { %1250 = vmatpush.msra.mxu3 %v1132_v11  ;;  %1223 = vmatpush.msra.mxu2 %v1096_v48  ;;  %v1056_v48 = vld [vmem:[%s13899_s4 + $0x68] sm:$0xff] }
 0x102   :  { %1212 = vmatpush.msra.mxu1 %v1123_v49  ;;  %1184 = vmatpush.msra.mxu0 %v1091_v52  ;;  %v1133_v49 = vld [vmem:[%s13899_s4 + $0x2d0] sm:$0xff] }
 0x103   :  { %1251 = vmatpush.msra.mxu3 %v1128_v13  ;;  %1224 = vmatpush.msra.mxu2 %v1092_v17  ;;  %v1067_v13 = vld [vmem:[%s13899_s4 + $0xc0] sm:$0xff]  ;;  %v1122_v17 = vld [vmem:[%s13899_s4 + $0x278] sm:$0xff] }
 0x104   :  { %1213 = vmatpush.msra.mxu1 %v1119_v27  ;;  %1185 = vmatpush.msra.mxu0 %v1087_v33  ;;  %v7976_v27 = vld [vmem:[%s13901_s3] sm:$0xf]  ;;  %v1117_v33 = vld [vmem:[%s13899_s4 + $0x250] sm:$0xff] }
 0x105   :  { %1252 = vmatpush.msra.mxu3 %v1124_v1  ;;  %1225 = vmatpush.msra.mxu2 %v1088_v30 }
 0x106   :  { %1214 = vmatpush.msra.mxu1 %v1115_v2  ;;  %1186 = vmatpush.msra.mxu0 %v1083_v41  ;;  %v1134_v2 = vld [vmem:[%s13899_s4 + $0x2d8] sm:$0xff]  ;;  %v1113_v41 = vld [vmem:[%s13899_s4 + $0x230] sm:$0xff] }
 0x107   :  { %1253 = vmatpush.msra.mxu3 %v1120_v28  ;;  %1226 = vmatpush.msra.mxu2 %v1084_v45  ;;  %v492_v28 = vperm.slane %v7836_v4, 3 }
 0x108   :  { %1215 = vmatpush.msra.mxu1 %v1111_v31  ;;  %1187 = vmatpush.msra.mxu0 %v1079_v60  ;;  %v1043_v60 = vld [vmem:[%s13899_s4] sm:$0xff] }
 0x109   :  { %1254 = vmatpush.msra.mxu3 %v1116_v50  ;;  %1227 = vmatpush.msra.mxu2 %v1080_v53  ;;  %v1044_v53 = vld [vmem:[%s13899_s4 + $0x8] sm:$0xff] }
 0x10a   :  { %1216 = vmatpush.msra.mxu1 %v1107_v5  ;;  %1188 = vmatpush.msra.mxu0 %v1075_v9  ;;  %v1064_v5 = vld [vmem:[%s13899_s4 + $0xa8] sm:$0xff]  ;;  %v1106_v9 = vld [vmem:[%s13899_s4 + $0x1f8] sm:$0xff] }
 0x10b   :  { %1255 = vmatpush.msra.mxu3 %v1112_v32  ;;  %1228 = vmatpush.msra.mxu2 %v1076_v14  ;;  %v1063_v32 = vld [vmem:[%s13899_s4 + $0xa0] sm:$0xff] }
 0x10c   :  { %1281 = vmatpush.msrb.mxu1 %v1169_v39  ;;  %1189 = vmatpush.msra.mxu0 %v1071_v3  ;;  %v1130_v39 = vld [vmem:[%s13899_s4 + $0x2b8] sm:$0xff]  ;;  %v966_v3 = vperm.slane %v7976_v27, 3 }
 0x10d   :  { %1256 = vmatpush.msra.mxu3 %v1108_v54  ;;  %1229 = vmatpush.msra.mxu2 %v1072_v42  ;;  %v1129_v54 = vld [vmem:[%s13899_s4 + $0x2b0] sm:$0xff] }
 0x10e   :  { %1282 = vmatpush.msrb.mxu1 %v1165_v63  ;;  %1190 = vmatpush.msra.mxu0 %v1067_v13  ;;  %v964_v63 = vperm.slane %v7976_v27, 1  ;;  %v1101_v42 = vld [vmem:[%s13899_s4 + $0x1d0] sm:$0xff] }
 0x10f   :  { %1321 = vmatpush.msrb.mxu3 %v1170_v12  ;;  %v1060_v12 = vld [vmem:[%s13899_s4 + $0x88] sm:$0xff] }
 0x110   :  { %1283 = vmatpush.msrb.mxu1 %v1161_v16  ;;  %1191 = vmatpush.msra.mxu0 %v1063_v32  ;;  %v1121_v16 = vld [vmem:[%s13899_s4 + $0x270] sm:$0xff]  ;;  %v1058_v32 = vld [vmem:[%s13899_s4 + $0x78] sm:$0xff] }
 0x111   :  { %1322 = vmatpush.msrb.mxu3 %v1166_v15  ;;  %v1126_v15 = vld [vmem:[%s13899_s4 + $0x298] sm:$0xff] }
 0x112   :  { %1284 = vmatpush.msrb.mxu1 %v1157_v18 }
 0x113   :  { %1323 = vmatpush.msrb.mxu3 %v1162_v62 }
 0x114   :  { %1285 = vmatpush.msrb.mxu1 %v1153_v19 }
 0x115   :  { %1324 = vmatpush.msrb.mxu3 %v1158_v29  ;;  %v1051_v29 = vld [vmem:[%s13899_s4 + $0x40] sm:$0xff] }
 0x116   :  { %1286 = vmatpush.msrb.mxu1 %v1149_v21 }
 0x117   :  { %1325 = vmatpush.msrb.mxu3 %v1154_v20  ;;  %v1047_v20 = vld [vmem:[%s13899_s4 + $0x20] sm:$0xff] }
 0x118   :  { %1287 = vmatpush.msrb.mxu1 %v1145_v57  ;;  %v1109_v57 = vld [vmem:[%s13899_s4 + $0x210] sm:$0xff] }
 0x119   :  { %1326 = vmatpush.msrb.mxu3 %v1150_v59 }
 0x11a   :  { %1288 = vmatpush.msrb.mxu1 %v1141_v22 }
 0x11b   :  { %1327 = vmatpush.msrb.mxu3 %v1146_v6  ;;  %v1105_v6 = vld [vmem:[%s13899_s4 + $0x1f0] sm:$0xff] }
 0x11c   :  { %1289 = vmatpush.msrb.mxu1 %v1137_v23  ;;  %v1102_v23 = vld [vmem:[%s13899_s4 + $0x1d8] sm:$0xff] }
 0x11d   :  { %1328 = vmatpush.msrb.mxu3 %v1142_v0 }
 0x11e   :  { %1290 = vmatpush.msrb.mxu1 %v1133_v49  ;;  %v1097_v49 = vld [vmem:[%s13899_s4 + $0x1b0] sm:$0xff] }
 0x11f   :  { %1329 = vmatpush.msrb.mxu3 %v1138_v24 }
 0x120   :  { %1291 = vmatpush.msrb.mxu1 %v1129_v54 }
 0x121   :  { %1330 = vmatpush.msrb.mxu3 %v1134_v2 }
 0x122   :  { %1292 = vmatpush.msrb.mxu1 %v1125_v43  ;;  %v1089_v43 = vld [vmem:[%s13899_s4 + $0x170] sm:$0xff] }
 0x123   :  { %1331 = vmatpush.msrb.mxu3 %v1130_v39 }
 0x124   :  { %1293 = vmatpush.msrb.mxu1 %v1121_v16  ;;  %v1086_v16 = vld [vmem:[%s13899_s4 + $0x158] sm:$0xff] }
 0x125   :  { %1332 = vmatpush.msrb.mxu3 %v1126_v15 }
 0x126   :  { %1294 = vmatpush.msrb.mxu1 %v1117_v33 }
 0x127   :  { %1333 = vmatpush.msrb.mxu3 %v1122_v17 }
 0x128   :  { %1295 = vmatpush.msrb.mxu1 %v1113_v41 }
 0x12a   :  { %1296 = vmatpush.msrb.mxu1 %v1109_v57  ;;  %v1069_v57 = vld [vmem:[%s13899_s4 + $0xd0] sm:$0xff] }
 0x152   :  { %v514_v51 = vpop.f32.mrf.mxu0 }
 0x153   :  { %v515_v26 = vadd.f32 %v514_v51, %v489_v58  ;;  %v7911_v37 = vpop.f32.mrf.mxu1  ;;  %v491_v51 = vperm.slane %v7836_v4, 2  ;;  %v1052_v4 = vld [vmem:[%s13899_s4 + $0x48] sm:$0xff] }
 0x155   :  { %v535_v55 = vadd.f32 %v7807_v46, %v515_v26  ;;  %v1068_v46 = vld [vmem:[%s13899_s4 + $0xc8] sm:$0xff] }
 0x156   :  { %1230 = vmatpush.msra.mxu2 %v1068_v46 }
 0x157   :  { %v6435_v34 = vmul.f32 -1.442695, %v535_v55  ;;  %v1118_v55 = vld [vmem:[%s13899_s4 + $0x258] sm:$0xff] }
 0x158   :  { %v554_v38 = vpop.f32.mrf.mxu2  ;;  %1231 = vmatpush.msra.mxu2 %v1064_v5  ;;  %1334 = vmatpush.msrb.mxu3 %v1118_v55  ;;  %v963_v55 = vperm.slane %v7976_v27, 0 }
 0x159   :  { %6533 = vpow2.f32 %v6435_v34  ;;  %v555_v61 = vadd.f32 %v554_v38, %v490_v56 }
 0x15a   :  { %v7993_v7 = vpop.f32.mrf.mxu3  ;;  %1232 = vmatpush.msra.mxu2 %v1060_v12  ;;  %v594_v26 = vpop.f32.mrf.mxu0 }
 0x15b   :  { %v575_v25 = vadd.f32 %v7855_v40, %v555_v61  ;;  %v1059_v40 = vld [vmem:[%s13899_s4 + $0x80] sm:$0xff]  ;;  %v595_v21 = vadd.f32 %v594_v26, %v491_v51  ;;  %v1110_v61 = vld [vmem:[%s13899_s4 + $0x218] sm:$0xff] }
 0x15c   :  { %v918_v31 = vpop.f32.mrf.mxu1  ;;  %1192 = vmatpush.msra.mxu0 %v1059_v40  ;;  %1233 = vmatpush.msra.mxu2 %v1056_v48  ;;  %v1085_v48 = vld [vmem:[%s13899_s4 + $0x150] sm:$0xff] }
 0x15d   :  { %v6436_v11 = vmul.f32 -1.442695, %v575_v25  ;;  %v919_v44 = vadd.f32 %v918_v31, %v7911_v37  ;;  %v1048_v37 = vld [vmem:[%s13899_s4 + $0x28] sm:$0xff]  ;;  %v615_v14 = vadd.f32 %v7844_v36, %v595_v21 }
 0x15e   :  { %1193 = vmatpush.msra.mxu0 %v1055_v47  ;;  %1234 = vmatpush.msra.mxu2 %v1052_v4  ;;  %v1082_v4 = vld [vmem:[%s13899_s4 + $0x138] sm:$0xff] }
 0x15f   :  { %v6534_v1 = vpop.eup %6533  ;;  %6535 = vpow2.f32 %v6436_v11  ;;  %v972_v30 = vadd.f32 %v964_v63, %v919_v44  ;;  %v1090_v44 = vld [vmem:[%s13899_s4 + $0x178] sm:$0xff] }
 0x160   :  { %v7982_v50 = vadd.f32 1.0, %v6534_v1  ;;  %1194 = vmatpush.msra.mxu0 %v1051_v29  ;;  %1235 = vmatpush.msra.mxu2 %v1048_v37  ;;  %v1098_v1 = vld [vmem:[%s13899_s4 + $0x1b8] sm:$0xff]  ;;  %v1081_v29 = vld [vmem:[%s13899_s4 + $0x130] sm:$0xff] }
 0x161   :  { %v634_v8 = vpop.f32.mrf.mxu2  ;;  %v6444_v59 = vmul.f32 -1.442695, %v972_v30  ;;  %v1078_v37 = vld [vmem:[%s13899_s4 + $0x118] sm:$0xff] }
 0x162   :  { %6537 = vrcp.f32 %v7982_v50  ;;  %v635_v58 = vadd.f32 %v634_v8, %v492_v28  ;;  %1195 = vmatpush.msra.mxu0 %v1047_v20  ;;  %1236 = vmatpush.msra.mxu2 %v1044_v53  ;;  %v672_v13 = vand.u32 2147483648, %v7982_v50  ;;  %vm666_vm14 = vweird.f32 %v7982_v50  ;;  %v1077_v20 = vld [vmem:[%s13899_s4 + $0x110] sm:$0xff] }
 0x163   :  { %v958_v38 = vpop.f32.mrf.mxu3  ;;  %v670_v2 = vand.u32 2147483647, %v7982_v50 }
 0x164   :  { %v655_v52 = vadd.f32 %v7922_v10, %v635_v58  ;;  %v1114_v10 = vld [vmem:[%s13899_s4 + $0x238] sm:$0xff]  ;;  %1196 = vmatpush.msra.mxu0 %v1043_v60  ;;  %v959_v0 = vadd.f32 %v958_v38, %v7993_v7  ;;  %1301 = vmatpush.msrb.mxu2 %v1106_v9  ;;  %v1093_v7 = vld [vmem:[%s13899_s4 + $0x190] sm:$0xff]  ;;  %v673_v12 = vor.u32 1.1754944e-38, %v672_v13 }
 0x165   :  { %v6536_v62 = vpop.eup %6535  ;;  %1335 = vmatpush.msrb.mxu3 %v1114_v10  ;;  %vm671_vm3 = vcmp.eq.f32.partialorder %v670_v2, 8.507059e+37  ;;  %v1073_v10 = vld [vmem:[%s13899_s4 + $0xf0] sm:$0xff] }
 0x166   :  { %v8027_v18 = vadd.f32 1.0, %v6536_v62  ;;  %v6437_v19 = vmul.f32 -1.442695, %v655_v52  ;;  %1261 = vmatpush.msrb.mxu0 %v1105_v6  ;;  %1302 = vmatpush.msrb.mxu2 %v1102_v23  ;;  %v974_v5 = vadd.f32 %v966_v3, %v959_v0 }
 0x167   :  { %1336 = vmatpush.msrb.mxu3 %v1110_v61  ;;  %v1070_v61 = vld [vmem:[%s13899_s4 + $0xd8] sm:$0xff] }
 0x168   :  { %v8041_v56 = vpop.eup %6537  ;;  %6539 = vrcp.f32 %v8027_v18  ;;  %1262 = vmatpush.msrb.mxu0 %v1101_v42  ;;  %v691_v31 = vand.u32 2147483648, %v8027_v18  ;;  %1303 = vmatpush.msrb.mxu2 %v1098_v1  ;;  %v689_v40 = vand.u32 2147483647, %v8027_v18  ;;  %vm685_vm2 = vweird.f32 %v8027_v18  ;;  %v1481_v1 = vld [vmem:[%s13897_s2 + $0x1f8] sm:$0xff] }
 0x169   :  { %v662_v45 = vmul.f32 %v8041_v56, %v7982_v50  ;;  %6541 = vpow2.f32 %v6437_v19  ;;  %vm667_vm13 = vweird.f32 %v8041_v56  ;;  %v1094_v50 = vld [vmem:[%s13899_s4 + $0x198] sm:$0xff]  ;;  %v6445_v52 = vmul.f32 -1.442695, %v974_v5  ;;  %v1475_v5 = vld [vmem:[%s13897_s2 + $0x1c8] sm:$0xff] }
 0x16a   :  { %6543 = vpow2.f32 %v6444_v59  ;;  %vm8101_vm15 = vmor %vm666_vm14, %vm667_vm13  ;;  %1263 = vmatpush.msrb.mxu0 %v1097_v49  ;;  %1304 = vmatpush.msrb.mxu2 %v1094_v50  ;;  %v692_v15 = vor.u32 1.1754944e-38, %v691_v31  ;;  %vm690_vm5 = vcmp.eq.f32.partialorder %v689_v40, 8.507059e+37  ;;  %v1479_v49 = vld [vmem:[%s13897_s2 + $0x1e8] sm:$0xff]  ;;  %v1057_v31 = vld [vmem:[%s13899_s4 + $0x70] sm:$0xff] }
 0x16b   :  { %v663_v34 = vsub.f32 1.0, %v662_v45  ;;  %6545 = vtanh.f32 %v615_v14  ;;  %v1053_v50 = vld [vmem:[%s13899_s4 + $0x50] sm:$0xff]  ;;  %v1471_v40 = vld [vmem:[%s13897_s2 + $0x1a8] sm:$0xff] }
 0x16c   :  { %1264 = vmatpush.msrb.mxu0 %v1093_v7  ;;  %1305 = vmatpush.msrb.mxu2 %v1090_v44 }
 0x16d   :  { %v664_v22 = vmul.f32 %v8041_v56, %v663_v34  ;;  %v1074_v34 = vld [vmem:[%s13899_s4 + $0xf8] sm:$0xff] }
 0x16e   :  { %v6540_v25 = vpop.eup %6539  ;;  %1265 = vmatpush.msrb.mxu0 %v1089_v43  ;;  %1306 = vmatpush.msrb.mxu2 %v1086_v16  ;;  %v965_v16 = vperm.slane %v7976_v27, 2  ;;  %v1046_v27 = vld [vmem:[%s13899_s4 + $0x18] sm:$0xff] }
 0x16f   :  { %v6542_v36 = vpop.eup %6541  ;;  %v681_v11 = vmul.f32 %v6540_v25, %v8027_v18  ;;  %v665_v24 = vadd.f32 %v8041_v56, %v664_v22  ;;  %vm686_vm1 = vweird.f32 %v6540_v25  ;;  %v1065_v22 = vld [vmem:[%s13899_s4 + $0xb0] sm:$0xff] }
 0x170   :  { %v8090_v46 = vadd.f32 1.0, %v6542_v36  ;;  %v6544_v63 = vpop.eup %6543  ;;  %vm687_vm4 = vmor %vm685_vm2, %vm686_vm1  ;;  %1266 = vmatpush.msrb.mxu0 %v1085_v48  ;;  %1307 = vmatpush.msrb.mxu2 %v1082_v4  ;;  %v1061_v36 = vld [vmem:[%s13899_s4 + $0x90] sm:$0xff] }
 0x171   :  { %v682_v28 = vsub.f32 1.0, %v681_v11  ;;  %v669_v39 = vsel %vm8101_vm15, %v8041_v56, %v665_v24  ;;  %v6546_v62 = vpop.eup %6545  ;;  %v8129_v26 = vadd.f32 1.0, %v6544_v63  ;;  %v1062_v11 = vld [vmem:[%s13899_s4 + $0x98] sm:$0xff]  ;;  %v1049_v63 = vld [vmem:[%s13899_s4 + $0x30] sm:$0xff] }
 0x172   :  { %6547 = vrcp.f32 %v8090_v46  ;;  %v815_v54 = vpop.f32.mrf.mxu0  ;;  %v674_v47 = vsel %vm671_vm3, %v673_v12, %v669_v39  ;;  %1267 = vmatpush.msrb.mxu0 %v1081_v29  ;;  %1308 = vmatpush.msrb.mxu2 %v1078_v37  ;;  %v711_v38 = vand.u32 2147483648, %v8090_v46  ;;  %v709_v53 = vand.u32 2147483647, %v8090_v46  ;;  %v1473_v12 = vld [vmem:[%s13897_s2 + $0x1b8] sm:$0xff] }
 0x173   :  { %v683_v8 = vmul.f32 %v6540_v25, %v682_v28  ;;  %v717_v30 = vmul.f32 %v6546_v62, %v674_v47  ;;  %6549 = vpow2.f32 %v6445_v52  ;;  %vm705_vm7 = vweird.f32 %v8090_v46  ;;  %v1469_v47 = vld [vmem:[%s13897_s2 + $0x198] sm:$0xff]  ;;  %v1463_v62 = vld [vmem:[%s13897_s2 + $0x168] sm:$0xff] }
 0x174   :  { %6551 = vrcp.f32 %v8129_v26  ;;  %1268 = vmatpush.msrb.mxu0 %v1077_v20  ;;  %1309 = vmatpush.msrb.mxu2 %v1074_v34  ;;  %v712_v3 = vor.u32 1.1754944e-38, %v711_v38  ;;  %vm710_vm9 = vcmp.eq.f32.partialorder %v709_v53, 8.507059e+37  ;;  %v1461_v29 = vld [vmem:[%s13897_s2 + $0x158] sm:$0xff]  ;;  %v1009_v37 = vand.u32 2147483648, %v8129_v26  ;;  %v1447_v53 = vld [vmem:[%s13897_s2 + $0xe8] sm:$0xff]  ;;  %v1448_v38 = vld [vmem:[%s13897_s2 + $0xf0] sm:$0xff] }
 0x175   :  { %v684_v58 = vadd.f32 %v6540_v25, %v683_v8  ;;  %v1054_v8 = vld [vmem:[%s13899_s4 + $0x58] sm:$0xff]  ;;  %vm1003_vm11 = vweird.f32 %v8129_v26 }
 0x176   :  { %1269 = vmatpush.msrb.mxu0 %v1073_v10  ;;  %1310 = vmatpush.msrb.mxu2 %v1070_v61  ;;  %v1453_v10 = vld [vmem:[%s13897_s2 + $0x118] sm:$0xff] }
 0x177   :  { %v688_v51 = vsel %vm687_vm4, %v6540_v25, %v684_v58  ;;  %v1066_v25 = vld [vmem:[%s13899_s4 + $0xb8] sm:$0xff] }
 0x178   :  { %v6548_v17 = vpop.eup %6547  ;;  %v693_v18 = vsel %vm690_vm5, %v692_v15, %v688_v51  ;;  %1270 = vmatpush.msrb.mxu0 %v1069_v57  ;;  %1311 = vmatpush.msrb.mxu2 %v1066_v25  ;;  %v1050_v58 = vld [vmem:[%s13899_s4 + $0x38] sm:$0xff]  ;;  %v1467_v15 = vld [vmem:[%s13897_s2 + $0x188] sm:$0xff] }
 0x179   :  { %v716_v33 = vmul.f32 0.0, %v693_v18  ;;  %v701_v19 = vmul.f32 %v6548_v17, %v8090_v46  ;;  %vm706_vm6 = vweird.f32 %v6548_v17  ;;  %v855_v6 = vpop.f32.mrf.mxu2  ;;  %v6550_v0 = vpop.eup %6549  ;;  %v1465_v51 = vld [vmem:[%s13897_s2 + $0x178] sm:$0xff]  ;;  %v1459_v18 = vld [vmem:[%s13897_s2 + $0x148] sm:$0xff] }
 0x17a   :  { %v898_v56 = vpop.f32.mrf.mxu0  ;;  %vm707_vm8 = vmor %vm705_vm7, %vm706_vm6  ;;  %v8171_v42 = vpop.eup %6551  ;;  %1271 = vmatpush.msrb.mxu0 %v1065_v22  ;;  %1312 = vmatpush.msrb.mxu2 %v1062_v11  ;;  %v8187_v2 = vadd.f32 1.0, %v6550_v0  ;;  %v1449_v57 = vld [vmem:[%s13897_s2 + $0xf8] sm:$0xff]  ;;  %v1443_v22 = vld [vmem:[%s13897_s2 + $0xc8] sm:$0xff] }
 0x17b   :  { %v8145_v41 = vadd.f32 %v717_v30, %v716_v33  ;;  %v899_v45 = vadd.f32 %v898_v56, %v815_v54  ;;  %v702_v21 = vsub.f32 1.0, %v701_v19  ;;  %v999_v28 = vmul.f32 %v8171_v42, %v8129_v26  ;;  %v1477_v54 = vld [vmem:[%s13897_s2 + $0x1d8] sm:$0xff]  ;;  %v1455_v19 = vld [vmem:[%s13897_s2 + $0x128] sm:$0xff] }
 0x17c   :  { %1272 = vmatpush.msrb.mxu0 %v1061_v36  ;;  %1313 = vmatpush.msrb.mxu2 %v1058_v32  ;;  %vm1004_vm10 = vweird.f32 %v8171_v42  ;;  %v1445_v25 = vld [vmem:[%s13897_s2 + $0xd8] sm:$0xff]  ;;  %v1431_v32 = vld [vmem:[%s13897_s2 + $0x68] sm:$0xff]  ;;  %vm1023_vm4 = vweird.f32 %v8187_v2 }
 0x17d   :  { %v971_v59 = vadd.f32 %v963_v55, %v899_v45  ;;  %6553 = vtanh.f32 %v8145_v41  ;;  %v703_v60 = vmul.f32 %v6548_v17, %v702_v21  ;;  %v1000_v43 = vsub.f32 1.0, %v999_v28  ;;  %v1457_v55 = vld [vmem:[%s13897_s2 + $0x138] sm:$0xff]  ;;  %v1451_v21 = vld [vmem:[%s13897_s2 + $0x108] sm:$0xff]  ;;  %vm8271_vm12 = vmor %vm1003_vm11, %vm1004_vm10 }
 0x17e   :  { %1273 = vmatpush.msrb.mxu0 %v1057_v31  ;;  %1314 = vmatpush.msrb.mxu2 %v1054_v8  ;;  %v1441_v36 = vld [vmem:[%s13897_s2 + $0xb8] sm:$0xff]  ;;  %v1029_v8 = vand.u32 2147483648, %v8187_v2 }
 0x17f   :  { %v6443_v9 = vmul.f32 -1.442695, %v971_v59  ;;  %v704_v14 = vadd.f32 %v6548_v17, %v703_v60  ;;  %v1001_v52 = vmul.f32 %v8171_v42, %v1000_v43  ;;  %v1007_v59 = vand.u32 2147483647, %v8129_v26 }
 0x180   :  { %1274 = vmatpush.msrb.mxu0 %v1053_v50  ;;  %1315 = vmatpush.msrb.mxu2 %v1050_v58  ;;  %v1429_v50 = vld [vmem:[%s13897_s2 + $0x58] sm:$0xff]  ;;  %v1414_v58 = vld [vmem:[%s13898_s1 + $0x28] sm:$0xff] }
 0x181   :  { %6555 = vpow2.f32 %v6443_v9  ;;  %v708_v23 = vsel %vm707_vm8, %v6548_v17, %v704_v14  ;;  %v938_v44 = vpop.f32.mrf.mxu2  ;;  %v1045_v17 = vld [vmem:[%s13899_s4 + $0x10] sm:$0xff]  ;;  %v1002_v20 = vadd.f32 %v8171_v42, %v1001_v52  ;;  %v1010_v9 = vor.u32 1.1754944e-38, %v1009_v37  ;;  %v1474_v52 = vld [vmem:[%s13897_s2 + $0x1c0] sm:$0xff] }
 0x182   :  { %v713_v13 = vsel %vm710_vm9, %v712_v3, %v708_v23  ;;  %6557 = vrcp.f32 %v8187_v2  ;;  %v939_v48 = vadd.f32 %v938_v44, %v855_v6  ;;  %1275 = vmatpush.msrb.mxu0 %v1049_v63  ;;  %1316 = vmatpush.msrb.mxu2 %v1046_v27  ;;  %vm1008_vm15 = vcmp.eq.f32.partialorder %v1007_v59, 8.507059e+37  ;;  %v1439_v23 = vld [vmem:[%s13897_s2 + $0xa8] sm:$0xff]  ;;  %v1476_v27 = vld [vmem:[%s13897_s2 + $0x1d0] sm:$0xff]  ;;  %v1446_v59 = vld [vmem:[%s13897_s2 + $0xe0] sm:$0xff] }
 0x183   :  { %v6554_v24 = vpop.eup %6553  ;;  %v1006_v6 = vsel %vm8271_vm12, %v8171_v42, %v1002_v20  ;;  %v1419_v44 = vld [vmem:[%s13897_s2 + $0x8] sm:$0xff]  ;;  %v1030_v63 = vor.u32 1.1754944e-38, %v1029_v8  ;;  %v1458_v20 = vld [vmem:[%s13897_s2 + $0x140] sm:$0xff]  ;;  %v1460_v37 = vld [vmem:[%s13897_s2 + $0x150] sm:$0xff] }
 0x184   :  { %v720_v46 = vmul.f32 %v6554_v24, %v713_v13  ;;  %v973_v30 = vadd.f32 %v965_v16, %v939_v48  ;;  %1276 = vmatpush.msrb.mxu0 %v1045_v17  ;;  %v1011_v42 = vsel %vm1008_vm15, %v1010_v9, %v1006_v6  ;;  %v1410_v17 = vld [vmem:[%s13898_s1 + $0x8] sm:$0xff]  ;;  %v1436_v6 = vld [vmem:[%s13897_s2 + $0x90] sm:$0xff]  ;;  %v1430_v9 = vld [vmem:[%s13897_s2 + $0x60] sm:$0xff] }
 0x185   :  { %v1034_v28 = vmul.f32 %v1011_v42, %v7645_v35  ;;  %v1427_v35 = vld [vmem:[%s13897_s2 + $0x48] sm:$0xff]  ;;  %v1418_v42 = vld [vmem:[%s13897_s2] sm:$0xff] }
 0x186   :  { %1217 = vmatmul.f32.vlgmr.msra.gmra.mxu1 %v720_v46  ;;  %1257 = vmatmul.f32.vlgmr.msra.gmra.mxu3 %v720_v46  ;;  %v1831_v8 = vld [vmem:[%s13899_s4 + $0x340] sm:$0xff] }
 0x187   :  { %v6556_v7 = vpop.eup %6555  ;;  %1502 = vmatpush.msra.mxu1 %v1479_v49  ;;  %1542 = vmatpush.msra.mxu3 %v1481_v1  ;;  %v1435_v49 = vld [vmem:[%s13897_s2 + $0x88] sm:$0xff]  ;;  %v1437_v1 = vld [vmem:[%s13897_s2 + $0x98] sm:$0xff] }
 0x188   :  { %v8207_v39 = vadd.f32 1.0, %v6556_v7  ;;  %v8249_v4 = vpop.eup %6557 }
 0x189   :  { %1503 = vmatpush.msra.mxu1 %v1475_v5  ;;  %1543 = vmatpush.msra.mxu3 %v1477_v54  ;;  %v1019_v45 = vmul.f32 %v8249_v4, %v8187_v2  ;;  %v1433_v5 = vld [vmem:[%s13897_s2 + $0x78] sm:$0xff]  ;;  %vm1024_vm3 = vweird.f32 %v8249_v4 }
 0x18a   :  { %6559 = vrcp.f32 %v8207_v39  ;;  %v990_v60 = vand.u32 2147483648, %v8207_v39  ;;  %v988_v26 = vand.u32 2147483647, %v8207_v39  ;;  %vm984_vm14 = vweird.f32 %v8207_v39  ;;  %vm1025_vm5 = vmor %vm1023_vm4, %vm1024_vm3 }
 0x18b   :  { %1504 = vmatpush.msra.mxu1 %v1471_v40  ;;  %1544 = vmatpush.msra.mxu3 %v1473_v12  ;;  %6561 = vtanh.f32 %v973_v30  ;;  %v1020_v14 = vsub.f32 1.0, %v1019_v45  ;;  %v1423_v40 = vld [vmem:[%s13897_s2 + $0x28] sm:$0xff]  ;;  %v1425_v12 = vld [vmem:[%s13897_s2 + $0x38] sm:$0xff]  ;;  %v1468_v30 = vld [vmem:[%s13897_s2 + $0x190] sm:$0xff] }
 0x18c   :  { %v991_v3 = vor.u32 1.1754944e-38, %v990_v60  ;;  %vm989_vm2 = vcmp.eq.f32.partialorder %v988_v26, 8.507059e+37  ;;  %v1454_v45 = vld [vmem:[%s13897_s2 + $0x120] sm:$0xff] }
 0x18d   :  { %1505 = vmatpush.msra.mxu1 %v1467_v15  ;;  %1545 = vmatpush.msra.mxu3 %v1469_v47  ;;  %v1021_v13 = vmul.f32 %v8249_v4, %v1020_v14  ;;  %v1416_v15 = vld [vmem:[%s13898_s1 + $0x38] sm:$0xff]  ;;  %v1442_v60 = vld [vmem:[%s13897_s2 + $0xc0] sm:$0xff]  ;;  %v1432_v14 = vld [vmem:[%s13897_s2 + $0x70] sm:$0xff] }
 0x18e   :  { %1297 = vmatmul.f32.vlgmr.msrb.gmra.mxu1 %v720_v46  ;;  %1337 = vmatmul.f32.vlgmr.msrb.gmra.mxu3 %v720_v46  ;;  %v1434_v26 = vld [vmem:[%s13897_s2 + $0x80] sm:$0xff] }
 0x18f   :  { %1506 = vmatpush.msra.mxu1 %v1463_v62  ;;  %1546 = vmatpush.msra.mxu3 %v1465_v51  ;;  %v1022_v7 = vadd.f32 %v8249_v4, %v1021_v13  ;;  %v1478_v62 = vld [vmem:[%s13897_s2 + $0x1e0] sm:$0xff]  ;;  %v1480_v51 = vld [vmem:[%s13897_s2 + $0x1f0] sm:$0xff] }
 0x190   :  { %v6560_v33 = vpop.eup %6559  ;;  %v1411_v13 = vld [vmem:[%s13898_s1 + $0x10] sm:$0xff] }
 0x191   :  { %v980_v56 = vmul.f32 %v6560_v33, %v8207_v39  ;;  %1507 = vmatpush.msra.mxu1 %v1459_v18  ;;  %1547 = vmatpush.msra.mxu3 %v1461_v29  ;;  %vm985_vm13 = vweird.f32 %v6560_v33  ;;  %v6562_v24 = vpop.eup %6561  ;;  %v1027_v39 = vand.u32 2147483647, %v8187_v2  ;;  %v1026_v43 = vsel %vm1025_vm5, %v8249_v4, %v1022_v7  ;;  %v1421_v2 = vld [vmem:[%s13897_s2 + $0x18] sm:$0xff]  ;;  %v1470_v29 = vld [vmem:[%s13897_s2 + $0x1a0] sm:$0xff]  ;;  %v1472_v4 = vld [vmem:[%s13897_s2 + $0x1b0] sm:$0xff] }
 0x192   :  { %vm986_vm1 = vmor %vm984_vm14, %vm985_vm13  ;;  %v1412_v18 = vld [vmem:[%s13898_s1 + $0x18] sm:$0xff]  ;;  %v1840_v7 = vld [vmem:[%s13899_s4 + $0x388] sm:$0xff] }
 0x193   :  { %v981_v34 = vsub.f32 1.0, %v980_v56  ;;  %1508 = vmatpush.msra.mxu1 %v1455_v19  ;;  %1548 = vmatpush.msra.mxu3 %v1457_v55  ;;  %vm1028_vm6 = vcmp.eq.f32.partialorder %v1027_v39, 8.507059e+37  ;;  %v1462_v19 = vld [vmem:[%s13897_s2 + $0x160] sm:$0xff]  ;;  %v1464_v55 = vld [vmem:[%s13897_s2 + $0x170] sm:$0xff]  ;;  %v1832_v39 = vld [vmem:[%s13899_s4 + $0x348] sm:$0xff] }
 0x194   :  { %v1031_v48 = vsel %vm1028_vm6, %v1030_v63, %v1026_v43  ;;  %v8391_v56 = vld [vmem:[%s13900_s0 + $0x10] sm:$0xff]  ;;  %v1823_v43 = vld [vmem:[%s13899_s4 + $0x300] sm:$0xff]  ;;  %v1820_v63 = vld [vmem:[%s13899_s4 + $0x2e8] sm:$0xff] }
 0x195   :  { %v982_v61 = vmul.f32 %v6560_v33, %v981_v34  ;;  %1509 = vmatpush.msra.mxu1 %v1451_v21  ;;  %1549 = vmatpush.msra.mxu3 %v1453_v10  ;;  %v1456_v21 = vld [vmem:[%s13897_s2 + $0x130] sm:$0xff]  ;;  %v1450_v10 = vld [vmem:[%s13897_s2 + $0x100] sm:$0xff] }
 0x196   :  { %v1452_v34 = vld [vmem:[%s13897_s2 + $0x110] sm:$0xff] }
 0x197   :  { %v983_v0 = vadd.f32 %v6560_v33, %v982_v61  ;;  %1510 = vmatpush.msra.mxu1 %v1447_v53  ;;  %1550 = vmatpush.msra.mxu3 %v1449_v57  ;;  %v1444_v53 = vld [vmem:[%s13897_s2 + $0xd0] sm:$0xff]  ;;  %v1438_v57 = vld [vmem:[%s13897_s2 + $0xa0] sm:$0xff] }
 0x198   :  { %v1440_v61 = vld [vmem:[%s13897_s2 + $0xb0] sm:$0xff] }
 0x199   :  { %v987_v11 = vsel %vm986_vm1, %v6560_v33, %v983_v0  ;;  %1511 = vmatpush.msra.mxu1 %v1443_v22  ;;  %1551 = vmatpush.msra.mxu3 %v1445_v25  ;;  %v1466_v33 = vld [vmem:[%s13897_s2 + $0x180] sm:$0xff]  ;;  %v1428_v25 = vld [vmem:[%s13897_s2 + $0x50] sm:$0xff] }
 0x19a   :  { %v992_v46 = vsel %vm989_vm2, %v991_v3, %v987_v11  ;;  %v1426_v22 = vld [vmem:[%s13897_s2 + $0x40] sm:$0xff]  ;;  %v1424_v3 = vld [vmem:[%s13897_s2 + $0x30] sm:$0xff] }
 0x19b   :  { %v1035_v31 = vmul.f32 %v6562_v24, %v992_v46  ;;  %1512 = vmatpush.msra.mxu1 %v1439_v23  ;;  %1552 = vmatpush.msra.mxu3 %v1441_v36  ;;  %v1422_v0 = vld [vmem:[%s13897_s2 + $0x20] sm:$0xff]  ;;  %v1420_v23 = vld [vmem:[%s13897_s2 + $0x10] sm:$0xff] }
 0x19c   :  { %v1413_v36 = vld [vmem:[%s13898_s1 + $0x20] sm:$0xff]  ;;  %v1415_v11 = vld [vmem:[%s13898_s1 + $0x30] sm:$0xff] }
 0x19d   :  { %v8313_v54 = vadd.f32 %v1035_v31, %v1034_v28  ;;  %1513 = vmatpush.msra.mxu1 %v1435_v49  ;;  %1553 = vmatpush.msra.mxu3 %v1437_v1  ;;  %v1409_v24 = vld [vmem:[%s13898_s1] sm:$0xff]  ;;  %v1852_v49 = vld [vmem:[%s13899_s4 + $0x3e8] sm:$0xff] }
 0x19e   :  { %v1851_v46 = vld [vmem:[%s13899_s4 + $0x3e0] sm:$0xff]  ;;  %v1848_v28 = vld [vmem:[%s13899_s4 + $0x3c8] sm:$0xff] }
 0x19f   :  { %6563 = vtanh.f32 %v8313_v54  ;;  %1514 = vmatpush.msra.mxu1 %v1431_v32  ;;  %1554 = vmatpush.msra.mxu3 %v1433_v5  ;;  %v1847_v1 = vld [vmem:[%s13899_s4 + $0x3c0] sm:$0xff]  ;;  %v1844_v32 = vld [vmem:[%s13899_s4 + $0x3a8] sm:$0xff] }
 0x1a0   :  { %v1843_v31 = vld [vmem:[%s13899_s4 + $0x3a0] sm:$0xff] }
 0x1a1   :  { %1515 = vmatpush.msra.mxu1 %v1427_v35  ;;  %1555 = vmatpush.msra.mxu3 %v1429_v50  ;;  %v1839_v5 = vld [vmem:[%s13899_s4 + $0x380] sm:$0xff]  ;;  %v1836_v50 = vld [vmem:[%s13899_s4 + $0x368] sm:$0xff] }
 0x1a2   :  { %v1835_v35 = vld [vmem:[%s13899_s4 + $0x360] sm:$0xff] }
 0x1a3   :  { %1516 = vmatpush.msra.mxu1 %v1423_v40  ;;  %1556 = vmatpush.msra.mxu3 %v1425_v12  ;;  %v1827_v40 = vld [vmem:[%s13899_s4 + $0x320] sm:$0xff]  ;;  %v1828_v12 = vld [vmem:[%s13899_s4 + $0x328] sm:$0xff] }
 0x1a5   :  { %v6564_v47 = vpop.eup %6563  ;;  %1517 = vmatpush.msra.mxu1 %v1419_v44  ;;  %1557 = vmatpush.msra.mxu3 %v1421_v2  ;;  %v1824_v44 = vld [vmem:[%s13899_s4 + $0x308] sm:$0xff]  ;;  %v1819_v2 = vld [vmem:[%s13899_s4 + $0x2e0] sm:$0xff] }
 0x1a6   :  { %v8346_v16 = vmul.f32 %v6564_v47, %v1031_v48  ;;  %v1811_v47 = vld [vmem:[%s13899_s4 + $0x2a0] sm:$0xff]  ;;  %v1812_v48 = vld [vmem:[%s13899_s4 + $0x2a8] sm:$0xff] }
 0x1a7   :  { %1599 = vmatpush.msrb.mxu1 %v1414_v58  ;;  %1639 = vmatpush.msrb.mxu3 %v1416_v15  ;;  %v1815_v58 = vld [vmem:[%s13899_s4 + $0x2c0] sm:$0xff]  ;;  %v1816_v15 = vld [vmem:[%s13899_s4 + $0x2c8] sm:$0xff] }
 0x1a8   :  { %1197 = vmatmul.f32.vlgmr.msra.gmra.mxu0 %v8346_v16  ;;  %1237 = vmatmul.f32.vlgmr.msra.gmra.mxu2 %v8346_v16 }
 0x1a9   :  { %1482 = vmatpush.msra.mxu0 %v1478_v62  ;;  %1518 = vmatmul.f32.vlgmr.msra.gmra.mxu1 %v8346_v16  ;;  %v1808_v62 = vld [vmem:[%s13899_s4 + $0x288] sm:$0xff] }
 0x1aa   :  { %1522 = vmatpush.msra.mxu2 %v1480_v51  ;;  %1558 = vmatmul.f32.vlgmr.msra.gmra.mxu3 %v8346_v16 }
 0x1ab   :  { %1483 = vmatpush.msra.mxu0 %v1474_v52  ;;  %1600 = vmatpush.msrb.mxu1 %v1410_v17  ;;  %v1803_v52 = vld [vmem:[%s13899_s4 + $0x260] sm:$0xff]  ;;  %v1804_v17 = vld [vmem:[%s13899_s4 + $0x268] sm:$0xff] }
 0x1ac   :  { %1523 = vmatpush.msra.mxu2 %v1476_v27  ;;  %1640 = vmatpush.msrb.mxu3 %v1412_v18  ;;  %v1799_v27 = vld [vmem:[%s13899_s4 + $0x240] sm:$0xff]  ;;  %v1800_v18 = vld [vmem:[%s13899_s4 + $0x248] sm:$0xff] }
 0x1ad   :  { %1484 = vmatpush.msra.mxu0 %v1470_v29  ;;  %1885 = vmatpush.msra.mxu1 %v1851_v46  ;;  %v1795_v29 = vld [vmem:[%s13899_s4 + $0x220] sm:$0xff] }
 0x1ae   :  { %1524 = vmatpush.msra.mxu2 %v1472_v4  ;;  %1925 = vmatpush.msra.mxu3 %v1852_v49  ;;  %v1796_v4 = vld [vmem:[%s13899_s4 + $0x228] sm:$0xff]  ;;  %v1767_v46 = vld [vmem:[%s13899_s4 + $0x140] sm:$0xff] }
 0x1af   :  { %1485 = vmatpush.msra.mxu0 %v1466_v33  ;;  %1886 = vmatpush.msra.mxu1 %v1847_v1  ;;  %v8576_v33 = vld [vmem:[%s13902_s5] sm:$0xf]  ;;  %v1768_v49 = vld [vmem:[%s13899_s4 + $0x148] sm:$0xff]  ;;  %v1833_v1 = vld [vmem:[%s13899_s4 + $0x350] sm:$0xff] }
 0x1b0   :  { %1525 = vmatpush.msra.mxu2 %v1468_v30  ;;  %1277 = vmatmul.f32.vlgmr.msrb.gmra.mxu0 %v8346_v16  ;;  %v1791_v30 = vld [vmem:[%s13899_s4 + $0x200] sm:$0xff] }
 0x1b1   :  { %1317 = vmatmul.f32.vlgmr.msrb.gmra.mxu2 %v8346_v16  ;;  %1486 = vmatpush.msra.mxu0 %v1462_v19  ;;  %v1792_v19 = vld [vmem:[%s13899_s4 + $0x208] sm:$0xff] }
 0x1b2   :  { %1526 = vmatpush.msra.mxu2 %v1464_v55  ;;  %6451 = vmatmul.msk.f32.vlgmr.msrb.gmra.mxu1 %vm193_vm0, %v8391_v56  ;;  %v1787_v55 = vld [vmem:[%s13899_s4 + $0x1e0] sm:$0xff] }
 0x1b3   :  { %6453 = vmatmul.msk.f32.vlgmr.msrb.gmra.mxu3 %vm193_vm0, %v8391_v56  ;;  %1487 = vmatpush.msra.mxu0 %v1458_v20  ;;  %v1853_v20 = vld [vmem:[%s13899_s4 + $0x3f0] sm:$0xff] }
 0x1b4   :  { %1527 = vmatpush.msra.mxu2 %v1460_v37  ;;  %1926 = vmatpush.msra.mxu3 %v1848_v28  ;;  %v1854_v37 = vld [vmem:[%s13899_s4 + $0x3f8] sm:$0xff] }
 0x1b5   :  { %1488 = vmatpush.msra.mxu0 %v1454_v45  ;;  %1887 = vmatpush.msra.mxu1 %v1843_v31  ;;  %v1834_v31 = vld [vmem:[%s13899_s4 + $0x358] sm:$0xff] }
 0x1b6   :  { %1528 = vmatpush.msra.mxu2 %v1456_v21  ;;  %1927 = vmatpush.msra.mxu3 %v1844_v32  ;;  %v1783_v21 = vld [vmem:[%s13899_s4 + $0x1c0] sm:$0xff] }
 0x1b7   :  { %1489 = vmatpush.msra.mxu0 %v1450_v10  ;;  %1888 = vmatpush.msra.mxu1 %v1839_v5  ;;  %v1784_v10 = vld [vmem:[%s13899_s4 + $0x1c8] sm:$0xff]  ;;  %v1763_v5 = vld [vmem:[%s13899_s4 + $0x120] sm:$0xff] }
 0x1b8   :  { %1529 = vmatpush.msra.mxu2 %v1452_v34  ;;  %1928 = vmatpush.msra.mxu3 %v1840_v7  ;;  %v1849_v34 = vld [vmem:[%s13899_s4 + $0x3d0] sm:$0xff]  ;;  %v1764_v7 = vld [vmem:[%s13899_s4 + $0x128] sm:$0xff] }
 0x1b9   :  { %1490 = vmatpush.msra.mxu0 %v1446_v59  ;;  %1889 = vmatpush.msra.mxu1 %v1835_v35  ;;  %v1829_v35 = vld [vmem:[%s13899_s4 + $0x330] sm:$0xff] }
 0x1ba   :  { %1530 = vmatpush.msra.mxu2 %v1448_v38  ;;  %1929 = vmatpush.msra.mxu3 %v1836_v50  ;;  %v1173_v38 = vperm.slane %v8576_v33, 0 }
 0x1bb   :  { %1491 = vmatpush.msra.mxu0 %v1442_v60  ;;  %1890 = vmatpush.msra.mxu1 %v1831_v8  ;;  %v1850_v60 = vld [vmem:[%s13899_s4 + $0x3d8] sm:$0xff] }
 0x1bc   :  { %1531 = vmatpush.msra.mxu2 %v1444_v53  ;;  %1930 = vmatpush.msra.mxu3 %v1832_v39  ;;  %v1779_v53 = vld [vmem:[%s13899_s4 + $0x1a0] sm:$0xff]  ;;  %v1830_v39 = vld [vmem:[%s13899_s4 + $0x338] sm:$0xff] }
 0x1bd   :  { %1492 = vmatpush.msra.mxu0 %v1438_v57  ;;  %1891 = vmatpush.msra.mxu1 %v1827_v40  ;;  %v1780_v57 = vld [vmem:[%s13899_s4 + $0x1a8] sm:$0xff]  ;;  %v1759_v40 = vld [vmem:[%s13899_s4 + $0x100] sm:$0xff] }
 0x1be   :  { %1532 = vmatpush.msra.mxu2 %v1440_v61  ;;  %1931 = vmatpush.msra.mxu3 %v1828_v12  ;;  %v1845_v61 = vld [vmem:[%s13899_s4 + $0x3b0] sm:$0xff]  ;;  %v1760_v12 = vld [vmem:[%s13899_s4 + $0x108] sm:$0xff] }
 0x1bf   :  { %1493 = vmatpush.msra.mxu0 %v1434_v26  ;;  %1892 = vmatpush.msra.mxu1 %v1823_v43  ;;  %v1846_v26 = vld [vmem:[%s13899_s4 + $0x3b8] sm:$0xff]  ;;  %v1825_v43 = vld [vmem:[%s13899_s4 + $0x310] sm:$0xff] }
 0x1c0   :  { %1533 = vmatpush.msra.mxu2 %v1436_v6  ;;  %1932 = vmatpush.msra.mxu3 %v1824_v44 }
 0x1c1   :  { %1494 = vmatpush.msra.mxu0 %v1430_v9  ;;  %1893 = vmatpush.msra.mxu1 %v1819_v2  ;;  %v1775_v9 = vld [vmem:[%s13899_s4 + $0x180] sm:$0xff]  ;;  %v1826_v2 = vld [vmem:[%s13899_s4 + $0x318] sm:$0xff] }
 0x1c2   :  { %1534 = vmatpush.msra.mxu2 %v1432_v14  ;;  %1933 = vmatpush.msra.mxu3 %v1820_v63  ;;  %v1776_v14 = vld [vmem:[%s13899_s4 + $0x188] sm:$0xff]  ;;  %v1755_v63 = vld [vmem:[%s13899_s4 + $0xe0] sm:$0xff] }
 0x1c3   :  { %1495 = vmatpush.msra.mxu0 %v1426_v22  ;;  %1894 = vmatpush.msra.mxu1 %v1815_v58  ;;  %v1841_v22 = vld [vmem:[%s13899_s4 + $0x390] sm:$0xff]  ;;  %v1756_v58 = vld [vmem:[%s13899_s4 + $0xe8] sm:$0xff] }
 0x1c4   :  { %1535 = vmatpush.msra.mxu2 %v1428_v25  ;;  %1934 = vmatpush.msra.mxu3 %v1816_v15  ;;  %v1821_v15 = vld [vmem:[%s13899_s4 + $0x2f0] sm:$0xff] }
 0x1c5   :  { %1496 = vmatpush.msra.mxu0 %v1422_v0  ;;  %1895 = vmatpush.msra.mxu1 %v1811_v47  ;;  %v1842_v0 = vld [vmem:[%s13899_s4 + $0x398] sm:$0xff] }
 0x1c6   :  { %1536 = vmatpush.msra.mxu2 %v1424_v3  ;;  %1935 = vmatpush.msra.mxu3 %v1812_v48  ;;  %v1771_v3 = vld [vmem:[%s13899_s4 + $0x160] sm:$0xff]  ;;  %v1822_v48 = vld [vmem:[%s13899_s4 + $0x2f8] sm:$0xff] }
 0x1c7   :  { %1497 = vmatpush.msra.mxu0 %v1418_v42  ;;  %v1772_v42 = vld [vmem:[%s13899_s4 + $0x168] sm:$0xff] }
 0x1c8   :  { %1537 = vmatpush.msra.mxu2 %v1420_v23  ;;  %1498 = vmatmul.f32.vlgmr.msra.gmra.mxu0 %v8346_v16  ;;  %v1837_v23 = vld [vmem:[%s13899_s4 + $0x370] sm:$0xff] }
 0x1c9   :  { %1538 = vmatmul.f32.vlgmr.msra.gmra.mxu2 %v8346_v16  ;;  %1579 = vmatpush.msrb.mxu0 %v1413_v36  ;;  %v1807_v16 = vld [vmem:[%s13899_s4 + $0x280] sm:$0xff] }
 0x1ca   :  { %1619 = vmatpush.msrb.mxu2 %v1415_v11  ;;  %1896 = vmatpush.msra.mxu1 %v1807_v16  ;;  %v1174_v11 = vperm.slane %v8576_v33, 1  ;;  %v1751_v16 = vld [vmem:[%s13899_s4 + $0xc0] sm:$0xff] }
 0x1cb   :  { %1580 = vmatpush.msrb.mxu0 %v1409_v24  ;;  %1936 = vmatpush.msra.mxu3 %v1808_v62  ;;  %v1838_v24 = vld [vmem:[%s13899_s4 + $0x378] sm:$0xff]  ;;  %v1752_v62 = vld [vmem:[%s13899_s4 + $0xc8] sm:$0xff] }
 0x1cc   :  { %1620 = vmatpush.msrb.mxu2 %v1411_v13  ;;  %1897 = vmatpush.msra.mxu1 %v1803_v52 }
 0x1cd   :  { %1937 = vmatpush.msra.mxu3 %v1804_v17  ;;  %1865 = vmatpush.msra.mxu0 %v1787_v55  ;;  %v8712_v17 = vld [vmem:[%s13901_s3] sm:$0xf]  ;;  %v1813_v55 = vld [vmem:[%s13899_s4 + $0x2b0] sm:$0xff] }
 0x1ce   :  { %1898 = vmatpush.msra.mxu1 %v1799_v27  ;;  %v1176_v27 = vperm.slane %v8576_v33, 3 }
 0x1cf   :  { %1938 = vmatpush.msra.mxu3 %v1800_v18  ;;  %1866 = vmatpush.msra.mxu0 %v1783_v21  ;;  %v1818_v18 = vld [vmem:[%s13899_s4 + $0x2d8] sm:$0xff]  ;;  %v1743_v21 = vld [vmem:[%s13899_s4 + $0x80] sm:$0xff] }
 0x1d0   :  { %6450 = vmatmul.msk.f32.vlgmr.msrb.gmra.mxu0 %vm193_vm0, %v8391_v56  ;;  %1899 = vmatpush.msra.mxu1 %v1795_v29 }
 0x1d1   :  { %6452 = vmatmul.msk.f32.vlgmr.msrb.gmra.mxu2 %vm193_vm0, %v8391_v56  ;;  %1939 = vmatpush.msra.mxu3 %v1796_v4  ;;  %v1788_v56 = vld [vmem:[%s13899_s4 + $0x1e8] sm:$0xff] }
 0x1d2   :  { %1900 = vmatpush.msra.mxu1 %v1791_v30  ;;  %1905 = vmatpush.msra.mxu2 %v1788_v56  ;;  %v1747_v30 = vld [vmem:[%s13899_s4 + $0xa0] sm:$0xff] }
 0x1d3   :  { %1940 = vmatpush.msra.mxu3 %v1792_v19  ;;  %1867 = vmatpush.msra.mxu0 %v1779_v53  ;;  %v1748_v19 = vld [vmem:[%s13899_s4 + $0xa8] sm:$0xff]  ;;  %v1810_v53 = vld [vmem:[%s13899_s4 + $0x298] sm:$0xff] }
 0x1d4   :  { %1965 = vmatpush.msrb.mxu1 %v1853_v20  ;;  %1906 = vmatpush.msra.mxu2 %v1784_v10  ;;  %v1744_v10 = vld [vmem:[%s13899_s4 + $0x88] sm:$0xff] }
 0x1d5   :  { %2005 = vmatpush.msrb.mxu3 %v1854_v37  ;;  %1868 = vmatpush.msra.mxu0 %v1775_v9  ;;  %v1814_v37 = vld [vmem:[%s13899_s4 + $0x2b8] sm:$0xff]  ;;  %v1175_v9 = vperm.slane %v8576_v33, 2  ;;  %v1736_v33 = vld [vmem:[%s13899_s4 + $0x48] sm:$0xff] }
 0x1d6   :  { %1966 = vmatpush.msrb.mxu1 %v1849_v34  ;;  %1907 = vmatpush.msra.mxu2 %v1780_v57  ;;  %v1809_v34 = vld [vmem:[%s13899_s4 + $0x290] sm:$0xff]  ;;  %v1739_v57 = vld [vmem:[%s13899_s4 + $0x60] sm:$0xff] }
 0x1d7   :  { %2006 = vmatpush.msrb.mxu3 %v1850_v60  ;;  %1869 = vmatpush.msra.mxu0 %v1771_v3  ;;  %v1735_v3 = vld [vmem:[%s13899_s4 + $0x40] sm:$0xff] }
 0x1d8   :  { %1967 = vmatpush.msrb.mxu1 %v1845_v61  ;;  %1908 = vmatpush.msra.mxu2 %v1776_v14  ;;  %v1740_v61 = vld [vmem:[%s13899_s4 + $0x68] sm:$0xff] }
 0x1d9   :  { %2007 = vmatpush.msrb.mxu3 %v1846_v26  ;;  %1870 = vmatpush.msra.mxu0 %v1767_v46  ;;  %v1805_v26 = vld [vmem:[%s13899_s4 + $0x270] sm:$0xff]  ;;  %v1732_v46 = vld [vmem:[%s13899_s4 + $0x28] sm:$0xff] }
 0x1da   :  { %1968 = vmatpush.msrb.mxu1 %v1841_v22  ;;  %1909 = vmatpush.msra.mxu2 %v1772_v42  ;;  %v1806_v22 = vld [vmem:[%s13899_s4 + $0x278] sm:$0xff]  ;;  %v1801_v42 = vld [vmem:[%s13899_s4 + $0x250] sm:$0xff] }
 0x1db   :  { %2008 = vmatpush.msrb.mxu3 %v1842_v0  ;;  %1871 = vmatpush.msra.mxu0 %v1763_v5 }
 0x1dc   :  { %1969 = vmatpush.msrb.mxu1 %v1837_v23  ;;  %1910 = vmatpush.msra.mxu2 %v1768_v49  ;;  %v1797_v49 = vld [vmem:[%s13899_s4 + $0x230] sm:$0xff] }
 0x1dd   :  { %2009 = vmatpush.msrb.mxu3 %v1838_v24  ;;  %1872 = vmatpush.msra.mxu0 %v1759_v40  ;;  %v1789_v40 = vld [vmem:[%s13899_s4 + $0x1f0] sm:$0xff] }
 0x1de   :  { %1970 = vmatpush.msrb.mxu1 %v1833_v1  ;;  %1911 = vmatpush.msra.mxu2 %v1764_v7 }
 0x1df   :  { %2010 = vmatpush.msrb.mxu3 %v1834_v31  ;;  %1873 = vmatpush.msra.mxu0 %v1755_v63  ;;  %v1798_v31 = vld [vmem:[%s13899_s4 + $0x238] sm:$0xff] }
 0x1e0   :  { %1971 = vmatpush.msrb.mxu1 %v1829_v35  ;;  %1912 = vmatpush.msra.mxu2 %v1760_v12  ;;  %v1727_v35 = vld [vmem:[%s13899_s4] sm:$0xff]  ;;  %v1790_v12 = vld [vmem:[%s13899_s4 + $0x1f8] sm:$0xff] }
 0x1e1   :  { %2011 = vmatpush.msrb.mxu3 %v1830_v39  ;;  %1874 = vmatpush.msra.mxu0 %v1751_v16  ;;  %v1794_v39 = vld [vmem:[%s13899_s4 + $0x218] sm:$0xff] }
 0x1e2   :  { %1972 = vmatpush.msrb.mxu1 %v1825_v43  ;;  %1913 = vmatpush.msra.mxu2 %v1756_v58  ;;  %v1650_v58 = vperm.slane %v8712_v17, 3 }
 0x1e3   :  { %2012 = vmatpush.msrb.mxu3 %v1826_v2  ;;  %1875 = vmatpush.msra.mxu0 %v1747_v30 }
 0x1e4   :  { %1973 = vmatpush.msrb.mxu1 %v1821_v15  ;;  %1914 = vmatpush.msra.mxu2 %v1752_v62  ;;  %v1785_v15 = vld [vmem:[%s13899_s4 + $0x1d0] sm:$0xff] }
 0x1e5   :  { %2013 = vmatpush.msrb.mxu3 %v1822_v48  ;;  %1876 = vmatpush.msra.mxu0 %v1743_v21 }
 0x1e6   :  { %1915 = vmatpush.msra.mxu2 %v1748_v19  ;;  %v1742_v19 = vld [vmem:[%s13899_s4 + $0x78] sm:$0xff] }
 0x1e7   :  { %2014 = vmatpush.msrb.mxu3 %v1818_v18  ;;  %1877 = vmatpush.msra.mxu0 %v1739_v57 }
 0x1e8   :  { %1916 = vmatpush.msra.mxu2 %v1744_v10 }
 0x1e9   :  { %2015 = vmatpush.msrb.mxu3 %v1814_v37  ;;  %1878 = vmatpush.msra.mxu0 %v1735_v3 }
 0x1ea   :  { %1917 = vmatpush.msra.mxu2 %v1740_v61 }
 0x1eb   :  { %2016 = vmatpush.msrb.mxu3 %v1810_v53 }
 0x1ec   :  { %1918 = vmatpush.msra.mxu2 %v1736_v33  ;;  %v1765_v33 = vld [vmem:[%s13899_s4 + $0x130] sm:$0xff] }
 0x1ed   :  { %2017 = vmatpush.msrb.mxu3 %v1806_v22 }
 0x1ee   :  { %1919 = vmatpush.msra.mxu2 %v1732_v46  ;;  %v1761_v46 = vld [vmem:[%s13899_s4 + $0x110] sm:$0xff] }
 0x203   :  { %v1218_v51 = vpop.f32.mrf.mxu1 }
 0x209   :  { %v1258_v59 = vpop.f32.mrf.mxu3 }
 0x20b   :  { %v8596_v45 = vpop.f32.mrf.mxu1 }
 0x211   :  { %v8671_v50 = vpop.f32.mrf.mxu3 }
 0x225   :  { %v1198_v6 = vpop.f32.mrf.mxu0 }
 0x226   :  { %v1199_v25 = vadd.f32 %v1198_v6, %v1173_v38  ;;  %v8648_v13 = vpop.f32.mrf.mxu1  ;;  %v1648_v38 = vperm.slane %v8712_v17, 1 }
 0x228   :  { %v1219_v36 = vadd.f32 %v1218_v51, %v1199_v25  ;;  %v1817_v51 = vld [vmem:[%s13899_s4 + $0x2d0] sm:$0xff] }
 0x229   :  { %1974 = vmatpush.msrb.mxu1 %v1817_v51 }
 0x22a   :  { %v6446_v28 = vmul.f32 -1.442695, %v1219_v36 }
 0x22b   :  { %v1238_v32 = vpop.f32.mrf.mxu2  ;;  %1975 = vmatpush.msrb.mxu1 %v1813_v55 }
 0x22c   :  { %6565 = vpow2.f32 %v6446_v28  ;;  %v1239_v8 = vadd.f32 %v1238_v32, %v1174_v11  ;;  %v1802_v11 = vld [vmem:[%s13899_s4 + $0x258] sm:$0xff] }
 0x22d   :  { %v8729_v56 = vpop.f32.mrf.mxu3  ;;  %1976 = vmatpush.msrb.mxu1 %v1809_v34  ;;  %v1278_v0 = vpop.f32.mrf.mxu0  ;;  %2018 = vmatpush.msrb.mxu3 %v1802_v11 }
 0x22e   :  { %v1259_v44 = vadd.f32 %v1258_v59, %v1239_v8  ;;  %v1279_v28 = vadd.f32 %v1278_v0, %v1175_v9  ;;  %v1793_v8 = vld [vmem:[%s13899_s4 + $0x210] sm:$0xff] }
 0x22f   :  { %v1602_v4 = vpop.f32.mrf.mxu1  ;;  %1977 = vmatpush.msrb.mxu1 %v1805_v26  ;;  %2019 = vmatpush.msrb.mxu3 %v1798_v31  ;;  %v1769_v26 = vld [vmem:[%s13899_s4 + $0x150] sm:$0xff] }
 0x230   :  { %v6447_v47 = vmul.f32 -1.442695, %v1259_v44  ;;  %v1603_v59 = vadd.f32 %v1602_v4, %v8648_v13  ;;  %v1731_v13 = vld [vmem:[%s13899_s4 + $0x20] sm:$0xff]  ;;  %v1299_v43 = vadd.f32 %v8596_v45, %v1279_v28  ;;  %v1757_v31 = vld [vmem:[%s13899_s4 + $0xf0] sm:$0xff] }
 0x231   :  { %1978 = vmatpush.msrb.mxu1 %v1801_v42  ;;  %1879 = vmatpush.msra.mxu0 %v1731_v13  ;;  %v1766_v42 = vld [vmem:[%s13899_s4 + $0x138] sm:$0xff] }
 0x232   :  { %v6566_v52 = vpop.eup %6565  ;;  %6567 = vpow2.f32 %v6447_v47  ;;  %v1656_v23 = vadd.f32 %v1648_v38, %v1603_v59  ;;  %2020 = vmatpush.msrb.mxu3 %v1794_v39  ;;  %v1786_v47 = vld [vmem:[%s13899_s4 + $0x1d8] sm:$0xff]  ;;  %v1773_v59 = vld [vmem:[%s13899_s4 + $0x170] sm:$0xff] }
 0x233   :  { %v8718_v29 = vadd.f32 1.0, %v6566_v52  ;;  %1979 = vmatpush.msrb.mxu1 %v1797_v49  ;;  %1880 = vmatpush.msra.mxu0 %v1727_v35  ;;  %v1781_v52 = vld [vmem:[%s13899_s4 + $0x1b0] sm:$0xff]  ;;  %v1774_v38 = vld [vmem:[%s13899_s4 + $0x178] sm:$0xff] }
 0x234   :  { %v1318_v20 = vpop.f32.mrf.mxu2  ;;  %v6455_v5 = vmul.f32 -1.442695, %v1656_v23  ;;  %v1762_v49 = vld [vmem:[%s13899_s4 + $0x118] sm:$0xff] }
 0x235   :  { %6569 = vrcp.f32 %v8718_v29  ;;  %v1319_v60 = vadd.f32 %v1318_v20, %v1176_v27  ;;  %1980 = vmatpush.msrb.mxu1 %v1793_v8  ;;  %1945 = vmatpush.msrb.mxu0 %v1789_v40  ;;  %v1356_v62 = vand.u32 2147483648, %v8718_v29  ;;  %v1782_v27 = vld [vmem:[%s13899_s4 + $0x1b8] sm:$0xff]  ;;  %vm1350_vm8 = vweird.f32 %v8718_v29  ;;  %v1777_v20 = vld [vmem:[%s13899_s4 + $0x190] sm:$0xff] }
 0x236   :  { %v1642_v7 = vpop.f32.mrf.mxu3  ;;  %v1354_v4 = vand.u32 2147483647, %v8718_v29  ;;  %v1753_v8 = vld [vmem:[%s13899_s4 + $0xd0] sm:$0xff]  ;;  %v1754_v39 = vld [vmem:[%s13899_s4 + $0xd8] sm:$0xff] }
 0x237   :  { %v1339_v14 = vadd.f32 %v8671_v50, %v1319_v60  ;;  %v1728_v50 = vld [vmem:[%s13899_s4 + $0x8] sm:$0xff]  ;;  %v1643_v63 = vadd.f32 %v1642_v7, %v8729_v56  ;;  %1946 = vmatpush.msrb.mxu0 %v1785_v15  ;;  %v1357_v34 = vor.u32 1.1754944e-38, %v1356_v62 }
 0x238   :  { %v6568_v6 = vpop.eup %6567  ;;  %1920 = vmatpush.msra.mxu2 %v1728_v50  ;;  %vm1355_vm12 = vcmp.eq.f32.partialorder %v1354_v4, 8.507059e+37 }
 0x239   :  { %v8763_v25 = vadd.f32 1.0, %v6568_v6  ;;  %v6448_v36 = vmul.f32 -1.442695, %v1339_v14  ;;  %v1658_v55 = vadd.f32 %v1650_v58, %v1643_v63  ;;  %1947 = vmatpush.msrb.mxu0 %v1781_v52  ;;  %v1770_v6 = vld [vmem:[%s13899_s4 + $0x158] sm:$0xff]  ;;  %v2163_v52 = vld [vmem:[%s13897_s2 + $0x1e8] sm:$0xff] }
 0x23a   :  { %1985 = vmatpush.msrb.mxu2 %v1790_v12 }
 0x23b   :  { %v8777_v24 = vpop.eup %6569  ;;  %6571 = vrcp.f32 %v8763_v25  ;;  %v1375_v30 = vand.u32 2147483648, %v8763_v25  ;;  %v1373_v10 = vand.u32 2147483647, %v8763_v25  ;;  %1948 = vmatpush.msrb.mxu0 %v1777_v20  ;;  %vm1369_vm11 = vweird.f32 %v8763_v25 }
 0x23c   :  { %v1346_v1 = vmul.f32 %v8777_v24, %v8718_v29  ;;  %6573 = vpow2.f32 %v6448_v36  ;;  %vm1351_vm7 = vweird.f32 %v8777_v24  ;;  %1986 = vmatpush.msrb.mxu2 %v1786_v47  ;;  %v1778_v29 = vld [vmem:[%s13899_s4 + $0x198] sm:$0xff]  ;;  %v6456_v22 = vmul.f32 -1.442695, %v1658_v55  ;;  %v2159_v55 = vld [vmem:[%s13897_s2 + $0x1c8] sm:$0xff] }
 0x23d   :  { %6575 = vpow2.f32 %v6455_v5  ;;  %vm8837_vm9 = vmor %vm1350_vm8, %vm1351_vm7  ;;  %v1376_v57 = vor.u32 1.1754944e-38, %v1375_v30  ;;  %1949 = vmatpush.msrb.mxu0 %v1773_v59  ;;  %vm1374_vm14 = vcmp.eq.f32.partialorder %v1373_v10, 8.507059e+37  ;;  %v1741_v30 = vld [vmem:[%s13899_s4 + $0x70] sm:$0xff]  ;;  %v2155_v10 = vld [vmem:[%s13897_s2 + $0x1a8] sm:$0xff] }
 0x23e   :  { %v1347_v32 = vsub.f32 1.0, %v1346_v1  ;;  %6577 = vtanh.f32 %v1299_v43  ;;  %1987 = vmatpush.msrb.mxu2 %v1782_v27  ;;  %v2165_v27 = vld [vmem:[%s13897_s2 + $0x1f8] sm:$0xff] }
 0x23f   :  { %1950 = vmatpush.msrb.mxu0 %v1769_v26 }
 0x240   :  { %v1348_v44 = vmul.f32 %v8777_v24, %v1347_v32  ;;  %1988 = vmatpush.msrb.mxu2 %v1778_v29  ;;  %v1758_v32 = vld [vmem:[%s13899_s4 + $0xf8] sm:$0xff]  ;;  %v1737_v29 = vld [vmem:[%s13899_s4 + $0x50] sm:$0xff] }
 0x241   :  { %v6572_v2 = vpop.eup %6571  ;;  %1951 = vmatpush.msrb.mxu0 %v1765_v33  ;;  %v2145_v33 = vld [vmem:[%s13897_s2 + $0x158] sm:$0xff] }
 0x242   :  { %v6574_v45 = vpop.eup %6573  ;;  %v1365_v48 = vmul.f32 %v6572_v2, %v8763_v25  ;;  %v1349_v16 = vadd.f32 %v8777_v24, %v1348_v44  ;;  %vm1370_vm10 = vweird.f32 %v6572_v2  ;;  %1989 = vmatpush.msrb.mxu2 %v1774_v38  ;;  %v1749_v44 = vld [vmem:[%s13899_s4 + $0xb0] sm:$0xff] }
 0x243   :  { %v8826_v51 = vadd.f32 1.0, %v6574_v45  ;;  %v6576_v60 = vpop.eup %6575  ;;  %vm1371_vm13 = vmor %vm1369_vm11, %vm1370_vm10  ;;  %1952 = vmatpush.msrb.mxu0 %v1761_v46  ;;  %v1745_v45 = vld [vmem:[%s13899_s4 + $0x90] sm:$0xff] }
 0x244   :  { %v1366_v18 = vsub.f32 1.0, %v1365_v48  ;;  %v1353_v21 = vsel %vm8837_vm9, %v8777_v24, %v1349_v16  ;;  %v6578_v9 = vpop.eup %6577  ;;  %v8865_v3 = vadd.f32 1.0, %v6576_v60  ;;  %1990 = vmatpush.msrb.mxu2 %v1770_v6  ;;  %v1647_v24 = vperm.slane %v8712_v17, 0  ;;  %v1746_v48 = vld [vmem:[%s13899_s4 + $0x98] sm:$0xff]  ;;  %v1733_v60 = vld [vmem:[%s13899_s4 + $0x30] sm:$0xff] }
 0x245   :  { %6579 = vrcp.f32 %v8826_v51  ;;  %v1499_v56 = vpop.f32.mrf.mxu0  ;;  %v1358_v61 = vsel %vm1355_vm12, %v1357_v34, %v1353_v21  ;;  %v1395_v7 = vand.u32 2147483648, %v8826_v51  ;;  %v1393_v50 = vand.u32 2147483647, %v8826_v51  ;;  %1953 = vmatpush.msrb.mxu0 %v1757_v31  ;;  %v2157_v34 = vld [vmem:[%s13897_s2 + $0x1b8] sm:$0xff] }
 0x246   :  { %v1367_v37 = vmul.f32 %v6572_v2, %v1366_v18  ;;  %v1401_v36 = vmul.f32 %v6578_v9, %v1358_v61  ;;  %1991 = vmatpush.msrb.mxu2 %v1766_v42  ;;  %6581 = vpow2.f32 %v6456_v22  ;;  %vm1389_vm1 = vweird.f32 %v8826_v51  ;;  %v2153_v61 = vld [vmem:[%s13897_s2 + $0x198] sm:$0xff]  ;;  %v2147_v9 = vld [vmem:[%s13897_s2 + $0x168] sm:$0xff] }
 0x247   :  { %6583 = vrcp.f32 %v8865_v3  ;;  %1954 = vmatpush.msrb.mxu0 %v1753_v8  ;;  %v1396_v58 = vor.u32 1.1754944e-38, %v1395_v7  ;;  %vm1394_vm3 = vcmp.eq.f32.partialorder %v1393_v50, 8.507059e+37  ;;  %v1649_v6 = vperm.slane %v8712_v17, 2  ;;  %v1730_v17 = vld [vmem:[%s13899_s4 + $0x18] sm:$0xff]  ;;  %v2131_v50 = vld [vmem:[%s13897_s2 + $0xe8] sm:$0xff]  ;;  %v2132_v7 = vld [vmem:[%s13897_s2 + $0xf0] sm:$0xff] }
 0x248   :  { %v1368_v53 = vadd.f32 %v6572_v2, %v1367_v37  ;;  %1992 = vmatpush.msrb.mxu2 %v1762_v49  ;;  %v1738_v37 = vld [vmem:[%s13899_s4 + $0x58] sm:$0xff]  ;;  %v1693_v49 = vand.u32 2147483648, %v8865_v3  ;;  %vm1687_vm5 = vweird.f32 %v8865_v3 }
 0x249   :  { %1955 = vmatpush.msrb.mxu0 %v1749_v44  ;;  %v2137_v31 = vld [vmem:[%s13897_s2 + $0x118] sm:$0xff]  ;;  %v2127_v44 = vld [vmem:[%s13897_s2 + $0xc8] sm:$0xff] }
 0x24a   :  { %v1372_v14 = vsel %vm1371_vm13, %v6572_v2, %v1368_v53  ;;  %1993 = vmatpush.msrb.mxu2 %v1758_v32  ;;  %v1750_v2 = vld [vmem:[%s13899_s4 + $0xb8] sm:$0xff] }
 0x24b   :  { %v6580_v25 = vpop.eup %6579  ;;  %v1377_v0 = vsel %vm1374_vm14, %v1376_v57, %v1372_v14  ;;  %1956 = vmatpush.msrb.mxu0 %v1745_v45  ;;  %v1734_v53 = vld [vmem:[%s13899_s4 + $0x38] sm:$0xff]  ;;  %v2151_v57 = vld [vmem:[%s13897_s2 + $0x188] sm:$0xff] }
 0x24c   :  { %v1400_v23 = vmul.f32 %v1377_v0, %v8145_v41  ;;  %v1385_v11 = vmul.f32 %v6580_v25, %v8826_v51  ;;  %vm1390_vm15 = vweird.f32 %v6580_v25  ;;  %v1539_v40 = vpop.f32.mrf.mxu2  ;;  %1994 = vmatpush.msrb.mxu2 %v1754_v39  ;;  %v6582_v63 = vpop.eup %6581  ;;  %v2149_v14 = vld [vmem:[%s13897_s2 + $0x178] sm:$0xff]  ;;  %v2143_v0 = vld [vmem:[%s13897_s2 + $0x148] sm:$0xff] }
 0x24d   :  { %v1582_v13 = vpop.f32.mrf.mxu0  ;;  %vm1391_vm2 = vmor %vm1389_vm1, %vm1390_vm15  ;;  %v8908_v15 = vpop.eup %6583  ;;  %v8924_v4 = vadd.f32 1.0, %v6582_v63  ;;  %1957 = vmatpush.msrb.mxu0 %v1741_v30  ;;  %v2133_v8 = vld [vmem:[%s13897_s2 + $0xf8] sm:$0xff] }
 0x24e   :  { %v8882_v1 = vadd.f32 %v1401_v36, %v1400_v23  ;;  %v1583_v41 = vadd.f32 %v1582_v13, %v1499_v56  ;;  %v1386_v28 = vsub.f32 1.0, %v1385_v11  ;;  %1995 = vmatpush.msrb.mxu2 %v1750_v2  ;;  %v1683_v18 = vmul.f32 %v8908_v15, %v8865_v3  ;;  %v2161_v56 = vld [vmem:[%s13897_s2 + $0x1d8] sm:$0xff]  ;;  %v2139_v11 = vld [vmem:[%s13897_s2 + $0x128] sm:$0xff] }
 0x24f   :  { %1958 = vmatpush.msrb.mxu0 %v1737_v29  ;;  %vm1688_vm4 = vweird.f32 %v8908_v15  ;;  %v2129_v2 = vld [vmem:[%s13897_s2 + $0xd8] sm:$0xff]  ;;  %vm1707_vm13 = vweird.f32 %v8924_v4 }
 0x250   :  { %v1655_v5 = vadd.f32 %v1647_v24, %v1583_v41  ;;  %6585 = vtanh.f32 %v8882_v1  ;;  %v1387_v35 = vmul.f32 %v6580_v25, %v1386_v28  ;;  %1996 = vmatpush.msrb.mxu2 %v1746_v48  ;;  %v1684_v59 = vsub.f32 1.0, %v1683_v18  ;;  %v2141_v24 = vld [vmem:[%s13897_s2 + $0x138] sm:$0xff]  ;;  %v2135_v28 = vld [vmem:[%s13897_s2 + $0x108] sm:$0xff]  ;;  %vm9008_vm6 = vmor %vm1687_vm5, %vm1688_vm4 }
 0x251   :  { %1959 = vmatpush.msrb.mxu0 %v1733_v60  ;;  %v2125_v45 = vld [vmem:[%s13897_s2 + $0xb8] sm:$0xff] }
 0x252   :  { %v6454_v12 = vmul.f32 -1.442695, %v1655_v5  ;;  %v1388_v43 = vadd.f32 %v6580_v25, %v1387_v35  ;;  %1997 = vmatpush.msrb.mxu2 %v1742_v19  ;;  %v1685_v22 = vmul.f32 %v8908_v15, %v1684_v59  ;;  %v1691_v5 = vand.u32 2147483647, %v8865_v3  ;;  %v2115_v19 = vld [vmem:[%s13897_s2 + $0x68] sm:$0xff]  ;;  %v2113_v29 = vld [vmem:[%s13897_s2 + $0x58] sm:$0xff] }
 0x254   :  { %6587 = vpow2.f32 %v6454_v12  ;;  %v1392_v47 = vsel %vm1391_vm2, %v6580_v25, %v1388_v43  ;;  %v1622_v38 = vpop.f32.mrf.mxu2  ;;  %1998 = vmatpush.msrb.mxu2 %v1738_v37  ;;  %v1729_v25 = vld [vmem:[%s13899_s4 + $0x10] sm:$0xff]  ;;  %v1686_v46 = vadd.f32 %v8908_v15, %v1685_v22  ;;  %v1694_v12 = vor.u32 1.1754944e-38, %v1693_v49  ;;  %v2158_v22 = vld [vmem:[%s13897_s2 + $0x1c0] sm:$0xff] }
 0x255   :  { %v1397_v62 = vsel %vm1394_vm3, %v1396_v58, %v1392_v47  ;;  %6589 = vrcp.f32 %v8924_v4  ;;  %v1623_v26 = vadd.f32 %v1622_v38, %v1539_v40  ;;  %1960 = vmatpush.msrb.mxu0 %v1729_v25  ;;  %vm1692_vm9 = vcmp.eq.f32.partialorder %v1691_v5, 8.507059e+37  ;;  %v2123_v47 = vld [vmem:[%s13897_s2 + $0xa8] sm:$0xff]  ;;  %v2144_v49 = vld [vmem:[%s13897_s2 + $0x150] sm:$0xff]  ;;  %v2130_v5 = vld [vmem:[%s13897_s2 + $0xe0] sm:$0xff] }
 0x256   :  { %v6586_v16 = vpop.eup %6585  ;;  %1999 = vmatpush.msrb.mxu2 %v1734_v53  ;;  %v1690_v40 = vsel %vm9008_vm6, %v8908_v15, %v1686_v46  ;;  %v1713_v37 = vand.u32 2147483648, %v8924_v4  ;;  %v2103_v38 = vld [vmem:[%s13897_s2 + $0x8] sm:$0xff]  ;;  %v2142_v46 = vld [vmem:[%s13897_s2 + $0x140] sm:$0xff] }
 0x257   :  { %v1404_v51 = vmul.f32 %v6586_v16, %v1397_v62  ;;  %v1657_v36 = vadd.f32 %v1649_v6, %v1623_v26  ;;  %v1695_v15 = vsel %vm1692_vm9, %v1694_v12, %v1690_v40  ;;  %v2098_v53 = vld [vmem:[%s13898_s1 + $0x28] sm:$0xff]  ;;  %v2120_v40 = vld [vmem:[%s13897_s2 + $0x90] sm:$0xff]  ;;  %v2114_v12 = vld [vmem:[%s13897_s2 + $0x60] sm:$0xff] }
 0x258   :  { %2000 = vmatpush.msrb.mxu2 %v1730_v17  ;;  %v1718_v18 = vmul.f32 %v1695_v15, %v8313_v54  ;;  %v2111_v54 = vld [vmem:[%s13897_s2 + $0x48] sm:$0xff]  ;;  %v1714_v60 = vor.u32 1.1754944e-38, %v1713_v37  ;;  %v2160_v17 = vld [vmem:[%s13897_s2 + $0x1d0] sm:$0xff]  ;;  %v2102_v15 = vld [vmem:[%s13897_s2] sm:$0xff] }
 0x259   :  { %1901 = vmatmul.f32.vlgmr.msra.gmra.mxu1 %v1404_v51  ;;  %1941 = vmatmul.f32.vlgmr.msra.gmra.mxu3 %v1404_v51  ;;  %v2094_v25 = vld [vmem:[%s13898_s1 + $0x8] sm:$0xff]  ;;  %v2515_v37 = vld [vmem:[%s13899_s4 + $0x340] sm:$0xff] }
 0x25a   :  { %v6588_v20 = vpop.eup %6587  ;;  %2186 = vmatpush.msra.mxu1 %v2163_v52  ;;  %2226 = vmatpush.msra.mxu3 %v2165_v27  ;;  %v2119_v52 = vld [vmem:[%s13897_s2 + $0x88] sm:$0xff]  ;;  %v2121_v27 = vld [vmem:[%s13897_s2 + $0x98] sm:$0xff] }
 0x25b   :  { %v8944_v21 = vadd.f32 1.0, %v6588_v20  ;;  %v8986_v42 = vpop.eup %6589 }
 0x25c   :  { %2187 = vmatpush.msra.mxu1 %v2159_v55  ;;  %2227 = vmatpush.msra.mxu3 %v2161_v56  ;;  %v1703_v41 = vmul.f32 %v8986_v42, %v8924_v4  ;;  %v2117_v55 = vld [vmem:[%s13897_s2 + $0x78] sm:$0xff]  ;;  %vm1708_vm12 = vweird.f32 %v8986_v42 }
 0x25d   :  { %6591 = vrcp.f32 %v8944_v21  ;;  %v1674_v35 = vand.u32 2147483648, %v8944_v21  ;;  %v1672_v3 = vand.u32 2147483647, %v8944_v21  ;;  %vm1668_vm8 = vweird.f32 %v8944_v21  ;;  %vm1709_vm14 = vmor %vm1707_vm13, %vm1708_vm12 }
 0x25e   :  { %2188 = vmatpush.msra.mxu1 %v2155_v10  ;;  %2228 = vmatpush.msra.mxu3 %v2157_v34  ;;  %6593 = vtanh.f32 %v1657_v36  ;;  %v1704_v43 = vsub.f32 1.0, %v1703_v41  ;;  %v2107_v10 = vld [vmem:[%s13897_s2 + $0x28] sm:$0xff]  ;;  %v2109_v34 = vld [vmem:[%s13897_s2 + $0x38] sm:$0xff]  ;;  %v2152_v36 = vld [vmem:[%s13897_s2 + $0x190] sm:$0xff] }
 0x25f   :  { %v1675_v58 = vor.u32 1.1754944e-38, %v1674_v35  ;;  %vm1673_vm11 = vcmp.eq.f32.partialorder %v1672_v3, 8.507059e+37  ;;  %v2138_v41 = vld [vmem:[%s13897_s2 + $0x120] sm:$0xff] }
 0x260   :  { %2189 = vmatpush.msra.mxu1 %v2151_v57  ;;  %2229 = vmatpush.msra.mxu3 %v2153_v61  ;;  %v1705_v62 = vmul.f32 %v8986_v42, %v1704_v43  ;;  %v2100_v57 = vld [vmem:[%s13898_s1 + $0x38] sm:$0xff]  ;;  %v2126_v35 = vld [vmem:[%s13897_s2 + $0xc0] sm:$0xff]  ;;  %v2116_v43 = vld [vmem:[%s13897_s2 + $0x70] sm:$0xff] }
 0x261   :  { %1981 = vmatmul.f32.vlgmr.msrb.gmra.mxu1 %v1404_v51  ;;  %2021 = vmatmul.f32.vlgmr.msrb.gmra.mxu3 %v1404_v51  ;;  %v2118_v3 = vld [vmem:[%s13897_s2 + $0x80] sm:$0xff] }
 0x262   :  { %2190 = vmatpush.msra.mxu1 %v2147_v9  ;;  %2230 = vmatpush.msra.mxu3 %v2149_v14  ;;  %v1706_v20 = vadd.f32 %v8986_v42, %v1705_v62  ;;  %v2162_v9 = vld [vmem:[%s13897_s2 + $0x1e0] sm:$0xff]  ;;  %v2164_v14 = vld [vmem:[%s13897_s2 + $0x1f0] sm:$0xff] }
 0x263   :  { %v6592_v23 = vpop.eup %6591  ;;  %v2095_v62 = vld [vmem:[%s13898_s1 + $0x10] sm:$0xff] }
 0x264   :  { %v1664_v13 = vmul.f32 %v6592_v23, %v8944_v21  ;;  %2191 = vmatpush.msra.mxu1 %v2143_v0  ;;  %2231 = vmatpush.msra.mxu3 %v2145_v33  ;;  %vm1669_vm7 = vweird.f32 %v6592_v23  ;;  %v6594_v16 = vpop.eup %6593  ;;  %v1711_v21 = vand.u32 2147483647, %v8924_v4  ;;  %v1710_v59 = vsel %vm1709_vm14, %v8986_v42, %v1706_v20  ;;  %v2105_v4 = vld [vmem:[%s13897_s2 + $0x18] sm:$0xff]  ;;  %v2154_v33 = vld [vmem:[%s13897_s2 + $0x1a0] sm:$0xff]  ;;  %v2156_v42 = vld [vmem:[%s13897_s2 + $0x1b0] sm:$0xff] }
 0x265   :  { %vm1670_vm10 = vmor %vm1668_vm8, %vm1669_vm7  ;;  %v2096_v0 = vld [vmem:[%s13898_s1 + $0x18] sm:$0xff]  ;;  %v2524_v20 = vld [vmem:[%s13899_s4 + $0x388] sm:$0xff] }
 0x266   :  { %v1665_v32 = vsub.f32 1.0, %v1664_v13  ;;  %2192 = vmatpush.msra.mxu1 %v2139_v11  ;;  %2232 = vmatpush.msra.mxu3 %v2141_v24  ;;  %vm1712_vm15 = vcmp.eq.f32.partialorder %v1711_v21, 8.507059e+37  ;;  %v2146_v11 = vld [vmem:[%s13897_s2 + $0x160] sm:$0xff]  ;;  %v2148_v24 = vld [vmem:[%s13897_s2 + $0x170] sm:$0xff]  ;;  %v9128_v13 = vld [vmem:[%s13900_s0 + $0x18] sm:$0xff] }
 0x267   :  { %v1715_v26 = vsel %vm1712_vm15, %v1714_v60, %v1710_v59  ;;  %v2516_v21 = vld [vmem:[%s13899_s4 + $0x348] sm:$0xff]  ;;  %v2507_v59 = vld [vmem:[%s13899_s4 + $0x300] sm:$0xff] }
 0x268   :  { %v1666_v39 = vmul.f32 %v6592_v23, %v1665_v32  ;;  %2193 = vmatpush.msra.mxu1 %v2135_v28  ;;  %2233 = vmatpush.msra.mxu3 %v2137_v31  ;;  %v2140_v28 = vld [vmem:[%s13897_s2 + $0x130] sm:$0xff]  ;;  %v2134_v31 = vld [vmem:[%s13897_s2 + $0x100] sm:$0xff]  ;;  %v2504_v60 = vld [vmem:[%s13899_s4 + $0x2e8] sm:$0xff] }
 0x269   :  { %v2136_v32 = vld [vmem:[%s13897_s2 + $0x110] sm:$0xff] }
 0x26a   :  { %v1667_v63 = vadd.f32 %v6592_v23, %v1666_v39  ;;  %2194 = vmatpush.msra.mxu1 %v2131_v50  ;;  %2234 = vmatpush.msra.mxu3 %v2133_v8  ;;  %v2128_v50 = vld [vmem:[%s13897_s2 + $0xd0] sm:$0xff]  ;;  %v2122_v8 = vld [vmem:[%s13897_s2 + $0xa0] sm:$0xff] }
 0x26b   :  { %v2124_v39 = vld [vmem:[%s13897_s2 + $0xb0] sm:$0xff] }
 0x26c   :  { %v1671_v48 = vsel %vm1670_vm10, %v6592_v23, %v1667_v63  ;;  %2195 = vmatpush.msra.mxu1 %v2127_v44  ;;  %2235 = vmatpush.msra.mxu3 %v2129_v2  ;;  %v2150_v23 = vld [vmem:[%s13897_s2 + $0x180] sm:$0xff]  ;;  %v2112_v2 = vld [vmem:[%s13897_s2 + $0x50] sm:$0xff] }
 0x26d   :  { %v1676_v51 = vsel %vm1673_vm11, %v1675_v58, %v1671_v48  ;;  %v2110_v44 = vld [vmem:[%s13897_s2 + $0x40] sm:$0xff]  ;;  %v2108_v58 = vld [vmem:[%s13897_s2 + $0x30] sm:$0xff] }
 0x26e   :  { %v1719_v30 = vmul.f32 %v6594_v16, %v1676_v51  ;;  %2196 = vmatpush.msra.mxu1 %v2123_v47  ;;  %2236 = vmatpush.msra.mxu3 %v2125_v45  ;;  %v2106_v63 = vld [vmem:[%s13897_s2 + $0x20] sm:$0xff]  ;;  %v2104_v47 = vld [vmem:[%s13897_s2 + $0x10] sm:$0xff] }
 0x26f   :  { %v2097_v45 = vld [vmem:[%s13898_s1 + $0x20] sm:$0xff]  ;;  %v2099_v48 = vld [vmem:[%s13898_s1 + $0x30] sm:$0xff] }
 0x270   :  { %v9050_v56 = vadd.f32 %v1719_v30, %v1718_v18  ;;  %2197 = vmatpush.msra.mxu1 %v2119_v52  ;;  %2237 = vmatpush.msra.mxu3 %v2121_v27  ;;  %v2093_v16 = vld [vmem:[%s13898_s1] sm:$0xff]  ;;  %v2536_v52 = vld [vmem:[%s13899_s4 + $0x3e8] sm:$0xff] }
 0x271   :  { %v2535_v51 = vld [vmem:[%s13899_s4 + $0x3e0] sm:$0xff]  ;;  %v2532_v18 = vld [vmem:[%s13899_s4 + $0x3c8] sm:$0xff] }
 0x272   :  { %6595 = vtanh.f32 %v9050_v56  ;;  %2198 = vmatpush.msra.mxu1 %v2115_v19  ;;  %2238 = vmatpush.msra.mxu3 %v2117_v55  ;;  %v2531_v27 = vld [vmem:[%s13899_s4 + $0x3c0] sm:$0xff]  ;;  %v2528_v19 = vld [vmem:[%s13899_s4 + $0x3a8] sm:$0xff] }
 0x273   :  { %v2527_v30 = vld [vmem:[%s13899_s4 + $0x3a0] sm:$0xff] }
 0x274   :  { %2199 = vmatpush.msra.mxu1 %v2111_v54  ;;  %2239 = vmatpush.msra.mxu3 %v2113_v29  ;;  %v2523_v55 = vld [vmem:[%s13899_s4 + $0x380] sm:$0xff]  ;;  %v2520_v29 = vld [vmem:[%s13899_s4 + $0x368] sm:$0xff] }
 0x275   :  { %v2519_v54 = vld [vmem:[%s13899_s4 + $0x360] sm:$0xff] }
 0x276   :  { %2200 = vmatpush.msra.mxu1 %v2107_v10  ;;  %2240 = vmatpush.msra.mxu3 %v2109_v34  ;;  %v2511_v10 = vld [vmem:[%s13899_s4 + $0x320] sm:$0xff]  ;;  %v2512_v34 = vld [vmem:[%s13899_s4 + $0x328] sm:$0xff] }
 0x278   :  { %v6596_v61 = vpop.eup %6595  ;;  %2201 = vmatpush.msra.mxu1 %v2103_v38  ;;  %2241 = vmatpush.msra.mxu3 %v2105_v4  ;;  %v2508_v38 = vld [vmem:[%s13899_s4 + $0x308] sm:$0xff]  ;;  %v2503_v4 = vld [vmem:[%s13899_s4 + $0x2e0] sm:$0xff] }
 0x279   :  { %v9083_v6 = vmul.f32 %v6596_v61, %v1715_v26  ;;  %v2495_v61 = vld [vmem:[%s13899_s4 + $0x2a0] sm:$0xff]  ;;  %v2496_v26 = vld [vmem:[%s13899_s4 + $0x2a8] sm:$0xff] }
 0x27a   :  { %2283 = vmatpush.msrb.mxu1 %v2098_v53  ;;  %2323 = vmatpush.msrb.mxu3 %v2100_v57  ;;  %v2499_v53 = vld [vmem:[%s13899_s4 + $0x2c0] sm:$0xff]  ;;  %v2500_v57 = vld [vmem:[%s13899_s4 + $0x2c8] sm:$0xff] }
 0x27b   :  { %1881 = vmatmul.f32.vlgmr.msra.gmra.mxu0 %v9083_v6  ;;  %1921 = vmatmul.f32.vlgmr.msra.gmra.mxu2 %v9083_v6 }
 0x27c   :  { %2166 = vmatpush.msra.mxu0 %v2162_v9  ;;  %2202 = vmatmul.f32.vlgmr.msra.gmra.mxu1 %v9083_v6  ;;  %v2492_v9 = vld [vmem:[%s13899_s4 + $0x288] sm:$0xff] }
 0x27d   :  { %2206 = vmatpush.msra.mxu2 %v2164_v14  ;;  %2242 = vmatmul.f32.vlgmr.msra.gmra.mxu3 %v9083_v6 }
 0x27e   :  { %2167 = vmatpush.msra.mxu0 %v2158_v22  ;;  %2284 = vmatpush.msrb.mxu1 %v2094_v25  ;;  %v2487_v22 = vld [vmem:[%s13899_s4 + $0x260] sm:$0xff]  ;;  %v2488_v25 = vld [vmem:[%s13899_s4 + $0x268] sm:$0xff] }
 0x27f   :  { %2207 = vmatpush.msra.mxu2 %v2160_v17  ;;  %2324 = vmatpush.msrb.mxu3 %v2096_v0  ;;  %v2483_v17 = vld [vmem:[%s13899_s4 + $0x240] sm:$0xff]  ;;  %v2484_v0 = vld [vmem:[%s13899_s4 + $0x248] sm:$0xff] }
 0x280   :  { %2168 = vmatpush.msra.mxu0 %v2154_v33  ;;  %2569 = vmatpush.msra.mxu1 %v2535_v51  ;;  %v2479_v33 = vld [vmem:[%s13899_s4 + $0x220] sm:$0xff] }
 0x281   :  { %2208 = vmatpush.msra.mxu2 %v2156_v42  ;;  %2609 = vmatpush.msra.mxu3 %v2536_v52  ;;  %v2480_v42 = vld [vmem:[%s13899_s4 + $0x228] sm:$0xff]  ;;  %v2451_v51 = vld [vmem:[%s13899_s4 + $0x140] sm:$0xff] }
 0x282   :  { %2169 = vmatpush.msra.mxu0 %v2150_v23  ;;  %2570 = vmatpush.msra.mxu1 %v2531_v27  ;;  %v9313_v23 = vld [vmem:[%s13902_s5] sm:$0xf]  ;;  %v2452_v52 = vld [vmem:[%s13899_s4 + $0x148] sm:$0xff]  ;;  %v2517_v27 = vld [vmem:[%s13899_s4 + $0x350] sm:$0xff] }
 0x283   :  { %2209 = vmatpush.msra.mxu2 %v2152_v36  ;;  %1961 = vmatmul.f32.vlgmr.msrb.gmra.mxu0 %v9083_v6  ;;  %v2475_v36 = vld [vmem:[%s13899_s4 + $0x200] sm:$0xff] }
 0x284   :  { %2001 = vmatmul.f32.vlgmr.msrb.gmra.mxu2 %v9083_v6  ;;  %2170 = vmatpush.msra.mxu0 %v2146_v11  ;;  %v2476_v11 = vld [vmem:[%s13899_s4 + $0x208] sm:$0xff] }
 0x285   :  { %2210 = vmatpush.msra.mxu2 %v2148_v24  ;;  %6462 = vmatmul.msk.f32.vlgmr.msrb.gmra.mxu1 %vm193_vm0, %v9128_v13  ;;  %v2471_v24 = vld [vmem:[%s13899_s4 + $0x1e0] sm:$0xff] }
 0x286   :  { %6464 = vmatmul.msk.f32.vlgmr.msrb.gmra.mxu3 %vm193_vm0, %v9128_v13  ;;  %2171 = vmatpush.msra.mxu0 %v2142_v46  ;;  %v2537_v46 = vld [vmem:[%s13899_s4 + $0x3f0] sm:$0xff] }
 0x287   :  { %2211 = vmatpush.msra.mxu2 %v2144_v49  ;;  %2610 = vmatpush.msra.mxu3 %v2532_v18  ;;  %v2538_v49 = vld [vmem:[%s13899_s4 + $0x3f8] sm:$0xff] }
 0x288   :  { %2172 = vmatpush.msra.mxu0 %v2138_v41  ;;  %2571 = vmatpush.msra.mxu1 %v2527_v30  ;;  %v2518_v30 = vld [vmem:[%s13899_s4 + $0x358] sm:$0xff] }
 0x289   :  { %2212 = vmatpush.msra.mxu2 %v2140_v28  ;;  %2611 = vmatpush.msra.mxu3 %v2528_v19  ;;  %v2467_v28 = vld [vmem:[%s13899_s4 + $0x1c0] sm:$0xff] }
 0x28a   :  { %2173 = vmatpush.msra.mxu0 %v2134_v31  ;;  %2572 = vmatpush.msra.mxu1 %v2523_v55  ;;  %v2468_v31 = vld [vmem:[%s13899_s4 + $0x1c8] sm:$0xff]  ;;  %v2447_v55 = vld [vmem:[%s13899_s4 + $0x120] sm:$0xff] }
 0x28b   :  { %2213 = vmatpush.msra.mxu2 %v2136_v32  ;;  %2612 = vmatpush.msra.mxu3 %v2524_v20  ;;  %v2533_v32 = vld [vmem:[%s13899_s4 + $0x3d0] sm:$0xff]  ;;  %v2448_v20 = vld [vmem:[%s13899_s4 + $0x128] sm:$0xff] }
 0x28c   :  { %2174 = vmatpush.msra.mxu0 %v2130_v5  ;;  %2573 = vmatpush.msra.mxu1 %v2519_v54  ;;  %v2513_v54 = vld [vmem:[%s13899_s4 + $0x330] sm:$0xff] }
 0x28d   :  { %2214 = vmatpush.msra.mxu2 %v2132_v7  ;;  %2613 = vmatpush.msra.mxu3 %v2520_v29  ;;  %v1857_v7 = vperm.slane %v9313_v23, 0 }
 0x28e   :  { %2175 = vmatpush.msra.mxu0 %v2126_v35  ;;  %2574 = vmatpush.msra.mxu1 %v2515_v37  ;;  %v2534_v35 = vld [vmem:[%s13899_s4 + $0x3d8] sm:$0xff] }
 0x28f   :  { %2215 = vmatpush.msra.mxu2 %v2128_v50  ;;  %2614 = vmatpush.msra.mxu3 %v2516_v21  ;;  %v2463_v50 = vld [vmem:[%s13899_s4 + $0x1a0] sm:$0xff]  ;;  %v2514_v21 = vld [vmem:[%s13899_s4 + $0x338] sm:$0xff] }
 0x290   :  { %2176 = vmatpush.msra.mxu0 %v2122_v8  ;;  %2575 = vmatpush.msra.mxu1 %v2511_v10  ;;  %v2464_v8 = vld [vmem:[%s13899_s4 + $0x1a8] sm:$0xff]  ;;  %v2443_v10 = vld [vmem:[%s13899_s4 + $0x100] sm:$0xff] }
 0x291   :  { %2216 = vmatpush.msra.mxu2 %v2124_v39  ;;  %2615 = vmatpush.msra.mxu3 %v2512_v34  ;;  %v2529_v39 = vld [vmem:[%s13899_s4 + $0x3b0] sm:$0xff]  ;;  %v2444_v34 = vld [vmem:[%s13899_s4 + $0x108] sm:$0xff] }
 0x292   :  { %2177 = vmatpush.msra.mxu0 %v2118_v3  ;;  %2576 = vmatpush.msra.mxu1 %v2507_v59  ;;  %v2530_v3 = vld [vmem:[%s13899_s4 + $0x3b8] sm:$0xff]  ;;  %v2509_v59 = vld [vmem:[%s13899_s4 + $0x310] sm:$0xff] }
 0x293   :  { %2217 = vmatpush.msra.mxu2 %v2120_v40  ;;  %2616 = vmatpush.msra.mxu3 %v2508_v38 }
 0x294   :  { %2178 = vmatpush.msra.mxu0 %v2114_v12  ;;  %2577 = vmatpush.msra.mxu1 %v2503_v4  ;;  %v2459_v12 = vld [vmem:[%s13899_s4 + $0x180] sm:$0xff]  ;;  %v2510_v4 = vld [vmem:[%s13899_s4 + $0x318] sm:$0xff] }
 0x295   :  { %2218 = vmatpush.msra.mxu2 %v2116_v43  ;;  %2617 = vmatpush.msra.mxu3 %v2504_v60  ;;  %v2460_v43 = vld [vmem:[%s13899_s4 + $0x188] sm:$0xff]  ;;  %v2439_v60 = vld [vmem:[%s13899_s4 + $0xe0] sm:$0xff] }
 0x296   :  { %2179 = vmatpush.msra.mxu0 %v2110_v44  ;;  %2578 = vmatpush.msra.mxu1 %v2499_v53  ;;  %v2525_v44 = vld [vmem:[%s13899_s4 + $0x390] sm:$0xff]  ;;  %v2440_v53 = vld [vmem:[%s13899_s4 + $0xe8] sm:$0xff] }
 0x297   :  { %2219 = vmatpush.msra.mxu2 %v2112_v2  ;;  %2618 = vmatpush.msra.mxu3 %v2500_v57  ;;  %v2505_v57 = vld [vmem:[%s13899_s4 + $0x2f0] sm:$0xff] }
 0x298   :  { %2180 = vmatpush.msra.mxu0 %v2106_v63  ;;  %2579 = vmatpush.msra.mxu1 %v2495_v61  ;;  %v2526_v63 = vld [vmem:[%s13899_s4 + $0x398] sm:$0xff] }
 0x299   :  { %2220 = vmatpush.msra.mxu2 %v2108_v58  ;;  %2619 = vmatpush.msra.mxu3 %v2496_v26  ;;  %v2455_v58 = vld [vmem:[%s13899_s4 + $0x160] sm:$0xff]  ;;  %v2506_v26 = vld [vmem:[%s13899_s4 + $0x2f8] sm:$0xff] }
 0x29a   :  { %2181 = vmatpush.msra.mxu0 %v2102_v15  ;;  %v2456_v15 = vld [vmem:[%s13899_s4 + $0x168] sm:$0xff] }
 0x29b   :  { %2221 = vmatpush.msra.mxu2 %v2104_v47  ;;  %2182 = vmatmul.f32.vlgmr.msra.gmra.mxu0 %v9083_v6  ;;  %v2521_v47 = vld [vmem:[%s13899_s4 + $0x370] sm:$0xff] }
 0x29c   :  { %2222 = vmatmul.f32.vlgmr.msra.gmra.mxu2 %v9083_v6  ;;  %2263 = vmatpush.msrb.mxu0 %v2097_v45  ;;  %v2491_v6 = vld [vmem:[%s13899_s4 + $0x280] sm:$0xff] }
 0x29d   :  { %2303 = vmatpush.msrb.mxu2 %v2099_v48  ;;  %2580 = vmatpush.msra.mxu1 %v2491_v6  ;;  %v1858_v48 = vperm.slane %v9313_v23, 1  ;;  %v2435_v6 = vld [vmem:[%s13899_s4 + $0xc0] sm:$0xff] }
 0x29e   :  { %2264 = vmatpush.msrb.mxu0 %v2093_v16  ;;  %2620 = vmatpush.msra.mxu3 %v2492_v9  ;;  %v2522_v16 = vld [vmem:[%s13899_s4 + $0x378] sm:$0xff]  ;;  %v2436_v9 = vld [vmem:[%s13899_s4 + $0xc8] sm:$0xff] }
 0x29f   :  { %2304 = vmatpush.msrb.mxu2 %v2095_v62  ;;  %2581 = vmatpush.msra.mxu1 %v2487_v22 }
 0x2a0   :  { %2621 = vmatpush.msra.mxu3 %v2488_v25  ;;  %2549 = vmatpush.msra.mxu0 %v2471_v24  ;;  %v9449_v25 = vld [vmem:[%s13901_s3] sm:$0xf]  ;;  %v2497_v24 = vld [vmem:[%s13899_s4 + $0x2b0] sm:$0xff] }
 0x2a1   :  { %2582 = vmatpush.msra.mxu1 %v2483_v17  ;;  %v1860_v17 = vperm.slane %v9313_v23, 3 }
 0x2a2   :  { %2622 = vmatpush.msra.mxu3 %v2484_v0  ;;  %2550 = vmatpush.msra.mxu0 %v2467_v28  ;;  %v2502_v0 = vld [vmem:[%s13899_s4 + $0x2d8] sm:$0xff]  ;;  %v2427_v28 = vld [vmem:[%s13899_s4 + $0x80] sm:$0xff] }
 0x2a3   :  { %6461 = vmatmul.msk.f32.vlgmr.msrb.gmra.mxu0 %vm193_vm0, %v9128_v13  ;;  %2583 = vmatpush.msra.mxu1 %v2479_v33 }
 0x2a4   :  { %6463 = vmatmul.msk.f32.vlgmr.msrb.gmra.mxu2 %vm193_vm0, %v9128_v13  ;;  %2623 = vmatpush.msra.mxu3 %v2480_v42  ;;  %v2472_v13 = vld [vmem:[%s13899_s4 + $0x1e8] sm:$0xff] }
 0x2a5   :  { %2584 = vmatpush.msra.mxu1 %v2475_v36  ;;  %2589 = vmatpush.msra.mxu2 %v2472_v13  ;;  %v2431_v36 = vld [vmem:[%s13899_s4 + $0xa0] sm:$0xff] }
 0x2a6   :  { %2624 = vmatpush.msra.mxu3 %v2476_v11  ;;  %2551 = vmatpush.msra.mxu0 %v2463_v50  ;;  %v2432_v11 = vld [vmem:[%s13899_s4 + $0xa8] sm:$0xff]  ;;  %v2494_v50 = vld [vmem:[%s13899_s4 + $0x298] sm:$0xff] }
 0x2a7   :  { %2649 = vmatpush.msrb.mxu1 %v2537_v46  ;;  %2590 = vmatpush.msra.mxu2 %v2468_v31  ;;  %v2428_v31 = vld [vmem:[%s13899_s4 + $0x88] sm:$0xff] }
 0x2a8   :  { %2689 = vmatpush.msrb.mxu3 %v2538_v49  ;;  %2552 = vmatpush.msra.mxu0 %v2459_v12  ;;  %v2498_v49 = vld [vmem:[%s13899_s4 + $0x2b8] sm:$0xff]  ;;  %v1859_v12 = vperm.slane %v9313_v23, 2  ;;  %v2420_v23 = vld [vmem:[%s13899_s4 + $0x48] sm:$0xff] }
 0x2a9   :  { %2650 = vmatpush.msrb.mxu1 %v2533_v32  ;;  %2591 = vmatpush.msra.mxu2 %v2464_v8  ;;  %v2493_v32 = vld [vmem:[%s13899_s4 + $0x290] sm:$0xff]  ;;  %v2423_v8 = vld [vmem:[%s13899_s4 + $0x60] sm:$0xff] }
 0x2aa   :  { %2690 = vmatpush.msrb.mxu3 %v2534_v35  ;;  %2553 = vmatpush.msra.mxu0 %v2455_v58  ;;  %v2419_v58 = vld [vmem:[%s13899_s4 + $0x40] sm:$0xff] }
 0x2ab   :  { %2651 = vmatpush.msrb.mxu1 %v2529_v39  ;;  %2592 = vmatpush.msra.mxu2 %v2460_v43  ;;  %v2424_v39 = vld [vmem:[%s13899_s4 + $0x68] sm:$0xff] }
 0x2ac   :  { %2691 = vmatpush.msrb.mxu3 %v2530_v3  ;;  %2554 = vmatpush.msra.mxu0 %v2451_v51  ;;  %v2489_v3 = vld [vmem:[%s13899_s4 + $0x270] sm:$0xff]  ;;  %v2416_v51 = vld [vmem:[%s13899_s4 + $0x28] sm:$0xff] }
 0x2ad   :  { %2652 = vmatpush.msrb.mxu1 %v2525_v44  ;;  %2593 = vmatpush.msra.mxu2 %v2456_v15  ;;  %v2490_v44 = vld [vmem:[%s13899_s4 + $0x278] sm:$0xff]  ;;  %v2485_v15 = vld [vmem:[%s13899_s4 + $0x250] sm:$0xff] }
 0x2ae   :  { %2692 = vmatpush.msrb.mxu3 %v2526_v63  ;;  %2555 = vmatpush.msra.mxu0 %v2447_v55 }
 0x2af   :  { %2653 = vmatpush.msrb.mxu1 %v2521_v47  ;;  %2594 = vmatpush.msra.mxu2 %v2452_v52  ;;  %v2481_v52 = vld [vmem:[%s13899_s4 + $0x230] sm:$0xff] }
 0x2b0   :  { %2693 = vmatpush.msrb.mxu3 %v2522_v16  ;;  %2556 = vmatpush.msra.mxu0 %v2443_v10  ;;  %v2473_v10 = vld [vmem:[%s13899_s4 + $0x1f0] sm:$0xff] }
 0x2b1   :  { %2654 = vmatpush.msrb.mxu1 %v2517_v27  ;;  %2595 = vmatpush.msra.mxu2 %v2448_v20 }
 0x2b2   :  { %2694 = vmatpush.msrb.mxu3 %v2518_v30  ;;  %2557 = vmatpush.msra.mxu0 %v2439_v60  ;;  %v2482_v30 = vld [vmem:[%s13899_s4 + $0x238] sm:$0xff] }
 0x2b3   :  { %2655 = vmatpush.msrb.mxu1 %v2513_v54  ;;  %2596 = vmatpush.msra.mxu2 %v2444_v34  ;;  %v2411_v54 = vld [vmem:[%s13899_s4] sm:$0xff]  ;;  %v2474_v34 = vld [vmem:[%s13899_s4 + $0x1f8] sm:$0xff] }
 0x2b4   :  { %2695 = vmatpush.msrb.mxu3 %v2514_v21  ;;  %2558 = vmatpush.msra.mxu0 %v2435_v6  ;;  %v2478_v21 = vld [vmem:[%s13899_s4 + $0x218] sm:$0xff] }
 0x2b5   :  { %2656 = vmatpush.msrb.mxu1 %v2509_v59  ;;  %2597 = vmatpush.msra.mxu2 %v2440_v53  ;;  %v2334_v53 = vperm.slane %v9449_v25, 3 }
 0x2b6   :  { %2696 = vmatpush.msrb.mxu3 %v2510_v4  ;;  %2559 = vmatpush.msra.mxu0 %v2431_v36 }
 0x2b7   :  { %2657 = vmatpush.msrb.mxu1 %v2505_v57  ;;  %2598 = vmatpush.msra.mxu2 %v2436_v9  ;;  %v2469_v57 = vld [vmem:[%s13899_s4 + $0x1d0] sm:$0xff] }
 0x2b8   :  { %2697 = vmatpush.msrb.mxu3 %v2506_v26  ;;  %2560 = vmatpush.msra.mxu0 %v2427_v28 }
 0x2b9   :  { %2599 = vmatpush.msra.mxu2 %v2432_v11  ;;  %v2426_v11 = vld [vmem:[%s13899_s4 + $0x78] sm:$0xff] }
 0x2ba   :  { %2698 = vmatpush.msrb.mxu3 %v2502_v0  ;;  %2561 = vmatpush.msra.mxu0 %v2423_v8 }
 0x2bb   :  { %2600 = vmatpush.msra.mxu2 %v2428_v31 }
 0x2bc   :  { %2699 = vmatpush.msrb.mxu3 %v2498_v49  ;;  %2562 = vmatpush.msra.mxu0 %v2419_v58 }
 0x2bd   :  { %2601 = vmatpush.msra.mxu2 %v2424_v39 }
 0x2be   :  { %2700 = vmatpush.msrb.mxu3 %v2494_v50 }
 0x2bf   :  { %2602 = vmatpush.msra.mxu2 %v2420_v23  ;;  %v2449_v23 = vld [vmem:[%s13899_s4 + $0x130] sm:$0xff] }
 0x2c0   :  { %2701 = vmatpush.msrb.mxu3 %v2490_v44 }
 0x2c1   :  { %2603 = vmatpush.msra.mxu2 %v2416_v51  ;;  %v2445_v51 = vld [vmem:[%s13899_s4 + $0x110] sm:$0xff] }
 0x2d6   :  { %v1902_v14 = vpop.f32.mrf.mxu1 }
 0x2dc   :  { %v1942_v5 = vpop.f32.mrf.mxu3 }
 0x2de   :  { %v9333_v41 = vpop.f32.mrf.mxu1 }
 0x2e4   :  { %v9408_v29 = vpop.f32.mrf.mxu3 }
 0x2f8   :  { %v1882_v40 = vpop.f32.mrf.mxu0 }
 0x2f9   :  { %v1883_v2 = vadd.f32 %v1882_v40, %v1857_v7  ;;  %v9385_v62 = vpop.f32.mrf.mxu1  ;;  %v2332_v7 = vperm.slane %v9449_v25, 1 }
 0x2fb   :  { %v1903_v45 = vadd.f32 %v1902_v14, %v1883_v2  ;;  %v2501_v14 = vld [vmem:[%s13899_s4 + $0x2d0] sm:$0xff] }
 0x2fc   :  { %2658 = vmatpush.msrb.mxu1 %v2501_v14 }
 0x2fd   :  { %v6457_v18 = vmul.f32 -1.442695, %v1903_v45 }
 0x2fe   :  { %v1922_v19 = vpop.f32.mrf.mxu2  ;;  %2659 = vmatpush.msrb.mxu1 %v2497_v24 }
 0x2ff   :  { %6597 = vpow2.f32 %v6457_v18  ;;  %v1923_v37 = vadd.f32 %v1922_v19, %v1858_v48  ;;  %v2486_v48 = vld [vmem:[%s13899_s4 + $0x258] sm:$0xff] }
 0x300   :  { %v9466_v13 = vpop.f32.mrf.mxu3  ;;  %2660 = vmatpush.msrb.mxu1 %v2493_v32  ;;  %v1962_v63 = vpop.f32.mrf.mxu0  ;;  %2702 = vmatpush.msrb.mxu3 %v2486_v48 }
 0x301   :  { %v1943_v38 = vadd.f32 %v1942_v5, %v1923_v37  ;;  %v1963_v18 = vadd.f32 %v1962_v63, %v1859_v12  ;;  %v2477_v37 = vld [vmem:[%s13899_s4 + $0x210] sm:$0xff] }
 0x302   :  { %v2286_v42 = vpop.f32.mrf.mxu1  ;;  %2661 = vmatpush.msrb.mxu1 %v2489_v3  ;;  %2703 = vmatpush.msrb.mxu3 %v2482_v30  ;;  %v2453_v3 = vld [vmem:[%s13899_s4 + $0x150] sm:$0xff] }
 0x303   :  { %v6458_v61 = vmul.f32 -1.442695, %v1943_v38  ;;  %v2287_v5 = vadd.f32 %v2286_v42, %v9385_v62  ;;  %v2415_v62 = vld [vmem:[%s13899_s4 + $0x20] sm:$0xff]  ;;  %v1983_v59 = vadd.f32 %v9333_v41, %v1963_v18  ;;  %v2441_v30 = vld [vmem:[%s13899_s4 + $0xf0] sm:$0xff] }
 0x304   :  { %2662 = vmatpush.msrb.mxu1 %v2485_v15  ;;  %2563 = vmatpush.msra.mxu0 %v2415_v62  ;;  %v2450_v15 = vld [vmem:[%s13899_s4 + $0x138] sm:$0xff] }
 0x305   :  { %v6598_v22 = vpop.eup %6597  ;;  %6599 = vpow2.f32 %v6458_v61  ;;  %v2340_v47 = vadd.f32 %v2332_v7, %v2287_v5  ;;  %2704 = vmatpush.msrb.mxu3 %v2478_v21  ;;  %v2470_v61 = vld [vmem:[%s13899_s4 + $0x1d8] sm:$0xff]  ;;  %v2457_v5 = vld [vmem:[%s13899_s4 + $0x170] sm:$0xff] }
 0x306   :  { %v9455_v33 = vadd.f32 1.0, %v6598_v22  ;;  %2663 = vmatpush.msrb.mxu1 %v2481_v52  ;;  %2564 = vmatpush.msra.mxu0 %v2411_v54  ;;  %v2465_v22 = vld [vmem:[%s13899_s4 + $0x1b0] sm:$0xff]  ;;  %v2458_v7 = vld [vmem:[%s13899_s4 + $0x178] sm:$0xff] }
 0x307   :  { %v2002_v46 = vpop.f32.mrf.mxu2  ;;  %v6466_v55 = vmul.f32 -1.442695, %v2340_v47  ;;  %v2446_v52 = vld [vmem:[%s13899_s4 + $0x118] sm:$0xff] }
 0x308   :  { %6601 = vrcp.f32 %v9455_v33  ;;  %v2003_v35 = vadd.f32 %v2002_v46, %v1860_v17  ;;  %2664 = vmatpush.msrb.mxu1 %v2477_v37  ;;  %2629 = vmatpush.msrb.mxu0 %v2473_v10  ;;  %v2040_v9 = vand.u32 2147483648, %v9455_v33  ;;  %v2466_v17 = vld [vmem:[%s13899_s4 + $0x1b8] sm:$0xff]  ;;  %vm2034_vm2 = vweird.f32 %v9455_v33  ;;  %v2461_v46 = vld [vmem:[%s13899_s4 + $0x190] sm:$0xff] }
 0x309   :  { %v2326_v20 = vpop.f32.mrf.mxu3  ;;  %v2038_v42 = vand.u32 2147483647, %v9455_v33  ;;  %v2437_v37 = vld [vmem:[%s13899_s4 + $0xd0] sm:$0xff]  ;;  %v2438_v21 = vld [vmem:[%s13899_s4 + $0xd8] sm:$0xff] }
 0x30a   :  { %v2023_v43 = vadd.f32 %v9408_v29, %v2003_v35  ;;  %v2412_v29 = vld [vmem:[%s13899_s4 + $0x8] sm:$0xff]  ;;  %v2327_v60 = vadd.f32 %v2326_v20, %v9466_v13  ;;  %2630 = vmatpush.msrb.mxu0 %v2469_v57  ;;  %v2041_v32 = vor.u32 1.1754944e-38, %v2040_v9 }
 0x30b   :  { %v6600_v40 = vpop.eup %6599  ;;  %2604 = vmatpush.msra.mxu2 %v2412_v29  ;;  %vm2039_vm6 = vcmp.eq.f32.partialorder %v2038_v42, 8.507059e+37 }
 0x30c   :  { %v9500_v2 = vadd.f32 1.0, %v6600_v40  ;;  %v6459_v45 = vmul.f32 -1.442695, %v2023_v43  ;;  %v2342_v24 = vadd.f32 %v2334_v53, %v2327_v60  ;;  %2631 = vmatpush.msrb.mxu0 %v2465_v22  ;;  %v2454_v40 = vld [vmem:[%s13899_s4 + $0x158] sm:$0xff]  ;;  %v2847_v22 = vld [vmem:[%s13897_s2 + $0x1e8] sm:$0xff] }
 0x30d   :  { %2669 = vmatpush.msrb.mxu2 %v2474_v34 }
 0x30e   :  { %v9514_v16 = vpop.eup %6601  ;;  %6603 = vrcp.f32 %v9500_v2  ;;  %v2059_v36 = vand.u32 2147483648, %v9500_v2  ;;  %v2057_v31 = vand.u32 2147483647, %v9500_v2  ;;  %2632 = vmatpush.msrb.mxu0 %v2461_v46  ;;  %vm2053_vm5 = vweird.f32 %v9500_v2 }
 0x30f   :  { %v2030_v27 = vmul.f32 %v9514_v16, %v9455_v33  ;;  %6605 = vpow2.f32 %v6459_v45  ;;  %vm2035_vm1 = vweird.f32 %v9514_v16  ;;  %2670 = vmatpush.msrb.mxu2 %v2470_v61  ;;  %v2462_v33 = vld [vmem:[%s13899_s4 + $0x198] sm:$0xff]  ;;  %v6467_v44 = vmul.f32 -1.442695, %v2342_v24  ;;  %v2843_v24 = vld [vmem:[%s13897_s2 + $0x1c8] sm:$0xff] }
 0x310   :  { %6607 = vpow2.f32 %v6466_v55  ;;  %vm9574_vm3 = vmor %vm2034_vm2, %vm2035_vm1  ;;  %v2060_v8 = vor.u32 1.1754944e-38, %v2059_v36  ;;  %2633 = vmatpush.msrb.mxu0 %v2457_v5  ;;  %vm2058_vm8 = vcmp.eq.f32.partialorder %v2057_v31, 8.507059e+37  ;;  %v2425_v36 = vld [vmem:[%s13899_s4 + $0x70] sm:$0xff]  ;;  %v2839_v31 = vld [vmem:[%s13897_s2 + $0x1a8] sm:$0xff] }
 0x311   :  { %v2031_v19 = vsub.f32 1.0, %v2030_v27  ;;  %6609 = vtanh.f32 %v1983_v59  ;;  %2671 = vmatpush.msrb.mxu2 %v2466_v17  ;;  %v2849_v17 = vld [vmem:[%s13897_s2 + $0x1f8] sm:$0xff] }
 0x312   :  { %2634 = vmatpush.msrb.mxu0 %v2453_v3 }
 0x313   :  { %v2032_v38 = vmul.f32 %v9514_v16, %v2031_v19  ;;  %2672 = vmatpush.msrb.mxu2 %v2462_v33  ;;  %v2442_v19 = vld [vmem:[%s13899_s4 + $0xf8] sm:$0xff]  ;;  %v2421_v33 = vld [vmem:[%s13899_s4 + $0x50] sm:$0xff] }
 0x314   :  { %v6604_v4 = vpop.eup %6603  ;;  %2635 = vmatpush.msrb.mxu0 %v2449_v23  ;;  %v2829_v23 = vld [vmem:[%s13897_s2 + $0x158] sm:$0xff] }
 0x315   :  { %v6606_v41 = vpop.eup %6605  ;;  %v2049_v26 = vmul.f32 %v6604_v4, %v9500_v2  ;;  %v2033_v6 = vadd.f32 %v9514_v16, %v2032_v38  ;;  %vm2054_vm4 = vweird.f32 %v6604_v4  ;;  %2673 = vmatpush.msrb.mxu2 %v2458_v7  ;;  %v2433_v38 = vld [vmem:[%s13899_s4 + $0xb0] sm:$0xff] }
 0x316   :  { %v9563_v14 = vadd.f32 1.0, %v6606_v41  ;;  %v6608_v35 = vpop.eup %6607  ;;  %vm2055_vm7 = vmor %vm2053_vm5, %vm2054_vm4  ;;  %2636 = vmatpush.msrb.mxu0 %v2445_v51  ;;  %v2429_v41 = vld [vmem:[%s13899_s4 + $0x90] sm:$0xff] }
 0x317   :  { %v2050_v0 = vsub.f32 1.0, %v2049_v26  ;;  %v2037_v28 = vsel %vm9574_vm3, %v9514_v16, %v2033_v6  ;;  %v6610_v12 = vpop.eup %6609  ;;  %v9602_v58 = vadd.f32 1.0, %v6608_v35  ;;  %2674 = vmatpush.msrb.mxu2 %v2454_v40  ;;  %v2331_v16 = vperm.slane %v9449_v25, 0  ;;  %v2430_v26 = vld [vmem:[%s13899_s4 + $0x98] sm:$0xff]  ;;  %v2417_v35 = vld [vmem:[%s13899_s4 + $0x30] sm:$0xff] }
 0x318   :  { %6611 = vrcp.f32 %v9563_v14  ;;  %v2183_v13 = vpop.f32.mrf.mxu0  ;;  %v2042_v39 = vsel %vm2039_vm6, %v2041_v32, %v2037_v28  ;;  %v2079_v20 = vand.u32 2147483648, %v9563_v14  ;;  %v2077_v29 = vand.u32 2147483647, %v9563_v14  ;;  %2637 = vmatpush.msrb.mxu0 %v2441_v30  ;;  %v2841_v32 = vld [vmem:[%s13897_s2 + $0x1b8] sm:$0xff] }
 0x319   :  { %v2051_v49 = vmul.f32 %v6604_v4, %v2050_v0  ;;  %v2085_v45 = vmul.f32 %v6610_v12, %v2042_v39  ;;  %2675 = vmatpush.msrb.mxu2 %v2450_v15  ;;  %6613 = vpow2.f32 %v6467_v44  ;;  %vm2073_vm10 = vweird.f32 %v9563_v14  ;;  %v2837_v39 = vld [vmem:[%s13897_s2 + $0x198] sm:$0xff]  ;;  %v2831_v12 = vld [vmem:[%s13897_s2 + $0x168] sm:$0xff] }
 0x31a   :  { %6615 = vrcp.f32 %v9602_v58  ;;  %2638 = vmatpush.msrb.mxu0 %v2437_v37  ;;  %v2080_v53 = vor.u32 1.1754944e-38, %v2079_v20  ;;  %vm2078_vm12 = vcmp.eq.f32.partialorder %v2077_v29, 8.507059e+37  ;;  %v2333_v40 = vperm.slane %v9449_v25, 2  ;;  %v2414_v25 = vld [vmem:[%s13899_s4 + $0x18] sm:$0xff]  ;;  %v2815_v29 = vld [vmem:[%s13897_s2 + $0xe8] sm:$0xff]  ;;  %v2816_v20 = vld [vmem:[%s13897_s2 + $0xf0] sm:$0xff] }
 0x31b   :  { %v2052_v50 = vadd.f32 %v6604_v4, %v2051_v49  ;;  %2676 = vmatpush.msrb.mxu2 %v2446_v52  ;;  %v2422_v49 = vld [vmem:[%s13899_s4 + $0x58] sm:$0xff]  ;;  %v2377_v52 = vand.u32 2147483648, %v9602_v58  ;;  %vm2371_vm14 = vweird.f32 %v9602_v58 }
 0x31c   :  { %2639 = vmatpush.msrb.mxu0 %v2433_v38  ;;  %v2821_v30 = vld [vmem:[%s13897_s2 + $0x118] sm:$0xff]  ;;  %v2811_v38 = vld [vmem:[%s13897_s2 + $0xc8] sm:$0xff] }
 0x31d   :  { %v2056_v43 = vsel %vm2055_vm7, %v6604_v4, %v2052_v50  ;;  %2677 = vmatpush.msrb.mxu2 %v2442_v19  ;;  %v2434_v4 = vld [vmem:[%s13899_s4 + $0xb8] sm:$0xff] }
 0x31e   :  { %v6612_v2 = vpop.eup %6611  ;;  %v2061_v63 = vsel %vm2058_vm8, %v2060_v8, %v2056_v43  ;;  %2640 = vmatpush.msrb.mxu0 %v2429_v41  ;;  %v2418_v50 = vld [vmem:[%s13899_s4 + $0x38] sm:$0xff]  ;;  %v2835_v8 = vld [vmem:[%s13897_s2 + $0x188] sm:$0xff] }
 0x31f   :  { %v2084_v47 = vmul.f32 %v2061_v63, %v8882_v1  ;;  %v2069_v48 = vmul.f32 %v6612_v2, %v9563_v14  ;;  %vm2074_vm9 = vweird.f32 %v6612_v2  ;;  %v2223_v10 = vpop.f32.mrf.mxu2  ;;  %2678 = vmatpush.msrb.mxu2 %v2438_v21  ;;  %v6614_v60 = vpop.eup %6613  ;;  %v2833_v43 = vld [vmem:[%s13897_s2 + $0x178] sm:$0xff]  ;;  %v2827_v63 = vld [vmem:[%s13897_s2 + $0x148] sm:$0xff] }
 0x320   :  { %v2266_v62 = vpop.f32.mrf.mxu0  ;;  %vm2075_vm11 = vmor %vm2073_vm10, %vm2074_vm9  ;;  %v9645_v57 = vpop.eup %6615  ;;  %v9661_v42 = vadd.f32 1.0, %v6614_v60  ;;  %2641 = vmatpush.msrb.mxu0 %v2425_v36  ;;  %v2817_v37 = vld [vmem:[%s13897_s2 + $0xf8] sm:$0xff] }
 0x321   :  { %v9619_v27 = vadd.f32 %v2085_v45, %v2084_v47  ;;  %v2267_v1 = vadd.f32 %v2266_v62, %v2183_v13  ;;  %v2070_v18 = vsub.f32 1.0, %v2069_v48  ;;  %2679 = vmatpush.msrb.mxu2 %v2434_v4  ;;  %v2367_v0 = vmul.f32 %v9645_v57, %v9602_v58  ;;  %v2845_v13 = vld [vmem:[%s13897_s2 + $0x1d8] sm:$0xff]  ;;  %v2823_v48 = vld [vmem:[%s13897_s2 + $0x128] sm:$0xff] }
 0x322   :  { %2642 = vmatpush.msrb.mxu0 %v2421_v33  ;;  %vm2372_vm13 = vweird.f32 %v9645_v57  ;;  %v2813_v4 = vld [vmem:[%s13897_s2 + $0xd8] sm:$0xff]  ;;  %vm2391_vm7 = vweird.f32 %v9661_v42 }
 0x323   :  { %v2339_v55 = vadd.f32 %v2331_v16, %v2267_v1  ;;  %6617 = vtanh.f32 %v9619_v27  ;;  %v2071_v54 = vmul.f32 %v6612_v2, %v2070_v18  ;;  %2680 = vmatpush.msrb.mxu2 %v2430_v26  ;;  %v2368_v5 = vsub.f32 1.0, %v2367_v0  ;;  %v2825_v16 = vld [vmem:[%s13897_s2 + $0x138] sm:$0xff]  ;;  %v2819_v18 = vld [vmem:[%s13897_s2 + $0x108] sm:$0xff]  ;;  %vm9745_vm15 = vmor %vm2371_vm14, %vm2372_vm13 }
 0x324   :  { %2643 = vmatpush.msrb.mxu0 %v2417_v35  ;;  %v2809_v41 = vld [vmem:[%s13897_s2 + $0xb8] sm:$0xff] }
 0x325   :  { %v6465_v34 = vmul.f32 -1.442695, %v2339_v55  ;;  %v2072_v59 = vadd.f32 %v6612_v2, %v2071_v54  ;;  %2681 = vmatpush.msrb.mxu2 %v2426_v11  ;;  %v2369_v44 = vmul.f32 %v9645_v57, %v2368_v5  ;;  %v2375_v55 = vand.u32 2147483647, %v9602_v58  ;;  %v2799_v11 = vld [vmem:[%s13897_s2 + $0x68] sm:$0xff]  ;;  %v2797_v33 = vld [vmem:[%s13897_s2 + $0x58] sm:$0xff] }
 0x327   :  { %6619 = vpow2.f32 %v6465_v34  ;;  %v2076_v61 = vsel %vm2075_vm11, %v6612_v2, %v2072_v59  ;;  %v2306_v7 = vpop.f32.mrf.mxu2  ;;  %2682 = vmatpush.msrb.mxu2 %v2422_v49  ;;  %v2413_v2 = vld [vmem:[%s13899_s4 + $0x10] sm:$0xff]  ;;  %v2370_v51 = vadd.f32 %v9645_v57, %v2369_v44  ;;  %v2378_v34 = vor.u32 1.1754944e-38, %v2377_v52  ;;  %v2842_v44 = vld [vmem:[%s13897_s2 + $0x1c0] sm:$0xff] }
 0x328   :  { %v2081_v9 = vsel %vm2078_vm12, %v2080_v53, %v2076_v61  ;;  %6621 = vrcp.f32 %v9661_v42  ;;  %v2307_v3 = vadd.f32 %v2306_v7, %v2223_v10  ;;  %2644 = vmatpush.msrb.mxu0 %v2413_v2  ;;  %vm2376_vm3 = vcmp.eq.f32.partialorder %v2375_v55, 8.507059e+37  ;;  %v2807_v61 = vld [vmem:[%s13897_s2 + $0xa8] sm:$0xff]  ;;  %v2828_v52 = vld [vmem:[%s13897_s2 + $0x150] sm:$0xff]  ;;  %v2814_v55 = vld [vmem:[%s13897_s2 + $0xe0] sm:$0xff] }
 0x329   :  { %v6618_v6 = vpop.eup %6617  ;;  %2683 = vmatpush.msrb.mxu2 %v2418_v50  ;;  %v2374_v10 = vsel %vm9745_vm15, %v9645_v57, %v2370_v51  ;;  %v2397_v49 = vand.u32 2147483648, %v9661_v42  ;;  %v2787_v7 = vld [vmem:[%s13897_s2 + $0x8] sm:$0xff]  ;;  %v2826_v51 = vld [vmem:[%s13897_s2 + $0x140] sm:$0xff] }
 0x32a   :  { %v2088_v14 = vmul.f32 %v6618_v6, %v2081_v9  ;;  %v2341_v45 = vadd.f32 %v2333_v40, %v2307_v3  ;;  %v2379_v57 = vsel %vm2376_vm3, %v2378_v34, %v2374_v10  ;;  %v2782_v50 = vld [vmem:[%s13898_s1 + $0x28] sm:$0xff]  ;;  %v2804_v10 = vld [vmem:[%s13897_s2 + $0x90] sm:$0xff]  ;;  %v2798_v34 = vld [vmem:[%s13897_s2 + $0x60] sm:$0xff] }
 0x32b   :  { %2684 = vmatpush.msrb.mxu2 %v2414_v25  ;;  %v2402_v0 = vmul.f32 %v2379_v57, %v9050_v56  ;;  %v2795_v56 = vld [vmem:[%s13897_s2 + $0x48] sm:$0xff]  ;;  %v2398_v35 = vor.u32 1.1754944e-38, %v2397_v49  ;;  %v2844_v25 = vld [vmem:[%s13897_s2 + $0x1d0] sm:$0xff]  ;;  %v2786_v57 = vld [vmem:[%s13897_s2] sm:$0xff] }
 0x32c   :  { %2585 = vmatmul.f32.vlgmr.msra.gmra.mxu1 %v2088_v14  ;;  %2625 = vmatmul.f32.vlgmr.msra.gmra.mxu3 %v2088_v14  ;;  %v2778_v2 = vld [vmem:[%s13898_s1 + $0x8] sm:$0xff]  ;;  %v3199_v49 = vld [vmem:[%s13899_s4 + $0x340] sm:$0xff] }
 0x32d   :  { %v6620_v46 = vpop.eup %6619  ;;  %2870 = vmatpush.msra.mxu1 %v2847_v22  ;;  %2910 = vmatpush.msra.mxu3 %v2849_v17  ;;  %v2803_v22 = vld [vmem:[%s13897_s2 + $0x88] sm:$0xff]  ;;  %v2805_v17 = vld [vmem:[%s13897_s2 + $0x98] sm:$0xff] }
 0x32e   :  { %v9681_v28 = vadd.f32 1.0, %v6620_v46  ;;  %v9723_v15 = vpop.eup %6621 }
 0x32f   :  { %2871 = vmatpush.msra.mxu1 %v2843_v24  ;;  %2911 = vmatpush.msra.mxu3 %v2845_v13  ;;  %v2387_v1 = vmul.f32 %v9723_v15, %v9661_v42  ;;  %v2801_v24 = vld [vmem:[%s13897_s2 + $0x78] sm:$0xff]  ;;  %vm2392_vm6 = vweird.f32 %v9723_v15 }
 0x330   :  { %6623 = vrcp.f32 %v9681_v28  ;;  %v2358_v54 = vand.u32 2147483648, %v9681_v28  ;;  %v2356_v58 = vand.u32 2147483647, %v9681_v28  ;;  %vm2352_vm2 = vweird.f32 %v9681_v28  ;;  %vm2393_vm8 = vmor %vm2391_vm7, %vm2392_vm6 }
 0x331   :  { %2872 = vmatpush.msra.mxu1 %v2839_v31  ;;  %2912 = vmatpush.msra.mxu3 %v2841_v32  ;;  %6625 = vtanh.f32 %v2341_v45  ;;  %v2388_v59 = vsub.f32 1.0, %v2387_v1  ;;  %v2791_v31 = vld [vmem:[%s13897_s2 + $0x28] sm:$0xff]  ;;  %v2793_v32 = vld [vmem:[%s13897_s2 + $0x38] sm:$0xff]  ;;  %v2836_v45 = vld [vmem:[%s13897_s2 + $0x190] sm:$0xff] }
 0x332   :  { %v2359_v53 = vor.u32 1.1754944e-38, %v2358_v54  ;;  %vm2357_vm5 = vcmp.eq.f32.partialorder %v2356_v58, 8.507059e+37  ;;  %v2822_v1 = vld [vmem:[%s13897_s2 + $0x120] sm:$0xff] }
 0x333   :  { %2873 = vmatpush.msra.mxu1 %v2835_v8  ;;  %2913 = vmatpush.msra.mxu3 %v2837_v39  ;;  %v2389_v9 = vmul.f32 %v9723_v15, %v2388_v59  ;;  %v2784_v8 = vld [vmem:[%s13898_s1 + $0x38] sm:$0xff]  ;;  %v2810_v54 = vld [vmem:[%s13897_s2 + $0xc0] sm:$0xff]  ;;  %v2800_v59 = vld [vmem:[%s13897_s2 + $0x70] sm:$0xff] }
 0x334   :  { %2665 = vmatmul.f32.vlgmr.msrb.gmra.mxu1 %v2088_v14  ;;  %2705 = vmatmul.f32.vlgmr.msrb.gmra.mxu3 %v2088_v14  ;;  %v2802_v58 = vld [vmem:[%s13897_s2 + $0x80] sm:$0xff] }
 0x335   :  { %2874 = vmatpush.msra.mxu1 %v2831_v12  ;;  %2914 = vmatpush.msra.mxu3 %v2833_v43  ;;  %v2390_v46 = vadd.f32 %v9723_v15, %v2389_v9  ;;  %v2846_v12 = vld [vmem:[%s13897_s2 + $0x1e0] sm:$0xff]  ;;  %v2848_v43 = vld [vmem:[%s13897_s2 + $0x1f0] sm:$0xff] }
 0x336   :  { %v6624_v47 = vpop.eup %6623  ;;  %v2779_v9 = vld [vmem:[%s13898_s1 + $0x10] sm:$0xff] }
 0x337   :  { %v2348_v62 = vmul.f32 %v6624_v47, %v9681_v28  ;;  %2875 = vmatpush.msra.mxu1 %v2827_v63  ;;  %2915 = vmatpush.msra.mxu3 %v2829_v23  ;;  %vm2353_vm1 = vweird.f32 %v6624_v47  ;;  %v6626_v6 = vpop.eup %6625  ;;  %v2395_v28 = vand.u32 2147483647, %v9661_v42  ;;  %v2394_v5 = vsel %vm2393_vm8, %v9723_v15, %v2390_v46  ;;  %v2789_v42 = vld [vmem:[%s13897_s2 + $0x18] sm:$0xff]  ;;  %v2838_v23 = vld [vmem:[%s13897_s2 + $0x1a0] sm:$0xff]  ;;  %v2840_v15 = vld [vmem:[%s13897_s2 + $0x1b0] sm:$0xff] }
 0x338   :  { %vm2354_vm4 = vmor %vm2352_vm2, %vm2353_vm1  ;;  %v2780_v63 = vld [vmem:[%s13898_s1 + $0x18] sm:$0xff]  ;;  %v3208_v46 = vld [vmem:[%s13899_s4 + $0x388] sm:$0xff] }
 0x339   :  { %v2349_v19 = vsub.f32 1.0, %v2348_v62  ;;  %2876 = vmatpush.msra.mxu1 %v2823_v48  ;;  %2916 = vmatpush.msra.mxu3 %v2825_v16  ;;  %vm2396_vm9 = vcmp.eq.f32.partialorder %v2395_v28, 8.507059e+37  ;;  %v2830_v48 = vld [vmem:[%s13897_s2 + $0x160] sm:$0xff]  ;;  %v2832_v16 = vld [vmem:[%s13897_s2 + $0x170] sm:$0xff]  ;;  %v3200_v28 = vld [vmem:[%s13899_s4 + $0x348] sm:$0xff] }
 0x33a   :  { %v2399_v3 = vsel %vm2396_vm9, %v2398_v35, %v2394_v5  ;;  %v9865_v62 = vld [vmem:[%s13900_s0 + $0x20] sm:$0xff]  ;;  %v3188_v35 = vld [vmem:[%s13899_s4 + $0x2e8] sm:$0xff] }
 0x33b   :  { %v2350_v21 = vmul.f32 %v6624_v47, %v2349_v19  ;;  %2877 = vmatpush.msra.mxu1 %v2819_v18  ;;  %2917 = vmatpush.msra.mxu3 %v2821_v30  ;;  %v2824_v18 = vld [vmem:[%s13897_s2 + $0x130] sm:$0xff]  ;;  %v2818_v30 = vld [vmem:[%s13897_s2 + $0x100] sm:$0xff] }
 0x33c   :  { %v2820_v19 = vld [vmem:[%s13897_s2 + $0x110] sm:$0xff]  ;;  %v3191_v5 = vld [vmem:[%s13899_s4 + $0x300] sm:$0xff] }
 0x33d   :  { %v2351_v60 = vadd.f32 %v6624_v47, %v2350_v21  ;;  %2878 = vmatpush.msra.mxu1 %v2815_v29  ;;  %2918 = vmatpush.msra.mxu3 %v2817_v37  ;;  %v2812_v29 = vld [vmem:[%s13897_s2 + $0xd0] sm:$0xff]  ;;  %v2806_v37 = vld [vmem:[%s13897_s2 + $0xa0] sm:$0xff] }
 0x33e   :  { %v2808_v21 = vld [vmem:[%s13897_s2 + $0xb0] sm:$0xff] }
 0x33f   :  { %v2355_v26 = vsel %vm2354_vm4, %v6624_v47, %v2351_v60  ;;  %2879 = vmatpush.msra.mxu1 %v2811_v38  ;;  %2919 = vmatpush.msra.mxu3 %v2813_v4  ;;  %v2834_v47 = vld [vmem:[%s13897_s2 + $0x180] sm:$0xff]  ;;  %v2796_v4 = vld [vmem:[%s13897_s2 + $0x50] sm:$0xff] }
 0x340   :  { %v2360_v14 = vsel %vm2357_vm5, %v2359_v53, %v2355_v26  ;;  %v2794_v38 = vld [vmem:[%s13897_s2 + $0x40] sm:$0xff]  ;;  %v2792_v53 = vld [vmem:[%s13897_s2 + $0x30] sm:$0xff] }
 0x341   :  { %v2403_v36 = vmul.f32 %v6626_v6, %v2360_v14  ;;  %2880 = vmatpush.msra.mxu1 %v2807_v61  ;;  %2920 = vmatpush.msra.mxu3 %v2809_v41  ;;  %v2790_v60 = vld [vmem:[%s13897_s2 + $0x20] sm:$0xff]  ;;  %v2788_v61 = vld [vmem:[%s13897_s2 + $0x10] sm:$0xff] }
 0x342   :  { %v2781_v41 = vld [vmem:[%s13898_s1 + $0x20] sm:$0xff]  ;;  %v2783_v26 = vld [vmem:[%s13898_s1 + $0x30] sm:$0xff] }
 0x343   :  { %v9787_v13 = vadd.f32 %v2403_v36, %v2402_v0  ;;  %2881 = vmatpush.msra.mxu1 %v2803_v22  ;;  %2921 = vmatpush.msra.mxu3 %v2805_v17  ;;  %v2777_v6 = vld [vmem:[%s13898_s1] sm:$0xff]  ;;  %v3220_v22 = vld [vmem:[%s13899_s4 + $0x3e8] sm:$0xff] }
 0x344   :  { %v3219_v14 = vld [vmem:[%s13899_s4 + $0x3e0] sm:$0xff]  ;;  %v3216_v0 = vld [vmem:[%s13899_s4 + $0x3c8] sm:$0xff] }
 0x345   :  { %6627 = vtanh.f32 %v9787_v13  ;;  %2882 = vmatpush.msra.mxu1 %v2799_v11  ;;  %2922 = vmatpush.msra.mxu3 %v2801_v24  ;;  %v3215_v17 = vld [vmem:[%s13899_s4 + $0x3c0] sm:$0xff]  ;;  %v3212_v11 = vld [vmem:[%s13899_s4 + $0x3a8] sm:$0xff] }
 0x346   :  { %v3211_v36 = vld [vmem:[%s13899_s4 + $0x3a0] sm:$0xff] }
 0x347   :  { %2883 = vmatpush.msra.mxu1 %v2795_v56  ;;  %2923 = vmatpush.msra.mxu3 %v2797_v33  ;;  %v3207_v24 = vld [vmem:[%s13899_s4 + $0x380] sm:$0xff]  ;;  %v3204_v33 = vld [vmem:[%s13899_s4 + $0x368] sm:$0xff] }
 0x348   :  { %v3203_v56 = vld [vmem:[%s13899_s4 + $0x360] sm:$0xff] }
 0x349   :  { %2884 = vmatpush.msra.mxu1 %v2791_v31  ;;  %2924 = vmatpush.msra.mxu3 %v2793_v32  ;;  %v3195_v31 = vld [vmem:[%s13899_s4 + $0x320] sm:$0xff]  ;;  %v3196_v32 = vld [vmem:[%s13899_s4 + $0x328] sm:$0xff] }
 0x34b   :  { %v6628_v39 = vpop.eup %6627  ;;  %2885 = vmatpush.msra.mxu1 %v2787_v7  ;;  %2925 = vmatpush.msra.mxu3 %v2789_v42  ;;  %v3192_v7 = vld [vmem:[%s13899_s4 + $0x308] sm:$0xff]  ;;  %v3187_v42 = vld [vmem:[%s13899_s4 + $0x2e0] sm:$0xff] }
 0x34c   :  { %v9820_v40 = vmul.f32 %v6628_v39, %v2399_v3  ;;  %v3179_v39 = vld [vmem:[%s13899_s4 + $0x2a0] sm:$0xff]  ;;  %v3180_v3 = vld [vmem:[%s13899_s4 + $0x2a8] sm:$0xff] }
 0x34d   :  { %2967 = vmatpush.msrb.mxu1 %v2782_v50  ;;  %3007 = vmatpush.msrb.mxu3 %v2784_v8  ;;  %v3183_v50 = vld [vmem:[%s13899_s4 + $0x2c0] sm:$0xff]  ;;  %v3184_v8 = vld [vmem:[%s13899_s4 + $0x2c8] sm:$0xff] }
 0x34e   :  { %2565 = vmatmul.f32.vlgmr.msra.gmra.mxu0 %v9820_v40  ;;  %2605 = vmatmul.f32.vlgmr.msra.gmra.mxu2 %v9820_v40 }
 0x34f   :  { %2850 = vmatpush.msra.mxu0 %v2846_v12  ;;  %2886 = vmatmul.f32.vlgmr.msra.gmra.mxu1 %v9820_v40  ;;  %v3176_v12 = vld [vmem:[%s13899_s4 + $0x288] sm:$0xff] }
 0x350   :  { %2890 = vmatpush.msra.mxu2 %v2848_v43  ;;  %2926 = vmatmul.f32.vlgmr.msra.gmra.mxu3 %v9820_v40 }
 0x351   :  { %2851 = vmatpush.msra.mxu0 %v2842_v44  ;;  %2968 = vmatpush.msrb.mxu1 %v2778_v2  ;;  %v3171_v44 = vld [vmem:[%s13899_s4 + $0x260] sm:$0xff]  ;;  %v3172_v2 = vld [vmem:[%s13899_s4 + $0x268] sm:$0xff] }
 0x352   :  { %2891 = vmatpush.msra.mxu2 %v2844_v25  ;;  %3008 = vmatpush.msrb.mxu3 %v2780_v63  ;;  %v3167_v25 = vld [vmem:[%s13899_s4 + $0x240] sm:$0xff]  ;;  %v3168_v63 = vld [vmem:[%s13899_s4 + $0x248] sm:$0xff] }
 0x353   :  { %2852 = vmatpush.msra.mxu0 %v2838_v23  ;;  %3253 = vmatpush.msra.mxu1 %v3219_v14  ;;  %v3163_v23 = vld [vmem:[%s13899_s4 + $0x220] sm:$0xff] }
 0x354   :  { %2892 = vmatpush.msra.mxu2 %v2840_v15  ;;  %3293 = vmatpush.msra.mxu3 %v3220_v22  ;;  %v3164_v15 = vld [vmem:[%s13899_s4 + $0x228] sm:$0xff]  ;;  %v3135_v14 = vld [vmem:[%s13899_s4 + $0x140] sm:$0xff] }
 0x355   :  { %2853 = vmatpush.msra.mxu0 %v2834_v47  ;;  %3254 = vmatpush.msra.mxu1 %v3215_v17  ;;  %v10050_v47 = vld [vmem:[%s13902_s5] sm:$0xf]  ;;  %v3136_v22 = vld [vmem:[%s13899_s4 + $0x148] sm:$0xff]  ;;  %v3201_v17 = vld [vmem:[%s13899_s4 + $0x350] sm:$0xff] }
 0x356   :  { %2893 = vmatpush.msra.mxu2 %v2836_v45  ;;  %2645 = vmatmul.f32.vlgmr.msrb.gmra.mxu0 %v9820_v40  ;;  %v3159_v45 = vld [vmem:[%s13899_s4 + $0x200] sm:$0xff] }
 0x357   :  { %2685 = vmatmul.f32.vlgmr.msrb.gmra.mxu2 %v9820_v40  ;;  %2854 = vmatpush.msra.mxu0 %v2830_v48  ;;  %v3160_v48 = vld [vmem:[%s13899_s4 + $0x208] sm:$0xff] }
 0x358   :  { %2894 = vmatpush.msra.mxu2 %v2832_v16  ;;  %6473 = vmatmul.msk.f32.vlgmr.msrb.gmra.mxu1 %vm193_vm0, %v9865_v62  ;;  %v3155_v16 = vld [vmem:[%s13899_s4 + $0x1e0] sm:$0xff] }
 0x359   :  { %6475 = vmatmul.msk.f32.vlgmr.msrb.gmra.mxu3 %vm193_vm0, %v9865_v62  ;;  %2855 = vmatpush.msra.mxu0 %v2826_v51  ;;  %v3221_v51 = vld [vmem:[%s13899_s4 + $0x3f0] sm:$0xff] }
 0x35a   :  { %2895 = vmatpush.msra.mxu2 %v2828_v52  ;;  %3294 = vmatpush.msra.mxu3 %v3216_v0  ;;  %v3222_v52 = vld [vmem:[%s13899_s4 + $0x3f8] sm:$0xff] }
 0x35b   :  { %2856 = vmatpush.msra.mxu0 %v2822_v1  ;;  %3255 = vmatpush.msra.mxu1 %v3211_v36  ;;  %v3202_v36 = vld [vmem:[%s13899_s4 + $0x358] sm:$0xff] }
 0x35c   :  { %2896 = vmatpush.msra.mxu2 %v2824_v18  ;;  %3295 = vmatpush.msra.mxu3 %v3212_v11  ;;  %v3151_v18 = vld [vmem:[%s13899_s4 + $0x1c0] sm:$0xff] }
 0x35d   :  { %2857 = vmatpush.msra.mxu0 %v2818_v30  ;;  %3256 = vmatpush.msra.mxu1 %v3207_v24  ;;  %v3152_v30 = vld [vmem:[%s13899_s4 + $0x1c8] sm:$0xff]  ;;  %v3131_v24 = vld [vmem:[%s13899_s4 + $0x120] sm:$0xff] }
 0x35e   :  { %2897 = vmatpush.msra.mxu2 %v2820_v19  ;;  %3296 = vmatpush.msra.mxu3 %v3208_v46  ;;  %v3217_v19 = vld [vmem:[%s13899_s4 + $0x3d0] sm:$0xff]  ;;  %v3132_v46 = vld [vmem:[%s13899_s4 + $0x128] sm:$0xff] }
 0x35f   :  { %2858 = vmatpush.msra.mxu0 %v2814_v55  ;;  %3257 = vmatpush.msra.mxu1 %v3203_v56  ;;  %v3197_v56 = vld [vmem:[%s13899_s4 + $0x330] sm:$0xff] }
 0x360   :  { %2898 = vmatpush.msra.mxu2 %v2816_v20  ;;  %3297 = vmatpush.msra.mxu3 %v3204_v33  ;;  %v2541_v20 = vperm.slane %v10050_v47, 0 }
 0x361   :  { %2859 = vmatpush.msra.mxu0 %v2810_v54  ;;  %3258 = vmatpush.msra.mxu1 %v3199_v49  ;;  %v3218_v54 = vld [vmem:[%s13899_s4 + $0x3d8] sm:$0xff] }
 0x362   :  { %2899 = vmatpush.msra.mxu2 %v2812_v29  ;;  %3298 = vmatpush.msra.mxu3 %v3200_v28  ;;  %v3147_v29 = vld [vmem:[%s13899_s4 + $0x1a0] sm:$0xff]  ;;  %v3198_v28 = vld [vmem:[%s13899_s4 + $0x338] sm:$0xff] }
 0x363   :  { %2860 = vmatpush.msra.mxu0 %v2806_v37  ;;  %3259 = vmatpush.msra.mxu1 %v3195_v31  ;;  %v3148_v37 = vld [vmem:[%s13899_s4 + $0x1a8] sm:$0xff]  ;;  %v3127_v31 = vld [vmem:[%s13899_s4 + $0x100] sm:$0xff] }
 0x364   :  { %2900 = vmatpush.msra.mxu2 %v2808_v21  ;;  %3299 = vmatpush.msra.mxu3 %v3196_v32  ;;  %v3213_v21 = vld [vmem:[%s13899_s4 + $0x3b0] sm:$0xff]  ;;  %v3128_v32 = vld [vmem:[%s13899_s4 + $0x108] sm:$0xff] }
 0x365   :  { %2861 = vmatpush.msra.mxu0 %v2802_v58  ;;  %3260 = vmatpush.msra.mxu1 %v3191_v5  ;;  %v3214_v58 = vld [vmem:[%s13899_s4 + $0x3b8] sm:$0xff]  ;;  %v3193_v5 = vld [vmem:[%s13899_s4 + $0x310] sm:$0xff] }
 0x366   :  { %2901 = vmatpush.msra.mxu2 %v2804_v10  ;;  %3300 = vmatpush.msra.mxu3 %v3192_v7 }
 0x367   :  { %2862 = vmatpush.msra.mxu0 %v2798_v34  ;;  %3261 = vmatpush.msra.mxu1 %v3187_v42  ;;  %v3143_v34 = vld [vmem:[%s13899_s4 + $0x180] sm:$0xff]  ;;  %v3194_v42 = vld [vmem:[%s13899_s4 + $0x318] sm:$0xff] }
 0x368   :  { %2902 = vmatpush.msra.mxu2 %v2800_v59  ;;  %3301 = vmatpush.msra.mxu3 %v3188_v35  ;;  %v3144_v59 = vld [vmem:[%s13899_s4 + $0x188] sm:$0xff]  ;;  %v3123_v35 = vld [vmem:[%s13899_s4 + $0xe0] sm:$0xff] }
 0x369   :  { %2863 = vmatpush.msra.mxu0 %v2794_v38  ;;  %3262 = vmatpush.msra.mxu1 %v3183_v50  ;;  %v3209_v38 = vld [vmem:[%s13899_s4 + $0x390] sm:$0xff]  ;;  %v3124_v50 = vld [vmem:[%s13899_s4 + $0xe8] sm:$0xff] }
 0x36a   :  { %2903 = vmatpush.msra.mxu2 %v2796_v4  ;;  %3302 = vmatpush.msra.mxu3 %v3184_v8  ;;  %v3189_v8 = vld [vmem:[%s13899_s4 + $0x2f0] sm:$0xff] }
 0x36b   :  { %2864 = vmatpush.msra.mxu0 %v2790_v60  ;;  %3263 = vmatpush.msra.mxu1 %v3179_v39  ;;  %v3210_v60 = vld [vmem:[%s13899_s4 + $0x398] sm:$0xff] }
 0x36c   :  { %2904 = vmatpush.msra.mxu2 %v2792_v53  ;;  %3303 = vmatpush.msra.mxu3 %v3180_v3  ;;  %v3139_v53 = vld [vmem:[%s13899_s4 + $0x160] sm:$0xff]  ;;  %v3190_v3 = vld [vmem:[%s13899_s4 + $0x2f8] sm:$0xff] }
 0x36d   :  { %2865 = vmatpush.msra.mxu0 %v2786_v57  ;;  %v3140_v57 = vld [vmem:[%s13899_s4 + $0x168] sm:$0xff] }
 0x36e   :  { %2905 = vmatpush.msra.mxu2 %v2788_v61  ;;  %2866 = vmatmul.f32.vlgmr.msra.gmra.mxu0 %v9820_v40  ;;  %v3205_v61 = vld [vmem:[%s13899_s4 + $0x370] sm:$0xff] }
 0x36f   :  { %2906 = vmatmul.f32.vlgmr.msra.gmra.mxu2 %v9820_v40  ;;  %2947 = vmatpush.msrb.mxu0 %v2781_v41  ;;  %v3175_v40 = vld [vmem:[%s13899_s4 + $0x280] sm:$0xff] }
 0x370   :  { %2987 = vmatpush.msrb.mxu2 %v2783_v26  ;;  %3264 = vmatpush.msra.mxu1 %v3175_v40  ;;  %v2542_v26 = vperm.slane %v10050_v47, 1  ;;  %v3119_v40 = vld [vmem:[%s13899_s4 + $0xc0] sm:$0xff] }
 0x371   :  { %2948 = vmatpush.msrb.mxu0 %v2777_v6  ;;  %3304 = vmatpush.msra.mxu3 %v3176_v12  ;;  %v3206_v6 = vld [vmem:[%s13899_s4 + $0x378] sm:$0xff]  ;;  %v3120_v12 = vld [vmem:[%s13899_s4 + $0xc8] sm:$0xff] }
 0x372   :  { %2988 = vmatpush.msrb.mxu2 %v2779_v9  ;;  %3265 = vmatpush.msra.mxu1 %v3171_v44 }
 0x373   :  { %3305 = vmatpush.msra.mxu3 %v3172_v2  ;;  %3233 = vmatpush.msra.mxu0 %v3155_v16  ;;  %v10186_v2 = vld [vmem:[%s13901_s3] sm:$0xf]  ;;  %v3181_v16 = vld [vmem:[%s13899_s4 + $0x2b0] sm:$0xff] }
 0x374   :  { %3266 = vmatpush.msra.mxu1 %v3167_v25  ;;  %v2544_v25 = vperm.slane %v10050_v47, 3 }
 0x375   :  { %3306 = vmatpush.msra.mxu3 %v3168_v63  ;;  %3234 = vmatpush.msra.mxu0 %v3151_v18  ;;  %v3186_v63 = vld [vmem:[%s13899_s4 + $0x2d8] sm:$0xff]  ;;  %v3111_v18 = vld [vmem:[%s13899_s4 + $0x80] sm:$0xff] }
 0x376   :  { %6472 = vmatmul.msk.f32.vlgmr.msrb.gmra.mxu0 %vm193_vm0, %v9865_v62  ;;  %3267 = vmatpush.msra.mxu1 %v3163_v23 }
 0x377   :  { %6474 = vmatmul.msk.f32.vlgmr.msrb.gmra.mxu2 %vm193_vm0, %v9865_v62  ;;  %3307 = vmatpush.msra.mxu3 %v3164_v15  ;;  %v3156_v62 = vld [vmem:[%s13899_s4 + $0x1e8] sm:$0xff] }
 0x378   :  { %3268 = vmatpush.msra.mxu1 %v3159_v45  ;;  %3273 = vmatpush.msra.mxu2 %v3156_v62  ;;  %v3115_v45 = vld [vmem:[%s13899_s4 + $0xa0] sm:$0xff] }
 0x379   :  { %3308 = vmatpush.msra.mxu3 %v3160_v48  ;;  %3235 = vmatpush.msra.mxu0 %v3147_v29  ;;  %v3116_v48 = vld [vmem:[%s13899_s4 + $0xa8] sm:$0xff]  ;;  %v3178_v29 = vld [vmem:[%s13899_s4 + $0x298] sm:$0xff] }
 0x37a   :  { %3333 = vmatpush.msrb.mxu1 %v3221_v51  ;;  %3274 = vmatpush.msra.mxu2 %v3152_v30  ;;  %v3112_v30 = vld [vmem:[%s13899_s4 + $0x88] sm:$0xff] }
 0x37b   :  { %3373 = vmatpush.msrb.mxu3 %v3222_v52  ;;  %3236 = vmatpush.msra.mxu0 %v3143_v34  ;;  %v3182_v52 = vld [vmem:[%s13899_s4 + $0x2b8] sm:$0xff]  ;;  %v2543_v34 = vperm.slane %v10050_v47, 2  ;;  %v3104_v47 = vld [vmem:[%s13899_s4 + $0x48] sm:$0xff] }
 0x37c   :  { %3334 = vmatpush.msrb.mxu1 %v3217_v19  ;;  %3275 = vmatpush.msra.mxu2 %v3148_v37  ;;  %v3177_v19 = vld [vmem:[%s13899_s4 + $0x290] sm:$0xff]  ;;  %v3107_v37 = vld [vmem:[%s13899_s4 + $0x60] sm:$0xff] }
 0x37d   :  { %3374 = vmatpush.msrb.mxu3 %v3218_v54  ;;  %3237 = vmatpush.msra.mxu0 %v3139_v53  ;;  %v3103_v53 = vld [vmem:[%s13899_s4 + $0x40] sm:$0xff] }
 0x37e   :  { %3335 = vmatpush.msrb.mxu1 %v3213_v21  ;;  %3276 = vmatpush.msra.mxu2 %v3144_v59  ;;  %v3108_v21 = vld [vmem:[%s13899_s4 + $0x68] sm:$0xff] }
 0x37f   :  { %3375 = vmatpush.msrb.mxu3 %v3214_v58  ;;  %3238 = vmatpush.msra.mxu0 %v3135_v14  ;;  %v3173_v58 = vld [vmem:[%s13899_s4 + $0x270] sm:$0xff]  ;;  %v3100_v14 = vld [vmem:[%s13899_s4 + $0x28] sm:$0xff] }
 0x380   :  { %3336 = vmatpush.msrb.mxu1 %v3209_v38  ;;  %3277 = vmatpush.msra.mxu2 %v3140_v57  ;;  %v3174_v38 = vld [vmem:[%s13899_s4 + $0x278] sm:$0xff]  ;;  %v3169_v57 = vld [vmem:[%s13899_s4 + $0x250] sm:$0xff] }
 0x381   :  { %3376 = vmatpush.msrb.mxu3 %v3210_v60  ;;  %3239 = vmatpush.msra.mxu0 %v3131_v24 }
 0x382   :  { %3337 = vmatpush.msrb.mxu1 %v3205_v61  ;;  %3278 = vmatpush.msra.mxu2 %v3136_v22  ;;  %v3165_v22 = vld [vmem:[%s13899_s4 + $0x230] sm:$0xff] }
 0x383   :  { %3377 = vmatpush.msrb.mxu3 %v3206_v6  ;;  %3240 = vmatpush.msra.mxu0 %v3127_v31  ;;  %v3157_v31 = vld [vmem:[%s13899_s4 + $0x1f0] sm:$0xff] }
 0x384   :  { %3338 = vmatpush.msrb.mxu1 %v3201_v17  ;;  %3279 = vmatpush.msra.mxu2 %v3132_v46 }
 0x385   :  { %3378 = vmatpush.msrb.mxu3 %v3202_v36  ;;  %3241 = vmatpush.msra.mxu0 %v3123_v35  ;;  %v3166_v36 = vld [vmem:[%s13899_s4 + $0x238] sm:$0xff] }
 0x386   :  { %3339 = vmatpush.msrb.mxu1 %v3197_v56  ;;  %3280 = vmatpush.msra.mxu2 %v3128_v32  ;;  %v3095_v56 = vld [vmem:[%s13899_s4] sm:$0xff]  ;;  %v3158_v32 = vld [vmem:[%s13899_s4 + $0x1f8] sm:$0xff] }
 0x387   :  { %3379 = vmatpush.msrb.mxu3 %v3198_v28  ;;  %3242 = vmatpush.msra.mxu0 %v3119_v40  ;;  %v3162_v28 = vld [vmem:[%s13899_s4 + $0x218] sm:$0xff] }
 0x388   :  { %3340 = vmatpush.msrb.mxu1 %v3193_v5  ;;  %3281 = vmatpush.msra.mxu2 %v3124_v50  ;;  %v3018_v50 = vperm.slane %v10186_v2, 3 }
 0x389   :  { %3380 = vmatpush.msrb.mxu3 %v3194_v42  ;;  %3243 = vmatpush.msra.mxu0 %v3115_v45 }
 0x38a   :  { %3341 = vmatpush.msrb.mxu1 %v3189_v8  ;;  %3282 = vmatpush.msra.mxu2 %v3120_v12  ;;  %v3153_v8 = vld [vmem:[%s13899_s4 + $0x1d0] sm:$0xff] }
 0x38b   :  { %3381 = vmatpush.msrb.mxu3 %v3190_v3  ;;  %3244 = vmatpush.msra.mxu0 %v3111_v18 }
 0x38c   :  { %3283 = vmatpush.msra.mxu2 %v3116_v48 }
 0x38d   :  { %3382 = vmatpush.msrb.mxu3 %v3186_v63  ;;  %3245 = vmatpush.msra.mxu0 %v3107_v37 }
 0x38e   :  { %3284 = vmatpush.msra.mxu2 %v3112_v30 }
 0x38f   :  { %3383 = vmatpush.msrb.mxu3 %v3182_v52  ;;  %3246 = vmatpush.msra.mxu0 %v3103_v53 }
 0x390   :  { %3285 = vmatpush.msra.mxu2 %v3108_v21 }
 0x391   :  { %3384 = vmatpush.msrb.mxu3 %v3178_v29 }
 0x392   :  { %3286 = vmatpush.msra.mxu2 %v3104_v47  ;;  %v3133_v47 = vld [vmem:[%s13899_s4 + $0x130] sm:$0xff] }
 0x393   :  { %3385 = vmatpush.msrb.mxu3 %v3174_v38 }
 0x394   :  { %3287 = vmatpush.msra.mxu2 %v3100_v14  ;;  %v3129_v14 = vld [vmem:[%s13899_s4 + $0x110] sm:$0xff] }
 0x3a9   :  { %v2586_v43 = vpop.f32.mrf.mxu1 }
 0x3af   :  { %v2626_v55 = vpop.f32.mrf.mxu3 }
 0x3b1   :  { %v10070_v1 = vpop.f32.mrf.mxu1 }
 0x3b7   :  { %v10145_v33 = vpop.f32.mrf.mxu3 }
 0x3cb   :  { %v2566_v10 = vpop.f32.mrf.mxu0 }
 0x3cc   :  { %v2567_v4 = vadd.f32 %v2566_v10, %v2541_v20  ;;  %v10122_v9 = vpop.f32.mrf.mxu1  ;;  %v3016_v20 = vperm.slane %v10186_v2, 1 }
 0x3ce   :  { %v2587_v41 = vadd.f32 %v2586_v43, %v2567_v4  ;;  %v3185_v43 = vld [vmem:[%s13899_s4 + $0x2d0] sm:$0xff] }
 0x3cf   :  { %3342 = vmatpush.msrb.mxu1 %v3185_v43 }
 0x3d0   :  { %v6468_v0 = vmul.f32 -1.442695, %v2587_v41 }
 0x3d1   :  { %v2606_v11 = vpop.f32.mrf.mxu2  ;;  %3343 = vmatpush.msrb.mxu1 %v3181_v16 }
 0x3d2   :  { %6629 = vpow2.f32 %v6468_v0  ;;  %v2607_v49 = vadd.f32 %v2606_v11, %v2542_v26  ;;  %v3170_v26 = vld [vmem:[%s13899_s4 + $0x258] sm:$0xff] }
 0x3d3   :  { %v10203_v62 = vpop.f32.mrf.mxu3  ;;  %3344 = vmatpush.msrb.mxu1 %v3177_v19  ;;  %v2646_v60 = vpop.f32.mrf.mxu0  ;;  %3386 = vmatpush.msrb.mxu3 %v3170_v26 }
 0x3d4   :  { %v2627_v7 = vadd.f32 %v2626_v55, %v2607_v49  ;;  %v2647_v0 = vadd.f32 %v2646_v60, %v2543_v34  ;;  %v3161_v49 = vld [vmem:[%s13899_s4 + $0x210] sm:$0xff] }
 0x3d5   :  { %v2970_v15 = vpop.f32.mrf.mxu1  ;;  %3345 = vmatpush.msrb.mxu1 %v3173_v58  ;;  %3387 = vmatpush.msrb.mxu3 %v3166_v36  ;;  %v3137_v58 = vld [vmem:[%s13899_s4 + $0x150] sm:$0xff] }
 0x3d6   :  { %v6469_v39 = vmul.f32 -1.442695, %v2627_v7  ;;  %v2971_v55 = vadd.f32 %v2970_v15, %v10122_v9  ;;  %v3099_v9 = vld [vmem:[%s13899_s4 + $0x20] sm:$0xff]  ;;  %v2667_v5 = vadd.f32 %v10070_v1, %v2647_v0  ;;  %v3125_v36 = vld [vmem:[%s13899_s4 + $0xf0] sm:$0xff] }
 0x3d7   :  { %3346 = vmatpush.msrb.mxu1 %v3169_v57  ;;  %3247 = vmatpush.msra.mxu0 %v3099_v9  ;;  %v3134_v57 = vld [vmem:[%s13899_s4 + $0x138] sm:$0xff]  ;;  %v3015_v9 = vperm.slane %v10186_v2, 0 }
 0x3d8   :  { %v6630_v44 = vpop.eup %6629  ;;  %6631 = vpow2.f32 %v6469_v39  ;;  %v3024_v61 = vadd.f32 %v3016_v20, %v2971_v55  ;;  %3388 = vmatpush.msrb.mxu3 %v3162_v28  ;;  %v3154_v39 = vld [vmem:[%s13899_s4 + $0x1d8] sm:$0xff]  ;;  %v3141_v55 = vld [vmem:[%s13899_s4 + $0x170] sm:$0xff] }
 0x3d9   :  { %v10192_v23 = vadd.f32 1.0, %v6630_v44  ;;  %3347 = vmatpush.msrb.mxu1 %v3165_v22  ;;  %3248 = vmatpush.msra.mxu0 %v3095_v56  ;;  %v3149_v44 = vld [vmem:[%s13899_s4 + $0x1b0] sm:$0xff]  ;;  %v3142_v20 = vld [vmem:[%s13899_s4 + $0x178] sm:$0xff] }
 0x3da   :  { %v2686_v51 = vpop.f32.mrf.mxu2  ;;  %v6477_v24 = vmul.f32 -1.442695, %v3024_v61  ;;  %v3130_v22 = vld [vmem:[%s13899_s4 + $0x118] sm:$0xff] }
 0x3db   :  { %6633 = vrcp.f32 %v10192_v23  ;;  %v2687_v54 = vadd.f32 %v2686_v51, %v2544_v25  ;;  %3348 = vmatpush.msrb.mxu1 %v3161_v49  ;;  %3313 = vmatpush.msrb.mxu0 %v3157_v31  ;;  %v2724_v12 = vand.u32 2147483648, %v10192_v23  ;;  %v3150_v25 = vld [vmem:[%s13899_s4 + $0x1b8] sm:$0xff]  ;;  %vm2718_vm11 = vweird.f32 %v10192_v23  ;;  %v3145_v51 = vld [vmem:[%s13899_s4 + $0x190] sm:$0xff] }
 0x3dc   :  { %v3010_v46 = vpop.f32.mrf.mxu3  ;;  %v2722_v15 = vand.u32 2147483647, %v10192_v23  ;;  %v3121_v49 = vld [vmem:[%s13899_s4 + $0xd0] sm:$0xff]  ;;  %v3122_v28 = vld [vmem:[%s13899_s4 + $0xd8] sm:$0xff] }
 0x3dd   :  { %v2707_v59 = vadd.f32 %v10145_v33, %v2687_v54  ;;  %v3096_v33 = vld [vmem:[%s13899_s4 + $0x8] sm:$0xff]  ;;  %v3011_v35 = vadd.f32 %v3010_v46, %v10203_v62  ;;  %3314 = vmatpush.msrb.mxu0 %v3153_v8  ;;  %v2725_v19 = vor.u32 1.1754944e-38, %v2724_v12 }
 0x3de   :  { %v6632_v10 = vpop.eup %6631  ;;  %3288 = vmatpush.msra.mxu2 %v3096_v33  ;;  %vm2723_vm15 = vcmp.eq.f32.partialorder %v2722_v15, 8.507059e+37  ;;  %v3109_v15 = vld [vmem:[%s13899_s4 + $0x70] sm:$0xff] }
 0x3df   :  { %v10237_v4 = vadd.f32 1.0, %v6632_v10  ;;  %v6470_v41 = vmul.f32 -1.442695, %v2707_v59  ;;  %v3026_v16 = vadd.f32 %v3018_v50, %v3011_v35  ;;  %3315 = vmatpush.msrb.mxu0 %v3149_v44  ;;  %v3138_v10 = vld [vmem:[%s13899_s4 + $0x158] sm:$0xff] }
 0x3e0   :  { %3353 = vmatpush.msrb.mxu2 %v3158_v32  ;;  %v3118_v35 = vld [vmem:[%s13899_s4 + $0xb8] sm:$0xff] }
 0x3e1   :  { %v10251_v6 = vpop.eup %6633  ;;  %6635 = vrcp.f32 %v10237_v4  ;;  %v2743_v45 = vand.u32 2147483648, %v10237_v4  ;;  %v2741_v30 = vand.u32 2147483647, %v10237_v4  ;;  %3316 = vmatpush.msrb.mxu0 %v3145_v51  ;;  %vm2737_vm14 = vweird.f32 %v10237_v4  ;;  %v3529_v51 = vld [vmem:[%s13897_s2 + $0x1d8] sm:$0xff] }
 0x3e2   :  { %v2714_v17 = vmul.f32 %v10251_v6, %v10192_v23  ;;  %6637 = vpow2.f32 %v6470_v41  ;;  %vm2719_vm10 = vweird.f32 %v10251_v6  ;;  %3354 = vmatpush.msrb.mxu2 %v3154_v39  ;;  %v3146_v23 = vld [vmem:[%s13899_s4 + $0x198] sm:$0xff]  ;;  %v6478_v38 = vmul.f32 -1.442695, %v3026_v16 }
 0x3e3   :  { %6639 = vpow2.f32 %v6477_v24  ;;  %vm10311_vm12 = vmor %vm2718_vm11, %vm2719_vm10  ;;  %v2744_v37 = vor.u32 1.1754944e-38, %v2743_v45  ;;  %3317 = vmatpush.msrb.mxu0 %v3141_v55  ;;  %vm2742_vm2 = vcmp.eq.f32.partialorder %v2741_v30, 8.507059e+37  ;;  %v3110_v45 = vld [vmem:[%s13899_s4 + $0x78] sm:$0xff]  ;;  %v3523_v30 = vld [vmem:[%s13897_s2 + $0x1a8] sm:$0xff] }
 0x3e4   :  { %v2715_v11 = vsub.f32 1.0, %v2714_v17  ;;  %6641 = vtanh.f32 %v2667_v5  ;;  %3355 = vmatpush.msrb.mxu2 %v3150_v25  ;;  %v3531_v25 = vld [vmem:[%s13897_s2 + $0x1e8] sm:$0xff] }
 0x3e5   :  { %3318 = vmatpush.msrb.mxu0 %v3137_v58  ;;  %v3521_v58 = vld [vmem:[%s13897_s2 + $0x198] sm:$0xff] }
 0x3e6   :  { %v2716_v7 = vmul.f32 %v10251_v6, %v2715_v11  ;;  %3356 = vmatpush.msrb.mxu2 %v3146_v23  ;;  %v3126_v11 = vld [vmem:[%s13899_s4 + $0xf8] sm:$0xff]  ;;  %v3105_v23 = vld [vmem:[%s13899_s4 + $0x50] sm:$0xff] }
 0x3e7   :  { %v6636_v42 = vpop.eup %6635  ;;  %3319 = vmatpush.msrb.mxu0 %v3133_v47 }
 0x3e8   :  { %v6638_v1 = vpop.eup %6637  ;;  %v2733_v3 = vmul.f32 %v6636_v42, %v10237_v4  ;;  %v2717_v40 = vadd.f32 %v10251_v6, %v2716_v7  ;;  %vm2738_vm13 = vweird.f32 %v6636_v42  ;;  %3357 = vmatpush.msrb.mxu2 %v3142_v20  ;;  %v3101_v20 = vld [vmem:[%s13899_s4 + $0x30] sm:$0xff]  ;;  %v3497_v7 = vld [vmem:[%s13897_s2 + $0xd8] sm:$0xff] }
 0x3e9   :  { %v10300_v43 = vadd.f32 1.0, %v6638_v1  ;;  %v6640_v54 = vpop.eup %6639  ;;  %vm2739_vm1 = vmor %vm2737_vm14, %vm2738_vm13  ;;  %3320 = vmatpush.msrb.mxu0 %v3129_v14 }
 0x3ea   :  { %v2734_v63 = vsub.f32 1.0, %v2733_v3  ;;  %v2721_v18 = vsel %vm10311_vm12, %v10251_v6, %v2717_v40  ;;  %v6642_v34 = vpop.eup %6641  ;;  %v10339_v53 = vadd.f32 1.0, %v6640_v54  ;;  %3358 = vmatpush.msrb.mxu2 %v3138_v10  ;;  %v3113_v3 = vld [vmem:[%s13899_s4 + $0x90] sm:$0xff]  ;;  %v3114_v40 = vld [vmem:[%s13899_s4 + $0x98] sm:$0xff]  ;;  %v3515_v10 = vld [vmem:[%s13897_s2 + $0x168] sm:$0xff] }
 0x3eb   :  { %6643 = vrcp.f32 %v10300_v43  ;;  %v2867_v62 = vpop.f32.mrf.mxu0  ;;  %v2726_v21 = vsel %vm2723_vm15, %v2725_v19, %v2721_v18  ;;  %v2763_v46 = vand.u32 2147483648, %v10300_v43  ;;  %v2761_v33 = vand.u32 2147483647, %v10300_v43  ;;  %3321 = vmatpush.msrb.mxu0 %v3125_v36  ;;  %v3525_v19 = vld [vmem:[%s13897_s2 + $0x1b8] sm:$0xff] }
 0x3ec   :  { %v2735_v52 = vmul.f32 %v6636_v42, %v2734_v63  ;;  %v2769_v41 = vmul.f32 %v6642_v34, %v2726_v21  ;;  %3359 = vmatpush.msrb.mxu2 %v3134_v57  ;;  %6645 = vpow2.f32 %v6478_v38  ;;  %vm2757_vm4 = vweird.f32 %v10300_v43  ;;  %v3533_v63 = vld [vmem:[%s13897_s2 + $0x1f8] sm:$0xff]  ;;  %v3519_v21 = vld [vmem:[%s13897_s2 + $0x188] sm:$0xff] }
 0x3ed   :  { %6647 = vrcp.f32 %v10339_v53  ;;  %3322 = vmatpush.msrb.mxu0 %v3121_v49  ;;  %v2764_v39 = vor.u32 1.1754944e-38, %v2763_v46  ;;  %vm2762_vm6 = vcmp.eq.f32.partialorder %v2761_v33, 8.507059e+37  ;;  %v3102_v54 = vld [vmem:[%s13899_s4 + $0x38] sm:$0xff]  ;;  %v3017_v38 = vperm.slane %v10186_v2, 2  ;;  %v3511_v57 = vld [vmem:[%s13897_s2 + $0x148] sm:$0xff]  ;;  %v3494_v49 = vld [vmem:[%s13897_s2 + $0xc0] sm:$0xff] }
 0x3ee   :  { %v2736_v29 = vadd.f32 %v6636_v42, %v2735_v52  ;;  %3360 = vmatpush.msrb.mxu2 %v3130_v22  ;;  %v3106_v52 = vld [vmem:[%s13899_s4 + $0x58] sm:$0xff]  ;;  %v3061_v36 = vand.u32 2147483648, %v10339_v53  ;;  %vm3055_vm8 = vweird.f32 %v10339_v53  ;;  %v3059_v46 = vand.u32 2147483647, %v10339_v53 }
 0x3ef   :  { %v3517_v34 = vld [vmem:[%s13897_s2 + $0x178] sm:$0xff] }
 0x3f0   :  { %v2740_v59 = vsel %vm2739_vm1, %v6636_v42, %v2736_v29  ;;  %3361 = vmatpush.msrb.mxu2 %v3126_v11  ;;  %v3117_v42 = vld [vmem:[%s13899_s4 + $0xb0] sm:$0xff]  ;;  %v3513_v2 = vld [vmem:[%s13897_s2 + $0x158] sm:$0xff]  ;;  %vm3060_vm12 = vcmp.eq.f32.partialorder %v3059_v46, 8.507059e+37 }
 0x3f1   :  { %v6644_v4 = vpop.eup %6643  ;;  %v2745_v60 = vsel %vm2742_vm2, %v2744_v37, %v2740_v59  ;;  %3323 = vmatpush.msrb.mxu0 %v3117_v42  ;;  %v3501_v33 = vld [vmem:[%s13897_s2 + $0xf8] sm:$0xff]  ;;  %v3062_v42 = vor.u32 1.1754944e-38, %v3061_v36  ;;  %v3506_v36 = vld [vmem:[%s13897_s2 + $0x120] sm:$0xff]  ;;  %v3504_v46 = vld [vmem:[%s13897_s2 + $0x110] sm:$0xff] }
 0x3f2   :  { %v2768_v61 = vmul.f32 %v2745_v60, %v9619_v27  ;;  %v2753_v26 = vmul.f32 %v6644_v4, %v10300_v43  ;;  %vm2758_vm3 = vweird.f32 %v6644_v4  ;;  %v2907_v32 = vpop.f32.mrf.mxu2  ;;  %3362 = vmatpush.msrb.mxu2 %v3122_v28  ;;  %v6646_v50 = vpop.eup %6645  ;;  %v3098_v60 = vld [vmem:[%s13899_s4 + $0x18] sm:$0xff] }
 0x3f3   :  { %v2950_v6 = vpop.f32.mrf.mxu0  ;;  %vm10375_vm5 = vmor %vm2757_vm4, %vm2758_vm3  ;;  %v10387_v1 = vpop.eup %6647  ;;  %3324 = vmatpush.msrb.mxu0 %v3113_v3  ;;  %v10409_v16 = vadd.f32 1.0, %v6646_v50 }
 0x3f4   :  { %v10356_v17 = vadd.f32 %v2769_v41, %v2768_v61  ;;  %v2754_v0 = vsub.f32 1.0, %v2753_v26  ;;  %v2951_v27 = vadd.f32 %v2950_v6, %v2867_v62  ;;  %3363 = vmatpush.msrb.mxu2 %v3118_v35  ;;  %v3051_v48 = vmul.f32 %v10387_v1, %v10339_v53  ;;  %v3527_v62 = vld [vmem:[%s13897_s2 + $0x1c8] sm:$0xff]  ;;  %v3509_v26 = vld [vmem:[%s13897_s2 + $0x138] sm:$0xff] }
 0x3f5   :  { %3325 = vmatpush.msrb.mxu0 %v3109_v15  ;;  %v3507_v41 = vld [vmem:[%s13897_s2 + $0x128] sm:$0xff]  ;;  %vm3056_vm7 = vweird.f32 %v10387_v1  ;;  %vm3075_vm1 = vweird.f32 %v10409_v16 }
 0x3f6   :  { %6649 = vtanh.f32 %v10356_v17  ;;  %v2755_v24 = vmul.f32 %v6644_v4, %v2754_v0  ;;  %v3023_v56 = vadd.f32 %v3015_v9, %v2951_v27  ;;  %3364 = vmatpush.msrb.mxu2 %v3114_v40  ;;  %v3052_v29 = vsub.f32 1.0, %v3051_v48  ;;  %v3503_v0 = vld [vmem:[%s13897_s2 + $0x108] sm:$0xff]  ;;  %v3505_v27 = vld [vmem:[%s13897_s2 + $0x118] sm:$0xff]  ;;  %vm10493_vm9 = vmor %vm3055_vm8, %vm3056_vm7 }
 0x3f7   :  { %3326 = vmatpush.msrb.mxu0 %v3105_v23  ;;  %v3483_v48 = vld [vmem:[%s13897_s2 + $0x68] sm:$0xff] }
 0x3f8   :  { %v2756_v31 = vadd.f32 %v6644_v4, %v2755_v24  ;;  %v6476_v5 = vmul.f32 -1.442695, %v3023_v56  ;;  %3365 = vmatpush.msrb.mxu2 %v3110_v45  ;;  %v3053_v47 = vmul.f32 %v10387_v1, %v3052_v29  ;;  %v3499_v56 = vld [vmem:[%s13897_s2 + $0xe8] sm:$0xff]  ;;  %v3473_v29 = vld [vmem:[%s13897_s2 + $0x18] sm:$0xff] }
 0x3f9   :  { %3327 = vmatpush.msrb.mxu0 %v3101_v20  ;;  %v3479_v23 = vld [vmem:[%s13897_s2 + $0x48] sm:$0xff] }
 0x3fa   :  { %v2760_v8 = vsel %vm10375_vm5, %v6644_v4, %v2756_v31  ;;  %6651 = vpow2.f32 %v6476_v5  ;;  %v2990_v37 = vpop.f32.mrf.mxu2  ;;  %3366 = vmatpush.msrb.mxu2 %v3106_v52  ;;  %v3097_v4 = vld [vmem:[%s13899_s4 + $0x10] sm:$0xff]  ;;  %v3054_v22 = vadd.f32 %v10387_v1, %v3053_v47  ;;  %v3495_v5 = vld [vmem:[%s13897_s2 + $0xc8] sm:$0xff] }
 0x3fb   :  { %v2765_v43 = vsel %vm2762_vm6, %v2764_v39, %v2760_v8  ;;  %6653 = vrcp.f32 %v10409_v16  ;;  %v2991_v59 = vadd.f32 %v2990_v37, %v2907_v32  ;;  %3328 = vmatpush.msrb.mxu0 %v3097_v4  ;;  %v3491_v8 = vld [vmem:[%s13897_s2 + $0xa8] sm:$0xff]  ;;  %v3493_v39 = vld [vmem:[%s13897_s2 + $0xb8] sm:$0xff]  ;;  %v3532_v47 = vld [vmem:[%s13897_s2 + $0x1f0] sm:$0xff] }
 0x3fc   :  { %v6650_v12 = vpop.eup %6649  ;;  %3367 = vmatpush.msrb.mxu2 %v3102_v54  ;;  %v3058_v32 = vsel %vm10493_vm9, %v10387_v1, %v3054_v22  ;;  %v3471_v54 = vld [vmem:[%s13897_s2 + $0x8] sm:$0xff] }
 0x3fd   :  { %v2772_v44 = vmul.f32 %v6650_v12, %v2765_v43  ;;  %v3025_v9 = vadd.f32 %v3017_v38, %v2991_v59  ;;  %v3063_v3 = vsel %vm3060_vm12, %v3062_v42, %v3058_v32  ;;  %v3487_v12 = vld [vmem:[%s13897_s2 + $0x88] sm:$0xff]  ;;  %v3489_v43 = vld [vmem:[%s13897_s2 + $0x98] sm:$0xff]  ;;  %v3486_v32 = vld [vmem:[%s13897_s2 + $0x80] sm:$0xff] }
 0x3fe   :  { %3368 = vmatpush.msrb.mxu2 %v3098_v60  ;;  %v3086_v15 = vmul.f32 %v3063_v3, %v9787_v13  ;;  %v3481_v13 = vld [vmem:[%s13897_s2 + $0x58] sm:$0xff]  ;;  %v3530_v60 = vld [vmem:[%s13897_s2 + $0x1e0] sm:$0xff]  ;;  %v10613_v22 = vld [vmem:[%s13900_s0 + $0x28] sm:$0xff] }
 0x3ff   :  { %3269 = vmatmul.f32.vlgmr.msra.gmra.mxu1 %v2772_v44  ;;  %3309 = vmatmul.f32.vlgmr.msra.gmra.mxu3 %v2772_v44  ;;  %v3484_v42 = vld [vmem:[%s13897_s2 + $0x70] sm:$0xff]  ;;  %v3880_v20 = vld [vmem:[%s13899_s4 + $0x328] sm:$0xff] }
 0x400   :  { %3554 = vmatpush.msra.mxu1 %v3531_v25  ;;  %3594 = vmatpush.msra.mxu3 %v3533_v63  ;;  %v6652_v18 = vpop.eup %6651  ;;  %v3472_v3 = vld [vmem:[%s13897_s2 + $0x10] sm:$0xff] }
 0x401   :  { %v10429_v55 = vadd.f32 1.0, %v6652_v18  ;;  %v10465_v61 = vpop.eup %6653  ;;  %v3081_v18 = vand.u32 2147483648, %v10409_v16 }
 0x402   :  { %3555 = vmatpush.msra.mxu1 %v3527_v62  ;;  %3595 = vmatpush.msra.mxu3 %v3529_v51  ;;  %v3071_v11 = vmul.f32 %v10465_v61, %v10409_v16  ;;  %v3485_v62 = vld [vmem:[%s13897_s2 + $0x78] sm:$0xff]  ;;  %vm3076_vm15 = vweird.f32 %v10465_v61 }
 0x403   :  { %6655 = vrcp.f32 %v10429_v55  ;;  %v3042_v28 = vand.u32 2147483648, %v10429_v55  ;;  %v3040_v53 = vand.u32 2147483647, %v10429_v55  ;;  %vm3036_vm11 = vweird.f32 %v10429_v55  ;;  %vm10549_vm2 = vmor %vm3075_vm1, %vm3076_vm15 }
 0x404   :  { %3556 = vmatpush.msra.mxu1 %v3523_v30  ;;  %3596 = vmatpush.msra.mxu3 %v3525_v19  ;;  %6657 = vtanh.f32 %v3025_v9  ;;  %v3072_v35 = vsub.f32 1.0, %v3071_v11  ;;  %v3475_v30 = vld [vmem:[%s13897_s2 + $0x28] sm:$0xff]  ;;  %v3477_v19 = vld [vmem:[%s13897_s2 + $0x38] sm:$0xff]  ;;  %v3514_v9 = vld [vmem:[%s13897_s2 + $0x160] sm:$0xff] }
 0x405   :  { %v3043_v1 = vor.u32 1.1754944e-38, %v3042_v28  ;;  %vm3041_vm14 = vcmp.eq.f32.partialorder %v3040_v53, 8.507059e+37  ;;  %v3508_v11 = vld [vmem:[%s13897_s2 + $0x130] sm:$0xff] }
 0x406   :  { %3557 = vmatpush.msra.mxu1 %v3519_v21  ;;  %3597 = vmatpush.msra.mxu3 %v3521_v58  ;;  %v3073_v25 = vmul.f32 %v10465_v61, %v3072_v35  ;;  %v3468_v21 = vld [vmem:[%s13898_s1 + $0x38] sm:$0xff]  ;;  %v3082_v58 = vor.u32 1.1754944e-38, %v3081_v18  ;;  %v3496_v28 = vld [vmem:[%s13897_s2 + $0xd0] sm:$0xff]  ;;  %v3478_v35 = vld [vmem:[%s13897_s2 + $0x40] sm:$0xff] }
 0x407   :  { %3349 = vmatmul.f32.vlgmr.msrb.gmra.mxu1 %v2772_v44  ;;  %3389 = vmatmul.f32.vlgmr.msrb.gmra.mxu3 %v2772_v44  ;;  %v3492_v53 = vld [vmem:[%s13897_s2 + $0xb0] sm:$0xff]  ;;  %v3888_v18 = vld [vmem:[%s13899_s4 + $0x368] sm:$0xff] }
 0x408   :  { %3558 = vmatpush.msra.mxu1 %v3515_v10  ;;  %3598 = vmatpush.msra.mxu3 %v3517_v34  ;;  %v3074_v52 = vadd.f32 %v10465_v61, %v3073_v25  ;;  %v3462_v10 = vld [vmem:[%s13898_s1 + $0x8] sm:$0xff]  ;;  %v3464_v34 = vld [vmem:[%s13898_s1 + $0x18] sm:$0xff]  ;;  %v3903_v25 = vld [vmem:[%s13899_s4 + $0x3e0] sm:$0xff] }
 0x409   :  { %v6656_v6 = vpop.eup %6655 }
 0x40a   :  { %3559 = vmatpush.msra.mxu1 %v3511_v57  ;;  %3599 = vmatpush.msra.mxu3 %v3513_v2  ;;  %v3032_v14 = vmul.f32 %v6656_v6, %v10429_v55  ;;  %vm3037_vm10 = vweird.f32 %v6656_v6  ;;  %v6658_v44 = vpop.eup %6657  ;;  %v3079_v55 = vand.u32 2147483647, %v10409_v16  ;;  %v3078_v37 = vsel %vm10549_vm2, %v10465_v61, %v3074_v52  ;;  %v3466_v16 = vld [vmem:[%s13898_s1 + $0x28] sm:$0xff]  ;;  %v3526_v57 = vld [vmem:[%s13897_s2 + $0x1c0] sm:$0xff]  ;;  %v3528_v2 = vld [vmem:[%s13897_s2 + $0x1d0] sm:$0xff] }
 0x40b   :  { %vm3038_vm13 = vmor %vm3036_vm11, %vm3037_vm10  ;;  %v3522_v61 = vld [vmem:[%s13897_s2 + $0x1a0] sm:$0xff] }
 0x40c   :  { %3560 = vmatpush.msra.mxu1 %v3507_v41  ;;  %3600 = vmatpush.msra.mxu3 %v3509_v26  ;;  %v3033_v24 = vsub.f32 1.0, %v3032_v14  ;;  %vm3080_vm3 = vcmp.eq.f32.partialorder %v3079_v55, 8.507059e+37  ;;  %v3524_v41 = vld [vmem:[%s13897_s2 + $0x1b0] sm:$0xff]  ;;  %v3518_v26 = vld [vmem:[%s13897_s2 + $0x180] sm:$0xff] }
 0x40d   :  { %v3083_v38 = vsel %vm3080_vm3, %v3082_v58, %v3078_v37  ;;  %v3516_v14 = vld [vmem:[%s13897_s2 + $0x170] sm:$0xff]  ;;  %v3887_v52 = vld [vmem:[%s13899_s4 + $0x360] sm:$0xff]  ;;  %v3868_v58 = vld [vmem:[%s13899_s4 + $0x2c8] sm:$0xff] }
 0x40e   :  { %3561 = vmatpush.msra.mxu1 %v3503_v0  ;;  %3601 = vmatpush.msra.mxu3 %v3505_v27  ;;  %v3034_v31 = vmul.f32 %v6656_v6, %v3033_v24  ;;  %v3510_v0 = vld [vmem:[%s13897_s2 + $0x140] sm:$0xff]  ;;  %v3512_v27 = vld [vmem:[%s13897_s2 + $0x150] sm:$0xff] }
 0x40f   :  { %v3502_v24 = vld [vmem:[%s13897_s2 + $0x100] sm:$0xff] }
 0x410   :  { %3562 = vmatpush.msra.mxu1 %v3499_v56  ;;  %3602 = vmatpush.msra.mxu3 %v3501_v33  ;;  %v3035_v50 = vadd.f32 %v6656_v6, %v3034_v31  ;;  %v3498_v56 = vld [vmem:[%s13897_s2 + $0xe0] sm:$0xff]  ;;  %v3500_v33 = vld [vmem:[%s13897_s2 + $0xf0] sm:$0xff] }
 0x411   :  { %v3490_v31 = vld [vmem:[%s13897_s2 + $0xa0] sm:$0xff] }
 0x412   :  { %3563 = vmatpush.msra.mxu1 %v3495_v5  ;;  %3603 = vmatpush.msra.mxu3 %v3497_v7  ;;  %v3039_v40 = vsel %vm3038_vm13, %v6656_v6, %v3035_v50  ;;  %v3520_v6 = vld [vmem:[%s13897_s2 + $0x190] sm:$0xff]  ;;  %v3482_v7 = vld [vmem:[%s13897_s2 + $0x60] sm:$0xff] }
 0x413   :  { %v3044_v63 = vsel %vm3041_vm14, %v3043_v1, %v3039_v40  ;;  %v3488_v5 = vld [vmem:[%s13897_s2 + $0x90] sm:$0xff]  ;;  %v3470_v1 = vld [vmem:[%s13897_s2] sm:$0xff] }
 0x414   :  { %3564 = vmatpush.msra.mxu1 %v3491_v8  ;;  %3604 = vmatpush.msra.mxu3 %v3493_v39  ;;  %v3087_v45 = vmul.f32 %v6658_v44, %v3044_v63  ;;  %v3480_v50 = vld [vmem:[%s13897_s2 + $0x50] sm:$0xff]  ;;  %v3474_v8 = vld [vmem:[%s13897_s2 + $0x20] sm:$0xff]  ;;  %v3904_v63 = vld [vmem:[%s13899_s4 + $0x3e8] sm:$0xff] }
 0x415   :  { %v3476_v39 = vld [vmem:[%s13897_s2 + $0x30] sm:$0xff]  ;;  %v3465_v40 = vld [vmem:[%s13898_s1 + $0x20] sm:$0xff] }
 0x416   :  { %3565 = vmatpush.msra.mxu1 %v3487_v12  ;;  %3605 = vmatpush.msra.mxu3 %v3489_v43  ;;  %v10529_v51 = vadd.f32 %v3087_v45, %v3086_v15  ;;  %v3467_v12 = vld [vmem:[%s13898_s1 + $0x30] sm:$0xff]  ;;  %v3461_v43 = vld [vmem:[%s13898_s1] sm:$0xff]  ;;  %v3900_v45 = vld [vmem:[%s13899_s4 + $0x3c8] sm:$0xff] }
 0x417   :  { %v3463_v44 = vld [vmem:[%s13898_s1 + $0x10] sm:$0xff]  ;;  %v3899_v15 = vld [vmem:[%s13899_s4 + $0x3c0] sm:$0xff] }
 0x418   :  { %3566 = vmatpush.msra.mxu1 %v3483_v48  ;;  %3606 = vmatpush.msra.mxu3 %v3485_v62  ;;  %6659 = vtanh.f32 %v10529_v51  ;;  %v3895_v48 = vld [vmem:[%s13899_s4 + $0x3a0] sm:$0xff]  ;;  %v3896_v62 = vld [vmem:[%s13899_s4 + $0x3a8] sm:$0xff] }
 0x419   :  { %v3879_v55 = vld [vmem:[%s13899_s4 + $0x320] sm:$0xff] }
 0x41a   :  { %3567 = vmatpush.msra.mxu1 %v3479_v23  ;;  %3607 = vmatpush.msra.mxu3 %v3481_v13  ;;  %v3891_v23 = vld [vmem:[%s13899_s4 + $0x380] sm:$0xff]  ;;  %v3892_v13 = vld [vmem:[%s13899_s4 + $0x388] sm:$0xff] }
 0x41b   :  { %v3871_v37 = vld [vmem:[%s13899_s4 + $0x2e0] sm:$0xff] }
 0x41c   :  { %3568 = vmatpush.msra.mxu1 %v3475_v30  ;;  %3608 = vmatpush.msra.mxu3 %v3477_v19  ;;  %v3883_v30 = vld [vmem:[%s13899_s4 + $0x340] sm:$0xff]  ;;  %v3884_v19 = vld [vmem:[%s13899_s4 + $0x348] sm:$0xff] }
 0x41e   :  { %3569 = vmatpush.msra.mxu1 %v3471_v54  ;;  %3609 = vmatpush.msra.mxu3 %v3473_v29  ;;  %v6660_v59 = vpop.eup %6659  ;;  %v3875_v54 = vld [vmem:[%s13899_s4 + $0x300] sm:$0xff]  ;;  %v3876_v29 = vld [vmem:[%s13899_s4 + $0x308] sm:$0xff] }
 0x41f   :  { %v10574_v4 = vmul.f32 %v6660_v59, %v3083_v38  ;;  %v3859_v59 = vld [vmem:[%s13899_s4 + $0x280] sm:$0xff]  ;;  %v3860_v38 = vld [vmem:[%s13899_s4 + $0x288] sm:$0xff] }
 0x420   :  { %3651 = vmatpush.msrb.mxu1 %v3466_v16  ;;  %3691 = vmatpush.msrb.mxu3 %v3468_v21  ;;  %v3872_v16 = vld [vmem:[%s13899_s4 + $0x2e8] sm:$0xff]  ;;  %v3867_v21 = vld [vmem:[%s13899_s4 + $0x2c0] sm:$0xff] }
 0x421   :  { %3249 = vmatmul.f32.vlgmr.msra.gmra.mxu0 %v10574_v4  ;;  %3289 = vmatmul.f32.vlgmr.msra.gmra.mxu2 %v10574_v4 }
 0x422   :  { %3652 = vmatpush.msrb.mxu1 %v3462_v10  ;;  %3692 = vmatpush.msrb.mxu3 %v3464_v34  ;;  %v3863_v10 = vld [vmem:[%s13899_s4 + $0x2a0] sm:$0xff]  ;;  %v3864_v34 = vld [vmem:[%s13899_s4 + $0x2a8] sm:$0xff] }
 0x423   :  { %3534 = vmatpush.msra.mxu0 %v3530_v60  ;;  %3570 = vmatmul.f32.vlgmr.msra.gmra.mxu1 %v10574_v4  ;;  %v3855_v60 = vld [vmem:[%s13899_s4 + $0x260] sm:$0xff] }
 0x424   :  { %3574 = vmatpush.msra.mxu2 %v3532_v47  ;;  %3610 = vmatmul.f32.vlgmr.msra.gmra.mxu3 %v10574_v4  ;;  %v3856_v47 = vld [vmem:[%s13899_s4 + $0x268] sm:$0xff] }
 0x425   :  { %3535 = vmatpush.msra.mxu0 %v3526_v57  ;;  %3937 = vmatpush.msra.mxu1 %v3903_v25  ;;  %v3851_v57 = vld [vmem:[%s13899_s4 + $0x240] sm:$0xff] }
 0x426   :  { %3575 = vmatpush.msra.mxu2 %v3528_v2  ;;  %3977 = vmatpush.msra.mxu3 %v3904_v63  ;;  %v3852_v2 = vld [vmem:[%s13899_s4 + $0x248] sm:$0xff]  ;;  %v3819_v25 = vld [vmem:[%s13899_s4 + $0x140] sm:$0xff] }
 0x427   :  { %3536 = vmatpush.msra.mxu0 %v3522_v61  ;;  %3938 = vmatpush.msra.mxu1 %v3899_v15  ;;  %v3847_v61 = vld [vmem:[%s13899_s4 + $0x220] sm:$0xff]  ;;  %v3820_v63 = vld [vmem:[%s13899_s4 + $0x148] sm:$0xff]  ;;  %v3885_v15 = vld [vmem:[%s13899_s4 + $0x350] sm:$0xff] }
 0x428   :  { %3576 = vmatpush.msra.mxu2 %v3524_v41  ;;  %3978 = vmatpush.msra.mxu3 %v3900_v45  ;;  %v3848_v41 = vld [vmem:[%s13899_s4 + $0x228] sm:$0xff] }
 0x429   :  { %3537 = vmatpush.msra.mxu0 %v3518_v26  ;;  %3369 = vmatmul.f32.vlgmr.msrb.gmra.mxu2 %v10574_v4  ;;  %v10798_v26 = vld [vmem:[%s13902_s5] sm:$0xf] }
 0x42a   :  { %3577 = vmatpush.msra.mxu2 %v3520_v6  ;;  %3329 = vmatmul.f32.vlgmr.msrb.gmra.mxu0 %v10574_v4  ;;  %v3843_v6 = vld [vmem:[%s13899_s4 + $0x200] sm:$0xff] }
 0x42b   :  { %3538 = vmatpush.msra.mxu0 %v3514_v9  ;;  %6484 = vmatmul.msk.f32.vlgmr.msrb.gmra.mxu1 %vm193_vm0, %v10613_v22  ;;  %v3844_v9 = vld [vmem:[%s13899_s4 + $0x208] sm:$0xff] }
 0x42c   :  { %3578 = vmatpush.msra.mxu2 %v3516_v14  ;;  %6486 = vmatmul.msk.f32.vlgmr.msrb.gmra.mxu3 %vm193_vm0, %v10613_v22  ;;  %v3839_v14 = vld [vmem:[%s13899_s4 + $0x1e0] sm:$0xff] }
 0x42d   :  { %3539 = vmatpush.msra.mxu0 %v3510_v0  ;;  %3939 = vmatpush.msra.mxu1 %v3895_v48  ;;  %v3905_v0 = vld [vmem:[%s13899_s4 + $0x3f0] sm:$0xff]  ;;  %v3886_v48 = vld [vmem:[%s13899_s4 + $0x358] sm:$0xff] }
 0x42e   :  { %3579 = vmatpush.msra.mxu2 %v3512_v27  ;;  %3979 = vmatpush.msra.mxu3 %v3896_v62  ;;  %v3906_v27 = vld [vmem:[%s13899_s4 + $0x3f8] sm:$0xff] }
 0x42f   :  { %3540 = vmatpush.msra.mxu0 %v3506_v36  ;;  %3940 = vmatpush.msra.mxu1 %v3891_v23  ;;  %v3815_v23 = vld [vmem:[%s13899_s4 + $0x120] sm:$0xff] }
 0x430   :  { %3580 = vmatpush.msra.mxu2 %v3508_v11  ;;  %3980 = vmatpush.msra.mxu3 %v3892_v13  ;;  %v3835_v11 = vld [vmem:[%s13899_s4 + $0x1c0] sm:$0xff]  ;;  %v3816_v13 = vld [vmem:[%s13899_s4 + $0x128] sm:$0xff] }
 0x431   :  { %3541 = vmatpush.msra.mxu0 %v3502_v24  ;;  %3941 = vmatpush.msra.mxu1 %v3887_v52  ;;  %v3836_v24 = vld [vmem:[%s13899_s4 + $0x1c8] sm:$0xff]  ;;  %v3881_v52 = vld [vmem:[%s13899_s4 + $0x330] sm:$0xff] }
 0x432   :  { %3581 = vmatpush.msra.mxu2 %v3504_v46  ;;  %3981 = vmatpush.msra.mxu3 %v3888_v18  ;;  %v3901_v46 = vld [vmem:[%s13899_s4 + $0x3d0] sm:$0xff] }
 0x433   :  { %3542 = vmatpush.msra.mxu0 %v3498_v56  ;;  %3942 = vmatpush.msra.mxu1 %v3883_v30 }
 0x434   :  { %3582 = vmatpush.msra.mxu2 %v3500_v33  ;;  %3982 = vmatpush.msra.mxu3 %v3884_v19  ;;  %v3225_v33 = vperm.slane %v10798_v26, 0  ;;  %v3882_v19 = vld [vmem:[%s13899_s4 + $0x338] sm:$0xff] }
 0x435   :  { %3543 = vmatpush.msra.mxu0 %v3494_v49  ;;  %3943 = vmatpush.msra.mxu1 %v3879_v55  ;;  %v3902_v49 = vld [vmem:[%s13899_s4 + $0x3d8] sm:$0xff]  ;;  %v3811_v55 = vld [vmem:[%s13899_s4 + $0x100] sm:$0xff] }
 0x436   :  { %3583 = vmatpush.msra.mxu2 %v3496_v28  ;;  %3983 = vmatpush.msra.mxu3 %v3880_v20  ;;  %v3831_v28 = vld [vmem:[%s13899_s4 + $0x1a0] sm:$0xff]  ;;  %v3812_v20 = vld [vmem:[%s13899_s4 + $0x108] sm:$0xff] }
 0x437   :  { %3544 = vmatpush.msra.mxu0 %v3490_v31  ;;  %3944 = vmatpush.msra.mxu1 %v3875_v54  ;;  %v3832_v31 = vld [vmem:[%s13899_s4 + $0x1a8] sm:$0xff]  ;;  %v3877_v54 = vld [vmem:[%s13899_s4 + $0x310] sm:$0xff] }
 0x438   :  { %3584 = vmatpush.msra.mxu2 %v3492_v53  ;;  %3984 = vmatpush.msra.mxu3 %v3876_v29  ;;  %v3897_v53 = vld [vmem:[%s13899_s4 + $0x3b0] sm:$0xff] }
 0x439   :  { %3545 = vmatpush.msra.mxu0 %v3486_v32  ;;  %3945 = vmatpush.msra.mxu1 %v3871_v37  ;;  %v3898_v32 = vld [vmem:[%s13899_s4 + $0x3b8] sm:$0xff] }
 0x43a   :  { %3585 = vmatpush.msra.mxu2 %v3488_v5  ;;  %3985 = vmatpush.msra.mxu3 %v3872_v16  ;;  %v3878_v37 = vld [vmem:[%s13899_s4 + $0x318] sm:$0xff]  ;;  %v3807_v16 = vld [vmem:[%s13899_s4 + $0xe0] sm:$0xff] }
 0x43b   :  { %3546 = vmatpush.msra.mxu0 %v3482_v7  ;;  %3946 = vmatpush.msra.mxu1 %v3867_v21  ;;  %v3827_v7 = vld [vmem:[%s13899_s4 + $0x180] sm:$0xff]  ;;  %v3808_v21 = vld [vmem:[%s13899_s4 + $0xe8] sm:$0xff] }
 0x43c   :  { %3586 = vmatpush.msra.mxu2 %v3484_v42  ;;  %3986 = vmatpush.msra.mxu3 %v3868_v58  ;;  %v3828_v42 = vld [vmem:[%s13899_s4 + $0x188] sm:$0xff]  ;;  %v3873_v58 = vld [vmem:[%s13899_s4 + $0x2f0] sm:$0xff] }
 0x43d   :  { %3547 = vmatpush.msra.mxu0 %v3478_v35  ;;  %3947 = vmatpush.msra.mxu1 %v3863_v10  ;;  %v3893_v35 = vld [vmem:[%s13899_s4 + $0x390] sm:$0xff] }
 0x43e   :  { %3587 = vmatpush.msra.mxu2 %v3480_v50  ;;  %3987 = vmatpush.msra.mxu3 %v3864_v34  ;;  %v3874_v34 = vld [vmem:[%s13899_s4 + $0x2f8] sm:$0xff] }
 0x43f   :  { %3548 = vmatpush.msra.mxu0 %v3474_v8  ;;  %3948 = vmatpush.msra.mxu1 %v3859_v59  ;;  %v3894_v8 = vld [vmem:[%s13899_s4 + $0x398] sm:$0xff]  ;;  %v3803_v59 = vld [vmem:[%s13899_s4 + $0xc0] sm:$0xff] }
 0x440   :  { %3588 = vmatpush.msra.mxu2 %v3476_v39  ;;  %3988 = vmatpush.msra.mxu3 %v3860_v38  ;;  %v3823_v39 = vld [vmem:[%s13899_s4 + $0x160] sm:$0xff]  ;;  %v3804_v38 = vld [vmem:[%s13899_s4 + $0xc8] sm:$0xff] }
 0x441   :  { %3549 = vmatpush.msra.mxu0 %v3470_v1  ;;  %3949 = vmatpush.msra.mxu1 %v3855_v60  ;;  %v3824_v1 = vld [vmem:[%s13899_s4 + $0x168] sm:$0xff] }
 0x442   :  { %3589 = vmatpush.msra.mxu2 %v3472_v3  ;;  %3550 = vmatmul.f32.vlgmr.msra.gmra.mxu0 %v10574_v4  ;;  %v3889_v3 = vld [vmem:[%s13899_s4 + $0x370] sm:$0xff] }
 0x443   :  { %3590 = vmatmul.f32.vlgmr.msra.gmra.mxu2 %v10574_v4  ;;  %3631 = vmatpush.msrb.mxu0 %v3465_v40 }
 0x444   :  { %3671 = vmatpush.msrb.mxu2 %v3467_v12  ;;  %3989 = vmatpush.msra.mxu3 %v3856_v47  ;;  %v3226_v12 = vperm.slane %v10798_v26, 1  ;;  %v10934_v47 = vld [vmem:[%s13901_s3] sm:$0xf] }
 0x445   :  { %3632 = vmatpush.msrb.mxu0 %v3461_v43  ;;  %3950 = vmatpush.msra.mxu1 %v3851_v57  ;;  %v3890_v43 = vld [vmem:[%s13899_s4 + $0x378] sm:$0xff]  ;;  %v3228_v57 = vperm.slane %v10798_v26, 3 }
 0x446   :  { %3672 = vmatpush.msrb.mxu2 %v3463_v44  ;;  %3990 = vmatpush.msra.mxu3 %v3852_v2  ;;  %v3870_v2 = vld [vmem:[%s13899_s4 + $0x2d8] sm:$0xff] }
 0x447   :  { %3951 = vmatpush.msra.mxu1 %v3847_v61  ;;  %3917 = vmatpush.msra.mxu0 %v3839_v14  ;;  %v3865_v14 = vld [vmem:[%s13899_s4 + $0x2b0] sm:$0xff] }
 0x448   :  { %3991 = vmatpush.msra.mxu3 %v3848_v41 }
 0x449   :  { %3952 = vmatpush.msra.mxu1 %v3843_v6  ;;  %3918 = vmatpush.msra.mxu0 %v3835_v11  ;;  %v3799_v6 = vld [vmem:[%s13899_s4 + $0xa0] sm:$0xff] }
 0x44a   :  { %6483 = vmatmul.msk.f32.vlgmr.msrb.gmra.mxu0 %vm193_vm0, %v10613_v22  ;;  %3992 = vmatpush.msra.mxu3 %v3844_v9  ;;  %v3800_v9 = vld [vmem:[%s13899_s4 + $0xa8] sm:$0xff]  ;;  %v3795_v11 = vld [vmem:[%s13899_s4 + $0x80] sm:$0xff] }
 0x44b   :  { %6485 = vmatmul.msk.f32.vlgmr.msrb.gmra.mxu2 %vm193_vm0, %v10613_v22  ;;  %v3840_v22 = vld [vmem:[%s13899_s4 + $0x1e8] sm:$0xff]  ;;  %4017 = vmatpush.msrb.mxu1 %v3905_v0 }
 0x44c   :  { %3957 = vmatpush.msra.mxu2 %v3840_v22  ;;  %4057 = vmatpush.msrb.mxu3 %v3906_v27  ;;  %v3866_v27 = vld [vmem:[%s13899_s4 + $0x2b8] sm:$0xff] }
 0x44d   :  { %4018 = vmatpush.msrb.mxu1 %v3901_v46  ;;  %3919 = vmatpush.msra.mxu0 %v3831_v28  ;;  %v3861_v46 = vld [vmem:[%s13899_s4 + $0x290] sm:$0xff]  ;;  %v3862_v28 = vld [vmem:[%s13899_s4 + $0x298] sm:$0xff] }
 0x44e   :  { %3958 = vmatpush.msra.mxu2 %v3836_v24  ;;  %4058 = vmatpush.msrb.mxu3 %v3902_v49  ;;  %v3796_v24 = vld [vmem:[%s13899_s4 + $0x88] sm:$0xff] }
 0x44f   :  { %4019 = vmatpush.msrb.mxu1 %v3897_v53  ;;  %3920 = vmatpush.msra.mxu0 %v3827_v7  ;;  %v3792_v53 = vld [vmem:[%s13899_s4 + $0x68] sm:$0xff]  ;;  %v3227_v7 = vperm.slane %v10798_v26, 2 }
 0x450   :  { %3959 = vmatpush.msra.mxu2 %v3832_v31  ;;  %4059 = vmatpush.msrb.mxu3 %v3898_v32  ;;  %v3791_v31 = vld [vmem:[%s13899_s4 + $0x60] sm:$0xff]  ;;  %v3857_v32 = vld [vmem:[%s13899_s4 + $0x270] sm:$0xff]  ;;  %v3788_v26 = vld [vmem:[%s13899_s4 + $0x48] sm:$0xff] }
 0x451   :  { %4020 = vmatpush.msrb.mxu1 %v3893_v35  ;;  %3921 = vmatpush.msra.mxu0 %v3823_v39  ;;  %v3858_v35 = vld [vmem:[%s13899_s4 + $0x278] sm:$0xff]  ;;  %v3787_v39 = vld [vmem:[%s13899_s4 + $0x40] sm:$0xff] }
 0x452   :  { %3960 = vmatpush.msra.mxu2 %v3828_v42  ;;  %4060 = vmatpush.msrb.mxu3 %v3894_v8 }
 0x453   :  { %4021 = vmatpush.msrb.mxu1 %v3889_v3  ;;  %3922 = vmatpush.msra.mxu0 %v3819_v25  ;;  %v3784_v25 = vld [vmem:[%s13899_s4 + $0x28] sm:$0xff] }
 0x454   :  { %3961 = vmatpush.msra.mxu2 %v3824_v1  ;;  %4061 = vmatpush.msrb.mxu3 %v3890_v43  ;;  %v3853_v1 = vld [vmem:[%s13899_s4 + $0x250] sm:$0xff] }
 0x455   :  { %4022 = vmatpush.msrb.mxu1 %v3885_v15  ;;  %3923 = vmatpush.msra.mxu0 %v3815_v23 }
 0x456   :  { %3962 = vmatpush.msra.mxu2 %v3820_v63  ;;  %4062 = vmatpush.msrb.mxu3 %v3886_v48  ;;  %v3849_v63 = vld [vmem:[%s13899_s4 + $0x230] sm:$0xff]  ;;  %v3850_v48 = vld [vmem:[%s13899_s4 + $0x238] sm:$0xff] }
 0x457   :  { %4023 = vmatpush.msrb.mxu1 %v3881_v52  ;;  %3924 = vmatpush.msra.mxu0 %v3811_v55  ;;  %v3779_v52 = vld [vmem:[%s13899_s4] sm:$0xff]  ;;  %v3841_v55 = vld [vmem:[%s13899_s4 + $0x1f0] sm:$0xff] }
 0x458   :  { %3963 = vmatpush.msra.mxu2 %v3816_v13  ;;  %4063 = vmatpush.msrb.mxu3 %v3882_v19  ;;  %v3846_v19 = vld [vmem:[%s13899_s4 + $0x218] sm:$0xff] }
 0x459   :  { %4024 = vmatpush.msrb.mxu1 %v3877_v54  ;;  %3925 = vmatpush.msra.mxu0 %v3807_v16 }
 0x45a   :  { %3964 = vmatpush.msra.mxu2 %v3812_v20  ;;  %4064 = vmatpush.msrb.mxu3 %v3878_v37  ;;  %v3842_v20 = vld [vmem:[%s13899_s4 + $0x1f8] sm:$0xff] }
 0x45b   :  { %4025 = vmatpush.msrb.mxu1 %v3873_v58  ;;  %3926 = vmatpush.msra.mxu0 %v3803_v59  ;;  %v3837_v58 = vld [vmem:[%s13899_s4 + $0x1d0] sm:$0xff] }
 0x45c   :  { %3965 = vmatpush.msra.mxu2 %v3808_v21  ;;  %4065 = vmatpush.msrb.mxu3 %v3874_v34  ;;  %v3702_v21 = vperm.slane %v10934_v47, 3 }
 0x45d   :  { %3927 = vmatpush.msra.mxu0 %v3799_v6 }
 0x45e   :  { %3966 = vmatpush.msra.mxu2 %v3804_v38  ;;  %4066 = vmatpush.msrb.mxu3 %v3870_v2 }
 0x45f   :  { %3928 = vmatpush.msra.mxu0 %v3795_v11 }
 0x460   :  { %3967 = vmatpush.msra.mxu2 %v3800_v9  ;;  %4067 = vmatpush.msrb.mxu3 %v3866_v27 }
 0x461   :  { %3929 = vmatpush.msra.mxu0 %v3791_v31 }
 0x462   :  { %3968 = vmatpush.msra.mxu2 %v3796_v24  ;;  %4068 = vmatpush.msrb.mxu3 %v3862_v28 }
 0x463   :  { %3930 = vmatpush.msra.mxu0 %v3787_v39 }
 0x464   :  { %3969 = vmatpush.msra.mxu2 %v3792_v53  ;;  %4069 = vmatpush.msrb.mxu3 %v3858_v35 }
 0x466   :  { %3970 = vmatpush.msra.mxu2 %v3788_v26  ;;  %v3817_v26 = vld [vmem:[%s13899_s4 + $0x130] sm:$0xff] }
 0x468   :  { %3971 = vmatpush.msra.mxu2 %v3784_v25  ;;  %v3813_v25 = vld [vmem:[%s13899_s4 + $0x110] sm:$0xff] }
 0x47c   :  { %v3270_v4 = vpop.f32.mrf.mxu1 }
 0x482   :  { %v3310_v56 = vpop.f32.mrf.mxu3 }
 0x484   :  { %v10818_v36 = vpop.f32.mrf.mxu1 }
 0x48a   :  { %v10893_v18 = vpop.f32.mrf.mxu3 }
 0x49e   :  { %v3250_v5 = vpop.f32.mrf.mxu0 }
 0x49f   :  { %v3251_v50 = vadd.f32 %v3250_v5, %v3225_v33  ;;  %v3700_v33 = vperm.slane %v10934_v47, 1 }
 0x4a0   :  { %v10870_v44 = vpop.f32.mrf.mxu1 }
 0x4a1   :  { %v3271_v40 = vadd.f32 %v3270_v4, %v3251_v50  ;;  %v3869_v4 = vld [vmem:[%s13899_s4 + $0x2d0] sm:$0xff] }
 0x4a2   :  { %4026 = vmatpush.msrb.mxu1 %v3869_v4 }
 0x4a3   :  { %v6479_v45 = vmul.f32 -1.442695, %v3271_v40 }
 0x4a4   :  { %v3290_v62 = vpop.f32.mrf.mxu2  ;;  %4027 = vmatpush.msrb.mxu1 %v3865_v14 }
 0x4a5   :  { %6661 = vpow2.f32 %v6479_v45  ;;  %v3291_v30 = vadd.f32 %v3290_v62, %v3226_v12  ;;  %v3854_v12 = vld [vmem:[%s13899_s4 + $0x258] sm:$0xff] }
 0x4a6   :  { %4028 = vmatpush.msrb.mxu1 %v3861_v46  ;;  %4070 = vmatpush.msrb.mxu3 %v3854_v12 }
 0x4a7   :  { %v3311_v29 = vadd.f32 %v3310_v56, %v3291_v30  ;;  %v10951_v22 = vpop.f32.mrf.mxu3  ;;  %v3330_v8 = vpop.f32.mrf.mxu0  ;;  %v3845_v30 = vld [vmem:[%s13899_s4 + $0x210] sm:$0xff] }
 0x4a8   :  { %v3654_v41 = vpop.f32.mrf.mxu1  ;;  %4029 = vmatpush.msrb.mxu1 %v3857_v32  ;;  %v3331_v45 = vadd.f32 %v3330_v8, %v3227_v7  ;;  %4071 = vmatpush.msrb.mxu3 %v3850_v48  ;;  %v3821_v32 = vld [vmem:[%s13899_s4 + $0x150] sm:$0xff] }
 0x4a9   :  { %v6480_v10 = vmul.f32 -1.442695, %v3311_v29  ;;  %v3655_v56 = vadd.f32 %v3654_v41, %v10870_v44  ;;  %v3783_v44 = vld [vmem:[%s13899_s4 + $0x20] sm:$0xff]  ;;  %v3809_v48 = vld [vmem:[%s13899_s4 + $0xf0] sm:$0xff] }
 0x4aa   :  { %4030 = vmatpush.msrb.mxu1 %v3853_v1  ;;  %3931 = vmatpush.msra.mxu0 %v3783_v44  ;;  %v3351_v54 = vadd.f32 %v10818_v36, %v3331_v45  ;;  %v3818_v1 = vld [vmem:[%s13899_s4 + $0x138] sm:$0xff]  ;;  %v3699_v44 = vperm.slane %v10934_v47, 0 }
 0x4ab   :  { %v6662_v60 = vpop.eup %6661  ;;  %6663 = vpow2.f32 %v6480_v10  ;;  %v3708_v3 = vadd.f32 %v3700_v33, %v3655_v56  ;;  %4072 = vmatpush.msrb.mxu3 %v3846_v19  ;;  %v3838_v10 = vld [vmem:[%s13899_s4 + $0x1d8] sm:$0xff]  ;;  %v3825_v56 = vld [vmem:[%s13899_s4 + $0x170] sm:$0xff] }
 0x4ac   :  { %v10940_v61 = vadd.f32 1.0, %v6662_v60  ;;  %v3370_v0 = vpop.f32.mrf.mxu2  ;;  %4031 = vmatpush.msrb.mxu1 %v3849_v63  ;;  %3932 = vmatpush.msra.mxu0 %v3779_v52  ;;  %v3833_v60 = vld [vmem:[%s13899_s4 + $0x1b0] sm:$0xff]  ;;  %v3826_v33 = vld [vmem:[%s13899_s4 + $0x178] sm:$0xff] }
 0x4ad   :  { %v3371_v49 = vadd.f32 %v3370_v0, %v3228_v57  ;;  %v6488_v23 = vmul.f32 -1.442695, %v3708_v3  ;;  %v3834_v57 = vld [vmem:[%s13899_s4 + $0x1b8] sm:$0xff]  ;;  %v3829_v0 = vld [vmem:[%s13899_s4 + $0x190] sm:$0xff] }
 0x4ae   :  { %6665 = vrcp.f32 %v10940_v61  ;;  %4032 = vmatpush.msrb.mxu1 %v3845_v30  ;;  %3997 = vmatpush.msrb.mxu0 %v3841_v55  ;;  %v3408_v38 = vand.u32 2147483648, %v10940_v61  ;;  %vm3402_vm5 = vweird.f32 %v10940_v61  ;;  %v3406_v41 = vand.u32 2147483647, %v10940_v61  ;;  %v3814_v63 = vld [vmem:[%s13899_s4 + $0x118] sm:$0xff]  ;;  %v3805_v30 = vld [vmem:[%s13899_s4 + $0xd0] sm:$0xff] }
 0x4af   :  { %v3391_v42 = vadd.f32 %v10893_v18, %v3371_v49  ;;  %v3694_v13 = vpop.f32.mrf.mxu3  ;;  %v3780_v18 = vld [vmem:[%s13899_s4 + $0x8] sm:$0xff]  ;;  %v3806_v19 = vld [vmem:[%s13899_s4 + $0xd8] sm:$0xff] }
 0x4b0   :  { %3972 = vmatpush.msra.mxu2 %v3780_v18  ;;  %v3695_v16 = vadd.f32 %v3694_v13, %v10951_v22  ;;  %3998 = vmatpush.msrb.mxu0 %v3837_v58  ;;  %v3409_v46 = vor.u32 1.1754944e-38, %v3408_v38  ;;  %vm3407_vm9 = vcmp.eq.f32.partialorder %v3406_v41, 8.507059e+37  ;;  %v3793_v41 = vld [vmem:[%s13899_s4 + $0x70] sm:$0xff] }
 0x4b1   :  { %v6664_v5 = vpop.eup %6663  ;;  %v6481_v40 = vmul.f32 -1.442695, %v3391_v42 }
 0x4b2   :  { %v10985_v50 = vadd.f32 1.0, %v6664_v5  ;;  %4037 = vmatpush.msrb.mxu2 %v3842_v20  ;;  %v3710_v14 = vadd.f32 %v3702_v21, %v3695_v16  ;;  %3999 = vmatpush.msrb.mxu0 %v3833_v60  ;;  %v3822_v5 = vld [vmem:[%s13899_s4 + $0x158] sm:$0xff] }
 0x4b3   :  { %v3802_v16 = vld [vmem:[%s13899_s4 + $0xb8] sm:$0xff] }
 0x4b4   :  { %v10999_v43 = vpop.eup %6665  ;;  %6667 = vrcp.f32 %v10985_v50  ;;  %4038 = vmatpush.msrb.mxu2 %v3838_v10  ;;  %v3427_v6 = vand.u32 2147483648, %v10985_v50  ;;  %v3425_v24 = vand.u32 2147483647, %v10985_v50  ;;  %4000 = vmatpush.msrb.mxu0 %v3829_v0  ;;  %vm3421_vm8 = vweird.f32 %v10985_v50  ;;  %v4213_v0 = vld [vmem:[%s13897_s2 + $0x1d8] sm:$0xff] }
 0x4b5   :  { %v3398_v15 = vmul.f32 %v10999_v43, %v10940_v61  ;;  %6669 = vpow2.f32 %v6481_v40  ;;  %vm3403_vm4 = vweird.f32 %v10999_v43  ;;  %v3830_v61 = vld [vmem:[%s13899_s4 + $0x198] sm:$0xff]  ;;  %v6489_v35 = vmul.f32 -1.442695, %v3710_v14 }
 0x4b6   :  { %6671 = vpow2.f32 %v6488_v23  ;;  %vm11059_vm6 = vmor %vm3402_vm5, %vm3403_vm4  ;;  %4039 = vmatpush.msrb.mxu2 %v3834_v57  ;;  %v3428_v31 = vor.u32 1.1754944e-38, %v3427_v6  ;;  %4001 = vmatpush.msrb.mxu0 %v3825_v56  ;;  %vm3426_vm11 = vcmp.eq.f32.partialorder %v3425_v24, 8.507059e+37  ;;  %v4215_v57 = vld [vmem:[%s13897_s2 + $0x1e8] sm:$0xff]  ;;  %v3794_v6 = vld [vmem:[%s13899_s4 + $0x78] sm:$0xff] }
 0x4b7   :  { %v3399_v62 = vsub.f32 1.0, %v3398_v15  ;;  %6673 = vtanh.f32 %v3351_v54  ;;  %v4207_v24 = vld [vmem:[%s13897_s2 + $0x1a8] sm:$0xff] }
 0x4b8   :  { %4040 = vmatpush.msrb.mxu2 %v3830_v61  ;;  %4002 = vmatpush.msrb.mxu0 %v3821_v32  ;;  %v3789_v61 = vld [vmem:[%s13899_s4 + $0x50] sm:$0xff]  ;;  %v4205_v32 = vld [vmem:[%s13897_s2 + $0x198] sm:$0xff] }
 0x4b9   :  { %v3400_v29 = vmul.f32 %v10999_v43, %v3399_v62  ;;  %v3810_v62 = vld [vmem:[%s13899_s4 + $0xf8] sm:$0xff] }
 0x4ba   :  { %v6668_v37 = vpop.eup %6667  ;;  %4041 = vmatpush.msrb.mxu2 %v3826_v33  ;;  %4003 = vmatpush.msrb.mxu0 %v3817_v26  ;;  %v3785_v33 = vld [vmem:[%s13899_s4 + $0x30] sm:$0xff] }
 0x4bb   :  { %v6670_v36 = vpop.eup %6669  ;;  %v3417_v34 = vmul.f32 %v6668_v37, %v10985_v50  ;;  %v3401_v59 = vadd.f32 %v10999_v43, %v3400_v29  ;;  %vm3422_vm7 = vweird.f32 %v6668_v37  ;;  %v4181_v29 = vld [vmem:[%s13897_s2 + $0xd8] sm:$0xff] }
 0x4bc   :  { %v11048_v4 = vadd.f32 1.0, %v6670_v36  ;;  %v6672_v49 = vpop.eup %6671  ;;  %vm3423_vm10 = vmor %vm3421_vm8, %vm3422_vm7  ;;  %4042 = vmatpush.msrb.mxu2 %v3822_v5  ;;  %4004 = vmatpush.msrb.mxu0 %v3813_v25  ;;  %v4199_v5 = vld [vmem:[%s13897_s2 + $0x168] sm:$0xff] }
 0x4bd   :  { %v3418_v2 = vsub.f32 1.0, %v3417_v34  ;;  %v3405_v11 = vsel %vm11059_vm6, %v10999_v43, %v3401_v59  ;;  %v6674_v7 = vpop.eup %6673  ;;  %v11087_v39 = vadd.f32 1.0, %v6672_v49  ;;  %v3797_v34 = vld [vmem:[%s13899_s4 + $0x90] sm:$0xff]  ;;  %v3798_v59 = vld [vmem:[%s13899_s4 + $0x98] sm:$0xff] }
 0x4be   :  { %6675 = vrcp.f32 %v11048_v4  ;;  %v3410_v53 = vsel %vm3407_vm9, %v3409_v46, %v3405_v11  ;;  %4043 = vmatpush.msrb.mxu2 %v3818_v1  ;;  %v3447_v13 = vand.u32 2147483648, %v11048_v4  ;;  %v3445_v18 = vand.u32 2147483647, %v11048_v4  ;;  %4005 = vmatpush.msrb.mxu0 %v3809_v48  ;;  %v4209_v46 = vld [vmem:[%s13897_s2 + $0x1b8] sm:$0xff]  ;;  %v4195_v1 = vld [vmem:[%s13897_s2 + $0x148] sm:$0xff] }
 0x4bf   :  { %v3551_v22 = vpop.f32.mrf.mxu0  ;;  %v3419_v27 = vmul.f32 %v6668_v37, %v3418_v2  ;;  %v3453_v40 = vmul.f32 %v6674_v7, %v3410_v53  ;;  %6677 = vpow2.f32 %v6489_v35  ;;  %vm3441_vm13 = vweird.f32 %v11048_v4  ;;  %v4217_v2 = vld [vmem:[%s13897_s2 + $0x1f8] sm:$0xff]  ;;  %v4203_v53 = vld [vmem:[%s13897_s2 + $0x188] sm:$0xff] }
 0x4c0   :  { %6679 = vrcp.f32 %v11087_v39  ;;  %4044 = vmatpush.msrb.mxu2 %v3814_v63  ;;  %4006 = vmatpush.msrb.mxu0 %v3805_v30  ;;  %v3448_v10 = vor.u32 1.1754944e-38, %v3447_v13  ;;  %vm3446_vm15 = vcmp.eq.f32.partialorder %v3445_v18, 8.507059e+37  ;;  %v3786_v49 = vld [vmem:[%s13899_s4 + $0x38] sm:$0xff]  ;;  %v3701_v35 = vperm.slane %v10934_v47, 2  ;;  %v4178_v30 = vld [vmem:[%s13897_s2 + $0xc0] sm:$0xff] }
 0x4c1   :  { %v3420_v28 = vadd.f32 %v6668_v37, %v3419_v27  ;;  %v3790_v27 = vld [vmem:[%s13899_s4 + $0x58] sm:$0xff]  ;;  %v3745_v48 = vand.u32 2147483648, %v11087_v39  ;;  %vm3739_vm2 = vweird.f32 %v11087_v39  ;;  %v3743_v13 = vand.u32 2147483647, %v11087_v39 }
 0x4c2   :  { %4045 = vmatpush.msrb.mxu2 %v3810_v62  ;;  %v4201_v7 = vld [vmem:[%s13897_s2 + $0x178] sm:$0xff] }
 0x4c3   :  { %v3424_v42 = vsel %vm3423_vm10, %v6668_v37, %v3420_v28  ;;  %v3801_v37 = vld [vmem:[%s13899_s4 + $0xb0] sm:$0xff]  ;;  %v4197_v47 = vld [vmem:[%s13897_s2 + $0x158] sm:$0xff]  ;;  %vm3744_vm6 = vcmp.eq.f32.partialorder %v3743_v13, 8.507059e+37 }
 0x4c4   :  { %v6676_v50 = vpop.eup %6675  ;;  %v3429_v8 = vsel %vm3426_vm11, %v3428_v31, %v3424_v42  ;;  %4046 = vmatpush.msrb.mxu2 %v3806_v19  ;;  %4007 = vmatpush.msrb.mxu0 %v3801_v37  ;;  %v4185_v18 = vld [vmem:[%s13897_s2 + $0xf8] sm:$0xff]  ;;  %v3746_v37 = vor.u32 1.1754944e-38, %v3745_v48  ;;  %v4190_v48 = vld [vmem:[%s13897_s2 + $0x120] sm:$0xff]  ;;  %v4188_v13 = vld [vmem:[%s13897_s2 + $0x110] sm:$0xff] }
 0x4c5   :  { %v3452_v3 = vmul.f32 %v3429_v8, %v10356_v17  ;;  %v3437_v12 = vmul.f32 %v6676_v50, %v11048_v4  ;;  %vm3442_vm12 = vweird.f32 %v6676_v50  ;;  %v6678_v21 = vpop.eup %6677  ;;  %v3782_v8 = vld [vmem:[%s13899_s4 + $0x18] sm:$0xff] }
 0x4c6   :  { %v3591_v20 = vpop.f32.mrf.mxu2  ;;  %vm11123_vm14 = vmor %vm3441_vm13, %vm3442_vm12  ;;  %v11135_v36 = vpop.eup %6679  ;;  %4047 = vmatpush.msrb.mxu2 %v3802_v16  ;;  %4008 = vmatpush.msrb.mxu0 %v3797_v34  ;;  %v11157_v14 = vadd.f32 1.0, %v6678_v21 }
 0x4c7   :  { %v3634_v43 = vpop.f32.mrf.mxu0  ;;  %v11104_v15 = vadd.f32 %v3453_v40, %v3452_v3  ;;  %v3438_v45 = vsub.f32 1.0, %v3437_v12  ;;  %v3735_v9 = vmul.f32 %v11135_v36, %v11087_v39  ;;  %v4191_v40 = vld [vmem:[%s13897_s2 + $0x128] sm:$0xff]  ;;  %v4193_v12 = vld [vmem:[%s13897_s2 + $0x138] sm:$0xff]  ;;  %vm3740_vm1 = vweird.f32 %v11135_v36 }
 0x4c8   :  { %v3635_v17 = vadd.f32 %v3634_v43, %v3551_v22  ;;  %4048 = vmatpush.msrb.mxu2 %v3798_v59  ;;  %v4211_v22 = vld [vmem:[%s13897_s2 + $0x1c8] sm:$0xff]  ;;  %4009 = vmatpush.msrb.mxu0 %v3793_v41  ;;  %vm11241_vm3 = vmor %vm3739_vm2, %vm3740_vm1  ;;  %vm3759_vm10 = vweird.f32 %v11157_v14 }
 0x4c9   :  { %6681 = vtanh.f32 %v11104_v15  ;;  %v3439_v23 = vmul.f32 %v6676_v50, %v3438_v45  ;;  %v3736_v28 = vsub.f32 1.0, %v3735_v9  ;;  %v4187_v45 = vld [vmem:[%s13897_s2 + $0x108] sm:$0xff] }
 0x4ca   :  { %v3707_v52 = vadd.f32 %v3699_v44, %v3635_v17  ;;  %4049 = vmatpush.msrb.mxu2 %v3794_v6  ;;  %4010 = vmatpush.msrb.mxu0 %v3789_v61  ;;  %v4189_v17 = vld [vmem:[%s13897_s2 + $0x118] sm:$0xff]  ;;  %v4167_v9 = vld [vmem:[%s13897_s2 + $0x68] sm:$0xff] }
 0x4cb   :  { %v3440_v55 = vadd.f32 %v6676_v50, %v3439_v23  ;;  %v3737_v26 = vmul.f32 %v11135_v36, %v3736_v28  ;;  %v4163_v61 = vld [vmem:[%s13897_s2 + $0x48] sm:$0xff]  ;;  %v4157_v28 = vld [vmem:[%s13897_s2 + $0x18] sm:$0xff] }
 0x4cc   :  { %v6487_v54 = vmul.f32 -1.442695, %v3707_v52  ;;  %4050 = vmatpush.msrb.mxu2 %v3790_v27  ;;  %4011 = vmatpush.msrb.mxu0 %v3785_v33  ;;  %v4183_v52 = vld [vmem:[%s13897_s2 + $0xe8] sm:$0xff] }
 0x4cd   :  { %v3444_v58 = vsel %vm11123_vm14, %v6676_v50, %v3440_v55  ;;  %v3781_v50 = vld [vmem:[%s13899_s4 + $0x10] sm:$0xff]  ;;  %v3738_v63 = vadd.f32 %v11135_v36, %v3737_v26  ;;  %v4564_v33 = vld [vmem:[%s13899_s4 + $0x328] sm:$0xff] }
 0x4ce   :  { %6683 = vpow2.f32 %v6487_v54  ;;  %v3449_v4 = vsel %vm3446_vm15, %v3448_v10, %v3444_v58  ;;  %v3674_v31 = vpop.f32.mrf.mxu2  ;;  %4051 = vmatpush.msrb.mxu2 %v3786_v49  ;;  %4012 = vmatpush.msrb.mxu0 %v3781_v50  ;;  %v4179_v54 = vld [vmem:[%s13897_s2 + $0xc8] sm:$0xff]  ;;  %v4177_v10 = vld [vmem:[%s13897_s2 + $0xb8] sm:$0xff]  ;;  %v4216_v26 = vld [vmem:[%s13897_s2 + $0x1f0] sm:$0xff] }
 0x4cf   :  { %v6682_v38 = vpop.eup %6681  ;;  %6685 = vrcp.f32 %v11157_v14  ;;  %v3675_v42 = vadd.f32 %v3674_v31, %v3591_v20  ;;  %v3742_v20 = vsel %vm11241_vm3, %v11135_v36, %v3738_v63  ;;  %v4175_v58 = vld [vmem:[%s13897_s2 + $0xa8] sm:$0xff]  ;;  %v11361_v63 = vld [vmem:[%s13900_s0 + $0x30] sm:$0xff] }
 0x4d0   :  { %v3456_v60 = vmul.f32 %v6682_v38, %v3449_v4  ;;  %4052 = vmatpush.msrb.mxu2 %v3782_v8  ;;  %v3747_v34 = vsel %vm3744_vm6, %v3746_v37, %v3742_v20  ;;  %v4171_v38 = vld [vmem:[%s13897_s2 + $0x88] sm:$0xff]  ;;  %v4173_v4 = vld [vmem:[%s13897_s2 + $0x98] sm:$0xff]  ;;  %v4214_v8 = vld [vmem:[%s13897_s2 + $0x1e0] sm:$0xff] }
 0x4d1   :  { %v3709_v44 = vadd.f32 %v3701_v35, %v3675_v42  ;;  %v3770_v41 = vmul.f32 %v3747_v34, %v10529_v51  ;;  %v4165_v51 = vld [vmem:[%s13897_s2 + $0x58] sm:$0xff]  ;;  %v4155_v49 = vld [vmem:[%s13897_s2 + $0x8] sm:$0xff]  ;;  %v4170_v20 = vld [vmem:[%s13897_s2 + $0x80] sm:$0xff] }
 0x4d2   :  { %3953 = vmatmul.f32.vlgmr.msra.gmra.mxu1 %v3456_v60  ;;  %3993 = vmatmul.f32.vlgmr.msra.gmra.mxu3 %v3456_v60  ;;  %v4168_v37 = vld [vmem:[%s13897_s2 + $0x70] sm:$0xff] }
 0x4d3   :  { %4238 = vmatpush.msra.mxu1 %v4215_v57  ;;  %4278 = vmatpush.msra.mxu3 %v4217_v2  ;;  %v4156_v34 = vld [vmem:[%s13897_s2 + $0x10] sm:$0xff] }
 0x4d4   :  { %v6684_v11 = vpop.eup %6683 }
 0x4d5   :  { %v11177_v56 = vadd.f32 1.0, %v6684_v11  ;;  %4239 = vmatpush.msra.mxu1 %v4211_v22  ;;  %4279 = vmatpush.msra.mxu3 %v4213_v0  ;;  %v11213_v3 = vpop.eup %6685  ;;  %v4169_v22 = vld [vmem:[%s13897_s2 + $0x78] sm:$0xff]  ;;  %v3765_v11 = vand.u32 2147483648, %v11157_v14 }
 0x4d6   :  { %v3755_v62 = vmul.f32 %v11213_v3, %v11157_v14  ;;  %vm3760_vm9 = vweird.f32 %v11213_v3 }
 0x4d7   :  { %6687 = vrcp.f32 %v11177_v56  ;;  %4240 = vmatpush.msra.mxu1 %v4207_v24  ;;  %4280 = vmatpush.msra.mxu3 %v4209_v46  ;;  %v3726_v19 = vand.u32 2147483648, %v11177_v56  ;;  %v3724_v39 = vand.u32 2147483647, %v11177_v56  ;;  %vm3720_vm5 = vweird.f32 %v11177_v56  ;;  %v4159_v24 = vld [vmem:[%s13897_s2 + $0x28] sm:$0xff]  ;;  %v4161_v46 = vld [vmem:[%s13897_s2 + $0x38] sm:$0xff]  ;;  %vm11297_vm11 = vmor %vm3759_vm10, %vm3760_vm9 }
 0x4d8   :  { %6689 = vtanh.f32 %v3709_v44  ;;  %v3756_v16 = vsub.f32 1.0, %v3755_v62  ;;  %v4198_v44 = vld [vmem:[%s13897_s2 + $0x160] sm:$0xff]  ;;  %v4192_v62 = vld [vmem:[%s13897_s2 + $0x130] sm:$0xff] }
 0x4d9   :  { %4241 = vmatpush.msra.mxu1 %v4203_v53  ;;  %4281 = vmatpush.msra.mxu3 %v4205_v32  ;;  %v3727_v36 = vor.u32 1.1754944e-38, %v3726_v19  ;;  %vm3725_vm8 = vcmp.eq.f32.partialorder %v3724_v39, 8.507059e+37  ;;  %v4152_v53 = vld [vmem:[%s13898_s1 + $0x38] sm:$0xff]  ;;  %v3766_v32 = vor.u32 1.1754944e-38, %v3765_v11  ;;  %v4180_v19 = vld [vmem:[%s13897_s2 + $0xd0] sm:$0xff]  ;;  %v4572_v11 = vld [vmem:[%s13899_s4 + $0x368] sm:$0xff] }
 0x4da   :  { %4033 = vmatmul.f32.vlgmr.msrb.gmra.mxu1 %v3456_v60  ;;  %4073 = vmatmul.f32.vlgmr.msrb.gmra.mxu3 %v3456_v60  ;;  %v3757_v57 = vmul.f32 %v11213_v3, %v3756_v16  ;;  %v4176_v39 = vld [vmem:[%s13897_s2 + $0xb0] sm:$0xff]  ;;  %v4162_v16 = vld [vmem:[%s13897_s2 + $0x40] sm:$0xff] }
 0x4db   :  { %4242 = vmatpush.msra.mxu1 %v4199_v5  ;;  %4282 = vmatpush.msra.mxu3 %v4201_v7  ;;  %v4146_v5 = vld [vmem:[%s13898_s1 + $0x8] sm:$0xff]  ;;  %v4148_v7 = vld [vmem:[%s13898_s1 + $0x18] sm:$0xff] }
 0x4dc   :  { %v3758_v27 = vadd.f32 %v11213_v3, %v3757_v57  ;;  %v4587_v57 = vld [vmem:[%s13899_s4 + $0x3e0] sm:$0xff] }
 0x4dd   :  { %v6688_v43 = vpop.eup %6687  ;;  %4243 = vmatpush.msra.mxu1 %v4195_v1  ;;  %4283 = vmatpush.msra.mxu3 %v4197_v47  ;;  %v4210_v1 = vld [vmem:[%s13897_s2 + $0x1c0] sm:$0xff]  ;;  %v4212_v47 = vld [vmem:[%s13897_s2 + $0x1d0] sm:$0xff] }
 0x4de   :  { %v3716_v25 = vmul.f32 %v6688_v43, %v11177_v56  ;;  %vm3721_vm4 = vweird.f32 %v6688_v43  ;;  %v6690_v60 = vpop.eup %6689  ;;  %v3763_v56 = vand.u32 2147483647, %v11157_v14  ;;  %v3762_v31 = vsel %vm11297_vm11, %v11213_v3, %v3758_v27  ;;  %v4150_v14 = vld [vmem:[%s13898_s1 + $0x28] sm:$0xff]  ;;  %v4206_v3 = vld [vmem:[%s13897_s2 + $0x1a0] sm:$0xff] }
 0x4df   :  { %4244 = vmatpush.msra.mxu1 %v4191_v40  ;;  %4284 = vmatpush.msra.mxu3 %v4193_v12  ;;  %vm3722_vm7 = vmor %vm3720_vm5, %vm3721_vm4  ;;  %v4208_v40 = vld [vmem:[%s13897_s2 + $0x1b0] sm:$0xff]  ;;  %v4202_v12 = vld [vmem:[%s13897_s2 + $0x180] sm:$0xff] }
 0x4e0   :  { %v3717_v23 = vsub.f32 1.0, %v3716_v25  ;;  %vm3764_vm12 = vcmp.eq.f32.partialorder %v3763_v56, 8.507059e+37  ;;  %v4200_v25 = vld [vmem:[%s13897_s2 + $0x170] sm:$0xff]  ;;  %v4571_v27 = vld [vmem:[%s13899_s4 + $0x360] sm:$0xff] }
 0x4e1   :  { %4245 = vmatpush.msra.mxu1 %v4187_v45  ;;  %4285 = vmatpush.msra.mxu3 %v4189_v17  ;;  %v3767_v35 = vsel %vm3764_vm12, %v3766_v32, %v3762_v31  ;;  %v4194_v45 = vld [vmem:[%s13897_s2 + $0x140] sm:$0xff]  ;;  %v4196_v17 = vld [vmem:[%s13897_s2 + $0x150] sm:$0xff]  ;;  %v4552_v32 = vld [vmem:[%s13899_s4 + $0x2c8] sm:$0xff] }
 0x4e2   :  { %v3718_v55 = vmul.f32 %v6688_v43, %v3717_v23  ;;  %v4186_v23 = vld [vmem:[%s13897_s2 + $0x100] sm:$0xff] }
 0x4e3   :  { %4246 = vmatpush.msra.mxu1 %v4183_v52  ;;  %4286 = vmatpush.msra.mxu3 %v4185_v18  ;;  %v4182_v52 = vld [vmem:[%s13897_s2 + $0xe0] sm:$0xff]  ;;  %v4184_v18 = vld [vmem:[%s13897_s2 + $0xf0] sm:$0xff] }
 0x4e4   :  { %v3719_v21 = vadd.f32 %v6688_v43, %v3718_v55  ;;  %v4174_v55 = vld [vmem:[%s13897_s2 + $0xa0] sm:$0xff] }
 0x4e5   :  { %4247 = vmatpush.msra.mxu1 %v4179_v54  ;;  %4287 = vmatpush.msra.mxu3 %v4181_v29  ;;  %v4172_v54 = vld [vmem:[%s13897_s2 + $0x90] sm:$0xff]  ;;  %v4166_v29 = vld [vmem:[%s13897_s2 + $0x60] sm:$0xff] }
 0x4e6   :  { %v3723_v59 = vsel %vm3722_vm7, %v6688_v43, %v3719_v21  ;;  %v4204_v43 = vld [vmem:[%s13897_s2 + $0x190] sm:$0xff]  ;;  %v4563_v56 = vld [vmem:[%s13899_s4 + $0x320] sm:$0xff] }
 0x4e7   :  { %v3728_v2 = vsel %vm3725_vm8, %v3727_v36, %v3723_v59  ;;  %4248 = vmatpush.msra.mxu1 %v4175_v58  ;;  %4288 = vmatpush.msra.mxu3 %v4177_v10  ;;  %v4164_v21 = vld [vmem:[%s13897_s2 + $0x50] sm:$0xff]  ;;  %v4158_v58 = vld [vmem:[%s13897_s2 + $0x20] sm:$0xff] }
 0x4e8   :  { %v3771_v6 = vmul.f32 %v6690_v60, %v3728_v2  ;;  %v4160_v10 = vld [vmem:[%s13897_s2 + $0x30] sm:$0xff]  ;;  %v4154_v36 = vld [vmem:[%s13897_s2] sm:$0xff]  ;;  %v4588_v2 = vld [vmem:[%s13899_s4 + $0x3e8] sm:$0xff] }
 0x4e9   :  { %4249 = vmatpush.msra.mxu1 %v4171_v38  ;;  %4289 = vmatpush.msra.mxu3 %v4173_v4  ;;  %v4149_v59 = vld [vmem:[%s13898_s1 + $0x20] sm:$0xff]  ;;  %v4151_v38 = vld [vmem:[%s13898_s1 + $0x30] sm:$0xff] }
 0x4ea   :  { %v11277_v0 = vadd.f32 %v3771_v6, %v3770_v41  ;;  %v4145_v4 = vld [vmem:[%s13898_s1] sm:$0xff]  ;;  %v4147_v60 = vld [vmem:[%s13898_s1 + $0x10] sm:$0xff]  ;;  %v4584_v6 = vld [vmem:[%s13899_s4 + $0x3c8] sm:$0xff] }
 0x4eb   :  { %4250 = vmatpush.msra.mxu1 %v4167_v9  ;;  %4290 = vmatpush.msra.mxu3 %v4169_v22  ;;  %v4583_v41 = vld [vmem:[%s13899_s4 + $0x3c0] sm:$0xff]  ;;  %v4580_v22 = vld [vmem:[%s13899_s4 + $0x3a8] sm:$0xff] }
 0x4ec   :  { %6691 = vtanh.f32 %v11277_v0  ;;  %v4579_v9 = vld [vmem:[%s13899_s4 + $0x3a0] sm:$0xff] }
 0x4ed   :  { %4251 = vmatpush.msra.mxu1 %v4163_v61  ;;  %4291 = vmatpush.msra.mxu3 %v4165_v51  ;;  %v4575_v61 = vld [vmem:[%s13899_s4 + $0x380] sm:$0xff]  ;;  %v4576_v51 = vld [vmem:[%s13899_s4 + $0x388] sm:$0xff] }
 0x4ee   :  { %v4555_v31 = vld [vmem:[%s13899_s4 + $0x2e0] sm:$0xff] }
 0x4ef   :  { %4252 = vmatpush.msra.mxu1 %v4159_v24  ;;  %4292 = vmatpush.msra.mxu3 %v4161_v46  ;;  %v4567_v24 = vld [vmem:[%s13899_s4 + $0x340] sm:$0xff]  ;;  %v4568_v46 = vld [vmem:[%s13899_s4 + $0x348] sm:$0xff] }
 0x4f1   :  { %4253 = vmatpush.msra.mxu1 %v4155_v49  ;;  %4293 = vmatpush.msra.mxu3 %v4157_v28  ;;  %v4559_v49 = vld [vmem:[%s13899_s4 + $0x300] sm:$0xff]  ;;  %v4560_v28 = vld [vmem:[%s13899_s4 + $0x308] sm:$0xff] }
 0x4f2   :  { %v6692_v42 = vpop.eup %6691 }
 0x4f3   :  { %4335 = vmatpush.msrb.mxu1 %v4150_v14  ;;  %4375 = vmatpush.msrb.mxu3 %v4152_v53  ;;  %v11322_v50 = vmul.f32 %v6692_v42, %v3767_v35  ;;  %v4556_v14 = vld [vmem:[%s13899_s4 + $0x2e8] sm:$0xff]  ;;  %v4551_v53 = vld [vmem:[%s13899_s4 + $0x2c0] sm:$0xff] }
 0x4f4   :  { %v4543_v35 = vld [vmem:[%s13899_s4 + $0x280] sm:$0xff] }
 0x4f5   :  { %4336 = vmatpush.msrb.mxu1 %v4146_v5  ;;  %4376 = vmatpush.msrb.mxu3 %v4148_v7  ;;  %v4547_v5 = vld [vmem:[%s13899_s4 + $0x2a0] sm:$0xff]  ;;  %v4548_v7 = vld [vmem:[%s13899_s4 + $0x2a8] sm:$0xff] }
 0x4f6   :  { %3933 = vmatmul.f32.vlgmr.msra.gmra.mxu0 %v11322_v50  ;;  %3973 = vmatmul.f32.vlgmr.msra.gmra.mxu2 %v11322_v50 }
 0x4f7   :  { %4218 = vmatpush.msra.mxu0 %v4214_v8  ;;  %4254 = vmatmul.f32.vlgmr.msra.gmra.mxu1 %v11322_v50  ;;  %v4539_v8 = vld [vmem:[%s13899_s4 + $0x260] sm:$0xff] }
 0x4f8   :  { %4258 = vmatpush.msra.mxu2 %v4216_v26  ;;  %4294 = vmatmul.f32.vlgmr.msra.gmra.mxu3 %v11322_v50  ;;  %v4540_v26 = vld [vmem:[%s13899_s4 + $0x268] sm:$0xff] }
 0x4f9   :  { %4219 = vmatpush.msra.mxu0 %v4210_v1  ;;  %4621 = vmatpush.msra.mxu1 %v4587_v57  ;;  %v4535_v1 = vld [vmem:[%s13899_s4 + $0x240] sm:$0xff]  ;;  %v4574_v57 = vld [vmem:[%s13899_s4 + $0x378] sm:$0xff] }
 0x4fa   :  { %4259 = vmatpush.msra.mxu2 %v4212_v47  ;;  %4661 = vmatpush.msra.mxu3 %v4588_v2  ;;  %v4536_v47 = vld [vmem:[%s13899_s4 + $0x248] sm:$0xff] }
 0x4fb   :  { %4220 = vmatpush.msra.mxu0 %v4206_v3  ;;  %4622 = vmatpush.msra.mxu1 %v4583_v41  ;;  %v4531_v3 = vld [vmem:[%s13899_s4 + $0x220] sm:$0xff] }
 0x4fc   :  { %4260 = vmatpush.msra.mxu2 %v4208_v40  ;;  %4662 = vmatpush.msra.mxu3 %v4584_v6  ;;  %v4532_v40 = vld [vmem:[%s13899_s4 + $0x228] sm:$0xff]  ;;  %v4503_v41 = vld [vmem:[%s13899_s4 + $0x140] sm:$0xff] }
 0x4fd   :  { %4221 = vmatpush.msra.mxu0 %v4202_v12  ;;  %4623 = vmatpush.msra.mxu1 %v4579_v9  ;;  %v11546_v12 = vld [vmem:[%s13902_s5] sm:$0xf]  ;;  %v4504_v6 = vld [vmem:[%s13899_s4 + $0x148] sm:$0xff]  ;;  %v4569_v9 = vld [vmem:[%s13899_s4 + $0x350] sm:$0xff] }
 0x4fe   :  { %4261 = vmatpush.msra.mxu2 %v4204_v43  ;;  %4013 = vmatmul.f32.vlgmr.msrb.gmra.mxu0 %v11322_v50  ;;  %v4527_v43 = vld [vmem:[%s13899_s4 + $0x200] sm:$0xff] }
 0x4ff   :  { %4053 = vmatmul.f32.vlgmr.msrb.gmra.mxu2 %v11322_v50  ;;  %4222 = vmatpush.msra.mxu0 %v4198_v44  ;;  %v4528_v44 = vld [vmem:[%s13899_s4 + $0x208] sm:$0xff] }
 0x500   :  { %4262 = vmatpush.msra.mxu2 %v4200_v25  ;;  %6495 = vmatmul.msk.f32.vlgmr.msrb.gmra.mxu1 %vm193_vm0, %v11361_v63 }
 0x501   :  { %6497 = vmatmul.msk.f32.vlgmr.msrb.gmra.mxu3 %vm193_vm0, %v11361_v63  ;;  %4223 = vmatpush.msra.mxu0 %v4194_v45  ;;  %v4524_v45 = vld [vmem:[%s13899_s4 + $0x1e8] sm:$0xff] }
 0x502   :  { %4263 = vmatpush.msra.mxu2 %v4196_v17  ;;  %4663 = vmatpush.msra.mxu3 %v4580_v22  ;;  %v4589_v17 = vld [vmem:[%s13899_s4 + $0x3f0] sm:$0xff] }
 0x503   :  { %4224 = vmatpush.msra.mxu0 %v4190_v48  ;;  %4624 = vmatpush.msra.mxu1 %v4575_v61 }
 0x504   :  { %4264 = vmatpush.msra.mxu2 %v4192_v62  ;;  %4664 = vmatpush.msra.mxu3 %v4576_v51  ;;  %v3909_v62 = vperm.slane %v11546_v12, 0  ;;  %v4570_v51 = vld [vmem:[%s13899_s4 + $0x358] sm:$0xff] }
 0x505   :  { %4225 = vmatpush.msra.mxu0 %v4186_v23  ;;  %4625 = vmatpush.msra.mxu1 %v4571_v27  ;;  %v4590_v23 = vld [vmem:[%s13899_s4 + $0x3f8] sm:$0xff]  ;;  %v4499_v27 = vld [vmem:[%s13899_s4 + $0x120] sm:$0xff] }
 0x506   :  { %4265 = vmatpush.msra.mxu2 %v4188_v13  ;;  %4665 = vmatpush.msra.mxu3 %v4572_v11  ;;  %v4519_v13 = vld [vmem:[%s13899_s4 + $0x1c0] sm:$0xff]  ;;  %v4500_v11 = vld [vmem:[%s13899_s4 + $0x128] sm:$0xff] }
 0x507   :  { %4226 = vmatpush.msra.mxu0 %v4182_v52  ;;  %4626 = vmatpush.msra.mxu1 %v4567_v24  ;;  %v4520_v52 = vld [vmem:[%s13899_s4 + $0x1c8] sm:$0xff]  ;;  %v4565_v24 = vld [vmem:[%s13899_s4 + $0x330] sm:$0xff] }
 0x508   :  { %4266 = vmatpush.msra.mxu2 %v4184_v18  ;;  %4666 = vmatpush.msra.mxu3 %v4568_v46  ;;  %v4585_v18 = vld [vmem:[%s13899_s4 + $0x3d0] sm:$0xff] }
 0x509   :  { %4227 = vmatpush.msra.mxu0 %v4178_v30  ;;  %4627 = vmatpush.msra.mxu1 %v4563_v56  ;;  %v4586_v30 = vld [vmem:[%s13899_s4 + $0x3d8] sm:$0xff] }
 0x50a   :  { %4267 = vmatpush.msra.mxu2 %v4180_v19  ;;  %4667 = vmatpush.msra.mxu3 %v4564_v33  ;;  %v4566_v56 = vld [vmem:[%s13899_s4 + $0x338] sm:$0xff]  ;;  %v4495_v33 = vld [vmem:[%s13899_s4 + $0x100] sm:$0xff] }
 0x50b   :  { %4228 = vmatpush.msra.mxu0 %v4174_v55  ;;  %4628 = vmatpush.msra.mxu1 %v4559_v49  ;;  %v4515_v55 = vld [vmem:[%s13899_s4 + $0x1a0] sm:$0xff]  ;;  %v4496_v49 = vld [vmem:[%s13899_s4 + $0x108] sm:$0xff] }
 0x50c   :  { %4268 = vmatpush.msra.mxu2 %v4176_v39  ;;  %4668 = vmatpush.msra.mxu3 %v4560_v28  ;;  %v4516_v39 = vld [vmem:[%s13899_s4 + $0x1a8] sm:$0xff]  ;;  %v4561_v28 = vld [vmem:[%s13899_s4 + $0x310] sm:$0xff] }
 0x50d   :  { %4229 = vmatpush.msra.mxu0 %v4170_v20  ;;  %4629 = vmatpush.msra.mxu1 %v4555_v31  ;;  %v4581_v20 = vld [vmem:[%s13899_s4 + $0x3b0] sm:$0xff] }
 0x50e   :  { %4269 = vmatpush.msra.mxu2 %v4172_v54  ;;  %4669 = vmatpush.msra.mxu3 %v4556_v14  ;;  %v4562_v14 = vld [vmem:[%s13899_s4 + $0x318] sm:$0xff] }
 0x50f   :  { %4230 = vmatpush.msra.mxu0 %v4166_v29  ;;  %4630 = vmatpush.msra.mxu1 %v4551_v53  ;;  %v4582_v29 = vld [vmem:[%s13899_s4 + $0x3b8] sm:$0xff]  ;;  %v4491_v53 = vld [vmem:[%s13899_s4 + $0xe0] sm:$0xff] }
 0x510   :  { %4270 = vmatpush.msra.mxu2 %v4168_v37  ;;  %4670 = vmatpush.msra.mxu3 %v4552_v32  ;;  %v4511_v37 = vld [vmem:[%s13899_s4 + $0x180] sm:$0xff]  ;;  %v4492_v32 = vld [vmem:[%s13899_s4 + $0xe8] sm:$0xff] }
 0x511   :  { %4231 = vmatpush.msra.mxu0 %v4162_v16  ;;  %4631 = vmatpush.msra.mxu1 %v4547_v5  ;;  %v4512_v16 = vld [vmem:[%s13899_s4 + $0x188] sm:$0xff]  ;;  %v4557_v5 = vld [vmem:[%s13899_s4 + $0x2f0] sm:$0xff] }
 0x512   :  { %4271 = vmatpush.msra.mxu2 %v4164_v21  ;;  %4671 = vmatpush.msra.mxu3 %v4548_v7  ;;  %v4577_v21 = vld [vmem:[%s13899_s4 + $0x390] sm:$0xff] }
 0x513   :  { %4232 = vmatpush.msra.mxu0 %v4158_v58  ;;  %4632 = vmatpush.msra.mxu1 %v4543_v35  ;;  %v3912_v35 = vperm.slane %v11546_v12, 3 }
 0x514   :  { %4272 = vmatpush.msra.mxu2 %v4160_v10  ;;  %v3910_v10 = vperm.slane %v11546_v12, 1 }
 0x515   :  { %4233 = vmatpush.msra.mxu0 %v4154_v36  ;;  %4633 = vmatpush.msra.mxu1 %v4539_v8  ;;  %v4578_v36 = vld [vmem:[%s13899_s4 + $0x398] sm:$0xff] }
 0x516   :  { %4273 = vmatpush.msra.mxu2 %v4156_v34  ;;  %4234 = vmatmul.f32.vlgmr.msra.gmra.mxu0 %v11322_v50 }
 0x517   :  { %4274 = vmatmul.f32.vlgmr.msra.gmra.mxu2 %v11322_v50  ;;  %4315 = vmatpush.msrb.mxu0 %v4149_v59  ;;  %v4544_v50 = vld [vmem:[%s13899_s4 + $0x288] sm:$0xff]  ;;  %v4507_v59 = vld [vmem:[%s13899_s4 + $0x160] sm:$0xff] }
 0x518   :  { %4355 = vmatpush.msrb.mxu2 %v4151_v38  ;;  %4672 = vmatpush.msra.mxu3 %v4544_v50  ;;  %v4508_v38 = vld [vmem:[%s13899_s4 + $0x168] sm:$0xff]  ;;  %v4558_v50 = vld [vmem:[%s13899_s4 + $0x2f8] sm:$0xff] }
 0x519   :  { %4316 = vmatpush.msrb.mxu0 %v4145_v4  ;;  %4634 = vmatpush.msra.mxu1 %v4535_v1  ;;  %v4573_v4 = vld [vmem:[%s13899_s4 + $0x370] sm:$0xff]  ;;  %v4487_v1 = vld [vmem:[%s13899_s4 + $0xc0] sm:$0xff] }
 0x51a   :  { %4356 = vmatpush.msrb.mxu2 %v4147_v60  ;;  %4673 = vmatpush.msra.mxu3 %v4540_v26 }
 0x51b   :  { %4635 = vmatpush.msra.mxu1 %v4531_v3  ;;  %v4553_v3 = vld [vmem:[%s13899_s4 + $0x2d0] sm:$0xff] }
 0x51c   :  { %4674 = vmatpush.msra.mxu3 %v4536_v47  ;;  %4641 = vmatpush.msra.mxu2 %v4524_v45  ;;  %v4488_v47 = vld [vmem:[%s13899_s4 + $0xc8] sm:$0xff] }
 0x51d   :  { %4636 = vmatpush.msra.mxu1 %v4527_v43  ;;  %v4484_v45 = vld [vmem:[%s13899_s4 + $0xa8] sm:$0xff] }
 0x51e   :  { %6494 = vmatmul.msk.f32.vlgmr.msrb.gmra.mxu0 %vm193_vm0, %v11361_v63  ;;  %4675 = vmatpush.msra.mxu3 %v4532_v40 }
 0x51f   :  { %6496 = vmatmul.msk.f32.vlgmr.msrb.gmra.mxu2 %vm193_vm0, %v11361_v63  ;;  %v4523_v63 = vld [vmem:[%s13899_s4 + $0x1e0] sm:$0xff]  ;;  %4701 = vmatpush.msrb.mxu1 %v4589_v17  ;;  %v4549_v17 = vld [vmem:[%s13899_s4 + $0x2b0] sm:$0xff] }
 0x520   :  { %4676 = vmatpush.msra.mxu3 %v4528_v44  ;;  %4601 = vmatpush.msra.mxu0 %v4523_v63  ;;  %v4554_v44 = vld [vmem:[%s13899_s4 + $0x2d8] sm:$0xff]  ;;  %v4483_v63 = vld [vmem:[%s13899_s4 + $0xa0] sm:$0xff] }
 0x521   :  { %4642 = vmatpush.msra.mxu2 %v4520_v52  ;;  %4702 = vmatpush.msrb.mxu1 %v4585_v18  ;;  %v4479_v52 = vld [vmem:[%s13899_s4 + $0x80] sm:$0xff]  ;;  %v4480_v18 = vld [vmem:[%s13899_s4 + $0x88] sm:$0xff] }
 0x522   :  { %4741 = vmatpush.msrb.mxu3 %v4590_v23  ;;  %4602 = vmatpush.msra.mxu0 %v4519_v13  ;;  %v4550_v13 = vld [vmem:[%s13899_s4 + $0x2b8] sm:$0xff] }
 0x523   :  { %4643 = vmatpush.msra.mxu2 %v4516_v39  ;;  %4703 = vmatpush.msrb.mxu1 %v4581_v20  ;;  %v4546_v20 = vld [vmem:[%s13899_s4 + $0x298] sm:$0xff] }
 0x524   :  { %4742 = vmatpush.msrb.mxu3 %v4586_v30  ;;  %4603 = vmatpush.msra.mxu0 %v4515_v55  ;;  %v4545_v30 = vld [vmem:[%s13899_s4 + $0x290] sm:$0xff]  ;;  %v3911_v55 = vperm.slane %v11546_v12, 2  ;;  %v4476_v12 = vld [vmem:[%s13899_s4 + $0x68] sm:$0xff] }
 0x525   :  { %4644 = vmatpush.msra.mxu2 %v4512_v16  ;;  %4704 = vmatpush.msrb.mxu1 %v4577_v21  ;;  %v4541_v16 = vld [vmem:[%s13899_s4 + $0x270] sm:$0xff] }
 0x526   :  { %4743 = vmatpush.msrb.mxu3 %v4582_v29  ;;  %4604 = vmatpush.msra.mxu0 %v4511_v37  ;;  %v4475_v37 = vld [vmem:[%s13899_s4 + $0x60] sm:$0xff] }
 0x527   :  { %4645 = vmatpush.msra.mxu2 %v4508_v38  ;;  %4705 = vmatpush.msrb.mxu1 %v4573_v4  ;;  %v4537_v38 = vld [vmem:[%s13899_s4 + $0x250] sm:$0xff] }
 0x528   :  { %4744 = vmatpush.msrb.mxu3 %v4578_v36  ;;  %4605 = vmatpush.msra.mxu0 %v4507_v59  ;;  %v4472_v59 = vld [vmem:[%s13899_s4 + $0x48] sm:$0xff] }
 0x529   :  { %4646 = vmatpush.msra.mxu2 %v4504_v6  ;;  %4706 = vmatpush.msrb.mxu1 %v4569_v9 }
 0x52a   :  { %4745 = vmatpush.msrb.mxu3 %v4574_v57  ;;  %4606 = vmatpush.msra.mxu0 %v4503_v41  ;;  %v4538_v57 = vld [vmem:[%s13899_s4 + $0x258] sm:$0xff]  ;;  %v4468_v41 = vld [vmem:[%s13899_s4 + $0x28] sm:$0xff] }
 0x52b   :  { %4647 = vmatpush.msra.mxu2 %v4500_v11  ;;  %4707 = vmatpush.msrb.mxu1 %v4565_v24  ;;  %v4464_v11 = vld [vmem:[%s13899_s4 + $0x8] sm:$0xff]  ;;  %v4529_v24 = vld [vmem:[%s13899_s4 + $0x210] sm:$0xff] }
 0x52c   :  { %4746 = vmatpush.msrb.mxu3 %v4570_v51  ;;  %4607 = vmatpush.msra.mxu0 %v4499_v27  ;;  %v4534_v51 = vld [vmem:[%s13899_s4 + $0x238] sm:$0xff]  ;;  %v4463_v27 = vld [vmem:[%s13899_s4] sm:$0xff] }
 0x52d   :  { %4648 = vmatpush.msra.mxu2 %v4496_v49  ;;  %4708 = vmatpush.msrb.mxu1 %v4561_v28  ;;  %v4525_v49 = vld [vmem:[%s13899_s4 + $0x1f0] sm:$0xff]  ;;  %v4526_v28 = vld [vmem:[%s13899_s4 + $0x1f8] sm:$0xff] }
 0x52e   :  { %4747 = vmatpush.msrb.mxu3 %v4566_v56  ;;  %4608 = vmatpush.msra.mxu0 %v4495_v33  ;;  %v4530_v33 = vld [vmem:[%s13899_s4 + $0x218] sm:$0xff] }
 0x52f   :  { %4649 = vmatpush.msra.mxu2 %v4492_v32  ;;  %4709 = vmatpush.msrb.mxu1 %v4557_v5 }
 0x530   :  { %4748 = vmatpush.msrb.mxu3 %v4562_v14  ;;  %4609 = vmatpush.msra.mxu0 %v4491_v53 }
 0x531   :  { %4650 = vmatpush.msra.mxu2 %v4488_v47  ;;  %4710 = vmatpush.msrb.mxu1 %v4553_v3  ;;  %v4517_v3 = vld [vmem:[%s13899_s4 + $0x1b0] sm:$0xff] }
 0x532   :  { %4749 = vmatpush.msrb.mxu3 %v4558_v50  ;;  %4610 = vmatpush.msra.mxu0 %v4487_v1 }
 0x533   :  { %4651 = vmatpush.msra.mxu2 %v4484_v45  ;;  %4711 = vmatpush.msrb.mxu1 %v4549_v17 }
 0x534   :  { %4750 = vmatpush.msrb.mxu3 %v4554_v44  ;;  %4611 = vmatpush.msra.mxu0 %v4483_v63 }
 0x535   :  { %4652 = vmatpush.msra.mxu2 %v4480_v18  ;;  %4712 = vmatpush.msrb.mxu1 %v4545_v30  ;;  %v4509_v30 = vld [vmem:[%s13899_s4 + $0x170] sm:$0xff] }
 0x536   :  { %4751 = vmatpush.msrb.mxu3 %v4550_v13  ;;  %4612 = vmatpush.msra.mxu0 %v4479_v52 }
 0x537   :  { %4653 = vmatpush.msra.mxu2 %v4476_v12  ;;  %4713 = vmatpush.msrb.mxu1 %v4541_v16  ;;  %v4506_v12 = vld [vmem:[%s13899_s4 + $0x158] sm:$0xff] }
 0x538   :  { %4752 = vmatpush.msrb.mxu3 %v4546_v20  ;;  %4613 = vmatpush.msra.mxu0 %v4475_v37  ;;  %v4505_v37 = vld [vmem:[%s13899_s4 + $0x150] sm:$0xff] }
 0x539   :  { %4654 = vmatpush.msra.mxu2 %v4472_v59  ;;  %4714 = vmatpush.msrb.mxu1 %v4537_v38  ;;  %v4501_v59 = vld [vmem:[%s13899_s4 + $0x130] sm:$0xff]  ;;  %v4502_v38 = vld [vmem:[%s13899_s4 + $0x138] sm:$0xff] }
 0x53b   :  { %4655 = vmatpush.msra.mxu2 %v4468_v41  ;;  %v4497_v41 = vld [vmem:[%s13899_s4 + $0x110] sm:$0xff] }
 0x53d   :  { %4656 = vmatpush.msra.mxu2 %v4464_v11 }
 0x53f   :  { %4721 = vmatpush.msrb.mxu2 %v4526_v28 }
 0x54f   :  { %v3954_v42 = vpop.f32.mrf.mxu1 }
 0x555   :  { %v3994_v48 = vpop.f32.mrf.mxu3 }
 0x557   :  { %v11554_v25 = vpop.f32.mrf.mxu1 }
 0x55d   :  { %v11629_v22 = vpop.f32.mrf.mxu3 }
 0x573   :  { %v3934_v19 = vpop.f32.mrf.mxu0 }
 0x574   :  { %v3935_v54 = vadd.f32 %v3934_v19, %v3909_v62  ;;  %v11606_v34 = vpop.f32.mrf.mxu1 }
 0x576   :  { %v3955_v58 = vadd.f32 %v3954_v42, %v3935_v54  ;;  %v11670_v42 = vld [vmem:[%s13901_s3] sm:$0xf] }
 0x577   :  { %v4384_v62 = vperm.slane %v11670_v42, 1 }
 0x578   :  { %v6490_v60 = vmul.f32 -1.442695, %v3955_v58 }
 0x579   :  { %v3974_v2 = vpop.f32.mrf.mxu2 }
 0x57a   :  { %6693 = vpow2.f32 %v6490_v60  ;;  %v3975_v61 = vadd.f32 %v3974_v2, %v3910_v10  ;;  %v4542_v10 = vld [vmem:[%s13899_s4 + $0x278] sm:$0xff]  ;;  %v4467_v2 = vld [vmem:[%s13899_s4 + $0x20] sm:$0xff] }
 0x57b   :  { %v11687_v40 = vpop.f32.mrf.mxu3  ;;  %v4014_v29 = vpop.f32.mrf.mxu0  ;;  %4753 = vmatpush.msrb.mxu3 %v4542_v10 }
 0x57c   :  { %v3995_v46 = vadd.f32 %v3994_v48, %v3975_v61  ;;  %v4015_v60 = vadd.f32 %v4014_v29, %v3911_v55  ;;  %v4533_v61 = vld [vmem:[%s13899_s4 + $0x230] sm:$0xff] }
 0x57d   :  { %v4338_v26 = vpop.f32.mrf.mxu1  ;;  %4754 = vmatpush.msrb.mxu3 %v4538_v57  ;;  %4715 = vmatpush.msrb.mxu1 %v4533_v61  ;;  %v4493_v61 = vld [vmem:[%s13899_s4 + $0xf0] sm:$0xff] }
 0x57e   :  { %v6491_v31 = vmul.f32 -1.442695, %v3995_v46  ;;  %v4339_v48 = vadd.f32 %v4338_v26, %v11606_v34  ;;  %v4471_v34 = vld [vmem:[%s13899_s4 + $0x40] sm:$0xff]  ;;  %v4035_v46 = vadd.f32 %v11554_v25, %v4015_v60  ;;  %v4386_v25 = vperm.slane %v11670_v42, 3 }
 0x57f   :  { %4614 = vmatpush.msra.mxu0 %v4471_v34  ;;  %4755 = vmatpush.msrb.mxu3 %v4534_v51  ;;  %v4383_v60 = vperm.slane %v11670_v42, 0  ;;  %v4494_v51 = vld [vmem:[%s13899_s4 + $0xf8] sm:$0xff] }
 0x580   :  { %v6694_v7 = vpop.eup %6693  ;;  %6695 = vpow2.f32 %v6491_v31  ;;  %v4392_v21 = vadd.f32 %v4384_v62, %v4339_v48  ;;  %4716 = vmatpush.msrb.mxu1 %v4529_v24  ;;  %v4513_v62 = vld [vmem:[%s13899_s4 + $0x190] sm:$0xff] }
 0x581   :  { %v11676_v8 = vadd.f32 1.0, %v6694_v7  ;;  %4615 = vmatpush.msra.mxu0 %v4467_v2  ;;  %4756 = vmatpush.msrb.mxu3 %v4530_v33  ;;  %v4521_v7 = vld [vmem:[%s13899_s4 + $0x1d0] sm:$0xff] }
 0x582   :  { %v4054_v43 = vpop.f32.mrf.mxu2  ;;  %v6499_v9 = vmul.f32 -1.442695, %v4392_v21 }
 0x583   :  { %6697 = vrcp.f32 %v11676_v8  ;;  %v4055_v23 = vadd.f32 %v4054_v43, %v3912_v35  ;;  %4616 = vmatpush.msra.mxu0 %v4463_v27  ;;  %v4522_v35 = vld [vmem:[%s13899_s4 + $0x1d8] sm:$0xff]  ;;  %v4092_v50 = vand.u32 2147483648, %v11676_v8  ;;  %vm4086_vm14 = vweird.f32 %v11676_v8 }
 0x584   :  { %v4090_v47 = vand.u32 2147483647, %v11676_v8  ;;  %4722 = vmatpush.msrb.mxu2 %v4522_v35  ;;  %v4481_v35 = vld [vmem:[%s13899_s4 + $0x90] sm:$0xff] }
 0x585   :  { %v4075_v39 = vadd.f32 %v11629_v22, %v4055_v23  ;;  %v4378_v22 = vpop.f32.mrf.mxu3  ;;  %4681 = vmatpush.msrb.mxu0 %v4525_v49  ;;  %v4514_v23 = vld [vmem:[%s13899_s4 + $0x198] sm:$0xff]  ;;  %v4093_v13 = vor.u32 1.1754944e-38, %v4092_v50 }
 0x586   :  { %v6696_v19 = vpop.eup %6695  ;;  %v4379_v14 = vadd.f32 %v4378_v22, %v11687_v40  ;;  %v4518_v40 = vld [vmem:[%s13899_s4 + $0x1b8] sm:$0xff]  ;;  %vm4091_vm3 = vcmp.eq.f32.partialorder %v4090_v47, 8.507059e+37 }
 0x587   :  { %v11721_v54 = vadd.f32 1.0, %v6696_v19  ;;  %v6492_v58 = vmul.f32 -1.442695, %v4075_v39  ;;  %4682 = vmatpush.msrb.mxu0 %v4521_v7  ;;  %4723 = vmatpush.msrb.mxu2 %v4518_v40  ;;  %v4510_v19 = vld [vmem:[%s13899_s4 + $0x178] sm:$0xff] }
 0x588   :  { %v4482_v50 = vld [vmem:[%s13899_s4 + $0x98] sm:$0xff] }
 0x589   :  { %v11735_v36 = vpop.eup %6697  ;;  %6699 = vrcp.f32 %v11721_v54  ;;  %v4111_v43 = vand.u32 2147483648, %v11721_v54  ;;  %v4109_v48 = vand.u32 2147483647, %v11721_v54  ;;  %4683 = vmatpush.msrb.mxu0 %v4517_v3  ;;  %vm4105_vm2 = vweird.f32 %v11721_v54  ;;  %4724 = vmatpush.msrb.mxu2 %v4514_v23  ;;  %v4901_v47 = vld [vmem:[%s13897_s2 + $0x1f8] sm:$0xff]  ;;  %v4477_v3 = vld [vmem:[%s13899_s4 + $0x70] sm:$0xff] }
 0x58a   :  { %v4082_v4 = vmul.f32 %v11735_v36, %v11676_v8  ;;  %6701 = vpow2.f32 %v6492_v58  ;;  %vm4087_vm13 = vweird.f32 %v11735_v36  ;;  %v4394_v8 = vadd.f32 %v4386_v25, %v4379_v14  ;;  %v4485_v25 = vld [vmem:[%s13899_s4 + $0xb0] sm:$0xff]  ;;  %v4478_v40 = vld [vmem:[%s13899_s4 + $0x78] sm:$0xff] }
 0x58b   :  { %6703 = vpow2.f32 %v6499_v9  ;;  %vm11809_vm15 = vmor %vm4086_vm14, %vm4087_vm13  ;;  %4684 = vmatpush.msrb.mxu0 %v4513_v62  ;;  %v4112_v55 = vor.u32 1.1754944e-38, %v4111_v43  ;;  %vm4110_vm5 = vcmp.eq.f32.partialorder %v4109_v48, 8.507059e+37  ;;  %4725 = vmatpush.msrb.mxu2 %v4510_v19  ;;  %v4891_v62 = vld [vmem:[%s13897_s2 + $0x1a8] sm:$0xff]  ;;  %v4893_v23 = vld [vmem:[%s13897_s2 + $0x1b8] sm:$0xff] }
 0x58c   :  { %v4083_v6 = vsub.f32 1.0, %v4082_v4  ;;  %6705 = vtanh.f32 %v4035_v46  ;;  %v4489_v46 = vld [vmem:[%s13899_s4 + $0xd0] sm:$0xff] }
 0x58d   :  { %4685 = vmatpush.msrb.mxu0 %v4509_v30  ;;  %4726 = vmatpush.msrb.mxu2 %v4506_v12  ;;  %v4465_v12 = vld [vmem:[%s13899_s4 + $0x10] sm:$0xff] }
 0x58e   :  { %v4084_v56 = vmul.f32 %v11735_v36, %v4083_v6  ;;  %v4498_v6 = vld [vmem:[%s13899_s4 + $0x118] sm:$0xff] }
 0x58f   :  { %v6700_v31 = vpop.eup %6699  ;;  %4686 = vmatpush.msrb.mxu0 %v4505_v37  ;;  %4727 = vmatpush.msrb.mxu2 %v4502_v38  ;;  %v4385_v37 = vperm.slane %v11670_v42, 2  ;;  %v4881_v42 = vld [vmem:[%s13897_s2 + $0x158] sm:$0xff] }
 0x590   :  { %v6702_v53 = vpop.eup %6701  ;;  %v4101_v32 = vmul.f32 %v6700_v31, %v11721_v54  ;;  %v4085_v5 = vadd.f32 %v11735_v36, %v4084_v56  ;;  %vm4106_vm1 = vweird.f32 %v6700_v31  ;;  %v6500_v54 = vmul.f32 -1.442695, %v4394_v8  ;;  %v4490_v56 = vld [vmem:[%s13899_s4 + $0xd8] sm:$0xff]  ;;  %v4895_v8 = vld [vmem:[%s13897_s2 + $0x1c8] sm:$0xff] }
 0x591   :  { %v11796_v26 = vadd.f32 1.0, %v6702_v53  ;;  %v6704_v52 = vpop.eup %6703  ;;  %vm4107_vm4 = vmor %vm4105_vm2, %vm4106_vm1  ;;  %4687 = vmatpush.msrb.mxu0 %v4501_v59  ;;  %4728 = vmatpush.msrb.mxu2 %v4498_v6  ;;  %v4486_v53 = vld [vmem:[%s13899_s4 + $0xb8] sm:$0xff] }
 0x592   :  { %v4102_v1 = vsub.f32 1.0, %v4101_v32  ;;  %v4089_v17 = vsel %vm11809_vm15, %v11735_v36, %v4085_v5  ;;  %v6706_v20 = vpop.eup %6705  ;;  %v11838_v58 = vadd.f32 1.0, %v6704_v52  ;;  %v4469_v52 = vld [vmem:[%s13899_s4 + $0x30] sm:$0xff]  ;;  %v4877_v59 = vld [vmem:[%s13897_s2 + $0x138] sm:$0xff] }
 0x593   :  { %6707 = vrcp.f32 %v11796_v26  ;;  %v4235_v63 = vpop.f32.mrf.mxu0  ;;  %v4094_v39 = vsel %vm4091_vm3, %v4093_v13, %v4089_v17  ;;  %v4131_v22 = vand.u32 2147483648, %v11796_v26  ;;  %4688 = vmatpush.msrb.mxu0 %v4497_v41  ;;  %v4129_v11 = vand.u32 2147483647, %v11796_v26  ;;  %4729 = vmatpush.msrb.mxu2 %v4494_v51  ;;  %v4474_v17 = vld [vmem:[%s13899_s4 + $0x58] sm:$0xff]  ;;  %v4867_v51 = vld [vmem:[%s13897_s2 + $0xe8] sm:$0xff] }
 0x594   :  { %v4103_v45 = vmul.f32 %v6700_v31, %v4102_v1  ;;  %v4137_v36 = vmul.f32 %v6706_v20, %v4094_v39  ;;  %6709 = vpow2.f32 %v6500_v54  ;;  %vm4125_vm7 = vweird.f32 %v11796_v26  ;;  %v4899_v1 = vld [vmem:[%s13897_s2 + $0x1e8] sm:$0xff]  ;;  %v4889_v39 = vld [vmem:[%s13897_s2 + $0x198] sm:$0xff] }
 0x595   :  { %6711 = vrcp.f32 %v11838_v58  ;;  %4689 = vmatpush.msrb.mxu0 %v4493_v61  ;;  %v4132_v14 = vor.u32 1.1754944e-38, %v4131_v22  ;;  %4730 = vmatpush.msrb.mxu2 %v4490_v56  ;;  %vm4130_vm9 = vcmp.eq.f32.partialorder %v4129_v11, 8.507059e+37  ;;  %v4883_v20 = vld [vmem:[%s13897_s2 + $0x168] sm:$0xff]  ;;  %v4873_v41 = vld [vmem:[%s13897_s2 + $0x118] sm:$0xff]  ;;  %v4429_v6 = vand.u32 2147483648, %v11838_v58  ;;  %v4862_v11 = vld [vmem:[%s13897_s2 + $0xc0] sm:$0xff] }
 0x596   :  { %v4104_v18 = vadd.f32 %v6700_v31, %v4103_v45  ;;  %v4473_v45 = vld [vmem:[%s13899_s4 + $0x50] sm:$0xff]  ;;  %vm4423_vm11 = vweird.f32 %v11838_v58  ;;  %v4427_v61 = vand.u32 2147483647, %v11838_v58 }
 0x597   :  { %4690 = vmatpush.msrb.mxu0 %v4489_v46  ;;  %4731 = vmatpush.msrb.mxu2 %v4486_v53  ;;  %v4861_v53 = vld [vmem:[%s13897_s2 + $0xb8] sm:$0xff] }
 0x598   :  { %v4108_v29 = vsel %vm4107_vm4, %v6700_v31, %v4104_v18  ;;  %v4470_v18 = vld [vmem:[%s13899_s4 + $0x38] sm:$0xff]  ;;  %vm4428_vm15 = vcmp.eq.f32.partialorder %v4427_v61, 8.507059e+37  ;;  %v4872_v61 = vld [vmem:[%s13897_s2 + $0x110] sm:$0xff] }
 0x599   :  { %v6708_v16 = vpop.eup %6707  ;;  %v4113_v21 = vsel %vm4110_vm5, %v4112_v55, %v4108_v29  ;;  %4691 = vmatpush.msrb.mxu0 %v4485_v25  ;;  %4732 = vmatpush.msrb.mxu2 %v4482_v50  ;;  %v4887_v55 = vld [vmem:[%s13897_s2 + $0x188] sm:$0xff]  ;;  %v4885_v29 = vld [vmem:[%s13897_s2 + $0x178] sm:$0xff] }
 0x59a   :  { %v4136_v10 = vmul.f32 %v4113_v21, %v11104_v15  ;;  %v4121_v34 = vmul.f32 %v6708_v16, %v11796_v26  ;;  %vm4126_vm6 = vweird.f32 %v6708_v16  ;;  %v4275_v33 = vpop.f32.mrf.mxu2  ;;  %v6710_v28 = vpop.eup %6709  ;;  %v4859_v25 = vld [vmem:[%s13897_s2 + $0xa8] sm:$0xff]  ;;  %v4857_v50 = vld [vmem:[%s13897_s2 + $0x98] sm:$0xff] }
 0x59b   :  { %v4318_v4 = vpop.f32.mrf.mxu0  ;;  %vm4127_vm8 = vmor %vm4125_vm7, %vm4126_vm6  ;;  %v11881_v32 = vpop.eup %6711  ;;  %4692 = vmatpush.msrb.mxu0 %v4481_v35  ;;  %v11903_v44 = vadd.f32 1.0, %v6710_v28  ;;  %4733 = vmatpush.msrb.mxu2 %v4478_v40  ;;  %v4430_v28 = vor.u32 1.1754944e-38, %v4429_v6  ;;  %v4855_v35 = vld [vmem:[%s13897_s2 + $0x88] sm:$0xff]  ;;  %v4874_v6 = vld [vmem:[%s13897_s2 + $0x120] sm:$0xff] }
 0x59c   :  { %v11849_v57 = vadd.f32 %v4137_v36, %v4136_v10  ;;  %v4122_v2 = vsub.f32 1.0, %v4121_v34  ;;  %v4319_v15 = vadd.f32 %v4318_v4, %v4235_v63  ;;  %v4419_v43 = vmul.f32 %v11881_v32, %v11838_v58  ;;  %v4897_v63 = vld [vmem:[%s13897_s2 + $0x1d8] sm:$0xff]  ;;  %v4879_v10 = vld [vmem:[%s13897_s2 + $0x148] sm:$0xff] }
 0x59d   :  { %4693 = vmatpush.msrb.mxu0 %v4477_v3  ;;  %4734 = vmatpush.msrb.mxu2 %v4474_v17  ;;  %v4875_v34 = vld [vmem:[%s13897_s2 + $0x128] sm:$0xff]  ;;  %vm4424_vm10 = vweird.f32 %v11881_v32  ;;  %vm4443_vm4 = vweird.f32 %v11903_v44 }
 0x59e   :  { %6713 = vtanh.f32 %v11849_v57  ;;  %v4123_v9 = vmul.f32 %v6708_v16, %v4122_v2  ;;  %v4391_v27 = vadd.f32 %v4383_v60, %v4319_v15  ;;  %v4420_v30 = vsub.f32 1.0, %v4419_v43  ;;  %v4871_v15 = vld [vmem:[%s13897_s2 + $0x108] sm:$0xff]  ;;  %vm11987_vm12 = vmor %vm4423_vm11, %vm4424_vm10 }
 0x59f   :  { %4694 = vmatpush.msrb.mxu0 %v4473_v45  ;;  %4735 = vmatpush.msrb.mxu2 %v4470_v18  ;;  %v4851_v43 = vld [vmem:[%s13897_s2 + $0x68] sm:$0xff] }
 0x5a0   :  { %v4124_v24 = vadd.f32 %v6708_v16, %v4123_v9  ;;  %v6498_v49 = vmul.f32 -1.442695, %v4391_v27  ;;  %v4421_v21 = vmul.f32 %v11881_v32, %v4420_v30  ;;  %v4869_v27 = vld [vmem:[%s13897_s2 + $0xf8] sm:$0xff]  ;;  %v4847_v45 = vld [vmem:[%s13897_s2 + $0x48] sm:$0xff] }
 0x5a1   :  { %4695 = vmatpush.msrb.mxu0 %v4469_v52  ;;  %v4839_v18 = vld [vmem:[%s13897_s2 + $0x8] sm:$0xff]  ;;  %v4841_v30 = vld [vmem:[%s13897_s2 + $0x18] sm:$0xff] }
 0x5a2   :  { %v4128_v31 = vsel %vm4127_vm8, %v6708_v16, %v4124_v24  ;;  %6715 = vpow2.f32 %v6498_v49  ;;  %v4358_v19 = vpop.f32.mrf.mxu2  ;;  %v4466_v16 = vld [vmem:[%s13899_s4 + $0x18] sm:$0xff]  ;;  %v4422_v2 = vadd.f32 %v11881_v32, %v4421_v21  ;;  %v4900_v21 = vld [vmem:[%s13897_s2 + $0x1f0] sm:$0xff]  ;;  %v5248_v52 = vld [vmem:[%s13899_s4 + $0x328] sm:$0xff] }
 0x5a3   :  { %v4133_v7 = vsel %vm4130_vm9, %v4132_v14, %v4128_v31  ;;  %6717 = vrcp.f32 %v11903_v44  ;;  %v4359_v54 = vadd.f32 %v4358_v19, %v4275_v33  ;;  %4696 = vmatpush.msrb.mxu0 %v4465_v12  ;;  %4736 = vmatpush.msrb.mxu2 %v4466_v16  ;;  %v4863_v33 = vld [vmem:[%s13897_s2 + $0xc8] sm:$0xff]  ;;  %v4865_v49 = vld [vmem:[%s13897_s2 + $0xd8] sm:$0xff]  ;;  %v4898_v16 = vld [vmem:[%s13897_s2 + $0x1e0] sm:$0xff] }
 0x5a4   :  { %v6714_v5 = vpop.eup %6713  ;;  %v4426_v56 = vsel %vm11987_vm12, %v11881_v32, %v4422_v2  ;;  %v12107_v2 = vld [vmem:[%s13900_s0 + $0x38] sm:$0xff] }
 0x5a5   :  { %v4140_v26 = vmul.f32 %v6714_v5, %v4133_v7  ;;  %v4393_v4 = vadd.f32 %v4385_v37, %v4359_v54  ;;  %v4431_v5 = vsel %vm4428_vm15, %v4430_v28, %v4426_v56  ;;  %v4854_v56 = vld [vmem:[%s13897_s2 + $0x80] sm:$0xff]  ;;  %v4852_v28 = vld [vmem:[%s13897_s2 + $0x70] sm:$0xff] }
 0x5a6   :  { %v4454_v3 = vmul.f32 %v4431_v5, %v11277_v0  ;;  %v4849_v0 = vld [vmem:[%s13897_s2 + $0x58] sm:$0xff]  ;;  %v4840_v5 = vld [vmem:[%s13897_s2 + $0x10] sm:$0xff] }
 0x5a7   :  { %4637 = vmatmul.f32.vlgmr.msra.gmra.mxu1 %v4140_v26  ;;  %4677 = vmatmul.f32.vlgmr.msra.gmra.mxu3 %v4140_v26 }
 0x5a8   :  { %4922 = vmatpush.msra.mxu1 %v4899_v1  ;;  %4962 = vmatpush.msra.mxu3 %v4901_v47  ;;  %v6716_v48 = vpop.eup %6715 }
 0x5a9   :  { %v11923_v13 = vadd.f32 1.0, %v6716_v48  ;;  %v11959_v36 = vpop.eup %6717  ;;  %v4449_v48 = vand.u32 2147483648, %v11903_v44 }
 0x5aa   :  { %4923 = vmatpush.msra.mxu1 %v4895_v8  ;;  %4963 = vmatpush.msra.mxu3 %v4897_v63  ;;  %v4439_v9 = vmul.f32 %v11959_v36, %v11903_v44  ;;  %v4853_v8 = vld [vmem:[%s13897_s2 + $0x78] sm:$0xff]  ;;  %vm4444_vm3 = vweird.f32 %v11959_v36 }
 0x5ab   :  { %6719 = vrcp.f32 %v11923_v13  ;;  %v4410_v24 = vand.u32 2147483648, %v11923_v13  ;;  %v4408_v58 = vand.u32 2147483647, %v11923_v13  ;;  %vm4404_vm14 = vweird.f32 %v11923_v13  ;;  %vm12043_vm5 = vmor %vm4443_vm4, %vm4444_vm3 }
 0x5ac   :  { %4924 = vmatpush.msra.mxu1 %v4891_v62  ;;  %4964 = vmatpush.msra.mxu3 %v4893_v23  ;;  %6721 = vtanh.f32 %v4393_v4  ;;  %v4440_v31 = vsub.f32 1.0, %v4439_v9  ;;  %v4843_v62 = vld [vmem:[%s13897_s2 + $0x28] sm:$0xff]  ;;  %v4845_v23 = vld [vmem:[%s13897_s2 + $0x38] sm:$0xff]  ;;  %v4882_v4 = vld [vmem:[%s13897_s2 + $0x160] sm:$0xff] }
 0x5ad   :  { %v4411_v32 = vor.u32 1.1754944e-38, %v4410_v24  ;;  %vm4409_vm2 = vcmp.eq.f32.partialorder %v4408_v58, 8.507059e+37  ;;  %v4876_v9 = vld [vmem:[%s13897_s2 + $0x130] sm:$0xff] }
 0x5ae   :  { %4925 = vmatpush.msra.mxu1 %v4887_v55  ;;  %4965 = vmatpush.msra.mxu3 %v4889_v39  ;;  %v4441_v1 = vmul.f32 %v11959_v36, %v4440_v31  ;;  %v4836_v55 = vld [vmem:[%s13898_s1 + $0x38] sm:$0xff]  ;;  %v4450_v39 = vor.u32 1.1754944e-38, %v4449_v48  ;;  %v4864_v24 = vld [vmem:[%s13897_s2 + $0xd0] sm:$0xff]  ;;  %v4846_v31 = vld [vmem:[%s13897_s2 + $0x40] sm:$0xff] }
 0x5af   :  { %4717 = vmatmul.f32.vlgmr.msrb.gmra.mxu1 %v4140_v26  ;;  %4757 = vmatmul.f32.vlgmr.msrb.gmra.mxu3 %v4140_v26  ;;  %v4860_v58 = vld [vmem:[%s13897_s2 + $0xb0] sm:$0xff]  ;;  %v5256_v48 = vld [vmem:[%s13899_s4 + $0x368] sm:$0xff] }
 0x5b0   :  { %4926 = vmatpush.msra.mxu1 %v4883_v20  ;;  %4966 = vmatpush.msra.mxu3 %v4885_v29  ;;  %v4442_v17 = vadd.f32 %v11959_v36, %v4441_v1  ;;  %v4830_v20 = vld [vmem:[%s13898_s1 + $0x8] sm:$0xff]  ;;  %v4832_v29 = vld [vmem:[%s13898_s1 + $0x18] sm:$0xff]  ;;  %v5271_v1 = vld [vmem:[%s13899_s4 + $0x3e0] sm:$0xff] }
 0x5b1   :  { %v6720_v38 = vpop.eup %6719 }
 0x5b2   :  { %4927 = vmatpush.msra.mxu1 %v4879_v10  ;;  %4967 = vmatpush.msra.mxu3 %v4881_v42  ;;  %v4400_v60 = vmul.f32 %v6720_v38, %v11923_v13  ;;  %vm4405_vm13 = vweird.f32 %v6720_v38  ;;  %v6722_v26 = vpop.eup %6721  ;;  %v4447_v13 = vand.u32 2147483647, %v11903_v44  ;;  %v4446_v19 = vsel %vm12043_vm5, %v11959_v36, %v4442_v17  ;;  %v4834_v44 = vld [vmem:[%s13898_s1 + $0x28] sm:$0xff]  ;;  %v4894_v10 = vld [vmem:[%s13897_s2 + $0x1c0] sm:$0xff]  ;;  %v4896_v42 = vld [vmem:[%s13897_s2 + $0x1d0] sm:$0xff] }
 0x5b3   :  { %vm4406_vm1 = vmor %vm4404_vm14, %vm4405_vm13  ;;  %v4890_v36 = vld [vmem:[%s13897_s2 + $0x1a0] sm:$0xff] }
 0x5b4   :  { %4928 = vmatpush.msra.mxu1 %v4875_v34  ;;  %4968 = vmatpush.msra.mxu3 %v4877_v59  ;;  %v4401_v22 = vsub.f32 1.0, %v4400_v60  ;;  %vm4448_vm6 = vcmp.eq.f32.partialorder %v4447_v13, 8.507059e+37  ;;  %v4892_v34 = vld [vmem:[%s13897_s2 + $0x1b0] sm:$0xff]  ;;  %v4886_v59 = vld [vmem:[%s13897_s2 + $0x180] sm:$0xff] }
 0x5b5   :  { %v4451_v37 = vsel %vm4448_vm6, %v4450_v39, %v4446_v19  ;;  %v4884_v60 = vld [vmem:[%s13897_s2 + $0x170] sm:$0xff]  ;;  %v5255_v17 = vld [vmem:[%s13899_s4 + $0x360] sm:$0xff] }
 0x5b6   :  { %4929 = vmatpush.msra.mxu1 %v4871_v15  ;;  %4969 = vmatpush.msra.mxu3 %v4873_v41  ;;  %v4402_v46 = vmul.f32 %v6720_v38, %v4401_v22  ;;  %v4878_v15 = vld [vmem:[%s13897_s2 + $0x140] sm:$0xff]  ;;  %v4880_v41 = vld [vmem:[%s13897_s2 + $0x150] sm:$0xff] }
 0x5b7   :  { %v4870_v22 = vld [vmem:[%s13897_s2 + $0x100] sm:$0xff] }
 0x5b8   :  { %4930 = vmatpush.msra.mxu1 %v4867_v51  ;;  %4970 = vmatpush.msra.mxu3 %v4869_v27  ;;  %v4403_v14 = vadd.f32 %v6720_v38, %v4402_v46  ;;  %v4866_v51 = vld [vmem:[%s13897_s2 + $0xe0] sm:$0xff]  ;;  %v4868_v27 = vld [vmem:[%s13897_s2 + $0xf0] sm:$0xff] }
 0x5b9   :  { %v4858_v46 = vld [vmem:[%s13897_s2 + $0xa0] sm:$0xff] }
 0x5ba   :  { %4931 = vmatpush.msra.mxu1 %v4863_v33  ;;  %4971 = vmatpush.msra.mxu3 %v4865_v49  ;;  %v4407_v7 = vsel %vm4406_vm1, %v6720_v38, %v4403_v14  ;;  %v4888_v38 = vld [vmem:[%s13897_s2 + $0x190] sm:$0xff]  ;;  %v4850_v49 = vld [vmem:[%s13897_s2 + $0x60] sm:$0xff] }
 0x5bb   :  { %v4412_v47 = vsel %vm4409_vm2, %v4411_v32, %v4407_v7  ;;  %v4856_v33 = vld [vmem:[%s13897_s2 + $0x90] sm:$0xff]  ;;  %v4838_v32 = vld [vmem:[%s13897_s2] sm:$0xff] }
 0x5bc   :  { %4932 = vmatpush.msra.mxu1 %v4859_v25  ;;  %4972 = vmatpush.msra.mxu3 %v4861_v53  ;;  %v4455_v40 = vmul.f32 %v6722_v26, %v4412_v47  ;;  %v4848_v14 = vld [vmem:[%s13897_s2 + $0x50] sm:$0xff]  ;;  %v4842_v25 = vld [vmem:[%s13897_s2 + $0x20] sm:$0xff]  ;;  %v5272_v47 = vld [vmem:[%s13899_s4 + $0x3e8] sm:$0xff] }
 0x5bd   :  { %v4844_v53 = vld [vmem:[%s13897_s2 + $0x30] sm:$0xff]  ;;  %v4833_v7 = vld [vmem:[%s13898_s1 + $0x20] sm:$0xff] }
 0x5be   :  { %4933 = vmatpush.msra.mxu1 %v4855_v35  ;;  %4973 = vmatpush.msra.mxu3 %v4857_v50  ;;  %v12023_v63 = vadd.f32 %v4455_v40, %v4454_v3  ;;  %v4835_v35 = vld [vmem:[%s13898_s1 + $0x30] sm:$0xff]  ;;  %v4829_v50 = vld [vmem:[%s13898_s1] sm:$0xff]  ;;  %v5268_v40 = vld [vmem:[%s13899_s4 + $0x3c8] sm:$0xff] }
 0x5bf   :  { %v4831_v26 = vld [vmem:[%s13898_s1 + $0x10] sm:$0xff]  ;;  %v5267_v3 = vld [vmem:[%s13899_s4 + $0x3c0] sm:$0xff] }
 0x5c0   :  { %4934 = vmatpush.msra.mxu1 %v4851_v43  ;;  %4974 = vmatpush.msra.mxu3 %v4853_v8  ;;  %6723 = vtanh.f32 %v12023_v63  ;;  %v5263_v43 = vld [vmem:[%s13899_s4 + $0x3a0] sm:$0xff]  ;;  %v5264_v8 = vld [vmem:[%s13899_s4 + $0x3a8] sm:$0xff] }
 0x5c1   :  { %v5247_v13 = vld [vmem:[%s13899_s4 + $0x320] sm:$0xff] }
 0x5c2   :  { %4935 = vmatpush.msra.mxu1 %v4847_v45  ;;  %4975 = vmatpush.msra.mxu3 %v4849_v0  ;;  %v5259_v45 = vld [vmem:[%s13899_s4 + $0x380] sm:$0xff]  ;;  %v5260_v0 = vld [vmem:[%s13899_s4 + $0x388] sm:$0xff] }
 0x5c3   :  { %v5235_v39 = vld [vmem:[%s13899_s4 + $0x2c0] sm:$0xff] }
 0x5c4   :  { %4936 = vmatpush.msra.mxu1 %v4843_v62  ;;  %4976 = vmatpush.msra.mxu3 %v4845_v23  ;;  %v5251_v62 = vld [vmem:[%s13899_s4 + $0x340] sm:$0xff]  ;;  %v5252_v23 = vld [vmem:[%s13899_s4 + $0x348] sm:$0xff] }
 0x5c6   :  { %4937 = vmatpush.msra.mxu1 %v4839_v18  ;;  %4977 = vmatpush.msra.mxu3 %v4841_v30  ;;  %v6724_v54 = vpop.eup %6723  ;;  %v5243_v18 = vld [vmem:[%s13899_s4 + $0x300] sm:$0xff]  ;;  %v5244_v30 = vld [vmem:[%s13899_s4 + $0x308] sm:$0xff] }
 0x5c7   :  { %v12068_v12 = vmul.f32 %v6724_v54, %v4451_v37  ;;  %v5232_v54 = vld [vmem:[%s13899_s4 + $0x2a8] sm:$0xff]  ;;  %v5227_v37 = vld [vmem:[%s13899_s4 + $0x280] sm:$0xff] }
 0x5c8   :  { %5019 = vmatpush.msrb.mxu1 %v4834_v44  ;;  %5059 = vmatpush.msrb.mxu3 %v4836_v55  ;;  %v5239_v44 = vld [vmem:[%s13899_s4 + $0x2e0] sm:$0xff]  ;;  %v5240_v55 = vld [vmem:[%s13899_s4 + $0x2e8] sm:$0xff] }
 0x5c9   :  { %4617 = vmatmul.f32.vlgmr.msra.gmra.mxu0 %v12068_v12  ;;  %4657 = vmatmul.f32.vlgmr.msra.gmra.mxu2 %v12068_v12 }
 0x5ca   :  { %5020 = vmatpush.msrb.mxu1 %v4830_v20  ;;  %5060 = vmatpush.msrb.mxu3 %v4832_v29  ;;  %v5236_v20 = vld [vmem:[%s13899_s4 + $0x2c8] sm:$0xff]  ;;  %v5231_v29 = vld [vmem:[%s13899_s4 + $0x2a0] sm:$0xff] }
 0x5cb   :  { %4902 = vmatpush.msra.mxu0 %v4898_v16  ;;  %4938 = vmatmul.f32.vlgmr.msra.gmra.mxu1 %v12068_v12  ;;  %v12274_v16 = vld [vmem:[%s13902_s5] sm:$0xf] }
 0x5cc   :  { %4942 = vmatpush.msra.mxu2 %v4900_v21  ;;  %4978 = vmatmul.f32.vlgmr.msra.gmra.mxu3 %v12068_v12  ;;  %v5223_v21 = vld [vmem:[%s13899_s4 + $0x260] sm:$0xff] }
 0x5cd   :  { %4903 = vmatpush.msra.mxu0 %v4894_v10  ;;  %5305 = vmatpush.msra.mxu1 %v5271_v1  ;;  %v5224_v10 = vld [vmem:[%s13899_s4 + $0x268] sm:$0xff] }
 0x5ce   :  { %4943 = vmatpush.msra.mxu2 %v4896_v42  ;;  %5345 = vmatpush.msra.mxu3 %v5272_v47  ;;  %v5266_v47 = vld [vmem:[%s13899_s4 + $0x3b8] sm:$0xff] }
 0x5cf   :  { %4904 = vmatpush.msra.mxu0 %v4890_v36  ;;  %5306 = vmatpush.msra.mxu1 %v5267_v3  ;;  %v5207_v36 = vld [vmem:[%s13899_s4 + $0x1e0] sm:$0xff] }
 0x5d0   :  { %4944 = vmatpush.msra.mxu2 %v4892_v34  ;;  %5346 = vmatpush.msra.mxu3 %v5268_v40  ;;  %v5208_v34 = vld [vmem:[%s13899_s4 + $0x1e8] sm:$0xff]  ;;  %v5183_v3 = vld [vmem:[%s13899_s4 + $0x120] sm:$0xff] }
 0x5d1   :  { %4905 = vmatpush.msra.mxu0 %v4886_v59  ;;  %4737 = vmatmul.f32.vlgmr.msrb.gmra.mxu2 %v12068_v12  ;;  %v5184_v40 = vld [vmem:[%s13899_s4 + $0x128] sm:$0xff] }
 0x5d2   :  { %4945 = vmatpush.msra.mxu2 %v4888_v38  ;;  %4697 = vmatmul.f32.vlgmr.msrb.gmra.mxu0 %v12068_v12  ;;  %v4593_v38 = vperm.slane %v12274_v16, 0 }
 0x5d3   :  { %4906 = vmatpush.msra.mxu0 %v4882_v4  ;;  %6506 = vmatmul.msk.f32.vlgmr.msrb.gmra.mxu1 %vm193_vm0, %v12107_v2  ;;  %v5219_v4 = vld [vmem:[%s13899_s4 + $0x240] sm:$0xff] }
 0x5d4   :  { %4946 = vmatpush.msra.mxu2 %v4884_v60  ;;  %6508 = vmatmul.msk.f32.vlgmr.msrb.gmra.mxu3 %vm193_vm0, %v12107_v2  ;;  %v5220_v60 = vld [vmem:[%s13899_s4 + $0x248] sm:$0xff] }
 0x5d5   :  { %4907 = vmatpush.msra.mxu0 %v4878_v15  ;;  %5307 = vmatpush.msra.mxu1 %v5263_v43  ;;  %v5204_v15 = vld [vmem:[%s13899_s4 + $0x1c8] sm:$0xff]  ;;  %v5261_v43 = vld [vmem:[%s13899_s4 + $0x390] sm:$0xff] }
 0x5d6   :  { %4947 = vmatpush.msra.mxu2 %v4880_v41  ;;  %5347 = vmatpush.msra.mxu3 %v5264_v8  ;;  %v5215_v41 = vld [vmem:[%s13899_s4 + $0x220] sm:$0xff] }
 0x5d7   :  { %4908 = vmatpush.msra.mxu0 %v4874_v6  ;;  %5308 = vmatpush.msra.mxu1 %v5259_v45  ;;  %v5216_v6 = vld [vmem:[%s13899_s4 + $0x228] sm:$0xff]  ;;  %v5262_v45 = vld [vmem:[%s13899_s4 + $0x398] sm:$0xff] }
 0x5d8   :  { %4948 = vmatpush.msra.mxu2 %v4876_v9  ;;  %5348 = vmatpush.msra.mxu3 %v5260_v0  ;;  %v5179_v0 = vld [vmem:[%s13899_s4 + $0x100] sm:$0xff] }
 0x5d9   :  { %4909 = vmatpush.msra.mxu0 %v4870_v22  ;;  %5309 = vmatpush.msra.mxu1 %v5255_v17  ;;  %v5199_v22 = vld [vmem:[%s13899_s4 + $0x1a0] sm:$0xff]  ;;  %v5180_v17 = vld [vmem:[%s13899_s4 + $0x108] sm:$0xff] }
 0x5da   :  { %4949 = vmatpush.msra.mxu2 %v4872_v61  ;;  %5349 = vmatpush.msra.mxu3 %v5256_v48  ;;  %v5200_v61 = vld [vmem:[%s13899_s4 + $0x1a8] sm:$0xff]  ;;  %v5257_v48 = vld [vmem:[%s13899_s4 + $0x370] sm:$0xff] }
 0x5db   :  { %4910 = vmatpush.msra.mxu0 %v4866_v51  ;;  %5310 = vmatpush.msra.mxu1 %v5251_v62 }
 0x5dc   :  { %4950 = vmatpush.msra.mxu2 %v4868_v27  ;;  %5350 = vmatpush.msra.mxu3 %v5252_v23  ;;  %v5211_v27 = vld [vmem:[%s13899_s4 + $0x200] sm:$0xff]  ;;  %v5258_v23 = vld [vmem:[%s13899_s4 + $0x378] sm:$0xff] }
 0x5dd   :  { %4911 = vmatpush.msra.mxu0 %v4862_v11  ;;  %5311 = vmatpush.msra.mxu1 %v5247_v13  ;;  %v5212_v11 = vld [vmem:[%s13899_s4 + $0x208] sm:$0xff]  ;;  %v5175_v13 = vld [vmem:[%s13899_s4 + $0xe0] sm:$0xff] }
 0x5de   :  { %4951 = vmatpush.msra.mxu2 %v4864_v24  ;;  %5351 = vmatpush.msra.mxu3 %v5248_v52  ;;  %v5195_v24 = vld [vmem:[%s13899_s4 + $0x180] sm:$0xff]  ;;  %v5176_v52 = vld [vmem:[%s13899_s4 + $0xe8] sm:$0xff] }
 0x5df   :  { %4912 = vmatpush.msra.mxu0 %v4858_v46  ;;  %5312 = vmatpush.msra.mxu1 %v5243_v18  ;;  %v5196_v46 = vld [vmem:[%s13899_s4 + $0x188] sm:$0xff]  ;;  %v5253_v18 = vld [vmem:[%s13899_s4 + $0x350] sm:$0xff] }
 0x5e0   :  { %4952 = vmatpush.msra.mxu2 %v4860_v58  ;;  %5352 = vmatpush.msra.mxu3 %v5244_v30  ;;  %v5273_v58 = vld [vmem:[%s13899_s4 + $0x3f0] sm:$0xff] }
 0x5e1   :  { %4913 = vmatpush.msra.mxu0 %v4854_v56  ;;  %5313 = vmatpush.msra.mxu1 %v5239_v44  ;;  %v4596_v44 = vperm.slane %v12274_v16, 3 }
 0x5e2   :  { %4953 = vmatpush.msra.mxu2 %v4856_v33  ;;  %5353 = vmatpush.msra.mxu3 %v5240_v55  ;;  %v4594_v33 = vperm.slane %v12274_v16, 1  ;;  %v5254_v55 = vld [vmem:[%s13899_s4 + $0x358] sm:$0xff] }
 0x5e3   :  { %4914 = vmatpush.msra.mxu0 %v4850_v49  ;;  %5314 = vmatpush.msra.mxu1 %v5235_v39  ;;  %v5274_v49 = vld [vmem:[%s13899_s4 + $0x3f8] sm:$0xff] }
 0x5e4   :  { %4954 = vmatpush.msra.mxu2 %v4852_v28  ;;  %5354 = vmatpush.msra.mxu3 %v5236_v20 }
 0x5e5   :  { %4915 = vmatpush.msra.mxu0 %v4846_v31  ;;  %5315 = vmatpush.msra.mxu1 %v5231_v29  ;;  %v5191_v31 = vld [vmem:[%s13899_s4 + $0x160] sm:$0xff] }
 0x5e6   :  { %4955 = vmatpush.msra.mxu2 %v4848_v14  ;;  %5355 = vmatpush.msra.mxu3 %v5232_v54  ;;  %v5192_v14 = vld [vmem:[%s13899_s4 + $0x168] sm:$0xff]  ;;  %v5171_v29 = vld [vmem:[%s13899_s4 + $0xc0] sm:$0xff] }
 0x5e7   :  { %4916 = vmatpush.msra.mxu0 %v4842_v25  ;;  %5316 = vmatpush.msra.mxu1 %v5227_v37  ;;  %v5269_v25 = vld [vmem:[%s13899_s4 + $0x3d0] sm:$0xff]  ;;  %v5172_v54 = vld [vmem:[%s13899_s4 + $0xc8] sm:$0xff] }
 0x5e8   :  { %4956 = vmatpush.msra.mxu2 %v4844_v53  ;;  %v5249_v37 = vld [vmem:[%s13899_s4 + $0x330] sm:$0xff] }
 0x5e9   :  { %4917 = vmatpush.msra.mxu0 %v4838_v32  ;;  %5317 = vmatpush.msra.mxu1 %v5223_v21  ;;  %v5270_v32 = vld [vmem:[%s13899_s4 + $0x3d8] sm:$0xff] }
 0x5ea   :  { %4957 = vmatpush.msra.mxu2 %v4840_v5  ;;  %4918 = vmatmul.f32.vlgmr.msra.gmra.mxu0 %v12068_v12 }
 0x5eb   :  { %4958 = vmatmul.f32.vlgmr.msra.gmra.mxu2 %v12068_v12  ;;  %4999 = vmatpush.msrb.mxu0 %v4833_v7  ;;  %v5228_v12 = vld [vmem:[%s13899_s4 + $0x288] sm:$0xff]  ;;  %v5187_v7 = vld [vmem:[%s13899_s4 + $0x140] sm:$0xff] }
 0x5ec   :  { %5039 = vmatpush.msrb.mxu2 %v4835_v35  ;;  %5356 = vmatpush.msra.mxu3 %v5228_v12  ;;  %v5188_v35 = vld [vmem:[%s13899_s4 + $0x148] sm:$0xff] }
 0x5ed   :  { %5000 = vmatpush.msrb.mxu0 %v4829_v50  ;;  %5318 = vmatpush.msra.mxu1 %v5219_v4  ;;  %v5265_v50 = vld [vmem:[%s13899_s4 + $0x3b0] sm:$0xff] }
 0x5ee   :  { %5040 = vmatpush.msrb.mxu2 %v4831_v26  ;;  %5357 = vmatpush.msra.mxu3 %v5224_v10  ;;  %v5250_v10 = vld [vmem:[%s13899_s4 + $0x338] sm:$0xff] }
 0x5ef   :  { %5285 = vmatpush.msra.mxu0 %v5207_v36  ;;  %5319 = vmatpush.msra.mxu1 %v5215_v41  ;;  %v5167_v36 = vld [vmem:[%s13899_s4 + $0xa0] sm:$0xff]  ;;  %v5164_v41 = vld [vmem:[%s13899_s4 + $0x88] sm:$0xff] }
 0x5f0   :  { %5325 = vmatpush.msra.mxu2 %v5208_v34  ;;  %5358 = vmatpush.msra.mxu3 %v5220_v60  ;;  %v5168_v34 = vld [vmem:[%s13899_s4 + $0xa8] sm:$0xff] }
 0x5f1   :  { %5320 = vmatpush.msra.mxu1 %v5211_v27 }
 0x5f2   :  { %6505 = vmatmul.msk.f32.vlgmr.msrb.gmra.mxu0 %vm193_vm0, %v12107_v2  ;;  %5326 = vmatpush.msra.mxu2 %v5204_v15  ;;  %v5163_v15 = vld [vmem:[%s13899_s4 + $0x80] sm:$0xff] }
 0x5f3   :  { %6507 = vmatmul.msk.f32.vlgmr.msrb.gmra.mxu2 %vm193_vm0, %v12107_v2  ;;  %v5203_v2 = vld [vmem:[%s13899_s4 + $0x1c0] sm:$0xff]  ;;  %5359 = vmatpush.msra.mxu3 %v5216_v6  ;;  %v5241_v6 = vld [vmem:[%s13899_s4 + $0x2f0] sm:$0xff] }
 0x5f4   :  { %5286 = vmatpush.msra.mxu0 %v5203_v2  ;;  %5327 = vmatpush.msra.mxu2 %v5200_v61  ;;  %v5246_v2 = vld [vmem:[%s13899_s4 + $0x318] sm:$0xff] }
 0x5f5   :  { %5360 = vmatpush.msra.mxu3 %v5212_v11  ;;  %5385 = vmatpush.msrb.mxu1 %v5273_v58 }
 0x5f6   :  { %5287 = vmatpush.msra.mxu0 %v5199_v22  ;;  %5328 = vmatpush.msra.mxu2 %v5196_v46  ;;  %v4595_v22 = vperm.slane %v12274_v16, 2  ;;  %v5160_v16 = vld [vmem:[%s13899_s4 + $0x68] sm:$0xff]  ;;  %v5237_v46 = vld [vmem:[%s13899_s4 + $0x2d0] sm:$0xff] }
 0x5f7   :  { %5425 = vmatpush.msrb.mxu3 %v5274_v49  ;;  %5386 = vmatpush.msrb.mxu1 %v5269_v25 }
 0x5f8   :  { %5288 = vmatpush.msra.mxu0 %v5195_v24  ;;  %5329 = vmatpush.msra.mxu2 %v5192_v14  ;;  %v5159_v24 = vld [vmem:[%s13899_s4 + $0x60] sm:$0xff]  ;;  %v5233_v14 = vld [vmem:[%s13899_s4 + $0x2b0] sm:$0xff] }
 0x5f9   :  { %5426 = vmatpush.msrb.mxu3 %v5270_v32  ;;  %5387 = vmatpush.msrb.mxu1 %v5265_v50  ;;  %v5234_v32 = vld [vmem:[%s13899_s4 + $0x2b8] sm:$0xff] }
 0x5fa   :  { %5289 = vmatpush.msra.mxu0 %v5191_v31  ;;  %5330 = vmatpush.msra.mxu2 %v5188_v35  ;;  %v5156_v31 = vld [vmem:[%s13899_s4 + $0x48] sm:$0xff] }
 0x5fb   :  { %5427 = vmatpush.msrb.mxu3 %v5266_v47  ;;  %5388 = vmatpush.msrb.mxu1 %v5261_v43  ;;  %v5230_v47 = vld [vmem:[%s13899_s4 + $0x298] sm:$0xff]  ;;  %v5225_v43 = vld [vmem:[%s13899_s4 + $0x270] sm:$0xff] }
 0x5fc   :  { %5290 = vmatpush.msra.mxu0 %v5187_v7  ;;  %5331 = vmatpush.msra.mxu2 %v5184_v40  ;;  %v5152_v7 = vld [vmem:[%s13899_s4 + $0x28] sm:$0xff] }
 0x5fd   :  { %5428 = vmatpush.msrb.mxu3 %v5262_v45  ;;  %5389 = vmatpush.msrb.mxu1 %v5257_v48  ;;  %v5148_v40 = vld [vmem:[%s13899_s4 + $0x8] sm:$0xff]  ;;  %v5210_v48 = vld [vmem:[%s13899_s4 + $0x1f8] sm:$0xff] }
 0x5fe   :  { %5291 = vmatpush.msra.mxu0 %v5183_v3  ;;  %5332 = vmatpush.msra.mxu2 %v5180_v17  ;;  %v5147_v3 = vld [vmem:[%s13899_s4] sm:$0xff]  ;;  %v5209_v17 = vld [vmem:[%s13899_s4 + $0x1f0] sm:$0xff] }
 0x5ff   :  { %5429 = vmatpush.msrb.mxu3 %v5258_v23  ;;  %5390 = vmatpush.msrb.mxu1 %v5253_v18 }
 0x600   :  { %5292 = vmatpush.msra.mxu0 %v5179_v0  ;;  %5333 = vmatpush.msra.mxu2 %v5176_v52  ;;  %v5226_v0 = vld [vmem:[%s13899_s4 + $0x278] sm:$0xff] }
 0x601   :  { %5430 = vmatpush.msrb.mxu3 %v5254_v55  ;;  %5391 = vmatpush.msrb.mxu1 %v5249_v37  ;;  %v5222_v52 = vld [vmem:[%s13899_s4 + $0x258] sm:$0xff]  ;;  %v5205_v55 = vld [vmem:[%s13899_s4 + $0x1d0] sm:$0xff] }
 0x602   :  { %5293 = vmatpush.msra.mxu0 %v5175_v13  ;;  %5334 = vmatpush.msra.mxu2 %v5172_v54  ;;  %v5221_v13 = vld [vmem:[%s13899_s4 + $0x250] sm:$0xff] }
 0x603   :  { %5431 = vmatpush.msrb.mxu3 %v5250_v10  ;;  %v5217_v37 = vld [vmem:[%s13899_s4 + $0x230] sm:$0xff] }
 0x604   :  { %5294 = vmatpush.msra.mxu0 %v5171_v29  ;;  %5335 = vmatpush.msra.mxu2 %v5168_v34  ;;  %v5202_v34 = vld [vmem:[%s13899_s4 + $0x1b8] sm:$0xff] }
 0x605   :  { %5432 = vmatpush.msrb.mxu3 %v5246_v2  ;;  %v5214_v2 = vld [vmem:[%s13899_s4 + $0x218] sm:$0xff] }
 0x606   :  { %5295 = vmatpush.msra.mxu0 %v5167_v36  ;;  %5336 = vmatpush.msra.mxu2 %v5164_v41  ;;  %v5201_v36 = vld [vmem:[%s13899_s4 + $0x1b0] sm:$0xff] }
 0x608   :  { %5296 = vmatpush.msra.mxu0 %v5163_v15  ;;  %5337 = vmatpush.msra.mxu2 %v5160_v16  ;;  %v5194_v16 = vld [vmem:[%s13899_s4 + $0x178] sm:$0xff] }
 0x60a   :  { %5297 = vmatpush.msra.mxu0 %v5159_v24  ;;  %5338 = vmatpush.msra.mxu2 %v5156_v31  ;;  %v5193_v24 = vld [vmem:[%s13899_s4 + $0x170] sm:$0xff] }
 0x60c   :  { %5339 = vmatpush.msra.mxu2 %v5152_v7  ;;  %v5185_v7 = vld [vmem:[%s13899_s4 + $0x130] sm:$0xff] }
 0x60e   :  { %5340 = vmatpush.msra.mxu2 %v5148_v40  ;;  %v5182_v40 = vld [vmem:[%s13899_s4 + $0x118] sm:$0xff] }
 0x610   :  { %5405 = vmatpush.msrb.mxu2 %v5210_v48 }
 0x624   :  { %v4638_v19 = vpop.f32.mrf.mxu1 }
 0x62a   :  { %v4678_v59 = vpop.f32.mrf.mxu3 }
 0x62c   :  { %v12282_v42 = vpop.f32.mrf.mxu1 }
 0x632   :  { %v12357_v26 = vpop.f32.mrf.mxu3 }
 0x646   :  { %v4618_v9 = vpop.f32.mrf.mxu0 }
 0x647   :  { %v4619_v51 = vadd.f32 %v4618_v9, %v4593_v38 }
 0x648   :  { %v12334_v28 = vpop.f32.mrf.mxu1 }
 0x649   :  { %v4639_v56 = vadd.f32 %v4638_v19, %v4619_v51  ;;  %v12398_v19 = vld [vmem:[%s13901_s3] sm:$0xf]  ;;  %v5242_v51 = vld [vmem:[%s13899_s4 + $0x2f8] sm:$0xff] }
 0x64a   :  { %v5068_v4 = vperm.slane %v12398_v19, 1  ;;  %5433 = vmatpush.msrb.mxu3 %v5242_v51  ;;  %v5070_v23 = vperm.slane %v12398_v19, 3 }
 0x64b   :  { %v6501_v53 = vmul.f32 -1.442695, %v4639_v56 }
 0x64c   :  { %v4658_v5 = vpop.f32.mrf.mxu2 }
 0x64d   :  { %6725 = vpow2.f32 %v6501_v53  ;;  %v4659_v1 = vadd.f32 %v4658_v5, %v4594_v33  ;;  %v5238_v33 = vld [vmem:[%s13899_s4 + $0x2d8] sm:$0xff]  ;;  %v5151_v5 = vld [vmem:[%s13899_s4 + $0x20] sm:$0xff] }
 0x64e   :  { %5434 = vmatpush.msrb.mxu3 %v5238_v33 }
 0x64f   :  { %v4679_v8 = vadd.f32 %v4678_v59, %v4659_v1  ;;  %v12415_v12 = vpop.f32.mrf.mxu3  ;;  %v5245_v59 = vld [vmem:[%s13899_s4 + $0x310] sm:$0xff]  ;;  %v4698_v11 = vpop.f32.mrf.mxu0 }
 0x650   :  { %v5022_v20 = vpop.f32.mrf.mxu1  ;;  %5392 = vmatpush.msrb.mxu1 %v5245_v59  ;;  %v4699_v53 = vadd.f32 %v4698_v11, %v4595_v22  ;;  %5435 = vmatpush.msrb.mxu3 %v5234_v32  ;;  %v5229_v1 = vld [vmem:[%s13899_s4 + $0x290] sm:$0xff]  ;;  %v5198_v22 = vld [vmem:[%s13899_s4 + $0x198] sm:$0xff] }
 0x651   :  { %v6502_v62 = vmul.f32 -1.442695, %v4679_v8  ;;  %v5023_v38 = vadd.f32 %v5022_v20, %v12334_v28  ;;  %v5155_v28 = vld [vmem:[%s13899_s4 + $0x40] sm:$0xff]  ;;  %v5206_v20 = vld [vmem:[%s13899_s4 + $0x1d8] sm:$0xff] }
 0x652   :  { %5393 = vmatpush.msrb.mxu1 %v5241_v6  ;;  %5298 = vmatpush.msra.mxu0 %v5155_v28  ;;  %v4719_v8 = vadd.f32 %v12282_v42, %v4699_v53  ;;  %v5190_v28 = vld [vmem:[%s13899_s4 + $0x158] sm:$0xff] }
 0x653   :  { %v6726_v30 = vpop.eup %6725  ;;  %6727 = vpow2.f32 %v6502_v62  ;;  %v5076_v58 = vadd.f32 %v5068_v4, %v5023_v38  ;;  %5436 = vmatpush.msrb.mxu3 %v5230_v47  ;;  %5406 = vmatpush.msrb.mxu2 %v5206_v20  ;;  %v5170_v20 = vld [vmem:[%s13899_s4 + $0xb8] sm:$0xff] }
 0x654   :  { %v12404_v39 = vadd.f32 1.0, %v6726_v30  ;;  %v4738_v21 = vpop.f32.mrf.mxu2  ;;  %5394 = vmatpush.msrb.mxu1 %v5237_v46  ;;  %5299 = vmatpush.msra.mxu0 %v5151_v5 }
 0x655   :  { %v4739_v60 = vadd.f32 %v4738_v21, %v4596_v44  ;;  %v6510_v50 = vmul.f32 -1.442695, %v5076_v58  ;;  %5437 = vmatpush.msrb.mxu3 %v5226_v0  ;;  %5407 = vmatpush.msrb.mxu2 %v5202_v34  ;;  %v5178_v0 = vld [vmem:[%s13899_s4 + $0xf8] sm:$0xff] }
 0x656   :  { %6729 = vrcp.f32 %v12404_v39  ;;  %5395 = vmatpush.msrb.mxu1 %v5233_v14  ;;  %5300 = vmatpush.msra.mxu0 %v5147_v3  ;;  %v4776_v29 = vand.u32 2147483648, %v12404_v39  ;;  %vm4770_vm7 = vweird.f32 %v12404_v39  ;;  %v4774_v10 = vand.u32 2147483647, %v12404_v39  ;;  %v5181_v3 = vld [vmem:[%s13899_s4 + $0x110] sm:$0xff]  ;;  %v5162_v34 = vld [vmem:[%s13899_s4 + $0x78] sm:$0xff] }
 0x657   :  { %v4759_v61 = vadd.f32 %v12357_v26, %v4739_v60  ;;  %v5062_v26 = vpop.f32.mrf.mxu3  ;;  %5438 = vmatpush.msrb.mxu3 %v5222_v52  ;;  %v5213_v60 = vld [vmem:[%s13899_s4 + $0x210] sm:$0xff]  ;;  %5408 = vmatpush.msrb.mxu2 %v5198_v22 }
 0x658   :  { %5396 = vmatpush.msrb.mxu1 %v5229_v1  ;;  %v5063_v42 = vadd.f32 %v5062_v26, %v12415_v12  ;;  %5365 = vmatpush.msrb.mxu0 %v5209_v17  ;;  %v5218_v12 = vld [vmem:[%s13899_s4 + $0x238] sm:$0xff]  ;;  %vm4775_vm11 = vcmp.eq.f32.partialorder %v4774_v10, 8.507059e+37  ;;  %v5067_v26 = vperm.slane %v12398_v19, 0  ;;  %v5149_v22 = vld [vmem:[%s13899_s4 + $0x10] sm:$0xff] }
 0x659   :  { %v6728_v9 = vpop.eup %6727  ;;  %v6503_v56 = vmul.f32 -1.442695, %v4759_v61  ;;  %5439 = vmatpush.msrb.mxu3 %v5218_v12  ;;  %v4777_v61 = vor.u32 1.1754944e-38, %v4776_v29  ;;  %5409 = vmatpush.msrb.mxu2 %v5194_v16  ;;  %v5165_v12 = vld [vmem:[%s13899_s4 + $0x90] sm:$0xff] }
 0x65a   :  { %v12449_v27 = vadd.f32 1.0, %v6728_v9  ;;  %5397 = vmatpush.msrb.mxu1 %v5225_v43  ;;  %5366 = vmatpush.msrb.mxu0 %v5205_v55  ;;  %v5197_v9 = vld [vmem:[%s13899_s4 + $0x190] sm:$0xff] }
 0x65b   :  { %5440 = vmatpush.msrb.mxu3 %v5214_v2  ;;  %5410 = vmatpush.msrb.mxu2 %v5190_v28  ;;  %v5169_v55 = vld [vmem:[%s13899_s4 + $0xb0] sm:$0xff] }
 0x65c   :  { %v12463_v49 = vpop.eup %6729  ;;  %6731 = vrcp.f32 %v12449_v27  ;;  %5398 = vmatpush.msrb.mxu1 %v5221_v13  ;;  %v4795_v59 = vand.u32 2147483648, %v12449_v27  ;;  %v4793_v6 = vand.u32 2147483647, %v12449_v27  ;;  %5367 = vmatpush.msrb.mxu0 %v5201_v36  ;;  %vm4789_vm10 = vweird.f32 %v12449_v27  ;;  %v5161_v36 = vld [vmem:[%s13899_s4 + $0x70] sm:$0xff] }
 0x65d   :  { %v4766_v25 = vmul.f32 %v12463_v49, %v12404_v39  ;;  %6733 = vpow2.f32 %v6503_v56  ;;  %vm4771_vm0 = vweird.f32 %v12463_v49  ;;  %v5078_v39 = vadd.f32 %v5070_v23, %v5063_v42  ;;  %v5173_v42 = vld [vmem:[%s13899_s4 + $0xd0] sm:$0xff]  ;;  %v5174_v23 = vld [vmem:[%s13899_s4 + $0xd8] sm:$0xff] }
 0x65e   :  { %6735 = vpow2.f32 %v6510_v50  ;;  %vm12552_vm8 = vmor %vm4770_vm7, %vm4771_vm0  ;;  %5399 = vmatpush.msrb.mxu1 %v5217_v37  ;;  %5368 = vmatpush.msrb.mxu0 %v5197_v9  ;;  %v4796_v46 = vor.u32 1.1754944e-38, %v4795_v59  ;;  %vm4794_vm13 = vcmp.eq.f32.partialorder %v4793_v6, 8.507059e+37  ;;  %v5153_v2 = vld [vmem:[%s13899_s4 + $0x30] sm:$0xff] }
 0x65f   :  { %v4767_v35 = vsub.f32 1.0, %v4766_v25  ;;  %6737 = vtanh.f32 %v4719_v8  ;;  %v6511_v33 = vmul.f32 -1.442695, %v5078_v39  ;;  %v5157_v39 = vld [vmem:[%s13899_s4 + $0x50] sm:$0xff] }
 0x660   :  { %5400 = vmatpush.msrb.mxu1 %v5213_v60  ;;  %5369 = vmatpush.msrb.mxu0 %v5193_v24 }
 0x661   :  { %v4768_v45 = vmul.f32 %v12463_v49, %v4767_v35  ;;  %v5186_v35 = vld [vmem:[%s13899_s4 + $0x138] sm:$0xff] }
 0x662   :  { %v12512_v62 = vpop.eup %6731  ;;  %5411 = vmatpush.msrb.mxu2 %v5186_v35 }
 0x663   :  { %v6734_v18 = vpop.eup %6733  ;;  %v4785_v30 = vmul.f32 %v12512_v62, %v12449_v27  ;;  %v4769_v44 = vadd.f32 %v12463_v49, %v4768_v45  ;;  %vm4790_vm9 = vweird.f32 %v12512_v62  ;;  %v5177_v45 = vld [vmem:[%s13899_s4 + $0xf0] sm:$0xff] }
 0x664   :  { %v12533_v54 = vadd.f32 1.0, %v6734_v18  ;;  %v6736_v51 = vpop.eup %6735  ;;  %vm4791_vm12 = vmor %vm4789_vm10, %vm4790_vm9  ;;  %5412 = vmatpush.msrb.mxu2 %v5182_v40 }
 0x665   :  { %v4786_v21 = vsub.f32 1.0, %v4785_v30  ;;  %v4773_v41 = vsel %vm12552_vm8, %v12463_v49, %v4769_v44  ;;  %v6738_v56 = vpop.eup %6737  ;;  %v5189_v49 = vld [vmem:[%s13899_s4 + $0x150] sm:$0xff]  ;;  %v12592_v25 = vadd.f32 1.0, %v6736_v51 }
 0x666   :  { %6739 = vrcp.f32 %v12533_v54  ;;  %v4778_v58 = vsel %vm4775_vm11, %v4777_v61, %v4773_v41  ;;  %5370 = vmatpush.msrb.mxu0 %v5189_v49  ;;  %v4815_v8 = vand.u32 2147483648, %v12533_v54  ;;  %v4813_v48 = vand.u32 2147483647, %v12533_v54  ;;  %5413 = vmatpush.msrb.mxu2 %v5178_v0  ;;  %v5150_v61 = vld [vmem:[%s13899_s4 + $0x18] sm:$0xff] }
 0x667   :  { %v4919_v4 = vpop.f32.mrf.mxu0  ;;  %v4787_v15 = vmul.f32 %v12512_v62, %v4786_v21  ;;  %v4821_v32 = vmul.f32 %v6738_v56, %v4778_v58  ;;  %6741 = vpow2.f32 %v6511_v33  ;;  %vm4809_vm15 = vweird.f32 %v12533_v54  ;;  %v5166_v21 = vld [vmem:[%s13899_s4 + $0x98] sm:$0xff] }
 0x668   :  { %5371 = vmatpush.msrb.mxu0 %v5185_v7  ;;  %6743 = vrcp.f32 %v12592_v25  ;;  %v4816_v44 = vor.u32 1.1754944e-38, %v4815_v8  ;;  %5414 = vmatpush.msrb.mxu2 %v5174_v23  ;;  %vm4814_vm2 = vcmp.eq.f32.partialorder %v4813_v48, 8.507059e+37  ;;  %v5113_v33 = vand.u32 2147483648, %v12592_v25 }
 0x669   :  { %v4788_v11 = vadd.f32 %v12512_v62, %v4787_v15  ;;  %v5154_v15 = vld [vmem:[%s13899_s4 + $0x38] sm:$0xff]  ;;  %vm5107_vm4 = vweird.f32 %v12592_v25  ;;  %v5111_v28 = vand.u32 2147483647, %v12592_v25 }
 0x66a   :  { %5372 = vmatpush.msrb.mxu0 %v5181_v3  ;;  %5415 = vmatpush.msrb.mxu2 %v5170_v20  ;;  %v5609_v20 = vld [vmem:[%s13903_s6 + $0x300] sm:$0xff] }
 0x66b   :  { %v4792_v27 = vsel %vm4791_vm12, %v12512_v62, %v4788_v11  ;;  %v5069_v11 = vperm.slane %v12398_v19, 2  ;;  %vm5112_vm7 = vcmp.eq.f32.partialorder %v5111_v28, 8.507059e+37  ;;  %v5611_v28 = vld [vmem:[%s13903_s6 + $0x310] sm:$0xff] }
 0x66c   :  { %v6740_v31 = vpop.eup %6739  ;;  %v4797_v14 = vsel %vm4794_vm13, %v4796_v46, %v4792_v27  ;;  %5373 = vmatpush.msrb.mxu0 %v5177_v45  ;;  %5416 = vmatpush.msrb.mxu2 %v5166_v21  ;;  %v5594_v21 = vld [vmem:[%s13903_s6 + $0x288] sm:$0xff] }
 0x66d   :  { %v4820_v53 = vmul.f32 %v4797_v14, %v11849_v57  ;;  %v4805_v5 = vmul.f32 %v6740_v31, %v12533_v54  ;;  %vm4810_vm14 = vweird.f32 %v6740_v31  ;;  %v6742_v18 = vpop.eup %6741 }
 0x66e   :  { %v4959_v13 = vpop.f32.mrf.mxu2  ;;  %vm4811_vm1 = vmor %vm4809_vm15, %vm4810_vm14  ;;  %5374 = vmatpush.msrb.mxu0 %v5173_v42  ;;  %v12635_v29 = vpop.eup %6743  ;;  %v12651_v38 = vadd.f32 1.0, %v6742_v18  ;;  %5417 = vmatpush.msrb.mxu2 %v5162_v34  ;;  %v5625_v18 = vld [vmem:[%s13903_s6 + $0x380] sm:$0xff] }
 0x66f   :  { %v5002_v50 = vpop.f32.mrf.mxu0  ;;  %v12603_v1 = vadd.f32 %v4821_v32, %v4820_v53  ;;  %v4806_v47 = vsub.f32 1.0, %v4805_v5  ;;  %v5103_v59 = vmul.f32 %v12635_v29, %v12592_v25  ;;  %vm5108_vm3 = vweird.f32 %v12635_v29  ;;  %v5577_v34 = vld [vmem:[%s13903_s6 + $0x200] sm:$0xff] }
 0x670   :  { %v5003_v57 = vadd.f32 %v5002_v50, %v4919_v4  ;;  %5375 = vmatpush.msrb.mxu0 %v5169_v55  ;;  %v5158_v4 = vld [vmem:[%s13899_s4 + $0x58] sm:$0xff]  ;;  %vm5109_vm5 = vmor %vm5107_vm4, %vm5108_vm3  ;;  %v5114_v5 = vor.u32 1.1754944e-38, %v5113_v33  ;;  %v5133_v0 = vand.u32 2147483648, %v12651_v38  ;;  %vm5127_vm11 = vweird.f32 %v12651_v38  ;;  %v5618_v55 = vld [vmem:[%s13903_s6 + $0x348] sm:$0xff] }
 0x671   :  { %6745 = vtanh.f32 %v12603_v1  ;;  %v4807_v43 = vmul.f32 %v6740_v31, %v4806_v47  ;;  %5418 = vmatpush.msrb.mxu2 %v5158_v4  ;;  %v5104_v6 = vsub.f32 1.0, %v5103_v59  ;;  %v5578_v59 = vld [vmem:[%s13903_s6 + $0x208] sm:$0xff]  ;;  %v5561_v4 = vld [vmem:[%s13903_s6 + $0x180] sm:$0xff]  ;;  %v5628_v33 = vld [vmem:[%s13903_s6 + $0x398] sm:$0xff] }
 0x672   :  { %v5075_v17 = vadd.f32 %v5067_v26, %v5003_v57  ;;  %5376 = vmatpush.msrb.mxu0 %v5165_v12  ;;  %v5593_v12 = vld [vmem:[%s13903_s6 + $0x280] sm:$0xff] }
 0x673   :  { %v4808_v62 = vadd.f32 %v6740_v31, %v4807_v43  ;;  %5419 = vmatpush.msrb.mxu2 %v5154_v15  ;;  %v5105_v24 = vmul.f32 %v12635_v29, %v5104_v6  ;;  %v5554_v15 = vld [vmem:[%s13903_s6 + $0x148] sm:$0xff] }
 0x674   :  { %v6509_v52 = vmul.f32 -1.442695, %v5075_v17  ;;  %5377 = vmatpush.msrb.mxu0 %v5161_v36  ;;  %v5131_v17 = vand.u32 2147483647, %v12651_v38  ;;  %v5586_v36 = vld [vmem:[%s13903_s6 + $0x248] sm:$0xff] }
 0x675   :  { %v4812_v30 = vsel %vm4811_vm1, %v6740_v31, %v4808_v62  ;;  %5420 = vmatpush.msrb.mxu2 %v5150_v61  ;;  %v5106_v27 = vadd.f32 %v12635_v29, %v5105_v24  ;;  %v5134_v62 = vor.u32 1.1754944e-38, %v5133_v0  ;;  %v5546_v6 = vld [vmem:[%s13903_s6 + $0x108] sm:$0xff]  ;;  %v5529_v61 = vld [vmem:[%s13903_s6 + $0x80] sm:$0xff]  ;;  %v5539_v0 = vld [vmem:[%s13903_s6 + $0xd0] sm:$0xff] }
 0x676   :  { %6747 = vpow2.f32 %v6509_v52  ;;  %v4817_v37 = vsel %vm4814_vm2, %v4816_v44, %v4812_v30  ;;  %5378 = vmatpush.msrb.mxu0 %v5157_v39  ;;  %v5042_v9 = vpop.f32.mrf.mxu2  ;;  %vm5132_vm13 = vcmp.eq.f32.partialorder %v5131_v17, 8.507059e+37  ;;  %v5634_v52 = vld [vmem:[%s13903_s6 + $0x3c8] sm:$0xff]  ;;  %v5617_v44 = vld [vmem:[%s13903_s6 + $0x340] sm:$0xff]  ;;  %v5540_v17 = vld [vmem:[%s13903_s6 + $0xd8] sm:$0xff] }
 0x677   :  { %v6746_v54 = vpop.eup %6745  ;;  %6749 = vrcp.f32 %v12651_v38  ;;  %v5043_v51 = vadd.f32 %v5042_v9, %v4959_v13  ;;  %v5110_v32 = vsel %vm5109_vm5, %v12635_v29, %v5106_v27  ;;  %v5626_v30 = vld [vmem:[%s13903_s6 + $0x388] sm:$0xff]  ;;  %v5537_v9 = vld [vmem:[%s13903_s6 + $0xc0] sm:$0xff]  ;;  %v5627_v27 = vld [vmem:[%s13903_s6 + $0x390] sm:$0xff] }
 0x678   :  { %v4824_v10 = vmul.f32 %v6746_v54, %v4817_v37  ;;  %5379 = vmatpush.msrb.mxu0 %v5153_v2  ;;  %v5115_v26 = vsel %vm5112_vm7, %v5114_v5, %v5110_v32  ;;  %v5610_v29 = vld [vmem:[%s13903_s6 + $0x308] sm:$0xff]  ;;  %v5601_v54 = vld [vmem:[%s13903_s6 + $0x2c0] sm:$0xff]  ;;  %v5595_v32 = vld [vmem:[%s13903_s6 + $0x290] sm:$0xff] }
 0x679   :  { %v5077_v58 = vadd.f32 %v5069_v11, %v5043_v51  ;;  %v5138_v40 = vmul.f32 %v5115_v26, %v12023_v63  ;;  %v5633_v63 = vld [vmem:[%s13903_s6 + $0x3c0] sm:$0xff]  ;;  %v5602_v37 = vld [vmem:[%s13903_s6 + $0x2c8] sm:$0xff]  ;;  %v5596_v5 = vld [vmem:[%s13903_s6 + $0x298] sm:$0xff] }
 0x67a   :  { %5321 = vmatmul.f32.vlgmr.msra.gmra.mxu1 %v4824_v10  ;;  %5361 = vmatmul.f32.vlgmr.msra.gmra.mxu3 %v4824_v10  ;;  %v5570_v39 = vld [vmem:[%s13903_s6 + $0x1c8] sm:$0xff]  ;;  %v5553_v2 = vld [vmem:[%s13903_s6 + $0x140] sm:$0xff]  ;;  %v5580_v26 = vld [vmem:[%s13903_s6 + $0x218] sm:$0xff] }
 0x67b   :  { %5380 = vmatpush.msrb.mxu0 %v5149_v22  ;;  %v5538_v22 = vld [vmem:[%s13903_s6 + $0xc8] sm:$0xff]  ;;  %v5521_v11 = vld [vmem:[%s13903_s6 + $0x40] sm:$0xff] }
 0x67c   :  { %v6748_v60 = vpop.eup %6747  ;;  %v5530_v51 = vld [vmem:[%s13903_s6 + $0x88] sm:$0xff] }
 0x67d   :  { %v5082_v41 = vadd.f32 1.0, %v6748_v60  ;;  %v6750_v16 = vpop.eup %6749  ;;  %v5562_v60 = vld [vmem:[%s13903_s6 + $0x188] sm:$0xff] }
 0x67e   :  { %v5123_v49 = vmul.f32 %v6750_v16, %v12651_v38  ;;  %vm5128_vm10 = vweird.f32 %v6750_v16  ;;  %v5569_v38 = vld [vmem:[%s13903_s6 + $0x1c0] sm:$0xff]  ;;  %v5522_v24 = vld [vmem:[%s13903_s6 + $0x48] sm:$0xff] }
 0x67f   :  { %6751 = vrcp.f32 %v5082_v41  ;;  %v5094_v31 = vand.u32 2147483648, %v5082_v41  ;;  %v5092_v53 = vand.u32 2147483647, %v5082_v41  ;;  %vm5088_vm0 = vweird.f32 %v5082_v41  ;;  %vm5129_vm12 = vmor %vm5127_vm11, %vm5128_vm10 }
 0x680   :  { %6753 = vtanh.f32 %v5077_v58  ;;  %v5124_v7 = vsub.f32 1.0, %v5123_v49  ;;  %v5635_v58 = vld [vmem:[%s13903_s6 + $0x3d0] sm:$0xff] }
 0x681   :  { %v5095_v50 = vor.u32 1.1754944e-38, %v5094_v31  ;;  %vm5093_vm9 = vcmp.eq.f32.partialorder %v5092_v53, 8.507059e+37  ;;  %v5619_v49 = vld [vmem:[%s13903_s6 + $0x350] sm:$0xff]  ;;  %v5612_v31 = vld [vmem:[%s13903_s6 + $0x318] sm:$0xff] }
 0x682   :  { %5401 = vmatmul.f32.vlgmr.msrb.gmra.mxu1 %v4824_v10  ;;  %5441 = vmatmul.f32.vlgmr.msrb.gmra.mxu3 %v4824_v10  ;;  %v5125_v25 = vmul.f32 %v6750_v16, %v5124_v7  ;;  %v5585_v10 = vld [vmem:[%s13903_s6 + $0x240] sm:$0xff]  ;;  %v5604_v53 = vld [vmem:[%s13903_s6 + $0x2d8] sm:$0xff]  ;;  %v5587_v7 = vld [vmem:[%s13903_s6 + $0x250] sm:$0xff] }
 0x684   :  { %v5126_v45 = vadd.f32 %v6750_v16, %v5125_v25  ;;  %v5563_v25 = vld [vmem:[%s13903_s6 + $0x190] sm:$0xff] }
 0x685   :  { %v6752_v46 = vpop.eup %6751 }
 0x686   :  { %v5084_v56 = vmul.f32 %v6752_v46, %v5082_v41  ;;  %vm5089_vm6 = vweird.f32 %v6752_v46  ;;  %v6754_v57 = vpop.eup %6753  ;;  %v5130_v48 = vsel %vm5129_vm12, %v6750_v16, %v5126_v45  ;;  %v5545_v41 = vld [vmem:[%s13903_s6 + $0x100] sm:$0xff]  ;;  %v5548_v45 = vld [vmem:[%s13903_s6 + $0x118] sm:$0xff] }
 0x687   :  { %vm5090_vm8 = vmor %vm5088_vm0, %vm5089_vm6  ;;  %v5135_v23 = vsel %vm5132_vm13, %v5134_v62, %v5130_v48  ;;  %v5513_v16 = vld [vmem:[%s13903_s6] sm:$0xff]  ;;  %v5531_v48 = vld [vmem:[%s13903_s6 + $0x90] sm:$0xff] }
 0x688   :  { %v5085_v19 = vsub.f32 1.0, %v5084_v56  ;;  %v5636_v56 = vld [vmem:[%s13903_s6 + $0x3d8] sm:$0xff] }
 0x689   :  { %v5532_v62 = vld [vmem:[%s13903_s6 + $0x98] sm:$0xff] }
 0x68a   :  { %v5086_v14 = vmul.f32 %v6752_v46, %v5085_v19  ;;  %v5620_v19 = vld [vmem:[%s13903_s6 + $0x358] sm:$0xff] }
 0x68c   :  { %v5087_v35 = vadd.f32 %v6752_v46, %v5086_v14  ;;  %v5603_v14 = vld [vmem:[%s13903_s6 + $0x2d0] sm:$0xff] }
 0x68e   :  { %v5091_v47 = vsel %vm5090_vm8, %v6752_v46, %v5087_v35  ;;  %v5514_v46 = vld [vmem:[%s13903_s6 + $0x8] sm:$0xff]  ;;  %v5588_v35 = vld [vmem:[%s13903_s6 + $0x258] sm:$0xff] }
 0x68f   :  { %v5096_v3 = vsel %vm5093_vm9, %v5095_v50, %v5091_v47  ;;  %v5579_v50 = vld [vmem:[%s13903_s6 + $0x210] sm:$0xff] }
 0x690   :  { %v5139_v43 = vmul.f32 %v6754_v57, %v5096_v3  ;;  %v5571_v47 = vld [vmem:[%s13903_s6 + $0x1d0] sm:$0xff]  ;;  %v5572_v57 = vld [vmem:[%s13903_s6 + $0x1d8] sm:$0xff] }
 0x691   :  { %v5564_v3 = vld [vmem:[%s13903_s6 + $0x198] sm:$0xff] }
 0x692   :  { %v5140_v8 = vadd.f32 %v5139_v43, %v5138_v40  ;;  %v5555_v40 = vld [vmem:[%s13903_s6 + $0x150] sm:$0xff]  ;;  %v5556_v43 = vld [vmem:[%s13903_s6 + $0x158] sm:$0xff] }
 0x694   :  { %6755 = vtanh.f32 %v5140_v8  ;;  %v5547_v8 = vld [vmem:[%s13903_s6 + $0x110] sm:$0xff] }
 0x69a   :  { %v6756_v42 = vpop.eup %6755 }
 0x69b   :  { %v12685_v13 = vmul.f32 %v6756_v42, %v5135_v23  ;;  %v5523_v42 = vld [vmem:[%s13903_s6 + $0x50] sm:$0xff]  ;;  %v5524_v23 = vld [vmem:[%s13903_s6 + $0x58] sm:$0xff] }
 0x69d   :  { %5301 = vmatmul.f32.vlgmr.msra.gmra.mxu0 %v12685_v13  ;;  %5341 = vmatmul.f32.vlgmr.msra.gmra.mxu2 %v12685_v13 }
 0x69e   :  { %5787 = vmatpush.msra.mxu0 %v5633_v63  ;;  %5827 = vmatpush.msra.mxu2 %v5634_v52  ;;  %v5515_v63 = vld [vmem:[%s13903_s6 + $0x10] sm:$0xff]  ;;  %v5516_v52 = vld [vmem:[%s13903_s6 + $0x18] sm:$0xff] }
 0x6a0   :  { %5788 = vmatpush.msra.mxu0 %v5625_v18  ;;  %5828 = vmatpush.msra.mxu2 %v5626_v30  ;;  %v5637_v18 = vld [vmem:[%s13903_s6 + $0x3e0] sm:$0xff]  ;;  %v5638_v30 = vld [vmem:[%s13903_s6 + $0x3e8] sm:$0xff] }
 0x6a2   :  { %5789 = vmatpush.msra.mxu0 %v5617_v44  ;;  %5829 = vmatpush.msra.mxu2 %v5618_v55  ;;  %v5629_v44 = vld [vmem:[%s13903_s6 + $0x3a0] sm:$0xff]  ;;  %v5630_v55 = vld [vmem:[%s13903_s6 + $0x3a8] sm:$0xff] }
 0x6a4   :  { %5790 = vmatpush.msra.mxu0 %v5609_v20  ;;  %5830 = vmatpush.msra.mxu2 %v5610_v29  ;;  %v5621_v20 = vld [vmem:[%s13903_s6 + $0x360] sm:$0xff]  ;;  %v5622_v29 = vld [vmem:[%s13903_s6 + $0x368] sm:$0xff] }
 0x6a5   :  { %5381 = vmatmul.f32.vlgmr.msrb.gmra.mxu0 %v12685_v13  ;;  %5421 = vmatmul.f32.vlgmr.msrb.gmra.mxu2 %v12685_v13 }
 0x6a6   :  { %5791 = vmatpush.msra.mxu0 %v5601_v54  ;;  %5831 = vmatpush.msra.mxu2 %v5602_v37  ;;  %v5613_v54 = vld [vmem:[%s13903_s6 + $0x320] sm:$0xff]  ;;  %v5614_v37 = vld [vmem:[%s13903_s6 + $0x328] sm:$0xff] }
 0x6a8   :  { %5792 = vmatpush.msra.mxu0 %v5593_v12  ;;  %5832 = vmatpush.msra.mxu2 %v5594_v21  ;;  %v5605_v12 = vld [vmem:[%s13903_s6 + $0x2e0] sm:$0xff]  ;;  %v5606_v21 = vld [vmem:[%s13903_s6 + $0x2e8] sm:$0xff] }
 0x6aa   :  { %5793 = vmatpush.msra.mxu0 %v5585_v10  ;;  %5833 = vmatpush.msra.mxu2 %v5586_v36  ;;  %v5597_v10 = vld [vmem:[%s13903_s6 + $0x2a0] sm:$0xff]  ;;  %v5598_v36 = vld [vmem:[%s13903_s6 + $0x2a8] sm:$0xff] }
 0x6ac   :  { %5794 = vmatpush.msra.mxu0 %v5577_v34  ;;  %5834 = vmatpush.msra.mxu2 %v5578_v59  ;;  %v5589_v34 = vld [vmem:[%s13903_s6 + $0x260] sm:$0xff]  ;;  %v5590_v59 = vld [vmem:[%s13903_s6 + $0x268] sm:$0xff] }
 0x6ae   :  { %5795 = vmatpush.msra.mxu0 %v5569_v38  ;;  %5835 = vmatpush.msra.mxu2 %v5570_v39  ;;  %v5581_v38 = vld [vmem:[%s13903_s6 + $0x220] sm:$0xff]  ;;  %v5582_v39 = vld [vmem:[%s13903_s6 + $0x228] sm:$0xff] }
 0x6b0   :  { %5796 = vmatpush.msra.mxu0 %v5561_v4  ;;  %5836 = vmatpush.msra.mxu2 %v5562_v60  ;;  %v5573_v4 = vld [vmem:[%s13903_s6 + $0x1e0] sm:$0xff]  ;;  %v5574_v60 = vld [vmem:[%s13903_s6 + $0x1e8] sm:$0xff] }
 0x6b2   :  { %5797 = vmatpush.msra.mxu0 %v5553_v2  ;;  %5837 = vmatpush.msra.mxu2 %v5554_v15  ;;  %v5565_v2 = vld [vmem:[%s13903_s6 + $0x1a0] sm:$0xff]  ;;  %v5566_v15 = vld [vmem:[%s13903_s6 + $0x1a8] sm:$0xff] }
 0x6b4   :  { %5798 = vmatpush.msra.mxu0 %v5545_v41  ;;  %5838 = vmatpush.msra.mxu2 %v5546_v6  ;;  %v5557_v41 = vld [vmem:[%s13903_s6 + $0x160] sm:$0xff]  ;;  %v5558_v6 = vld [vmem:[%s13903_s6 + $0x168] sm:$0xff] }
 0x6b6   :  { %5799 = vmatpush.msra.mxu0 %v5537_v9  ;;  %5839 = vmatpush.msra.mxu2 %v5538_v22  ;;  %v5549_v9 = vld [vmem:[%s13903_s6 + $0x120] sm:$0xff]  ;;  %v5550_v22 = vld [vmem:[%s13903_s6 + $0x128] sm:$0xff] }
 0x6b8   :  { %5800 = vmatpush.msra.mxu0 %v5529_v61  ;;  %5840 = vmatpush.msra.mxu2 %v5530_v51  ;;  %v5761_v61 = vld [vmem:[%s13903_s6 + $0x7c0] sm:$0xff]  ;;  %v5762_v51 = vld [vmem:[%s13903_s6 + $0x7c8] sm:$0xff] }
 0x6b9   :  { %5807 = vmatpush.msra.mxu1 %v5761_v61  ;;  %5847 = vmatpush.msra.mxu3 %v5762_v51  ;;  %v5641_v61 = vld [vmem:[%s13903_s6 + $0x400] sm:$0xff]  ;;  %v5642_v51 = vld [vmem:[%s13903_s6 + $0x408] sm:$0xff] }
 0x6ba   :  { %5801 = vmatpush.msra.mxu0 %v5521_v11  ;;  %5841 = vmatpush.msra.mxu2 %v5522_v24  ;;  %v5541_v11 = vld [vmem:[%s13903_s6 + $0xe0] sm:$0xff]  ;;  %v5542_v24 = vld [vmem:[%s13903_s6 + $0xe8] sm:$0xff] }
 0x6bc   :  { %5802 = vmatpush.msra.mxu0 %v5513_v16  ;;  %5842 = vmatpush.msra.mxu2 %v5514_v46  ;;  %v5753_v16 = vld [vmem:[%s13903_s6 + $0x780] sm:$0xff]  ;;  %v5754_v46 = vld [vmem:[%s13903_s6 + $0x788] sm:$0xff] }
 0x6bd   :  { %5803 = vmatmul.f32.vlgmr.msra.gmra.mxu0 %v12685_v13  ;;  %5843 = vmatmul.f32.vlgmr.msra.gmra.mxu2 %v12685_v13 }
 0x6be   :  { %5867 = vmatpush.msrb.mxu0 %v5635_v58  ;;  %5907 = vmatpush.msrb.mxu2 %v5636_v56  ;;  %v5533_v58 = vld [vmem:[%s13903_s6 + $0xa0] sm:$0xff]  ;;  %v5534_v56 = vld [vmem:[%s13903_s6 + $0xa8] sm:$0xff] }
 0x6bf   :  { %5808 = vmatpush.msra.mxu1 %v5753_v16  ;;  %5848 = vmatpush.msra.mxu3 %v5754_v46  ;;  %v5543_v16 = vld [vmem:[%s13903_s6 + $0xf0] sm:$0xff]  ;;  %v5544_v46 = vld [vmem:[%s13903_s6 + $0xf8] sm:$0xff] }
 0x6c0   :  { %5868 = vmatpush.msrb.mxu0 %v5627_v27  ;;  %5908 = vmatpush.msrb.mxu2 %v5628_v33  ;;  %v5745_v27 = vld [vmem:[%s13903_s6 + $0x740] sm:$0xff]  ;;  %v5746_v33 = vld [vmem:[%s13903_s6 + $0x748] sm:$0xff] }
 0x6c1   :  { %5809 = vmatpush.msra.mxu1 %v5745_v27  ;;  %5849 = vmatpush.msra.mxu3 %v5746_v33  ;;  %v5756_v27 = vld [vmem:[%s13903_s6 + $0x798] sm:$0xff]  ;;  %v5535_v33 = vld [vmem:[%s13903_s6 + $0xb0] sm:$0xff] }
 0x6c2   :  { %5869 = vmatpush.msrb.mxu0 %v5619_v49  ;;  %5909 = vmatpush.msrb.mxu2 %v5620_v19  ;;  %v5525_v49 = vld [vmem:[%s13903_s6 + $0x60] sm:$0xff]  ;;  %v5526_v19 = vld [vmem:[%s13903_s6 + $0x68] sm:$0xff] }
 0x6c4   :  { %5870 = vmatpush.msrb.mxu0 %v5611_v28  ;;  %5910 = vmatpush.msrb.mxu2 %v5612_v31  ;;  %v5737_v28 = vld [vmem:[%s13903_s6 + $0x700] sm:$0xff]  ;;  %v5738_v31 = vld [vmem:[%s13903_s6 + $0x708] sm:$0xff] }
 0x6c5   :  { %5810 = vmatpush.msra.mxu1 %v5737_v28  ;;  %5850 = vmatpush.msra.mxu3 %v5738_v31  ;;  %v5748_v28 = vld [vmem:[%s13903_s6 + $0x758] sm:$0xff]  ;;  %v5527_v31 = vld [vmem:[%s13903_s6 + $0x70] sm:$0xff] }
 0x6c6   :  { %5871 = vmatpush.msrb.mxu0 %v5603_v14  ;;  %5911 = vmatpush.msrb.mxu2 %v5604_v53  ;;  %v5517_v14 = vld [vmem:[%s13903_s6 + $0x20] sm:$0xff]  ;;  %v5518_v53 = vld [vmem:[%s13903_s6 + $0x28] sm:$0xff] }
 0x6c8   :  { %5872 = vmatpush.msrb.mxu0 %v5595_v32  ;;  %5912 = vmatpush.msrb.mxu2 %v5596_v5  ;;  %v5729_v32 = vld [vmem:[%s13903_s6 + $0x6c0] sm:$0xff]  ;;  %v5730_v5 = vld [vmem:[%s13903_s6 + $0x6c8] sm:$0xff] }
 0x6c9   :  { %5811 = vmatpush.msra.mxu1 %v5729_v32  ;;  %5851 = vmatpush.msra.mxu3 %v5730_v5  ;;  %v5739_v32 = vld [vmem:[%s13903_s6 + $0x710] sm:$0xff]  ;;  %v5740_v5 = vld [vmem:[%s13903_s6 + $0x718] sm:$0xff] }
 0x6ca   :  { %5873 = vmatpush.msrb.mxu0 %v5587_v7  ;;  %5913 = vmatpush.msrb.mxu2 %v5588_v35  ;;  %v5639_v7 = vld [vmem:[%s13903_s6 + $0x3f0] sm:$0xff]  ;;  %v5640_v35 = vld [vmem:[%s13903_s6 + $0x3f8] sm:$0xff] }
 0x6cc   :  { %5874 = vmatpush.msrb.mxu0 %v5579_v50  ;;  %5914 = vmatpush.msrb.mxu2 %v5580_v26  ;;  %v5631_v50 = vld [vmem:[%s13903_s6 + $0x3b0] sm:$0xff]  ;;  %v5632_v26 = vld [vmem:[%s13903_s6 + $0x3b8] sm:$0xff] }
 0x6ce   :  { %5875 = vmatpush.msrb.mxu0 %v5571_v47  ;;  %5915 = vmatpush.msrb.mxu2 %v5572_v57  ;;  %v5721_v47 = vld [vmem:[%s13903_s6 + $0x680] sm:$0xff]  ;;  %v5722_v57 = vld [vmem:[%s13903_s6 + $0x688] sm:$0xff] }
 0x6cf   :  { %5812 = vmatpush.msra.mxu1 %v5721_v47  ;;  %5852 = vmatpush.msra.mxu3 %v5722_v57  ;;  %v5731_v47 = vld [vmem:[%s13903_s6 + $0x6d0] sm:$0xff]  ;;  %v5732_v57 = vld [vmem:[%s13903_s6 + $0x6d8] sm:$0xff] }
 0x6d0   :  { %5876 = vmatpush.msrb.mxu0 %v5563_v25  ;;  %5916 = vmatpush.msrb.mxu2 %v5564_v3  ;;  %v5623_v25 = vld [vmem:[%s13903_s6 + $0x370] sm:$0xff]  ;;  %v5624_v3 = vld [vmem:[%s13903_s6 + $0x378] sm:$0xff] }
 0x6d2   :  { %5877 = vmatpush.msrb.mxu0 %v5555_v40  ;;  %5917 = vmatpush.msrb.mxu2 %v5556_v43  ;;  %v5713_v40 = vld [vmem:[%s13903_s6 + $0x640] sm:$0xff]  ;;  %v5714_v43 = vld [vmem:[%s13903_s6 + $0x648] sm:$0xff] }
 0x6d3   :  { %5813 = vmatpush.msra.mxu1 %v5713_v40  ;;  %5853 = vmatpush.msra.mxu3 %v5714_v43  ;;  %v5723_v43 = vld [vmem:[%s13903_s6 + $0x690] sm:$0xff] }
 0x6d4   :  { %5878 = vmatpush.msrb.mxu0 %v5547_v8  ;;  %5918 = vmatpush.msrb.mxu2 %v5548_v45  ;;  %v5615_v8 = vld [vmem:[%s13903_s6 + $0x330] sm:$0xff]  ;;  %v5616_v45 = vld [vmem:[%s13903_s6 + $0x338] sm:$0xff] }
 0x6d6   :  { %5879 = vmatpush.msrb.mxu0 %v5539_v0  ;;  %5919 = vmatpush.msrb.mxu2 %v5540_v17  ;;  %v5705_v0 = vld [vmem:[%s13903_s6 + $0x600] sm:$0xff]  ;;  %v5706_v17 = vld [vmem:[%s13903_s6 + $0x608] sm:$0xff] }
 0x6d7   :  { %5814 = vmatpush.msra.mxu1 %v5705_v0  ;;  %5854 = vmatpush.msra.mxu3 %v5706_v17  ;;  %v5715_v0 = vld [vmem:[%s13903_s6 + $0x650] sm:$0xff] }
 0x6d8   :  { %5880 = vmatpush.msrb.mxu0 %v5531_v48  ;;  %5920 = vmatpush.msrb.mxu2 %v5532_v62  ;;  %v5607_v48 = vld [vmem:[%s13903_s6 + $0x2f0] sm:$0xff]  ;;  %v5608_v62 = vld [vmem:[%s13903_s6 + $0x2f8] sm:$0xff] }
 0x6da   :  { %5881 = vmatpush.msrb.mxu0 %v5523_v42  ;;  %5921 = vmatpush.msrb.mxu2 %v5524_v23  ;;  %v5697_v42 = vld [vmem:[%s13903_s6 + $0x5c0] sm:$0xff]  ;;  %v5698_v23 = vld [vmem:[%s13903_s6 + $0x5c8] sm:$0xff] }
 0x6db   :  { %5815 = vmatpush.msra.mxu1 %v5697_v42  ;;  %5855 = vmatpush.msra.mxu3 %v5698_v23  ;;  %v5707_v42 = vld [vmem:[%s13903_s6 + $0x610] sm:$0xff]  ;;  %v5708_v23 = vld [vmem:[%s13903_s6 + $0x618] sm:$0xff] }
 0x6dc   :  { %5882 = vmatpush.msrb.mxu0 %v5515_v63  ;;  %5922 = vmatpush.msrb.mxu2 %v5516_v52  ;;  %v5599_v63 = vld [vmem:[%s13903_s6 + $0x2b0] sm:$0xff]  ;;  %v5600_v52 = vld [vmem:[%s13903_s6 + $0x2b8] sm:$0xff] }
 0x6dd   :  { %5883 = vmatmul.f32.vlgmr.msrb.gmra.mxu0 %v12685_v13  ;;  %5923 = vmatmul.f32.vlgmr.msrb.gmra.mxu2 %v12685_v13 }
 0x6de   :  { %5947 = vmatpush.msra.mxu0 %v5637_v18  ;;  %5987 = vmatpush.msra.mxu2 %v5638_v30  ;;  %v5689_v18 = vld [vmem:[%s13903_s6 + $0x580] sm:$0xff]  ;;  %v5690_v30 = vld [vmem:[%s13903_s6 + $0x588] sm:$0xff] }
 0x6df   :  { %5816 = vmatpush.msra.mxu1 %v5689_v18  ;;  %5856 = vmatpush.msra.mxu3 %v5690_v30  ;;  %v5700_v18 = vld [vmem:[%s13903_s6 + $0x5d8] sm:$0xff] }
 0x6e0   :  { %5948 = vmatpush.msra.mxu0 %v5629_v44  ;;  %5988 = vmatpush.msra.mxu2 %v5630_v55  ;;  %v5591_v44 = vld [vmem:[%s13903_s6 + $0x270] sm:$0xff]  ;;  %v5592_v55 = vld [vmem:[%s13903_s6 + $0x278] sm:$0xff] }
 0x6e2   :  { %5949 = vmatpush.msra.mxu0 %v5621_v20  ;;  %5989 = vmatpush.msra.mxu2 %v5622_v29  ;;  %v5681_v20 = vld [vmem:[%s13903_s6 + $0x540] sm:$0xff]  ;;  %v5682_v29 = vld [vmem:[%s13903_s6 + $0x548] sm:$0xff] }
 0x6e3   :  { %5817 = vmatpush.msra.mxu1 %v5681_v20  ;;  %5857 = vmatpush.msra.mxu3 %v5682_v29  ;;  %v5692_v20 = vld [vmem:[%s13903_s6 + $0x598] sm:$0xff] }
 0x6e4   :  { %5950 = vmatpush.msra.mxu0 %v5613_v54  ;;  %5990 = vmatpush.msra.mxu2 %v5614_v37  ;;  %v5583_v54 = vld [vmem:[%s13903_s6 + $0x230] sm:$0xff]  ;;  %v5584_v37 = vld [vmem:[%s13903_s6 + $0x238] sm:$0xff] }
 0x6e6   :  { %5951 = vmatpush.msra.mxu0 %v5605_v12  ;;  %5991 = vmatpush.msra.mxu2 %v5606_v21  ;;  %v5673_v12 = vld [vmem:[%s13903_s6 + $0x500] sm:$0xff]  ;;  %v5674_v21 = vld [vmem:[%s13903_s6 + $0x508] sm:$0xff] }
 0x6e7   :  { %5818 = vmatpush.msra.mxu1 %v5673_v12  ;;  %5858 = vmatpush.msra.mxu3 %v5674_v21 }
 0x6e8   :  { %5952 = vmatpush.msra.mxu0 %v5597_v10  ;;  %5992 = vmatpush.msra.mxu2 %v5598_v36  ;;  %v5575_v10 = vld [vmem:[%s13903_s6 + $0x1f0] sm:$0xff]  ;;  %v5576_v36 = vld [vmem:[%s13903_s6 + $0x1f8] sm:$0xff] }
 0x6ea   :  { %5953 = vmatpush.msra.mxu0 %v5589_v34  ;;  %5993 = vmatpush.msra.mxu2 %v5590_v59  ;;  %v5665_v34 = vld [vmem:[%s13903_s6 + $0x4c0] sm:$0xff]  ;;  %v5666_v59 = vld [vmem:[%s13903_s6 + $0x4c8] sm:$0xff] }
 0x6eb   :  { %5819 = vmatpush.msra.mxu1 %v5665_v34  ;;  %5859 = vmatpush.msra.mxu3 %v5666_v59  ;;  %v5676_v34 = vld [vmem:[%s13903_s6 + $0x518] sm:$0xff] }
 0x6ec   :  { %5954 = vmatpush.msra.mxu0 %v5581_v38  ;;  %5994 = vmatpush.msra.mxu2 %v5582_v39  ;;  %v5567_v38 = vld [vmem:[%s13903_s6 + $0x1b0] sm:$0xff]  ;;  %v5568_v39 = vld [vmem:[%s13903_s6 + $0x1b8] sm:$0xff] }
 0x6ee   :  { %5955 = vmatpush.msra.mxu0 %v5573_v4  ;;  %5995 = vmatpush.msra.mxu2 %v5574_v60  ;;  %v5657_v4 = vld [vmem:[%s13903_s6 + $0x480] sm:$0xff]  ;;  %v5658_v60 = vld [vmem:[%s13903_s6 + $0x488] sm:$0xff] }
 0x6ef   :  { %5820 = vmatpush.msra.mxu1 %v5657_v4  ;;  %5860 = vmatpush.msra.mxu3 %v5658_v60  ;;  %v5668_v4 = vld [vmem:[%s13903_s6 + $0x4d8] sm:$0xff] }
 0x6f0   :  { %5956 = vmatpush.msra.mxu0 %v5565_v2  ;;  %5996 = vmatpush.msra.mxu2 %v5566_v15  ;;  %v5559_v2 = vld [vmem:[%s13903_s6 + $0x170] sm:$0xff]  ;;  %v5560_v15 = vld [vmem:[%s13903_s6 + $0x178] sm:$0xff] }
 0x6f2   :  { %5957 = vmatpush.msra.mxu0 %v5557_v41  ;;  %5997 = vmatpush.msra.mxu2 %v5558_v6  ;;  %v5649_v41 = vld [vmem:[%s13903_s6 + $0x440] sm:$0xff]  ;;  %v5650_v6 = vld [vmem:[%s13903_s6 + $0x448] sm:$0xff] }
 0x6f3   :  { %5821 = vmatpush.msra.mxu1 %v5649_v41  ;;  %5861 = vmatpush.msra.mxu3 %v5650_v6  ;;  %v5660_v41 = vld [vmem:[%s13903_s6 + $0x498] sm:$0xff] }
 0x6f4   :  { %5958 = vmatpush.msra.mxu0 %v5549_v9  ;;  %5998 = vmatpush.msra.mxu2 %v5550_v22  ;;  %v5551_v9 = vld [vmem:[%s13903_s6 + $0x130] sm:$0xff]  ;;  %v5552_v22 = vld [vmem:[%s13903_s6 + $0x138] sm:$0xff] }
 0x6f5   :  { %5822 = vmatpush.msra.mxu1 %v5641_v61  ;;  %5862 = vmatpush.msra.mxu3 %v5642_v51  ;;  %v5651_v61 = vld [vmem:[%s13903_s6 + $0x450] sm:$0xff]  ;;  %v5652_v51 = vld [vmem:[%s13903_s6 + $0x458] sm:$0xff] }
 0x6f6   :  { %5959 = vmatpush.msra.mxu0 %v5541_v11  ;;  %5999 = vmatpush.msra.mxu2 %v5542_v24  ;;  %v5763_v11 = vld [vmem:[%s13903_s6 + $0x7d0] sm:$0xff]  ;;  %v5764_v24 = vld [vmem:[%s13903_s6 + $0x7d8] sm:$0xff] }
 0x6f7   :  { %5887 = vmatpush.msrb.mxu1 %v5763_v11  ;;  %5927 = vmatpush.msrb.mxu3 %v5764_v24 }
 0x6f8   :  { %5960 = vmatpush.msra.mxu0 %v5533_v58  ;;  %6000 = vmatpush.msra.mxu2 %v5534_v56  ;;  %v13168_v58 = vld [vmem:[%s13902_s5] sm:$0xf]  ;;  %v5755_v56 = vld [vmem:[%s13903_s6 + $0x790] sm:$0xff] }
 0x6f9   :  { %5888 = vmatpush.msrb.mxu1 %v5755_v56  ;;  %5928 = vmatpush.msrb.mxu3 %v5756_v27  ;;  %v5278_v40 = vperm.slane %v13168_v58, 1 }
 0x6fa   :  { %5961 = vmatpush.msra.mxu0 %v5525_v49  ;;  %6001 = vmatpush.msra.mxu2 %v5526_v19  ;;  %v5536_v49 = vld [vmem:[%s13903_s6 + $0xb8] sm:$0xff]  ;;  %v5747_v19 = vld [vmem:[%s13903_s6 + $0x750] sm:$0xff] }
 0x6fb   :  { %5889 = vmatpush.msrb.mxu1 %v5747_v19  ;;  %5929 = vmatpush.msrb.mxu3 %v5748_v28 }
 0x6fc   :  { %5962 = vmatpush.msra.mxu0 %v5517_v14  ;;  %6002 = vmatpush.msra.mxu2 %v5518_v53  ;;  %v5528_v14 = vld [vmem:[%s13903_s6 + $0x78] sm:$0xff]  ;;  %v5277_v53 = vperm.slane %v13168_v58, 0 }
 0x6fd   :  { %5963 = vmatmul.f32.vlgmr.msra.gmra.mxu0 %v12685_v13  ;;  %6003 = vmatmul.f32.vlgmr.msra.gmra.mxu2 %v12685_v13  ;;  %v5362_v17 = vpop.f32.mrf.mxu3 }
 0x6fe   :  { %6027 = vmatpush.msrb.mxu0 %v5639_v7  ;;  %6067 = vmatpush.msrb.mxu2 %v5640_v35  ;;  %v5519_v7 = vld [vmem:[%s13903_s6 + $0x30] sm:$0xff]  ;;  %v5520_v35 = vld [vmem:[%s13903_s6 + $0x38] sm:$0xff] }
 0x6ff   :  { %5890 = vmatpush.msrb.mxu1 %v5739_v32  ;;  %5930 = vmatpush.msrb.mxu3 %v5740_v5 }
 0x700   :  { %6028 = vmatpush.msrb.mxu0 %v5631_v50  ;;  %6068 = vmatpush.msrb.mxu2 %v5632_v26 }
 0x701   :  { %5891 = vmatpush.msrb.mxu1 %v5731_v47  ;;  %5931 = vmatpush.msrb.mxu3 %v5732_v57 }
 0x702   :  { %6029 = vmatpush.msrb.mxu0 %v5623_v25  ;;  %6069 = vmatpush.msrb.mxu2 %v5624_v3  ;;  %v5322_v25 = vpop.f32.mrf.mxu1 }
 0x703   :  { %5892 = vmatpush.msrb.mxu1 %v5723_v43 }
 0x704   :  { %6030 = vmatpush.msrb.mxu0 %v5615_v8  ;;  %6070 = vmatpush.msrb.mxu2 %v5616_v45  ;;  %v5724_v8 = vld [vmem:[%s13903_s6 + $0x698] sm:$0xff] }
 0x705   :  { %5932 = vmatpush.msrb.mxu3 %v5724_v8  ;;  %5893 = vmatpush.msrb.mxu1 %v5715_v0  ;;  %v5442_v59 = vpop.f32.mrf.mxu3 }
 0x706   :  { %6031 = vmatpush.msrb.mxu0 %v5607_v48  ;;  %6071 = vmatpush.msrb.mxu2 %v5608_v62 }
 0x707   :  { %5894 = vmatpush.msrb.mxu1 %v5707_v42 }
 0x708   :  { %6032 = vmatpush.msrb.mxu0 %v5599_v63  ;;  %6072 = vmatpush.msrb.mxu2 %v5600_v52  ;;  %v5699_v52 = vld [vmem:[%s13903_s6 + $0x5d0] sm:$0xff] }
 0x709   :  { %5895 = vmatpush.msrb.mxu1 %v5699_v52 }
 0x70a   :  { %6033 = vmatpush.msrb.mxu0 %v5591_v44  ;;  %6073 = vmatpush.msrb.mxu2 %v5592_v55  ;;  %v5280_v44 = vperm.slane %v13168_v58, 3  ;;  %v5691_v55 = vld [vmem:[%s13903_s6 + $0x590] sm:$0xff] }
 0x70b   :  { %5896 = vmatpush.msrb.mxu1 %v5691_v55 }
 0x70c   :  { %6034 = vmatpush.msrb.mxu0 %v5583_v54  ;;  %6074 = vmatpush.msrb.mxu2 %v5584_v37  ;;  %v5683_v54 = vld [vmem:[%s13903_s6 + $0x550] sm:$0xff]  ;;  %v5684_v37 = vld [vmem:[%s13903_s6 + $0x558] sm:$0xff] }
 0x70d   :  { %5897 = vmatpush.msrb.mxu1 %v5683_v54  ;;  %v5766_v54 = vld [vmem:[%s13903_s6 + $0x7e8] sm:$0xff] }
 0x70e   :  { %6035 = vmatpush.msrb.mxu0 %v5575_v10  ;;  %6075 = vmatpush.msrb.mxu2 %v5576_v36  ;;  %v5675_v36 = vld [vmem:[%s13903_s6 + $0x510] sm:$0xff] }
 0x70f   :  { %5898 = vmatpush.msrb.mxu1 %v5675_v36  ;;  %v5741_v36 = vld [vmem:[%s13903_s6 + $0x720] sm:$0xff] }
 0x710   :  { %6036 = vmatpush.msrb.mxu0 %v5567_v38  ;;  %6076 = vmatpush.msrb.mxu2 %v5568_v39  ;;  %v5667_v39 = vld [vmem:[%s13903_s6 + $0x4d0] sm:$0xff] }
 0x711   :  { %5899 = vmatpush.msrb.mxu1 %v5667_v39  ;;  %v5725_v39 = vld [vmem:[%s13903_s6 + $0x6a0] sm:$0xff] }
 0x712   :  { %6037 = vmatpush.msrb.mxu0 %v5559_v2  ;;  %6077 = vmatpush.msrb.mxu2 %v5560_v15  ;;  %v5659_v15 = vld [vmem:[%s13903_s6 + $0x490] sm:$0xff] }
 0x713   :  { %5900 = vmatpush.msrb.mxu1 %v5659_v15  ;;  %v5709_v15 = vld [vmem:[%s13903_s6 + $0x620] sm:$0xff] }
 0x714   :  { %6038 = vmatpush.msrb.mxu0 %v5551_v9  ;;  %6078 = vmatpush.msrb.mxu2 %v5552_v22  ;;  %v5279_v9 = vperm.slane %v13168_v58, 2 }
 0x715   :  { %5901 = vmatpush.msrb.mxu1 %v5651_v61  ;;  %v5694_v61 = vld [vmem:[%s13903_s6 + $0x5a8] sm:$0xff] }
 0x716   :  { %6039 = vmatpush.msrb.mxu0 %v5543_v16  ;;  %6079 = vmatpush.msrb.mxu2 %v5544_v46  ;;  %v5643_v16 = vld [vmem:[%s13903_s6 + $0x410] sm:$0xff]  ;;  %v5644_v46 = vld [vmem:[%s13903_s6 + $0x418] sm:$0xff] }
 0x717   :  { %5902 = vmatpush.msrb.mxu1 %v5643_v16  ;;  %v5678_v16 = vld [vmem:[%s13903_s6 + $0x528] sm:$0xff] }
 0x718   :  { %6040 = vmatpush.msrb.mxu0 %v5535_v33  ;;  %6080 = vmatpush.msrb.mxu2 %v5536_v49  ;;  %v5402_v33 = vpop.f32.mrf.mxu1 }
 0x71a   :  { %6041 = vmatpush.msrb.mxu0 %v5527_v31  ;;  %6081 = vmatpush.msrb.mxu2 %v5528_v14  ;;  %v5302_v50 = vpop.f32.mrf.mxu0 }
 0x71b   :  { %v5303_v26 = vadd.f32 %v5302_v50, %v5277_v53 }
 0x71c   :  { %6042 = vmatpush.msrb.mxu0 %v5519_v7  ;;  %6082 = vmatpush.msrb.mxu2 %v5520_v35 }
 0x71d   :  { %6043 = vmatmul.f32.vlgmr.msrb.gmra.mxu0 %v12685_v13  ;;  %6083 = vmatmul.f32.vlgmr.msrb.gmra.mxu2 %v12685_v13  ;;  %v5323_v3 = vadd.f32 %v5322_v25, %v5303_v26  ;;  %v5716_v13 = vld [vmem:[%s13903_s6 + $0x658] sm:$0xff] }
 0x71e   :  { %5933 = vmatpush.msrb.mxu3 %v5716_v13 }
 0x71f   :  { %v6512_v45 = vmul.f32 -1.442695, %v5323_v3 }
 0x720   :  { %v5342_v48 = vpop.f32.mrf.mxu2  ;;  %5934 = vmatpush.msrb.mxu3 %v5708_v23 }
 0x721   :  { %6757 = vpow2.f32 %v6512_v45  ;;  %v5343_v62 = vadd.f32 %v5342_v48, %v5278_v40 }
 0x722   :  { %5935 = vmatpush.msrb.mxu3 %v5700_v18  ;;  %v5382_v22 = vpop.f32.mrf.mxu0 }
 0x723   :  { %v5363_v63 = vadd.f32 %v5362_v17, %v5343_v62  ;;  %v5383_v58 = vadd.f32 %v5382_v22, %v5279_v9  ;;  %v5702_v9 = vld [vmem:[%s13903_s6 + $0x5e8] sm:$0xff]  ;;  %v5693_v22 = vld [vmem:[%s13903_s6 + $0x5a0] sm:$0xff] }
 0x724   :  { %5936 = vmatpush.msrb.mxu3 %v5692_v20 }
 0x725   :  { %v6513_v30 = vmul.f32 -1.442695, %v5363_v63  ;;  %v5403_v28 = vadd.f32 %v5402_v33, %v5383_v58  ;;  %v5670_v58 = vld [vmem:[%s13903_s6 + $0x4e8] sm:$0xff]  ;;  %v5653_v33 = vld [vmem:[%s13903_s6 + $0x460] sm:$0xff] }
 0x726   :  { %5937 = vmatpush.msrb.mxu3 %v5684_v37  ;;  %v5757_v37 = vld [vmem:[%s13903_s6 + $0x7a0] sm:$0xff] }
 0x727   :  { %v6758_v29 = vpop.eup %6757  ;;  %6759 = vpow2.f32 %v6513_v30 }
 0x728   :  { %v13253_v12 = vadd.f32 1.0, %v6758_v29  ;;  %v5422_v21 = vpop.f32.mrf.mxu2  ;;  %5938 = vmatpush.msrb.mxu3 %v5676_v34  ;;  %v5742_v34 = vld [vmem:[%s13903_s6 + $0x728] sm:$0xff] }
 0x729   :  { %v5423_v10 = vadd.f32 %v5422_v21, %v5280_v44  ;;  %v5749_v21 = vld [vmem:[%s13903_s6 + $0x760] sm:$0xff] }
 0x72a   :  { %6761 = vrcp.f32 %v13253_v12  ;;  %5939 = vmatpush.msrb.mxu3 %v5668_v4  ;;  %v5460_v32 = vand.u32 2147483648, %v13253_v12  ;;  %vm5454_vm15 = vweird.f32 %v13253_v12  ;;  %v5458_v7 = vand.u32 2147483647, %v13253_v12  ;;  %v5726_v4 = vld [vmem:[%s13903_s6 + $0x6a8] sm:$0xff] }
 0x72b   :  { %v5443_v38 = vadd.f32 %v5442_v59, %v5423_v10  ;;  %v5750_v10 = vld [vmem:[%s13903_s6 + $0x768] sm:$0xff]  ;;  %v5733_v59 = vld [vmem:[%s13903_s6 + $0x6e0] sm:$0xff] }
 0x72c   :  { %5940 = vmatpush.msrb.mxu3 %v5660_v41  ;;  %v5461_v57 = vor.u32 1.1754944e-38, %v5460_v32  ;;  %vm5459_vm4 = vcmp.eq.f32.partialorder %v5458_v7, 8.507059e+37  ;;  %v5710_v41 = vld [vmem:[%s13903_s6 + $0x628] sm:$0xff]  ;;  %v5760_v32 = vld [vmem:[%s13903_s6 + $0x7b8] sm:$0xff] }
 0x72d   :  { %v6760_v60 = vpop.eup %6759  ;;  %v6514_v2 = vmul.f32 -1.442695, %v5443_v38  ;;  %v5734_v38 = vld [vmem:[%s13903_s6 + $0x6e8] sm:$0xff]  ;;  %v5752_v7 = vld [vmem:[%s13903_s6 + $0x778] sm:$0xff] }
 0x72e   :  { %v5467_v6 = vadd.f32 1.0, %v6760_v60  ;;  %5941 = vmatpush.msrb.mxu3 %v5652_v51  ;;  %v5717_v60 = vld [vmem:[%s13903_s6 + $0x660] sm:$0xff] }
 0x72f   :  { %6763 = vpow2.f32 %v6514_v2  ;;  %v5718_v2 = vld [vmem:[%s13903_s6 + $0x668] sm:$0xff]  ;;  %v5685_v51 = vld [vmem:[%s13903_s6 + $0x560] sm:$0xff] }
 0x730   :  { %v6762_v11 = vpop.eup %6761  ;;  %6765 = vrcp.f32 %v5467_v6  ;;  %5942 = vmatpush.msrb.mxu3 %v5644_v46  ;;  %v5479_v35 = vand.u32 2147483648, %v5467_v6  ;;  %v5477_v47 = vand.u32 2147483647, %v5467_v6  ;;  %vm5473_vm3 = vweird.f32 %v5467_v6  ;;  %v5669_v46 = vld [vmem:[%s13903_s6 + $0x4e0] sm:$0xff] }
 0x731   :  { %v5450_v24 = vmul.f32 %v6762_v11, %v13253_v12  ;;  %vm5455_vm14 = vweird.f32 %v6762_v11  ;;  %v5758_v12 = vld [vmem:[%s13903_s6 + $0x7a8] sm:$0xff] }
 0x732   :  { %vm5456_vm1 = vmor %vm5454_vm15, %vm5455_vm14  ;;  %v5480_v40 = vor.u32 1.1754944e-38, %v5479_v35  ;;  %vm5478_vm6 = vcmp.eq.f32.partialorder %v5477_v47, 8.507059e+37  ;;  %v5743_v35 = vld [vmem:[%s13903_s6 + $0x730] sm:$0xff]  ;;  %v5736_v47 = vld [vmem:[%s13903_s6 + $0x6f8] sm:$0xff] }
 0x733   :  { %v5451_v56 = vsub.f32 1.0, %v5450_v24  ;;  %v5677_v24 = vld [vmem:[%s13903_s6 + $0x520] sm:$0xff] }
 0x735   :  { %v6764_v27 = vpop.eup %6763  ;;  %v5452_v49 = vmul.f32 %v6762_v11, %v5451_v56  ;;  %v5661_v56 = vld [vmem:[%s13903_s6 + $0x4a0] sm:$0xff] }
 0x736   :  { %v6766_v19 = vpop.eup %6765  ;;  %v5487_v31 = vadd.f32 1.0, %v6764_v27  ;;  %v5662_v27 = vld [vmem:[%s13903_s6 + $0x4a8] sm:$0xff] }
 0x737   :  { %v5469_v14 = vmul.f32 %v6766_v19, %v5467_v6  ;;  %v5453_v53 = vadd.f32 %v6762_v11, %v5452_v49  ;;  %vm5474_vm2 = vweird.f32 %v6766_v19  ;;  %v5701_v6 = vld [vmem:[%s13903_s6 + $0x5e0] sm:$0xff]  ;;  %v5654_v49 = vld [vmem:[%s13903_s6 + $0x468] sm:$0xff] }
 0x738   :  { %6767 = vrcp.f32 %v5487_v31  ;;  %vm5475_vm5 = vmor %vm5473_vm3, %vm5474_vm2  ;;  %v5499_v52 = vand.u32 2147483648, %v5487_v31  ;;  %vm5493_vm7 = vweird.f32 %v5487_v31  ;;  %v5497_v18 = vand.u32 2147483647, %v5487_v31 }
 0x739   :  { %v5470_v5 = vsub.f32 1.0, %v5469_v14  ;;  %6769 = vtanh.f32 %v5403_v28  ;;  %v5457_v26 = vsel %vm5456_vm1, %v6762_v11, %v5453_v53  ;;  %v5686_v11 = vld [vmem:[%s13903_s6 + $0x568] sm:$0xff]  ;;  %v5768_v14 = vld [vmem:[%s13903_s6 + $0x7f8] sm:$0xff]  ;;  %v5759_v53 = vld [vmem:[%s13903_s6 + $0x7b0] sm:$0xff] }
 0x73a   :  { %v5462_v43 = vsel %vm5459_vm4, %v5461_v57, %v5457_v26  ;;  %v5500_v44 = vor.u32 1.1754944e-38, %v5499_v52  ;;  %vm5498_vm9 = vcmp.eq.f32.partialorder %v5497_v18, 8.507059e+37  ;;  %v5646_v28 = vld [vmem:[%s13903_s6 + $0x428] sm:$0xff]  ;;  %v5735_v26 = vld [vmem:[%s13903_s6 + $0x6f0] sm:$0xff]  ;;  %v5680_v52 = vld [vmem:[%s13903_s6 + $0x538] sm:$0xff] }
 0x73b   :  { %v5471_v50 = vmul.f32 %v6766_v19, %v5470_v5  ;;  %v5751_v5 = vld [vmem:[%s13903_s6 + $0x770] sm:$0xff]  ;;  %v6144_v18 = vld [vmem:[%s13904_s8 + $0x68] sm:$0xff] }
 0x73c   :  { %v5727_v57 = vld [vmem:[%s13903_s6 + $0x6b0] sm:$0xff] }
 0x73d   :  { %v5472_v25 = vadd.f32 %v6766_v19, %v5471_v50  ;;  %v5744_v50 = vld [vmem:[%s13903_s6 + $0x738] sm:$0xff] }
 0x73e   :  { %v6768_v3 = vpop.eup %6767 }
 0x73f   :  { %v5476_v8 = vsel %vm5475_vm5, %v6766_v19, %v5472_v25  ;;  %v5489_v45 = vmul.f32 %v6768_v3, %v5487_v31  ;;  %v6770_v0 = vpop.eup %6769  ;;  %vm5494_vm0 = vweird.f32 %v6768_v3  ;;  %v5645_v19 = vld [vmem:[%s13903_s6 + $0x420] sm:$0xff]  ;;  %v5767_v31 = vld [vmem:[%s13903_s6 + $0x7f0] sm:$0xff]  ;;  %v5728_v25 = vld [vmem:[%s13903_s6 + $0x6b8] sm:$0xff] }
 0x740   :  { %v5481_v13 = vsel %vm5478_vm6, %v5480_v40, %v5476_v8  ;;  %v5505_v48 = vmul.f32 %v6770_v0, %v5462_v43  ;;  %vm5495_vm8 = vmor %vm5493_vm7, %vm5494_vm0  ;;  %v5720_v40 = vld [vmem:[%s13903_s6 + $0x678] sm:$0xff]  ;;  %v5711_v43 = vld [vmem:[%s13903_s6 + $0x630] sm:$0xff] }
 0x741   :  { %v5504_v17 = vmul.f32 %v5481_v13, %v12603_v1  ;;  %v5490_v62 = vsub.f32 1.0, %v5489_v45  ;;  %v5765_v1 = vld [vmem:[%s13903_s6 + $0x7e0] sm:$0xff]  ;;  %v5712_v8 = vld [vmem:[%s13903_s6 + $0x638] sm:$0xff]  ;;  %v5703_v45 = vld [vmem:[%s13903_s6 + $0x5f0] sm:$0xff] }
 0x742   :  { %v5704_v0 = vld [vmem:[%s13903_s6 + $0x5f8] sm:$0xff]  ;;  %v5695_v13 = vld [vmem:[%s13903_s6 + $0x5b0] sm:$0xff] }
 0x743   :  { %v5506_v42 = vadd.f32 %v5505_v48, %v5504_v17  ;;  %v5491_v23 = vmul.f32 %v6768_v3, %v5490_v62  ;;  %v5696_v17 = vld [vmem:[%s13903_s6 + $0x5b8] sm:$0xff]  ;;  %v5687_v48 = vld [vmem:[%s13903_s6 + $0x570] sm:$0xff] }
 0x744   :  { %v5688_v62 = vld [vmem:[%s13903_s6 + $0x578] sm:$0xff] }
 0x745   :  { %6771 = vtanh.f32 %v5506_v42  ;;  %v5492_v63 = vadd.f32 %v6768_v3, %v5491_v23  ;;  %v6146_v42 = vld [vmem:[%s13904_s8 + $0x78] sm:$0xff]  ;;  %v6145_v23 = vld [vmem:[%s13904_s8 + $0x70] sm:$0xff] }
 0x746   :  { %6263 = vmatpush.msra.mxu0 %v6146_v42  ;;  %v6209_v42 = vld [vmem:[%s13904_s8 + $0x270] sm:$0xff] }
 0x747   :  { %v5496_v30 = vsel %vm5495_vm8, %v6768_v3, %v5492_v63  ;;  %v5719_v3 = vld [vmem:[%s13903_s6 + $0x670] sm:$0xff] }
 0x748   :  { %v5501_v20 = vsel %vm5498_vm9, %v5500_v44, %v5496_v30  ;;  %v5679_v63 = vld [vmem:[%s13903_s6 + $0x530] sm:$0xff]  ;;  %v6178_v30 = vld [vmem:[%s13904_s8 + $0x178] sm:$0xff]  ;;  %6264 = vmatpush.msra.mxu0 %v6145_v23  ;;  %v6148_v23 = vld [vmem:[%s13904_s8 + $0x88] sm:$0xff] }
 0x749   :  { %v5671_v44 = vld [vmem:[%s13903_s6 + $0x4f0] sm:$0xff]  ;;  %6303 = vmatpush.msra.mxu2 %v6178_v30  ;;  %v6147_v30 = vld [vmem:[%s13904_s8 + $0x80] sm:$0xff] }
 0x74a   :  { %6265 = vmatpush.msra.mxu0 %v6144_v18  ;;  %v6208_v18 = vld [vmem:[%s13904_s8 + $0x268] sm:$0xff] }
 0x74b   :  { %v6772_v55 = vpop.eup %6771 }
 0x74c   :  { %v13292_v29 = vmul.f32 %v6772_v55, %v5501_v20  ;;  %v5672_v55 = vld [vmem:[%s13903_s6 + $0x4f8] sm:$0xff]  ;;  %v6177_v20 = vld [vmem:[%s13904_s8 + $0x170] sm:$0xff] }
 0x74d   :  { %6304 = vmatpush.msra.mxu2 %v6177_v20  ;;  %v6207_v20 = vld [vmem:[%s13904_s8 + $0x260] sm:$0xff] }
 0x74e   :  { %5823 = vmatmul.f32.vlgmr.msra.gmra.mxu1 %v13292_v29  ;;  %5863 = vmatmul.f32.vlgmr.msra.gmra.mxu3 %v13292_v29 }
 0x74f   :  { %5967 = vmatpush.msra.mxu1 %v5765_v1  ;;  %6007 = vmatpush.msra.mxu3 %v5766_v54  ;;  %v6143_v1 = vld [vmem:[%s13904_s8 + $0x60] sm:$0xff]  ;;  %v6176_v54 = vld [vmem:[%s13904_s8 + $0x168] sm:$0xff] }
 0x750   :  { %6266 = vmatpush.msra.mxu0 %v6143_v1  ;;  %6305 = vmatpush.msra.mxu2 %v6176_v54  ;;  %v6226_v1 = vld [vmem:[%s13904_s8 + $0x2f8] sm:$0xff]  ;;  %v6163_v54 = vld [vmem:[%s13904_s8 + $0x100] sm:$0xff] }
 0x751   :  { %5968 = vmatpush.msra.mxu1 %v5757_v37  ;;  %6008 = vmatpush.msra.mxu3 %v5758_v12  ;;  %v5663_v37 = vld [vmem:[%s13903_s6 + $0x4b0] sm:$0xff]  ;;  %v5664_v12 = vld [vmem:[%s13903_s6 + $0x4b8] sm:$0xff] }
 0x753   :  { %5969 = vmatpush.msra.mxu1 %v5749_v21  ;;  %6009 = vmatpush.msra.mxu3 %v5750_v10  ;;  %v6142_v21 = vld [vmem:[%s13904_s8 + $0x58] sm:$0xff]  ;;  %v6175_v10 = vld [vmem:[%s13904_s8 + $0x160] sm:$0xff] }
 0x754   :  { %6267 = vmatpush.msra.mxu0 %v6142_v21  ;;  %6306 = vmatpush.msra.mxu2 %v6175_v10  ;;  %v6225_v21 = vld [vmem:[%s13904_s8 + $0x2f0] sm:$0xff] }
 0x755   :  { %5970 = vmatpush.msra.mxu1 %v5741_v36  ;;  %6010 = vmatpush.msra.mxu3 %v5742_v34  ;;  %v5655_v36 = vld [vmem:[%s13903_s6 + $0x470] sm:$0xff]  ;;  %v5656_v34 = vld [vmem:[%s13903_s6 + $0x478] sm:$0xff] }
 0x756   :  { %5903 = vmatmul.f32.vlgmr.msrb.gmra.mxu1 %v13292_v29  ;;  %5943 = vmatmul.f32.vlgmr.msrb.gmra.mxu3 %v13292_v29  ;;  %v6181_v10 = vld [vmem:[%s13904_s8 + $0x190] sm:$0xff] }
 0x757   :  { %5971 = vmatpush.msra.mxu1 %v5733_v59  ;;  %6011 = vmatpush.msra.mxu3 %v5734_v38  ;;  %v6141_v59 = vld [vmem:[%s13904_s8 + $0x50] sm:$0xff]  ;;  %v6174_v38 = vld [vmem:[%s13904_s8 + $0x158] sm:$0xff] }
 0x758   :  { %6268 = vmatpush.msra.mxu0 %v6141_v59  ;;  %6307 = vmatpush.msra.mxu2 %v6174_v38  ;;  %v6180_v59 = vld [vmem:[%s13904_s8 + $0x188] sm:$0xff] }
 0x759   :  { %5972 = vmatpush.msra.mxu1 %v5725_v39  ;;  %6012 = vmatpush.msra.mxu3 %v5726_v4  ;;  %v5647_v39 = vld [vmem:[%s13903_s6 + $0x430] sm:$0xff]  ;;  %v5648_v4 = vld [vmem:[%s13903_s6 + $0x438] sm:$0xff]  ;;  %v6204_v38 = vld [vmem:[%s13904_s8 + $0x248] sm:$0xff] }
 0x75b   :  { %5973 = vmatpush.msra.mxu1 %v5717_v60  ;;  %6013 = vmatpush.msra.mxu3 %v5718_v2  ;;  %v6162_v60 = vld [vmem:[%s13904_s8 + $0xf8] sm:$0xff]  ;;  %v6140_v2 = vld [vmem:[%s13904_s8 + $0x48] sm:$0xff] }
 0x75c   :  { %6269 = vmatpush.msra.mxu0 %v6140_v2  ;;  %v6222_v2 = vld [vmem:[%s13904_s8 + $0x2d8] sm:$0xff] }
 0x75d   :  { %5974 = vmatpush.msra.mxu1 %v5709_v15  ;;  %6014 = vmatpush.msra.mxu3 %v5710_v41  ;;  %v6194_v15 = vld [vmem:[%s13904_s8 + $0x1f8] sm:$0xff]  ;;  %v6173_v41 = vld [vmem:[%s13904_s8 + $0x150] sm:$0xff] }
 0x75e   :  { %6308 = vmatpush.msra.mxu2 %v6173_v41  ;;  %v6202_v41 = vld [vmem:[%s13904_s8 + $0x238] sm:$0xff] }
 0x75f   :  { %5975 = vmatpush.msra.mxu1 %v5701_v6  ;;  %6015 = vmatpush.msra.mxu3 %v5702_v9  ;;  %v6161_v6 = vld [vmem:[%s13904_s8 + $0xf0] sm:$0xff]  ;;  %v6139_v9 = vld [vmem:[%s13904_s8 + $0x40] sm:$0xff] }
 0x760   :  { %6270 = vmatpush.msra.mxu0 %v6139_v9  ;;  %v6201_v9 = vld [vmem:[%s13904_s8 + $0x230] sm:$0xff] }
 0x761   :  { %5976 = vmatpush.msra.mxu1 %v5693_v22  ;;  %6016 = vmatpush.msra.mxu3 %v5694_v61  ;;  %v6193_v22 = vld [vmem:[%s13904_s8 + $0x1f0] sm:$0xff]  ;;  %v6172_v61 = vld [vmem:[%s13904_s8 + $0x148] sm:$0xff] }
 0x762   :  { %6309 = vmatpush.msra.mxu2 %v6172_v61 }
 0x763   :  { %5977 = vmatpush.msra.mxu1 %v5685_v51  ;;  %6017 = vmatpush.msra.mxu3 %v5686_v11  ;;  %v6138_v51 = vld [vmem:[%s13904_s8 + $0x38] sm:$0xff]  ;;  %v6192_v11 = vld [vmem:[%s13904_s8 + $0x1e8] sm:$0xff] }
 0x764   :  { %6271 = vmatpush.msra.mxu0 %v6138_v51  ;;  %v6200_v51 = vld [vmem:[%s13904_s8 + $0x228] sm:$0xff] }
 0x765   :  { %5978 = vmatpush.msra.mxu1 %v5677_v24  ;;  %6018 = vmatpush.msra.mxu3 %v5678_v16  ;;  %v6171_v24 = vld [vmem:[%s13904_s8 + $0x140] sm:$0xff] }
 0x766   :  { %v6159_v16 = vld [vmem:[%s13904_s8 + $0xe0] sm:$0xff]  ;;  %6310 = vmatpush.msra.mxu2 %v6171_v24 }
 0x767   :  { %5979 = vmatpush.msra.mxu1 %v5669_v46  ;;  %6019 = vmatpush.msra.mxu3 %v5670_v58  ;;  %v6137_v46 = vld [vmem:[%s13904_s8 + $0x30] sm:$0xff]  ;;  %v6191_v58 = vld [vmem:[%s13904_s8 + $0x1e0] sm:$0xff] }
 0x768   :  { %6272 = vmatpush.msra.mxu0 %v6137_v46  ;;  %v6199_v24 = vld [vmem:[%s13904_s8 + $0x220] sm:$0xff] }
 0x769   :  { %5980 = vmatpush.msra.mxu1 %v5661_v56  ;;  %6020 = vmatpush.msra.mxu3 %v5662_v27  ;;  %v6170_v56 = vld [vmem:[%s13904_s8 + $0x138] sm:$0xff] }
 0x76a   :  { %v6158_v27 = vld [vmem:[%s13904_s8 + $0xd8] sm:$0xff]  ;;  %6311 = vmatpush.msra.mxu2 %v6170_v56 }
 0x76b   :  { %5981 = vmatpush.msra.mxu1 %v5653_v33  ;;  %6021 = vmatpush.msra.mxu3 %v5654_v49  ;;  %v6136_v33 = vld [vmem:[%s13904_s8 + $0x28] sm:$0xff]  ;;  %v6190_v49 = vld [vmem:[%s13904_s8 + $0x1d8] sm:$0xff] }
 0x76c   :  { %6273 = vmatpush.msra.mxu0 %v6136_v33  ;;  %v6198_v56 = vld [vmem:[%s13904_s8 + $0x218] sm:$0xff] }
 0x76d   :  { %5982 = vmatpush.msra.mxu1 %v5645_v19  ;;  %6022 = vmatpush.msra.mxu3 %v5646_v28  ;;  %v6157_v19 = vld [vmem:[%s13904_s8 + $0xd0] sm:$0xff]  ;;  %v6135_v28 = vld [vmem:[%s13904_s8 + $0x20] sm:$0xff] }
 0x76e   :  { %5983 = vmatmul.f32.vlgmr.msra.gmra.mxu1 %v13292_v29  ;;  %6023 = vmatmul.f32.vlgmr.msra.gmra.mxu3 %v13292_v29 }
 0x76f   :  { %6047 = vmatpush.msrb.mxu1 %v5767_v31  ;;  %6087 = vmatpush.msrb.mxu3 %v5768_v14  ;;  %v6189_v31 = vld [vmem:[%s13904_s8 + $0x1d0] sm:$0xff]  ;;  %v6156_v14 = vld [vmem:[%s13904_s8 + $0xc8] sm:$0xff] }
 0x770   :  { %6274 = vmatpush.msra.mxu0 %v6135_v28 }
 0x771   :  { %6048 = vmatpush.msrb.mxu1 %v5759_v53  ;;  %6088 = vmatpush.msrb.mxu3 %v5760_v32  ;;  %v6134_v53 = vld [vmem:[%s13904_s8 + $0x18] sm:$0xff]  ;;  %v6155_v32 = vld [vmem:[%s13904_s8 + $0xc0] sm:$0xff] }
 0x772   :  { %6275 = vmatpush.msra.mxu0 %v6134_v53  ;;  %v6216_v53 = vld [vmem:[%s13904_s8 + $0x2a8] sm:$0xff] }
 0x773   :  { %6049 = vmatpush.msrb.mxu1 %v5751_v5  ;;  %6089 = vmatpush.msrb.mxu3 %v5752_v7  ;;  %v6154_v5 = vld [vmem:[%s13904_s8 + $0xb8] sm:$0xff]  ;;  %v6153_v7 = vld [vmem:[%s13904_s8 + $0xb0] sm:$0xff] }
 0x775   :  { %6050 = vmatpush.msrb.mxu1 %v5743_v35  ;;  %6090 = vmatpush.msrb.mxu3 %v5744_v50  ;;  %v6133_v35 = vld [vmem:[%s13904_s8 + $0x10] sm:$0xff]  ;;  %v6152_v50 = vld [vmem:[%s13904_s8 + $0xa8] sm:$0xff] }
 0x776   :  { %6276 = vmatpush.msra.mxu0 %v6133_v35  ;;  %v6196_v35 = vld [vmem:[%s13904_s8 + $0x208] sm:$0xff] }
 0x777   :  { %6051 = vmatpush.msrb.mxu1 %v5735_v26  ;;  %6091 = vmatpush.msrb.mxu3 %v5736_v47  ;;  %v6169_v26 = vld [vmem:[%s13904_s8 + $0x130] sm:$0xff]  ;;  %v6188_v47 = vld [vmem:[%s13904_s8 + $0x1c8] sm:$0xff] }
 0x778   :  { %6312 = vmatpush.msra.mxu2 %v6169_v26 }
 0x779   :  { %6052 = vmatpush.msrb.mxu1 %v5727_v57  ;;  %6092 = vmatpush.msrb.mxu3 %v5728_v25  ;;  %v6132_v57 = vld [vmem:[%s13904_s8 + $0x8] sm:$0xff]  ;;  %v6151_v25 = vld [vmem:[%s13904_s8 + $0xa0] sm:$0xff] }
 0x77a   :  { %6277 = vmatpush.msra.mxu0 %v6132_v57  ;;  %v6214_v57 = vld [vmem:[%s13904_s8 + $0x298] sm:$0xff] }
 0x77b   :  { %6053 = vmatpush.msrb.mxu1 %v5719_v3  ;;  %6093 = vmatpush.msrb.mxu3 %v5720_v40  ;;  %v6168_v3 = vld [vmem:[%s13904_s8 + $0x128] sm:$0xff]  ;;  %v6187_v40 = vld [vmem:[%s13904_s8 + $0x1c0] sm:$0xff] }
 0x77c   :  { %6313 = vmatpush.msra.mxu2 %v6168_v3 }
 0x77d   :  { %6054 = vmatpush.msrb.mxu1 %v5711_v43  ;;  %6094 = vmatpush.msrb.mxu3 %v5712_v8  ;;  %v6131_v43 = vld [vmem:[%s13904_s8] sm:$0xff]  ;;  %v6150_v8 = vld [vmem:[%s13904_s8 + $0x98] sm:$0xff] }
 0x77e   :  { %6278 = vmatpush.msra.mxu0 %v6131_v43  ;;  %v6242_v43 = vld [vmem:[%s13904_s8 + $0x378] sm:$0xff] }
 0x77f   :  { %6055 = vmatpush.msrb.mxu1 %v5703_v45  ;;  %6095 = vmatpush.msrb.mxu3 %v5704_v0  ;;  %v6167_v45 = vld [vmem:[%s13904_s8 + $0x120] sm:$0xff]  ;;  %v6186_v0 = vld [vmem:[%s13904_s8 + $0x1b8] sm:$0xff] }
 0x780   :  { %6314 = vmatpush.msra.mxu2 %v6167_v45 }
 0x781   :  { %6056 = vmatpush.msrb.mxu1 %v5695_v13  ;;  %6096 = vmatpush.msrb.mxu3 %v5696_v17  ;;  %v6210_v13 = vld [vmem:[%s13904_s8 + $0x278] sm:$0xff]  ;;  %v6149_v17 = vld [vmem:[%s13904_s8 + $0x90] sm:$0xff] }
 0x782   :  { %6343 = vmatpush.msrb.mxu0 %v6210_v13  ;;  %v6213_v13 = vld [vmem:[%s13904_s8 + $0x290] sm:$0xff] }
 0x783   :  { %6057 = vmatpush.msrb.mxu1 %v5687_v48  ;;  %6097 = vmatpush.msrb.mxu3 %v5688_v62  ;;  %v6166_v48 = vld [vmem:[%s13904_s8 + $0x118] sm:$0xff]  ;;  %v6185_v62 = vld [vmem:[%s13904_s8 + $0x1b0] sm:$0xff] }
 0x784   :  { %6315 = vmatpush.msra.mxu2 %v6166_v48  ;;  %6344 = vmatpush.msrb.mxu0 %v6209_v42  ;;  %v6241_v48 = vld [vmem:[%s13904_s8 + $0x370] sm:$0xff] }
 0x785   :  { %6058 = vmatpush.msrb.mxu1 %v5679_v63  ;;  %6098 = vmatpush.msrb.mxu3 %v5680_v52  ;;  %v6165_v63 = vld [vmem:[%s13904_s8 + $0x110] sm:$0xff]  ;;  %v6184_v52 = vld [vmem:[%s13904_s8 + $0x1a8] sm:$0xff] }
 0x786   :  { %6316 = vmatpush.msra.mxu2 %v6165_v63  ;;  %6345 = vmatpush.msrb.mxu0 %v6208_v18  ;;  %v6240_v63 = vld [vmem:[%s13904_s8 + $0x368] sm:$0xff]  ;;  %v6258_v18 = vld [vmem:[%s13904_s8 + $0x3f8] sm:$0xff] }
 0x787   :  { %6059 = vmatpush.msrb.mxu1 %v5671_v44  ;;  %6099 = vmatpush.msrb.mxu3 %v5672_v55  ;;  %v6164_v44 = vld [vmem:[%s13904_s8 + $0x108] sm:$0xff]  ;;  %v6183_v55 = vld [vmem:[%s13904_s8 + $0x1a0] sm:$0xff] }
 0x788   :  { %6317 = vmatpush.msra.mxu2 %v6164_v44  ;;  %6346 = vmatpush.msrb.mxu0 %v6207_v20 }
 0x789   :  { %6060 = vmatpush.msrb.mxu1 %v5663_v37  ;;  %6100 = vmatpush.msrb.mxu3 %v5664_v12  ;;  %v6182_v37 = vld [vmem:[%s13904_s8 + $0x198] sm:$0xff] }
 0x78a   :  { %v6206_v12 = vld [vmem:[%s13904_s8 + $0x258] sm:$0xff]  ;;  %6318 = vmatpush.msra.mxu2 %v6163_v54 }
 0x78b   :  { %6061 = vmatpush.msrb.mxu1 %v5655_v36  ;;  %6101 = vmatpush.msrb.mxu3 %v5656_v34  ;;  %v6205_v36 = vld [vmem:[%s13904_s8 + $0x250] sm:$0xff]  ;;  %v6224_v34 = vld [vmem:[%s13904_s8 + $0x2e8] sm:$0xff] }
 0x78c   :  { %6347 = vmatpush.msrb.mxu0 %v6206_v12  ;;  %6383 = vmatpush.msrb.mxu2 %v6242_v43  ;;  %v6238_v12 = vld [vmem:[%s13904_s8 + $0x358] sm:$0xff] }
 0x78d   :  { %6062 = vmatpush.msrb.mxu1 %v5647_v39  ;;  %6102 = vmatpush.msrb.mxu3 %v5648_v4  ;;  %v6223_v39 = vld [vmem:[%s13904_s8 + $0x2e0] sm:$0xff] }
 0x78e   :  { %6063 = vmatmul.f32.vlgmr.msrb.gmra.mxu1 %v13292_v29  ;;  %6103 = vmatmul.f32.vlgmr.msrb.gmra.mxu3 %v13292_v29  ;;  %v6160_v29 = vld [vmem:[%s13904_s8 + $0xe8] sm:$0xff]  ;;  %v6179_v4 = vld [vmem:[%s13904_s8 + $0x180] sm:$0xff] }
 0x78f   :  { %6283 = vmatpush.msra.mxu1 %v6162_v60  ;;  %6323 = vmatpush.msra.mxu3 %v6194_v15  ;;  %v6203_v60 = vld [vmem:[%s13904_s8 + $0x240] sm:$0xff] }
 0x790   :  { %6348 = vmatpush.msrb.mxu0 %v6205_v36  ;;  %v13728_v15 = vld [vmem:[%s13906_s7] sm:$0xff]  ;;  %6384 = vmatpush.msrb.mxu2 %v6241_v48 }
 0x791   :  { %6284 = vmatpush.msra.mxu1 %v6161_v6  ;;  %6324 = vmatpush.msra.mxu3 %v6193_v22  ;;  %v6221_v6 = vld [vmem:[%s13904_s8 + $0x2d0] sm:$0xff]  ;;  %v6220_v22 = vld [vmem:[%s13904_s8 + $0x2c8] sm:$0xff]  ;;  %v5771_v61 = vperm.slane %v13728_v15, 0  ;;  %v5772_v33 = vperm.slane %v13728_v15, 1  ;;  %v5773_v28 = vperm.slane %v13728_v15, 2  ;;  %v6255_v36 = vld [vmem:[%s13904_s8 + $0x3e0] sm:$0xff] }
 0x792   :  { %6349 = vmatpush.msrb.mxu0 %v6204_v38  ;;  %6385 = vmatpush.msrb.mxu2 %v6240_v63  ;;  %v6254_v38 = vld [vmem:[%s13904_s8 + $0x3d8] sm:$0xff] }
 0x793   :  { %6285 = vmatpush.msra.mxu1 %v6160_v29  ;;  %6325 = vmatpush.msra.mxu3 %v6192_v11  ;;  %v5804_v29 = vpop.f32.mrf.mxu0  ;;  %v6219_v11 = vld [vmem:[%s13904_s8 + $0x2c0] sm:$0xff] }
 0x794   :  { %6350 = vmatpush.msrb.mxu0 %v6203_v60  ;;  %v5805_v46 = vadd.f32 %v5804_v29, %v5771_v61  ;;  %v6234_v60 = vld [vmem:[%s13904_s8 + $0x338] sm:$0xff]  ;;  %v6232_v61 = vld [vmem:[%s13904_s8 + $0x328] sm:$0xff] }
 0x795   :  { %6286 = vmatpush.msra.mxu1 %v6159_v16  ;;  %6326 = vmatpush.msra.mxu3 %v6191_v58  ;;  %v6218_v16 = vld [vmem:[%s13904_s8 + $0x2b8] sm:$0xff] }
 0x796   :  { %6351 = vmatpush.msrb.mxu0 %v6202_v41  ;;  %v6233_v41 = vld [vmem:[%s13904_s8 + $0x330] sm:$0xff]  ;;  %v6250_v29 = vld [vmem:[%s13904_s8 + $0x3b8] sm:$0xff] }
 0x797   :  { %6287 = vmatpush.msra.mxu1 %v6158_v27  ;;  %6327 = vmatpush.msra.mxu3 %v6190_v49  ;;  %v6217_v27 = vld [vmem:[%s13904_s8 + $0x2b0] sm:$0xff] }
 0x798   :  { %6352 = vmatpush.msrb.mxu0 %v6201_v9  ;;  %v5775_v9 = vperm.slane %v13728_v15, 4 }
 0x799   :  { %6288 = vmatpush.msra.mxu1 %v6157_v19  ;;  %6328 = vmatpush.msra.mxu3 %v6189_v31  ;;  %v5844_v19 = vpop.f32.mrf.mxu2 }
 0x79a   :  { %6353 = vmatpush.msrb.mxu0 %v6200_v51  ;;  %v6231_v51 = vld [vmem:[%s13904_s8 + $0x320] sm:$0xff] }
 0x79b   :  { %6289 = vmatpush.msra.mxu1 %v6156_v14  ;;  %6329 = vmatpush.msra.mxu3 %v6188_v47  ;;  %v6197_v14 = vld [vmem:[%s13904_s8 + $0x210] sm:$0xff]  ;;  %v6195_v47 = vld [vmem:[%s13904_s8 + $0x200] sm:$0xff] }
 0x79c   :  { %6354 = vmatpush.msrb.mxu0 %v6199_v24 }
 0x79d   :  { %6290 = vmatpush.msra.mxu1 %v6155_v32  ;;  %6330 = vmatpush.msra.mxu3 %v6187_v40  ;;  %v5884_v32 = vpop.f32.mrf.mxu0 }
 0x79e   :  { %6355 = vmatpush.msrb.mxu0 %v6198_v56 }
 0x79f   :  { %6291 = vmatpush.msra.mxu1 %v6154_v5  ;;  %6331 = vmatpush.msra.mxu3 %v6186_v0  ;;  %v5845_v5 = vadd.f32 %v5844_v19, %v5772_v33  ;;  %v6229_v33 = vld [vmem:[%s13904_s8 + $0x310] sm:$0xff] }
 0x7a0   :  { %6356 = vmatpush.msrb.mxu0 %v6197_v14 }
 0x7a1   :  { %6292 = vmatpush.msra.mxu1 %v6153_v7  ;;  %6332 = vmatpush.msra.mxu3 %v6185_v62 }
 0x7a2   :  { %6357 = vmatpush.msrb.mxu0 %v6196_v35 }
 0x7a3   :  { %6293 = vmatpush.msra.mxu1 %v6152_v50  ;;  %6333 = vmatpush.msra.mxu3 %v6184_v52  ;;  %v6215_v50 = vld [vmem:[%s13904_s8 + $0x2a0] sm:$0xff] }
 0x7a4   :  { %6358 = vmatpush.msrb.mxu0 %v6195_v47  ;;  %v6211_v52 = vld [vmem:[%s13904_s8 + $0x280] sm:$0xff]  ;;  %v6244_v47 = vld [vmem:[%s13904_s8 + $0x388] sm:$0xff] }
 0x7a5   :  { %6294 = vmatpush.msra.mxu1 %v6151_v25  ;;  %6334 = vmatpush.msra.mxu3 %v6183_v55  ;;  %v5885_v25 = vadd.f32 %v5884_v32, %v5773_v28  ;;  %v6257_v55 = vld [vmem:[%s13904_s8 + $0x3f0] sm:$0xff]  ;;  %v6228_v28 = vld [vmem:[%s13904_s8 + $0x308] sm:$0xff]  ;;  %v6246_v32 = vld [vmem:[%s13904_s8 + $0x398] sm:$0xff] }
 0x7a7   :  { %6295 = vmatpush.msra.mxu1 %v6150_v8  ;;  %6335 = vmatpush.msra.mxu3 %v6182_v37  ;;  %v5774_v8 = vperm.slane %v13728_v15, 3  ;;  %v6256_v37 = vld [vmem:[%s13904_s8 + $0x3e8] sm:$0xff] }
 0x7a9   :  { %6296 = vmatpush.msra.mxu1 %v6149_v17  ;;  %6336 = vmatpush.msra.mxu3 %v6181_v10  ;;  %v5924_v17 = vpop.f32.mrf.mxu2  ;;  %v6237_v10 = vld [vmem:[%s13904_s8 + $0x350] sm:$0xff] }
 0x7ab   :  { %6297 = vmatpush.msra.mxu1 %v6148_v23  ;;  %6337 = vmatpush.msra.mxu3 %v6180_v59  ;;  %v6212_v23 = vld [vmem:[%s13904_s8 + $0x288] sm:$0xff] }
 0x7ac   :  { %v6236_v59 = vld [vmem:[%s13904_s8 + $0x348] sm:$0xff] }
 0x7ad   :  { %6298 = vmatpush.msra.mxu1 %v6147_v30  ;;  %6338 = vmatpush.msra.mxu3 %v6179_v4  ;;  %v5925_v30 = vadd.f32 %v5924_v17, %v5774_v8  ;;  %v6253_v4 = vld [vmem:[%s13904_s8 + $0x3d0] sm:$0xff] }
 0x7af   :  { %6363 = vmatpush.msrb.mxu1 %v6226_v1  ;;  %6403 = vmatpush.msrb.mxu3 %v6258_v18  ;;  %v6239_v1 = vld [vmem:[%s13904_s8 + $0x360] sm:$0xff] }
 0x7b0   :  { %6386 = vmatpush.msrb.mxu2 %v6239_v1  ;;  %v6516_v18 = vld [vmem:[%s13905_s9] ss:$0 sm:$0xff] }
 0x7b1   :  { %6364 = vmatpush.msrb.mxu1 %v6225_v21  ;;  %6404 = vmatpush.msrb.mxu3 %v6257_v55 }
 0x7b2   :  { %6387 = vmatpush.msrb.mxu2 %v6238_v12 }
 0x7b3   :  { %6365 = vmatpush.msrb.mxu1 %v6224_v34  ;;  %6405 = vmatpush.msrb.mxu3 %v6256_v37 }
 0x7b4   :  { %6388 = vmatpush.msrb.mxu2 %v6237_v10 }
 0x7b5   :  { %6366 = vmatpush.msrb.mxu1 %v6223_v39  ;;  %6406 = vmatpush.msrb.mxu3 %v6255_v36  ;;  %v6235_v39 = vld [vmem:[%s13904_s8 + $0x340] sm:$0xff] }
 0x7b6   :  { %6389 = vmatpush.msrb.mxu2 %v6236_v59 }
 0x7b7   :  { %6367 = vmatpush.msrb.mxu1 %v6222_v2  ;;  %6407 = vmatpush.msrb.mxu3 %v6254_v38  ;;  %v6252_v2 = vld [vmem:[%s13904_s8 + $0x3c8] sm:$0xff] }
 0x7b8   :  { %6390 = vmatpush.msrb.mxu2 %v6235_v39 }
 0x7b9   :  { %6368 = vmatpush.msrb.mxu1 %v6221_v6  ;;  %6408 = vmatpush.msrb.mxu3 %v6253_v4  ;;  %v6251_v6 = vld [vmem:[%s13904_s8 + $0x3c0] sm:$0xff] }
 0x7ba   :  { %6391 = vmatpush.msrb.mxu2 %v6234_v60 }
 0x7bb   :  { %6369 = vmatpush.msrb.mxu1 %v6220_v22  ;;  %6409 = vmatpush.msrb.mxu3 %v6252_v2  ;;  %v5964_v22 = vpop.f32.mrf.mxu0 }
 0x7bc   :  { %6392 = vmatpush.msrb.mxu2 %v6233_v41  ;;  %v5965_v24 = vadd.f32 %v5964_v22, %v5775_v9 }
 0x7bd   :  { %6370 = vmatpush.msrb.mxu1 %v6219_v11  ;;  %6410 = vmatpush.msrb.mxu3 %v6251_v6  ;;  %v6249_v11 = vld [vmem:[%s13904_s8 + $0x3b0] sm:$0xff] }
 0x7be   :  { %6393 = vmatpush.msrb.mxu2 %v6232_v61 }
 0x7bf   :  { %6371 = vmatpush.msrb.mxu1 %v6218_v16  ;;  %6411 = vmatpush.msrb.mxu3 %v6250_v29 }
 0x7c0   :  { %6394 = vmatpush.msrb.mxu2 %v6231_v51 }
 0x7c1   :  { %6372 = vmatpush.msrb.mxu1 %v6217_v27  ;;  %6412 = vmatpush.msrb.mxu3 %v6249_v11  ;;  %v6004_v27 = vpop.f32.mrf.mxu2 }
 0x7c3   :  { %6373 = vmatpush.msrb.mxu1 %v6216_v53 }
 0x7c5   :  { %6374 = vmatpush.msrb.mxu1 %v6215_v50  ;;  %v6245_v50 = vld [vmem:[%s13904_s8 + $0x390] sm:$0xff] }
 0x7c7   :  { %6375 = vmatpush.msrb.mxu1 %v6214_v57 }
 0x7c9   :  { %6376 = vmatpush.msrb.mxu1 %v6213_v13  ;;  %v6084_v13 = vpop.f32.mrf.mxu2 }
 0x7cb   :  { %v5824_v58 = vpop.f32.mrf.mxu1  ;;  %6377 = vmatpush.msrb.mxu1 %v6212_v23 }
 0x7cc   :  { %v5825_v49 = vadd.f32 %v5824_v58, %v5805_v46  ;;  %v6230_v46 = vld [vmem:[%s13904_s8 + $0x318] sm:$0xff]  ;;  %v5776_v58 = vperm.slane %v13728_v15, 5 }
 0x7cd   :  { %6378 = vmatpush.msrb.mxu1 %v6211_v52  ;;  %6395 = vmatpush.msrb.mxu2 %v6230_v46 }
 0x7ce   :  { %vm6107_vm10 = vcmp.ge.f32.partialorder %v5825_v49, 0.0  ;;  %v6115_v31 = vmul.f32 0.01, %v5825_v49  ;;  %v6005_v14 = vadd.f32 %v6004_v27, %v5776_v58 }
 0x7cf   :  { %6396 = vmatpush.msrb.mxu2 %v6229_v33 }
 0x7d0   :  { %v6123_v7 = vsel %vm6107_vm10, %v5825_v49, %v6115_v31  ;;  %v6248_v49 = vld [vmem:[%s13904_s8 + $0x3a8] sm:$0xff]  ;;  %v6247_v31 = vld [vmem:[%s13904_s8 + $0x3a0] sm:$0xff] }
 0x7d1   :  { %v5864_v26 = vpop.f32.mrf.mxu3  ;;  %6279 = vmatmul.f32.vlgmr.msra.gmra.mxu0 %v6123_v7  ;;  %6413 = vmatpush.msrb.mxu3 %v6248_v49  ;;  %v6227_v7 = vld [vmem:[%s13904_s8 + $0x300] sm:$0xff] }
 0x7d2   :  { %v5865_v3 = vadd.f32 %v5864_v26, %v5845_v5  ;;  %6397 = vmatpush.msrb.mxu2 %v6228_v28 }
 0x7d3   :  { %v5904_v40 = vpop.f32.mrf.mxu1  ;;  %6414 = vmatpush.msrb.mxu3 %v6247_v31 }
 0x7d4   :  { %vm6108_vm11 = vcmp.ge.f32.partialorder %v5865_v3, 0.0  ;;  %v6116_v45 = vmul.f32 0.01, %v5865_v3  ;;  %v5905_v0 = vadd.f32 %v5904_v40, %v5885_v25  ;;  %6398 = vmatpush.msrb.mxu2 %v6227_v7  ;;  %v6243_v25 = vld [vmem:[%s13904_s8 + $0x380] sm:$0xff]  ;;  %v6044_v40 = vpop.f32.mrf.mxu0 }
 0x7d5   :  { %6415 = vmatpush.msrb.mxu3 %v6246_v32 }
 0x7d6   :  { %v6124_v62 = vsel %vm6108_vm11, %v5865_v3, %v6116_v45  ;;  %vm6109_vm12 = vcmp.ge.f32.partialorder %v5905_v0, 0.0  ;;  %v6117_v42 = vmul.f32 0.01, %v5905_v0  ;;  %v5777_v3 = vperm.slane %v13728_v15, 6 }
 0x7d7   :  { %6299 = vmatmul.f32.vlgmr.msra.gmra.mxu1 %v6124_v62  ;;  %6416 = vmatpush.msrb.mxu3 %v6245_v50  ;;  %v5778_v45 = vperm.slane %v13728_v15, 7 }
 0x7d8   :  { %v6125_v44 = vsel %vm6109_vm12, %v5905_v0, %v6117_v42  ;;  %v6045_v43 = vadd.f32 %v6044_v40, %v5777_v3 }
 0x7d9   :  { %v5944_v20 = vpop.f32.mrf.mxu3  ;;  %6319 = vmatmul.f32.vlgmr.msra.gmra.mxu2 %v6125_v44  ;;  %6417 = vmatpush.msrb.mxu3 %v6244_v47  ;;  %v6085_v48 = vadd.f32 %v6084_v13, %v5778_v45 }
 0x7da   :  { %v5945_v54 = vadd.f32 %v5944_v20, %v5925_v30 }
 0x7db   :  { %6418 = vmatpush.msrb.mxu3 %v6243_v25 }
 0x7dc   :  { %vm6110_vm13 = vcmp.ge.f32.partialorder %v5945_v54, 0.0  ;;  %v6118_v21 = vmul.f32 0.01, %v5945_v54 }
 0x7de   :  { %v6126_v34 = vsel %vm6110_vm13, %v5945_v54, %v6118_v21 }
 0x7df   :  { %6339 = vmatmul.f32.vlgmr.msra.gmra.mxu3 %v6126_v34 }
 0x7eb   :  { %v5984_v16 = vpop.f32.mrf.mxu1 }
 0x7ec   :  { %v5985_v56 = vadd.f32 %v5984_v16, %v5965_v24 }
 0x7ee   :  { %vm6111_vm14 = vcmp.ge.f32.partialorder %v5985_v56, 0.0  ;;  %v6119_v19 = vmul.f32 0.01, %v5985_v56 }
 0x7f0   :  { %v6127_v53 = vsel %vm6111_vm14, %v5985_v56, %v6119_v19 }
 0x7f1   :  { %v6024_v5 = vpop.f32.mrf.mxu3  ;;  %6359 = vmatmul.f32.vlgmr.msrb.gmra.mxu0 %v6127_v53 }
 0x7f2   :  { %v6025_v35 = vadd.f32 %v6024_v5, %v6005_v14 }
 0x7f4   :  { %vm6112_vm15 = vcmp.ge.f32.partialorder %v6025_v35, 0.0  ;;  %v6120_v26 = vmul.f32 0.01, %v6025_v35 }
 0x7f6   :  { %v6128_v57 = vsel %vm6112_vm15, %v6025_v35, %v6120_v26 }
 0x7f7   :  { %6379 = vmatmul.f32.vlgmr.msrb.gmra.mxu1 %v6128_v57 }
 0x80b   :  { %v6064_v8 = vpop.f32.mrf.mxu1 }
 0x80c   :  { %v6065_v0 = vadd.f32 %v6064_v8, %v6045_v43 }
 0x80e   :  { %vm6113_vm1 = vcmp.ge.f32.partialorder %v6065_v0, 0.0  ;;  %v6121_v17 = vmul.f32 0.01, %v6065_v0 }
 0x810   :  { %v6129_v62 = vsel %vm6113_vm1, %v6065_v0, %v6121_v17 }
 0x811   :  { %v6104_v42 = vpop.f32.mrf.mxu3  ;;  %6399 = vmatmul.f32.vlgmr.msrb.gmra.mxu2 %v6129_v62 }
 0x812   :  { %v6105_v23 = vadd.f32 %v6104_v42, %v6085_v48 }
 0x814   :  { %vm6114_vm2 = vcmp.ge.f32.partialorder %v6105_v23, 0.0  ;;  %v6122_v63 = vmul.f32 0.01, %v6105_v23 }
 0x816   :  { %v6130_v52 = vsel %vm6114_vm2, %v6105_v23, %v6122_v63 }
 0x817   :  { %6419 = vmatmul.f32.vlgmr.msrb.gmra.mxu3 %v6130_v52 }
 0x84e   :  { %v6280_v30 = vpop.f32.mrf.mxu0 }
 0x84f   :  { %v6281_v15 = vadd.f32 %v6516_v18, %v6280_v30 }
 0x854   :  { %v6300_v44 = vpop.f32.mrf.mxu1 }
 0x855   :  { %v6301_v20 = vadd.f32 %v6300_v44, %v6281_v15 }
 0x85c   :  { %v6320_v55 = vpop.f32.mrf.mxu2 }
 0x85d   :  { %v6321_v54 = vadd.f32 %v6320_v55, %v6301_v20 }
 0x862   :  { %v6340_v1 = vpop.f32.mrf.mxu3 }
 0x863   :  { %v6341_v12 = vadd.f32 %v6340_v1, %v6321_v54 }
 0x86e   :  { %v6360_v37 = vpop.f32.mrf.mxu0 }
 0x86f   :  { %v6361_v10 = vadd.f32 %v6360_v37, %v6341_v12 }
 0x874   :  { %v6380_v21 = vpop.f32.mrf.mxu1 }
 0x875   :  { %v6381_v34 = vadd.f32 %v6380_v21, %v6361_v10 }
 0x894   :  { %v6400_v36 = vpop.f32.mrf.mxu2 }
 0x895   :  { %v6401_v59 = vadd.f32 %v6400_v36, %v6381_v34 }
 0x89a   :  { %v6420_v38 = vpop.f32.mrf.mxu3 }
 0x89b   :  { %v6421_v39 = vadd.f32 %v6420_v38, %v6401_v59 }
 0x89d   :  { %6423 = vst [vmem:[%s13907_s10] sm:$0xff] %v6421_v39 }

</bundles_post_ra>
